<compile_context>
chip_gen: v7x
topology: tpu7x:2x2x1
jax: 0.10.0
libtpu: 0.0.40
codegen_flags: <defaults>
</compile_context>

<pallas_src>
import functools

import jax
import jax.numpy as jnp
from jax.experimental import pallas as pl
from jax.experimental.pallas import tpu as pltpu


# ----------------------------- Pallas kernel ------------------------------- #
def _fused_matmul_bias_act_kernel(a_ref, b_ref, bias_ref, o_ref, *, apply_relu):
    # Single K step: full-K operands are resident in VMEM, accumulate in f32.
    acc = jnp.dot(a_ref[...], b_ref[...], preferred_element_type=jnp.float32)
    y = acc + bias_ref[...]              # (tm, N) + (1, N) broadcast, f32
    if apply_relu:
        y = jnp.maximum(y, 0.0)
    o_ref[...] = y.astype(o_ref.dtype)


def fused_matmul(a, b, bias, *, apply_relu, out_dtype):
    """act(a @ b + bias).  a: [M, K] bf16, b: [K, N] bf16, bias: [1, N] f32."""
    M, K = a.shape
    K2, N = b.shape
    assert K == K2 and bias.shape == (1, N)

    # Full-K / full-N blocks (no K grid axis, no padding).  Split M into two
    # "parallel" blocks only when both halves stay >= 256 rows: big layers use
    # both v7x TensorCores; tiny layers stay a single grid step (no extra
    # per-step overhead on single-TC v5e/v6e, no 16-row MXU tiles).
    if M >= 512 and M % 256 == 0:
        tm = M // 2
    else:
        tm = M
    grid = (M // tm,)

    cost = pl.CostEstimate(
        flops=2 * M * K * N,
        transcendentals=0,
        bytes_accessed=(M * K * a.dtype.itemsize
                        + K * N * b.dtype.itemsize
                        + N * 4
                        + M * N * jnp.dtype(out_dtype).itemsize))

    return pl.pallas_call(
        functools.partial(_fused_matmul_bias_act_kernel, apply_relu=apply_relu),
        out_shape=jax.ShapeDtypeStruct((M, N), out_dtype),
        grid=grid,
        in_specs=[
            pl.BlockSpec((tm, K), lambda i: (i, 0)),   # A: M-block, full K
            pl.BlockSpec((K, N), lambda i: (0, 0)),    # B: full weight, resident
            pl.BlockSpec((1, N), lambda i: (0, 0)),    # bias row
        ],
        out_specs=pl.BlockSpec((tm, N), lambda i: (i, 0)),
        compiler_params=pltpu.CompilerParams(
            dimension_semantics=("parallel",)),
        cost_estimate=cost,
    )(a, b, bias)


# ------------------------------ glue (JAX) --------------------------------- #
def _im2col_nhwc(x, stride):
    """x: [B,H,W,C] -> patches [B*Ho*Wo, 9*C], column order (kh, kw, cin).

    Built as 9 shifted slices concatenated along channels so XLA emits a
    single fusion; no [kh,kw,B,Ho,Wo,C] stack or 6-D transpose is materialized.
    """
    B, H, W, C = x.shape
    Ho = (H + 2 - 3) // stride + 1
    Wo = (W + 2 - 3) // stride + 1
    xp = jnp.pad(x, ((0, 0), (1, 1), (1, 1), (0, 0)))
    taps = [
        xp[:, di:di + stride * (Ho - 1) + 1:stride,
              dj:dj + stride * (Wo - 1) + 1:stride, :]
        for di in range(3) for dj in range(3)
    ]
    patches = jnp.concatenate(taps, axis=-1)           # [B, Ho, Wo, 9*C]
    return patches.reshape(B * Ho * Wo, 9 * C), (B, Ho, Wo)


def init_params(key, num_classes=10):
    """Parameters in the PyTorch module's native layout."""
    plan = [(3, 64), (64, 128), (128, 256), (256, 512)]
    params = {"features": []}
    for cin, cout in plan:
        key, k1, k2, k3, k4, k5, k6 = jax.random.split(key, 7)
        params["features"].append({
            "conv_w": 0.05 * jax.random.normal(k1, (cout, cin, 3, 3), jnp.float32),
            "conv_b": 0.05 * jax.random.normal(k2, (cout,), jnp.float32),
            "bn_gamma": 1.0 + 0.1 * jax.random.normal(k3, (cout,), jnp.float32),
            "bn_beta": 0.1 * jax.random.normal(k4, (cout,), jnp.float32),
            "bn_mean": 0.1 * jax.random.normal(k5, (cout,), jnp.float32),
            "bn_var": 0.5 + jnp.abs(jax.random.normal(k6, (cout,), jnp.float32)) * 0.1,
        })
    key, k1, k2 = jax.random.split(key, 3)
    params["linear_w"] = 0.01 * jax.random.normal(
        k1, (num_classes, 512 * 4 * 4), jnp.float32)
    params["linear_b"] = 0.01 * jax.random.normal(k2, (num_classes,), jnp.float32)
    return params


def prepare_params(params):
    """One-time prep: fold BN into conv weights, reorder to the im2col column
    order, cast MXU operands to bf16, pre-permute + pre-transpose the
    classifier weight to NHWC flatten order."""
    eps = 1e-5
    prepped = {"features": []}
    for p in params["features"]:
        scale = p["bn_gamma"] / jnp.sqrt(p["bn_var"] + eps)            # [Cout]
        bias = p["bn_beta"] + scale * (p["conv_b"] - p["bn_mean"])     # [Cout]
        w = p["conv_w"] * scale[:, None, None, None]                   # fold BN scale
        cout, cin = w.shape[0], w.shape[1]
        # [Cout,Cin,kh,kw] -> [(kh,kw,Cin), Cout] to match im2col columns.
        w_mat = jnp.transpose(w, (2, 3, 1, 0)).reshape(9 * cin, cout)
        prepped["features"].append({
            "w": w_mat.astype(jnp.bfloat16),
            "bias": bias.reshape(1, cout).astype(jnp.float32),
        })
    # Classifier: PyTorch flattens 'b c h w'; activations are NHWC, so permute
    # the weight columns once to (h, w, c) order and pre-transpose to [K, N].
    wl = params["linear_w"]                                            # [ncls, 8192]
    ncls = wl.shape[0]
    wl = wl.reshape(ncls, 512, 4, 4)
    wl = jnp.transpose(wl, (2, 3, 1, 0)).reshape(4 * 4 * 512, ncls)    # [8192, ncls]
    prepped["linear_w"] = wl.astype(jnp.bfloat16)
    prepped["linear_b"] = params["linear_b"].reshape(1, ncls).astype(jnp.float32)
    return prepped


def simple_conv_forward(prepped, x_nchw):
    # NCHW in (PyTorch), NHWC bf16 internally.
    x = jnp.transpose(x_nchw, (0, 2, 3, 1)).astype(jnp.bfloat16)
    for blk, stride in zip(prepped["features"], (1, 2, 2, 2)):
        patches, (B, Ho, Wo) = _im2col_nhwc(x, stride)
        cout = blk["w"].shape[1]
        y = fused_matmul(patches, blk["w"], blk["bias"],
                         apply_relu=True, out_dtype=jnp.bfloat16)
        x = y.reshape(B, Ho, Wo, cout)
    B = x.shape[0]
    feat = x.reshape(B, -1)        # NHWC flatten; classifier weight pre-permuted
    return fused_matmul(feat, prepped["linear_w"], prepped["linear_b"],
                        apply_relu=False, out_dtype=jnp.float32)


if __name__ == "__main__":
    key = jax.random.PRNGKey(0)
    pkey, xkey = jax.random.split(key)
    params = init_params(pkey, num_classes=10)
    prepped = prepare_params(params)          # one-time weight prep
    # Spatial size 32 so the final feature map is 4x4 (matches 512*4*4).
    x = jax.random.normal(xkey, (2, 3, 32, 32), jnp.float32)
    forward = jax.jit(simple_conv_forward)
    logits = forward(prepped, x)
    jax.block_until_ready(logits)
    assert logits.shape == (2, 10), logits.shape
    assert bool(jnp.all(jnp.isfinite(logits)))
    print("KERNEL_OK")
</pallas_src>

<mosaic_0001>
module attributes {stable_mosaic.version = 11 : i64} {
  func.func @_fused_matmul_bias_act_kernel(%arg0: i32, %arg1: memref<1024x27xbf16, #tpu.memory_space<vmem>>, %arg2: memref<27x64xbf16, #tpu.memory_space<vmem>>, %arg3: memref<1x64xf32, #tpu.memory_space<vmem>>, %arg4: memref<1024x64xbf16, #tpu.memory_space<vmem>>) attributes {dimension_semantics = [#tpu.dimension_semantics<parallel>], iteration_bounds = array<i64: 2>, scalar_prefetch = 0 : i64, scratch_operands = 0 : i64, tpu.core_type = #tpu.core_type<tc>, window_params = [{transform_indices = @transform_0, window_bounds = array<i64: 1024, 27>}, {pipeline_mode = #tpu.pipeline_mode<synchronous>, transform_indices = @transform_1, window_bounds = array<i64: 27, 64>}, {pipeline_mode = #tpu.pipeline_mode<synchronous>, transform_indices = @transform_2, window_bounds = array<i64: 1, 64>}, {transform_indices = @transform_3, window_bounds = array<i64: 1024, 64>}]} {
    %c0 = arith.constant 0 : index
    %c0_0 = arith.constant 0 : index
    %0 = vector.load %arg1[%c0, %c0_0] : memref<1024x27xbf16, #tpu.memory_space<vmem>>, vector<1024x27xbf16>
    %c0_1 = arith.constant 0 : index
    %c0_2 = arith.constant 0 : index
    %1 = vector.load %arg2[%c0_1, %c0_2] : memref<27x64xbf16, #tpu.memory_space<vmem>>, vector<27x64xbf16>
    %cst = arith.constant dense<0.000000e+00> : vector<1024x64xf32>
    %2 = tpu.matmul %0, %1, %cst {dimension_numbers = #tpu.dot_dimension_numbers<[1], [0], [0], [1], [0, 0, 1, 1], [], []>} : vector<1024x27xbf16>, vector<27x64xbf16>, vector<1024x64xf32> -> vector<1024x64xf32>
    %c0_3 = arith.constant 0 : index
    %c0_4 = arith.constant 0 : index
    %3 = vector.load %arg3[%c0_3, %c0_4] : memref<1x64xf32, #tpu.memory_space<vmem>>, vector<1x64xf32>
    %4 = vector.broadcast %3 : vector<1x64xf32> to vector<1024x64xf32>
    %5 = arith.addf %2, %4 : vector<1024x64xf32>
    %cst_5 = arith.constant 0.000000e+00 : f32
    %6 = vector.broadcast %cst_5 : f32 to vector<1024x64xf32>
    %7 = arith.maximumf %5, %6 : vector<1024x64xf32>
    %8 = arith.truncf %7 : vector<1024x64xf32> to vector<1024x64xbf16>
    %c0_6 = arith.constant 0 : index
    %c0_7 = arith.constant 0 : index
    %9 = vector.load %arg4[%c0_6, %c0_7] : memref<1024x64xbf16, #tpu.memory_space<vmem>>, vector<1024x64xbf16>
    tpu.vector_store %arg4[%c0_6, %c0_7], %8 {strides = array<i32>} : memref<1024x64xbf16, #tpu.memory_space<vmem>>, vector<1024x64xbf16>,
    return
  }
  func.func @transform_0(%arg0: i32) -> (i32, i32) {
    %c0_i32 = arith.constant 0 : i32
    %c0_i32_0 = arith.constant 0 : i32
    return %arg0, %c0_i32 : i32, i32
  }
  func.func @transform_1(%arg0: i32) -> (i32, i32) {
    %c0_i32 = arith.constant 0 : i32
    %c0_i32_0 = arith.constant 0 : i32
    %c0_i32_1 = arith.constant 0 : i32
    return %c0_i32, %c0_i32_0 : i32, i32
  }
  func.func @transform_2(%arg0: i32) -> (i32, i32) {
    %c0_i32 = arith.constant 0 : i32
    %c0_i32_0 = arith.constant 0 : i32
    %c0_i32_1 = arith.constant 0 : i32
    return %c0_i32, %c0_i32_0 : i32, i32
  }
  func.func @transform_3(%arg0: i32) -> (i32, i32) {
    %c0_i32 = arith.constant 0 : i32
    %c0_i32_0 = arith.constant 0 : i32
    return %arg0, %c0_i32 : i32, i32
  }
}

module attributes {stable_mosaic.version = 11 : i64} {
  func.func @_fused_matmul_bias_act_kernel(%arg0: i32, %arg1: memref<256x576xbf16, #tpu.memory_space<vmem>>, %arg2: memref<576x128xbf16, #tpu.memory_space<vmem>>, %arg3: memref<1x128xf32, #tpu.memory_space<vmem>>, %arg4: memref<256x128xbf16, #tpu.memory_space<vmem>>) attributes {dimension_semantics = [#tpu.dimension_semantics<parallel>], iteration_bounds = array<i64: 2>, scalar_prefetch = 0 : i64, scratch_operands = 0 : i64, tpu.core_type = #tpu.core_type<tc>, window_params = [{transform_indices = @transform_0, window_bounds = array<i64: 256, 576>}, {pipeline_mode = #tpu.pipeline_mode<synchronous>, transform_indices = @transform_1, window_bounds = array<i64: 576, 128>}, {pipeline_mode = #tpu.pipeline_mode<synchronous>, transform_indices = @transform_2, window_bounds = array<i64: 1, 128>}, {transform_indices = @transform_3, window_bounds = array<i64: 256, 128>}]} {
    %c0 = arith.constant 0 : index
    %c0_0 = arith.constant 0 : index
    %0 = vector.load %arg1[%c0, %c0_0] : memref<256x576xbf16, #tpu.memory_space<vmem>>, vector<256x576xbf16>
    %c0_1 = arith.constant 0 : index
    %c0_2 = arith.constant 0 : index
    %1 = vector.load %arg2[%c0_1, %c0_2] : memref<576x128xbf16, #tpu.memory_space<vmem>>, vector<576x128xbf16>
    %cst = arith.constant dense<0.000000e+00> : vector<256x128xf32>
    %2 = tpu.matmul %0, %1, %cst {dimension_numbers = #tpu.dot_dimension_numbers<[1], [0], [0], [1], [0, 0, 1, 1], [], []>} : vector<256x576xbf16>, vector<576x128xbf16>, vector<256x128xf32> -> vector<256x128xf32>
    %c0_3 = arith.constant 0 : index
    %c0_4 = arith.constant 0 : index
    %3 = vector.load %arg3[%c0_3, %c0_4] : memref<1x128xf32, #tpu.memory_space<vmem>>, vector<1x128xf32>
    %4 = vector.broadcast %3 : vector<1x128xf32> to vector<256x128xf32>
    %5 = arith.addf %2, %4 : vector<256x128xf32>
    %cst_5 = arith.constant 0.000000e+00 : f32
    %6 = vector.broadcast %cst_5 : f32 to vector<256x128xf32>
    %7 = arith.maximumf %5, %6 : vector<256x128xf32>
    %8 = arith.truncf %7 : vector<256x128xf32> to vector<256x128xbf16>
    %c0_6 = arith.constant 0 : index
    %c0_7 = arith.constant 0 : index
    %9 = vector.load %arg4[%c0_6, %c0_7] : memref<256x128xbf16, #tpu.memory_space<vmem>>, vector<256x128xbf16>
    tpu.vector_store %arg4[%c0_6, %c0_7], %8 {strides = array<i32>} : memref<256x128xbf16, #tpu.memory_space<vmem>>, vector<256x128xbf16>,
    return
  }
  func.func @transform_0(%arg0: i32) -> (i32, i32) {
    %c0_i32 = arith.constant 0 : i32
    %c0_i32_0 = arith.constant 0 : i32
    return %arg0, %c0_i32 : i32, i32
  }
  func.func @transform_1(%arg0: i32) -> (i32, i32) {
    %c0_i32 = arith.constant 0 : i32
    %c0_i32_0 = arith.constant 0 : i32
    %c0_i32_1 = arith.constant 0 : i32
    return %c0_i32, %c0_i32_0 : i32, i32
  }
  func.func @transform_2(%arg0: i32) -> (i32, i32) {
    %c0_i32 = arith.constant 0 : i32
    %c0_i32_0 = arith.constant 0 : i32
    %c0_i32_1 = arith.constant 0 : i32
    return %c0_i32, %c0_i32_0 : i32, i32
  }
  func.func @transform_3(%arg0: i32) -> (i32, i32) {
    %c0_i32 = arith.constant 0 : i32
    %c0_i32_0 = arith.constant 0 : i32
    return %arg0, %c0_i32 : i32, i32
  }
}

module attributes {stable_mosaic.version = 11 : i64} {
  func.func @_fused_matmul_bias_act_kernel(%arg0: i32, %arg1: memref<128x1152xbf16, #tpu.memory_space<vmem>>, %arg2: memref<1152x256xbf16, #tpu.memory_space<vmem>>, %arg3: memref<1x256xf32, #tpu.memory_space<vmem>>, %arg4: memref<128x256xbf16, #tpu.memory_space<vmem>>) attributes {dimension_semantics = [#tpu.dimension_semantics<parallel>], iteration_bounds = array<i64: 1>, scalar_prefetch = 0 : i64, scratch_operands = 0 : i64, tpu.core_type = #tpu.core_type<tc>, window_params = [{transform_indices = @transform_0, window_bounds = array<i64: 128, 1152>}, {pipeline_mode = #tpu.pipeline_mode<synchronous>, transform_indices = @transform_1, window_bounds = array<i64: 1152, 256>}, {pipeline_mode = #tpu.pipeline_mode<synchronous>, transform_indices = @transform_2, window_bounds = array<i64: 1, 256>}, {transform_indices = @transform_3, window_bounds = array<i64: 128, 256>}]} {
    %c0 = arith.constant 0 : index
    %c0_0 = arith.constant 0 : index
    %0 = vector.load %arg1[%c0, %c0_0] : memref<128x1152xbf16, #tpu.memory_space<vmem>>, vector<128x1152xbf16>
    %c0_1 = arith.constant 0 : index
    %c0_2 = arith.constant 0 : index
    %1 = vector.load %arg2[%c0_1, %c0_2] : memref<1152x256xbf16, #tpu.memory_space<vmem>>, vector<1152x256xbf16>
    %cst = arith.constant dense<0.000000e+00> : vector<128x256xf32>
    %2 = tpu.matmul %0, %1, %cst {dimension_numbers = #tpu.dot_dimension_numbers<[1], [0], [0], [1], [0, 0, 1, 1], [], []>} : vector<128x1152xbf16>, vector<1152x256xbf16>, vector<128x256xf32> -> vector<128x256xf32>
    %c0_3 = arith.constant 0 : index
    %c0_4 = arith.constant 0 : index
    %3 = vector.load %arg3[%c0_3, %c0_4] : memref<1x256xf32, #tpu.memory_space<vmem>>, vector<1x256xf32>
    %4 = vector.broadcast %3 : vector<1x256xf32> to vector<128x256xf32>
    %5 = arith.addf %2, %4 : vector<128x256xf32>
    %cst_5 = arith.constant 0.000000e+00 : f32
    %6 = vector.broadcast %cst_5 : f32 to vector<128x256xf32>
    %7 = arith.maximumf %5, %6 : vector<128x256xf32>
    %8 = arith.truncf %7 : vector<128x256xf32> to vector<128x256xbf16>
    %c0_6 = arith.constant 0 : index
    %c0_7 = arith.constant 0 : index
    %9 = vector.load %arg4[%c0_6, %c0_7] : memref<128x256xbf16, #tpu.memory_space<vmem>>, vector<128x256xbf16>
    tpu.vector_store %arg4[%c0_6, %c0_7], %8 {strides = array<i32>} : memref<128x256xbf16, #tpu.memory_space<vmem>>, vector<128x256xbf16>,
    return
  }
  func.func @transform_0(%arg0: i32) -> (i32, i32) {
    %c0_i32 = arith.constant 0 : i32
    %c0_i32_0 = arith.constant 0 : i32
    return %arg0, %c0_i32 : i32, i32
  }
  func.func @transform_1(%arg0: i32) -> (i32, i32) {
    %c0_i32 = arith.constant 0 : i32
    %c0_i32_0 = arith.constant 0 : i32
    %c0_i32_1 = arith.constant 0 : i32
    return %c0_i32, %c0_i32_0 : i32, i32
  }
  func.func @transform_2(%arg0: i32) -> (i32, i32) {
    %c0_i32 = arith.constant 0 : i32
    %c0_i32_0 = arith.constant 0 : i32
    %c0_i32_1 = arith.constant 0 : i32
    return %c0_i32, %c0_i32_0 : i32, i32
  }
  func.func @transform_3(%arg0: i32) -> (i32, i32) {
    %c0_i32 = arith.constant 0 : i32
    %c0_i32_0 = arith.constant 0 : i32
    return %arg0, %c0_i32 : i32, i32
  }
}

module attributes {stable_mosaic.version = 11 : i64} {
  func.func @_fused_matmul_bias_act_kernel(%arg0: i32, %arg1: memref<32x2304xbf16, #tpu.memory_space<vmem>>, %arg2: memref<2304x512xbf16, #tpu.memory_space<vmem>>, %arg3: memref<1x512xf32, #tpu.memory_space<vmem>>, %arg4: memref<32x512xbf16, #tpu.memory_space<vmem>>) attributes {dimension_semantics = [#tpu.dimension_semantics<parallel>], iteration_bounds = array<i64: 1>, scalar_prefetch = 0 : i64, scratch_operands = 0 : i64, tpu.core_type = #tpu.core_type<tc>, window_params = [{transform_indices = @transform_0, window_bounds = array<i64: 32, 2304>}, {pipeline_mode = #tpu.pipeline_mode<synchronous>, transform_indices = @transform_1, window_bounds = array<i64: 2304, 512>}, {pipeline_mode = #tpu.pipeline_mode<synchronous>, transform_indices = @transform_2, window_bounds = array<i64: 1, 512>}, {transform_indices = @transform_3, window_bounds = array<i64: 32, 512>}]} {
    %c0 = arith.constant 0 : index
    %c0_0 = arith.constant 0 : index
    %0 = vector.load %arg1[%c0, %c0_0] : memref<32x2304xbf16, #tpu.memory_space<vmem>>, vector<32x2304xbf16>
    %c0_1 = arith.constant 0 : index
    %c0_2 = arith.constant 0 : index
    %1 = vector.load %arg2[%c0_1, %c0_2] : memref<2304x512xbf16, #tpu.memory_space<vmem>>, vector<2304x512xbf16>
    %cst = arith.constant dense<0.000000e+00> : vector<32x512xf32>
    %2 = tpu.matmul %0, %1, %cst {dimension_numbers = #tpu.dot_dimension_numbers<[1], [0], [0], [1], [0, 0, 1, 1], [], []>} : vector<32x2304xbf16>, vector<2304x512xbf16>, vector<32x512xf32> -> vector<32x512xf32>
    %c0_3 = arith.constant 0 : index
    %c0_4 = arith.constant 0 : index
    %3 = vector.load %arg3[%c0_3, %c0_4] : memref<1x512xf32, #tpu.memory_space<vmem>>, vector<1x512xf32>
    %4 = vector.broadcast %3 : vector<1x512xf32> to vector<32x512xf32>
    %5 = arith.addf %2, %4 : vector<32x512xf32>
    %cst_5 = arith.constant 0.000000e+00 : f32
    %6 = vector.broadcast %cst_5 : f32 to vector<32x512xf32>
    %7 = arith.maximumf %5, %6 : vector<32x512xf32>
    %8 = arith.truncf %7 : vector<32x512xf32> to vector<32x512xbf16>
    %c0_6 = arith.constant 0 : index
    %c0_7 = arith.constant 0 : index
    %9 = vector.load %arg4[%c0_6, %c0_7] : memref<32x512xbf16, #tpu.memory_space<vmem>>, vector<32x512xbf16>
    tpu.vector_store %arg4[%c0_6, %c0_7], %8 {strides = array<i32>} : memref<32x512xbf16, #tpu.memory_space<vmem>>, vector<32x512xbf16>,
    return
  }
  func.func @transform_0(%arg0: i32) -> (i32, i32) {
    %c0_i32 = arith.constant 0 : i32
    %c0_i32_0 = arith.constant 0 : i32
    return %arg0, %c0_i32 : i32, i32
  }
  func.func @transform_1(%arg0: i32) -> (i32, i32) {
    %c0_i32 = arith.constant 0 : i32
    %c0_i32_0 = arith.constant 0 : i32
    %c0_i32_1 = arith.constant 0 : i32
    return %c0_i32, %c0_i32_0 : i32, i32
  }
  func.func @transform_2(%arg0: i32) -> (i32, i32) {
    %c0_i32 = arith.constant 0 : i32
    %c0_i32_0 = arith.constant 0 : i32
    %c0_i32_1 = arith.constant 0 : i32
    return %c0_i32, %c0_i32_0 : i32, i32
  }
  func.func @transform_3(%arg0: i32) -> (i32, i32) {
    %c0_i32 = arith.constant 0 : i32
    %c0_i32_0 = arith.constant 0 : i32
    return %arg0, %c0_i32 : i32, i32
  }
}

module attributes {stable_mosaic.version = 11 : i64} {
  func.func @_fused_matmul_bias_act_kernel(%arg0: i32, %arg1: memref<2x8192xbf16, #tpu.memory_space<vmem>>, %arg2: memref<8192x10xbf16, #tpu.memory_space<vmem>>, %arg3: memref<1x10xf32, #tpu.memory_space<vmem>>, %arg4: memref<2x10xf32, #tpu.memory_space<vmem>>) attributes {dimension_semantics = [#tpu.dimension_semantics<parallel>], iteration_bounds = array<i64: 1>, scalar_prefetch = 0 : i64, scratch_operands = 0 : i64, tpu.core_type = #tpu.core_type<tc>, window_params = [{transform_indices = @transform_0, window_bounds = array<i64: 2, 8192>}, {pipeline_mode = #tpu.pipeline_mode<synchronous>, transform_indices = @transform_1, window_bounds = array<i64: 8192, 10>}, {pipeline_mode = #tpu.pipeline_mode<synchronous>, transform_indices = @transform_2, window_bounds = array<i64: 1, 10>}, {transform_indices = @transform_3, window_bounds = array<i64: 2, 10>}]} {
    %c0 = arith.constant 0 : index
    %c0_0 = arith.constant 0 : index
    %0 = vector.load %arg1[%c0, %c0_0] : memref<2x8192xbf16, #tpu.memory_space<vmem>>, vector<2x8192xbf16>
    %c0_1 = arith.constant 0 : index
    %c0_2 = arith.constant 0 : index
    %1 = vector.load %arg2[%c0_1, %c0_2] : memref<8192x10xbf16, #tpu.memory_space<vmem>>, vector<8192x10xbf16>
    %cst = arith.constant dense<0.000000e+00> : vector<2x10xf32>
    %2 = tpu.matmul %0, %1, %cst {dimension_numbers = #tpu.dot_dimension_numbers<[1], [0], [0], [1], [0, 0, 1, 1], [], []>} : vector<2x8192xbf16>, vector<8192x10xbf16>, vector<2x10xf32> -> vector<2x10xf32>
    %c0_3 = arith.constant 0 : index
    %c0_4 = arith.constant 0 : index
    %3 = vector.load %arg3[%c0_3, %c0_4] : memref<1x10xf32, #tpu.memory_space<vmem>>, vector<1x10xf32>
    %4 = vector.broadcast %3 : vector<1x10xf32> to vector<2x10xf32>
    %5 = arith.addf %2, %4 : vector<2x10xf32>
    %c0_5 = arith.constant 0 : index
    %c0_6 = arith.constant 0 : index
    %6 = vector.load %arg4[%c0_5, %c0_6] : memref<2x10xf32, #tpu.memory_space<vmem>>, vector<2x10xf32>
    tpu.vector_store %arg4[%c0_5, %c0_6], %5 {strides = array<i32>} : memref<2x10xf32, #tpu.memory_space<vmem>>, vector<2x10xf32>,
    return
  }
  func.func @transform_0(%arg0: i32) -> (i32, i32) {
    %c0_i32 = arith.constant 0 : i32
    %c0_i32_0 = arith.constant 0 : i32
    return %arg0, %c0_i32 : i32, i32
  }
  func.func @transform_1(%arg0: i32) -> (i32, i32) {
    %c0_i32 = arith.constant 0 : i32
    %c0_i32_0 = arith.constant 0 : i32
    %c0_i32_1 = arith.constant 0 : i32
    return %c0_i32, %c0_i32_0 : i32, i32
  }
  func.func @transform_2(%arg0: i32) -> (i32, i32) {
    %c0_i32 = arith.constant 0 : i32
    %c0_i32_0 = arith.constant 0 : i32
    %c0_i32_1 = arith.constant 0 : i32
    return %c0_i32, %c0_i32_0 : i32, i32
  }
  func.func @transform_3(%arg0: i32) -> (i32, i32) {
    %c0_i32 = arith.constant 0 : i32
    %c0_i32_0 = arith.constant 0 : i32
    return %arg0, %c0_i32 : i32, i32
  }
}

</mosaic_0001>

<bundles_post_ra>
// kernel: simple_conv_forward.5
= control target key start
LH: loop header
LB: loop body
LE: loop exit
PB: predicated region body
PF: predicated region fallthrough
CT: control target
= control target key end

     0   :  { %8 = vsyncpa [#allocation3], 0  ;;  %s3689_s0 = inlined_call_operand.vmem [shape: bf16[2048,27], index: 0, kind: input, shape index: {}]   ;;  %s3690_s1 = inlined_call_operand.hbm [shape: bf16[27,64], index: 1, kind: input, shape index: {}]   ;;  %s3691_s2 = inlined_call_operand.hbm [shape: f32[1,64], index: 2, kind: input, shape index: {}]   ;;  %s3692_s3 = inlined_call_operand.vmem [shape: bf16[2048,64], index: 3, kind: output, shape index: {}]  }
   0x1   :  { %9 = vsyncpa [#allocation5], 0  ;;  %s3065_s12 = smov 0  }
   0x2 LB: > { %s2265_s13 = sadd.s32 4294967295, %s3038_s12   ;;  %p2267_p0 = scmp.ge.s32.totalorder %s3038_s12, 1  ;;  %s3038_s12 = sphi %s3065_s12, %s15_s12  }
   0x3   : > { %p114_p1 = scmp.lt.s32.totalorder %s3038_s12, 3  ;;  %s3040_s14 = smov [#allocation2]  }
   0x4   : > { %s126_s15 = sshll.u32 %s3040_s14, 4  ;;  %p3079_p3 = scmp.eq.s32.totalorder %s2265_s13, 0  ;;  %s127_s15 = int_to_ptr.vmem [resolvable:$true] %s126_s15 }
   0x5   : > { %p3073_p2 = pnand %p2267_p0, %p114_p1  ;;  %s3041_s18 = smov [#allocation4]  }
   0x6   : > { %s3697_s17 = scalar_select %p3079_p3, 1, 0 }
   0x7   : > { %s3696_s16 = scalar_select %p3073_p2, 1, 0 }
   0x8   : > { %p2877_p4 = pneg %p3073_p2  ;;  %s140_s19 = sshll.u32 %s3041_s18, 4  ;;  %s3091_s19 = int_to_ptr.vmem [resolvable:$true] %s140_s19 }
   0x9   : > { %s2968_s23 = scalar_lea.hbm %s3690_s1, 256 }
   0xa   : > { %p3087_p5 = pnand %p3079_p3, %p2877_p4  ;;  %p2969_p6 = scmp.ne.s32.totalorder %s3690_s1, %s2968_s23 }
   0xb   : > { %p2975_p10 = scmp.lt.u32.totalorder %s2968_s23, %s3690_s1 }
   0xc   : > { %p2970_p7 = pneg %p3087_p5 }
   0xe   : > { %p2971_p8 = pnand %p2970_p7, %p2969_p6 }
  0x10   : > { %p2972_p9 = pneg %p2971_p8 }
  0x12   : > { %p2977_p11 = pnand %p2975_p10, %p2972_p9 }
  0x14   : > { %2980 = shalt.err (!%p2977_p11)
}
  0x15   : > { %s2981_s28 = scalar_lea.vmem %s127_s15, 256  ;;  %p2989_p1 = scmp.lt.s32.totalorder %s127_s15, %s127_s15 }
  0x16   : > { %p2982_p12 = scmp.ne.s32.totalorder %s127_s15, %s2981_s28  ;;  %p2990_p4 = scmp.lt.s32.totalorder %s2981_s28, %s2981_s28 }
  0x18   : > { %p2984_p13 = pnand %p2982_p12, %p2970_p7  ;;  %p2991_p3 = por %p2990_p4, %p2989_p1 }
  0x1a   : > { %p2985_p0 = pneg %p2984_p13 }
  0x1c   : > { %p2992_p2 = pnand %p2991_p3, %p2985_p0 }
  0x1e   : > { %2995 = shalt.err (!%p2992_p2)
}
  0x1f   : > { %s3042_s29 = smov 64   ;;  %s3043_s30 = smov 4  }
  0x20   : > { %2880 = dma.hbm_to_vmem [thread:$0]  (!%p3087_p5), %s3690_s1, 256, %s127_s15, [#allocation3], %s3042_s29, %s3042_s29, %s3043_s30  }
  0x21   : > { %s2996_s8 = scalar_lea.hbm %s3691_s2, 16 }
  0x22   : > { %p2997_p6 = scmp.ne.s32.totalorder %s3691_s2, %s2996_s8  ;;  %p3003_p8 = scmp.lt.u32.totalorder %s2996_s8, %s3691_s2 }
  0x24   : > { %p2999_p2 = pnand %p2997_p6, %p2970_p7 }
  0x26   : > { %p3000_p3 = pneg %p2999_p2 }
  0x28   : > { %p3005_p9 = pnand %p3003_p8, %p3000_p3 }
  0x2a   : > { %3008 = shalt.err (!%p3005_p9)
}
  0x2b   : > { %s3009_s15 = scalar_lea.vmem %s3091_s19, 16  ;;  %s3016_s18 = scalar_lea.vmem %s3091_s19, 32 }
  0x2c   : > { %p3010_p10 = scmp.ne.s32.totalorder %s3091_s19, %s3009_s15  ;;  %p3017_p13 = scmp.lt.s32.totalorder %s3091_s19, %s3091_s19 }
  0x2d   : > { %p3018_p0 = scmp.lt.s32.totalorder %s3016_s18, %s3009_s15 }
  0x2e   : > { %p3012_p11 = pnand %p3010_p10, %p2970_p7 }
  0x2f   : > { %p3019_p1 = por %p3018_p0, %p3017_p13 }
  0x30   : > { %p3013_p12 = pneg %p3012_p11 }
  0x32   : > { %p3020_p4 = pnand %p3019_p1, %p3013_p12 }
  0x34   : > { %3023 = shalt.err (!%p3020_p4)
}
  0x35   : > { %2883 = dma.hbm_to_vmem [thread:$0]  (!%p3087_p5), %s3691_s2, 16, %s3091_s19, [#allocation5]  }
  0x36   : > { %p3699_p6 = scmp.ne.s32.totalorder %s3696_s16, 0 }
  0x37   : > { %p3700_p7 = scmp.ne.s32.totalorder (!%p3699_p6), %s3697_s17, 0 }
  0x38   : > { %162 = sbr.rel (%p3699_p6) target bundleno = 419 (0x1a3), region = 32 }
  0x3f   : > { %3029 = dma.done.wait (%p3700_p7), [#allocation3], 256  }
  0x40   : > { %3031 = vsyncadd (%p3700_p7), [#allocation3], 4294967040 }
  0x41   : > { %3033 = dma.done.wait (%p3700_p7), [#allocation5], 16  }
  0x42   : > { %3035 = vsyncadd (%p3700_p7), [#allocation5], 4294967280  ;;  %s2274_s20 = sshll.u32 %s2265_s13, 7  ;;  %vm866_vm0 = vcmask 1044480   ;;  %vm867_vm1 = vcmask 1045504   ;;  %v3044_v0 = vmov 65535  }
  0x43   : > { %p191_p5 = scmp.lt.s32.totalorder %s2274_s20, 255  ;;  %v868_v1 = vsel %vm866_vm0, 4294967295, %v3044_v0  ;;  %vm673_vm2 = vcmask 220160   ;;  %v2901_v2 = vld [vmem:[#allocation2] sm:$0xff]   ;;  %v2902_v4 = vld [vmem:[#allocation2 + $0x8] sm:$0x3f]  }
  0x44   : > { %v869_v3 = vsel %vm867_vm1, %v868_v1, 0  ;;  %2733 = vmatprep.subr.bf16.mxu0 %v2901_v2  ;;  %2865 = vmatprep.subr.bf16.mxu1 %v2901_v2  ;;  %vm2058_vm3 = vcmask 519168  }
  0x45   : > { %s3702_s20 = smov (!%p191_p5, %s2274_s20), 255  ;;  %2734 = vmatpush3.bf16.msra.mxu0 %v2901_v2  ;;  %2867 = vmatpush3.bf16.msra.mxu1 %v2901_v2  ;;  %v871_v6 = vand.u32 %v2902_v4, %v869_v3 }
  0x46   : > { %s2275_s16 = sshll.u32 %s3702_s20, 2 }
  0x47   : > { %s3161_s24 = scalar_lea.vmem %s3689_s0, %s2275_s16  ;;  %2735 = vmatprep.subr.bf16.mxu0 %v871_v6  ;;  %2866 = vmatprep.subr.bf16.mxu1 %v871_v6  ;;  %s3304_s25 = scalar_lea.vmem %s3692_s3, %s2275_s16 }
  0x48   : > { %v2903_v5 = vld [vmem:[%s3161_s24] sm:$0xff]   ;;  %v2905_v8 = vld [vmem:[%s3161_s24 + $0x8] sm:$0xff]   ;;  %v2907_v10 = vld [vmem:[%s3161_s24 + $0x10] sm:$0xff]  }
  0x49   : > { %v2904_v7 = vld [vmem:[%s3161_s24 + $0x100] sm:$0xff]   ;;  %2737 = vmatprep.mubr.msk.bf16.mxu0 %vm673_vm2, %v2903_v5  ;;  %v2906_v9 = vld [vmem:[%s3161_s24 + $0x108] sm:$0xff]   ;;  %2736 = vmatpush3.bf16.msra.mxu0 %v871_v6  ;;  %v2908_v11 = vld [vmem:[%s3161_s24 + $0x110] sm:$0xff]  }
  0x4a   : > { %2801 = vmatprep.mubr.msk.bf16.mxu1 %vm673_vm2, %v2904_v7  ;;  %2868 = vmatpush3.bf16.msra.mxu1 %v871_v6  ;;  %v2909_v12 = vld [vmem:[%s3161_s24 + $0x18] sm:$0xff]   ;;  %v2911_v14 = vld [vmem:[%s3161_s24 + $0x20] sm:$0xff]   ;;  %v2913_v16 = vld [vmem:[%s3161_s24 + $0x28] sm:$0xff]  }
  0x4b   : > { %v2910_v13 = vld [vmem:[%s3161_s24 + $0x118] sm:$0xff]   ;;  %v2912_v15 = vld [vmem:[%s3161_s24 + $0x120] sm:$0xff]   ;;  %v2914_v17 = vld [vmem:[%s3161_s24 + $0x128] sm:$0xff]  }
  0x4c   : > { %2738 = vmatmul.mubr.msk.bf16.vlgmr.msra.gmra.mrb[0].mxu0 %vm673_vm2, %v2905_v8  ;;  %v2915_v18 = vld [vmem:[%s3161_s24 + $0x30] sm:$0xff]   ;;  %v2917_v20 = vld [vmem:[%s3161_s24 + $0x38] sm:$0xff]   ;;  %v2919_v22 = vld [vmem:[%s3161_s24 + $0x40] sm:$0xff]  }
  0x4d   : > { %2802 = vmatmul.mubr.msk.bf16.vlgmr.msra.gmra.mrb[0].mxu1 %vm673_vm2, %v2906_v9  ;;  %2741 = vmatprep.mubr.msk.bf16.mxu0 %vm673_vm2, %v2907_v10  ;;  %v2916_v19 = vld [vmem:[%s3161_s24 + $0x130] sm:$0xff]   ;;  %v2918_v21 = vld [vmem:[%s3161_s24 + $0x138] sm:$0xff]   ;;  %v2920_v23 = vld [vmem:[%s3161_s24 + $0x140] sm:$0xff]  }
  0x4e   : > { %2805 = vmatprep.mubr.msk.bf16.mxu1 %vm673_vm2, %v2908_v11  ;;  %v2921_v24 = vld [vmem:[%s3161_s24 + $0x48] sm:$0xff]   ;;  %v2923_v26 = vld [vmem:[%s3161_s24 + $0x50] sm:$0xff]   ;;  %v2925_v28 = vld [vmem:[%s3161_s24 + $0x58] sm:$0xff]  }
  0x4f   : > { %v2922_v25 = vld [vmem:[%s3161_s24 + $0x148] sm:$0xff]   ;;  %v2924_v27 = vld [vmem:[%s3161_s24 + $0x150] sm:$0xff]   ;;  %v2926_v29 = vld [vmem:[%s3161_s24 + $0x158] sm:$0xff]  }
  0x50   : > { %v2927_v30 = vld [vmem:[%s3161_s24 + $0x60] sm:$0xff]   ;;  %v2929_v32 = vld [vmem:[%s3161_s24 + $0x68] sm:$0xff]   ;;  %v2931_v34 = vld [vmem:[%s3161_s24 + $0x70] sm:$0xff]  }
  0x51   : > { %v2928_v31 = vld [vmem:[%s3161_s24 + $0x160] sm:$0xff]   ;;  %v2930_v33 = vld [vmem:[%s3161_s24 + $0x168] sm:$0xff]   ;;  %v2932_v35 = vld [vmem:[%s3161_s24 + $0x170] sm:$0xff]  }
  0x52   : > { %v2933_v36 = vld [vmem:[%s3161_s24 + $0x78] sm:$0xff]   ;;  %v2935_v38 = vld [vmem:[%s3161_s24 + $0x80] sm:$0xff]   ;;  %v2937_v40 = vld [vmem:[%s3161_s24 + $0x88] sm:$0xff]  }
  0x53   : > { %v2934_v37 = vld [vmem:[%s3161_s24 + $0x178] sm:$0xff]   ;;  %v2936_v39 = vld [vmem:[%s3161_s24 + $0x180] sm:$0xff]   ;;  %v2938_v41 = vld [vmem:[%s3161_s24 + $0x188] sm:$0xff]  }
  0x54   : > { %2742 = vmatmul.mubr.msk.bf16.gmra.mrb[4].mxu0 %vm673_vm2, %v2909_v12  ;;  %v2939_v42 = vld [vmem:[%s3161_s24 + $0x90] sm:$0xff]   ;;  %v2941_v44 = vld [vmem:[%s3161_s24 + $0x98] sm:$0xff]   ;;  %v2943_v46 = vld [vmem:[%s3161_s24 + $0xa0] sm:$0xff]  }
  0x55   : > { %2806 = vmatmul.mubr.msk.bf16.gmra.mrb[4].mxu1 %vm673_vm2, %v2910_v13  ;;  %2745 = vmatprep.mubr.msk.bf16.mxu0 %vm673_vm2, %v2911_v14  ;;  %v2940_v43 = vld [vmem:[%s3161_s24 + $0x190] sm:$0xff]   ;;  %v2942_v45 = vld [vmem:[%s3161_s24 + $0x198] sm:$0xff]   ;;  %v2944_v47 = vld [vmem:[%s3161_s24 + $0x1a0] sm:$0xff]  }
  0x56   : > { %2809 = vmatprep.mubr.msk.bf16.mxu1 %vm673_vm2, %v2912_v15  ;;  %v2945_v48 = vld [vmem:[%s3161_s24 + $0xa8] sm:$0xff]   ;;  %v2947_v50 = vld [vmem:[%s3161_s24 + $0xb0] sm:$0xff]   ;;  %v2949_v52 = vld [vmem:[%s3161_s24 + $0xb8] sm:$0xff]  }
  0x57   : > { %v2946_v49 = vld [vmem:[%s3161_s24 + $0x1a8] sm:$0xff]   ;;  %v2948_v51 = vld [vmem:[%s3161_s24 + $0x1b0] sm:$0xff]   ;;  %v2950_v53 = vld [vmem:[%s3161_s24 + $0x1b8] sm:$0xff]  }
  0x58   : > { %v2951_v54 = vld [vmem:[%s3161_s24 + $0xc0] sm:$0xff]   ;;  %v2953_v56 = vld [vmem:[%s3161_s24 + $0xc8] sm:$0xff]   ;;  %v2955_v58 = vld [vmem:[%s3161_s24 + $0xd0] sm:$0xff]  }
  0x59   : > { %v2952_v55 = vld [vmem:[%s3161_s24 + $0x1c0] sm:$0xff]   ;;  %v2954_v57 = vld [vmem:[%s3161_s24 + $0x1c8] sm:$0xff]   ;;  %v2956_v59 = vld [vmem:[%s3161_s24 + $0x1d0] sm:$0xff]  }
  0x5a   : > { %v2957_v60 = vld [vmem:[%s3161_s24 + $0xd8] sm:$0xff]   ;;  %v2959_v62 = vld [vmem:[%s3161_s24 + $0xe0] sm:$0xff]   ;;  %v2961_v0 = vld [vmem:[%s3161_s24 + $0xe8] sm:$0xff]  }
  0x5b   : > { %v2958_v61 = vld [vmem:[%s3161_s24 + $0x1d8] sm:$0xff]   ;;  %v2960_v63 = vld [vmem:[%s3161_s24 + $0x1e0] sm:$0xff]   ;;  %v2962_v1 = vld [vmem:[%s3161_s24 + $0x1e8] sm:$0xff]  }
  0x5c   : > { %2746 = vmatmul.mubr.msk.bf16.gmra.mrb[8].mxu0 %vm673_vm2, %v2913_v16  ;;  %v2963_v2 = vld [vmem:[%s3161_s24 + $0xf0] sm:$0xff]   ;;  %v2965_v4 = vld [vmem:[%s3161_s24 + $0xf8] sm:$0xff]  }
  0x5d   : > { %2810 = vmatmul.mubr.msk.bf16.gmra.mrb[8].mxu1 %vm673_vm2, %v2914_v17  ;;  %2749 = vmatprep.mubr.msk.bf16.mxu0 %vm673_vm2, %v2915_v18  ;;  %v2964_v3 = vld [vmem:[%s3161_s24 + $0x1f0] sm:$0xff]   ;;  %v2966_v5 = vld [vmem:[%s3161_s24 + $0x1f8] sm:$0xff]  }
  0x5e   : > { %2813 = vmatprep.mubr.msk.bf16.mxu1 %vm673_vm2, %v2916_v19  ;;  %v3291_v6 = vld [vmem:[#allocation4] ss:$0 sm:$0xff] }
  0x64   : > { %2750 = vmatmul.mubr.msk.bf16.gmra.mrb[12].mxu0 %vm673_vm2, %v2917_v20 }
  0x65   : > { %2814 = vmatmul.mubr.msk.bf16.gmra.mrb[12].mxu1 %vm673_vm2, %v2918_v21  ;;  %2753 = vmatprep.mubr.msk.bf16.mxu0 %vm673_vm2, %v2919_v22 }
  0x66   : > { %2817 = vmatprep.mubr.msk.bf16.mxu1 %vm673_vm2, %v2920_v23 }
  0x6c   : > { %2754 = vmatmul.mubr.msk.bf16.gmra.mrb[16].mxu0 %vm673_vm2, %v2921_v24 }
  0x6d   : > { %2818 = vmatmul.mubr.msk.bf16.gmra.mrb[16].mxu1 %vm673_vm2, %v2922_v25  ;;  %2757 = vmatprep.mubr.msk.bf16.mxu0 %vm673_vm2, %v2923_v26 }
  0x6e   : > { %2821 = vmatprep.mubr.msk.bf16.mxu1 %vm673_vm2, %v2924_v27 }
  0x74   : > { %2758 = vmatmul.mubr.msk.bf16.gmra.mrb[20].mxu0 %vm673_vm2, %v2925_v28 }
  0x75   : > { %2822 = vmatmul.mubr.msk.bf16.gmra.mrb[20].mxu1 %vm673_vm2, %v2926_v29  ;;  %2761 = vmatprep.mubr.msk.bf16.mxu0 %vm673_vm2, %v2927_v30 }
  0x76   : > { %2825 = vmatprep.mubr.msk.bf16.mxu1 %vm673_vm2, %v2928_v31 }
  0x7c   : > { %2762 = vmatmul.mubr.msk.bf16.gmra.mrb[24].mxu0 %vm673_vm2, %v2929_v32 }
  0x7d   : > { %2826 = vmatmul.mubr.msk.bf16.gmra.mrb[24].mxu1 %vm673_vm2, %v2930_v33  ;;  %2765 = vmatprep.mubr.msk.bf16.mxu0 %vm673_vm2, %v2931_v34 }
  0x7e   : > { %2829 = vmatprep.mubr.msk.bf16.mxu1 %vm673_vm2, %v2932_v35 }
  0x84   : > { %2766 = vmatmul.mubr.msk.bf16.gmra.mrb[28].mxu0 %vm673_vm2, %v2933_v36 }
  0x85   : > { %2830 = vmatmul.mubr.msk.bf16.gmra.mrb[28].mxu1 %vm673_vm2, %v2934_v37  ;;  %2769 = vmatprep.mubr.msk.bf16.mxu0 %vm673_vm2, %v2935_v38 }
  0x86   : > { %2833 = vmatprep.mubr.msk.bf16.mxu1 %vm673_vm2, %v2936_v39 }
  0x8c   : > { %2770 = vmatmul.mubr.msk.bf16.gmra.mrb[32].mxu0 %vm673_vm2, %v2937_v40 }
  0x8d   : > { %2834 = vmatmul.mubr.msk.bf16.gmra.mrb[32].mxu1 %vm673_vm2, %v2938_v41  ;;  %2773 = vmatprep.mubr.msk.bf16.mxu0 %vm673_vm2, %v2939_v42 }
  0x8e   : > { %2837 = vmatprep.mubr.msk.bf16.mxu1 %vm673_vm2, %v2940_v43 }
  0x94   : > { %2774 = vmatmul.mubr.msk.bf16.gmra.mrb[36].mxu0 %vm673_vm2, %v2941_v44 }
  0x95   : > { %2838 = vmatmul.mubr.msk.bf16.gmra.mrb[36].mxu1 %vm673_vm2, %v2942_v45  ;;  %2777 = vmatprep.mubr.msk.bf16.mxu0 %vm673_vm2, %v2943_v46 }
  0x96   : > { %2841 = vmatprep.mubr.msk.bf16.mxu1 %vm673_vm2, %v2944_v47 }
  0x9c   : > { %2778 = vmatmul.mubr.msk.bf16.gmra.mrb[40].mxu0 %vm673_vm2, %v2945_v48 }
  0x9d   : > { %2842 = vmatmul.mubr.msk.bf16.gmra.mrb[40].mxu1 %vm673_vm2, %v2946_v49  ;;  %2781 = vmatprep.mubr.msk.bf16.mxu0 %vm673_vm2, %v2947_v50 }
  0x9e   : > { %2845 = vmatprep.mubr.msk.bf16.mxu1 %vm673_vm2, %v2948_v51 }
  0xa4   : > { %2782 = vmatmul.mubr.msk.bf16.gmra.mrb[44].mxu0 %vm673_vm2, %v2949_v52 }
  0xa5   : > { %2846 = vmatmul.mubr.msk.bf16.gmra.mrb[44].mxu1 %vm673_vm2, %v2950_v53  ;;  %2785 = vmatprep.mubr.msk.bf16.mxu0 %vm673_vm2, %v2951_v54 }
  0xa6   : > { %2849 = vmatprep.mubr.msk.bf16.mxu1 %vm673_vm2, %v2952_v55 }
  0xac   : > { %2786 = vmatmul.mubr.msk.bf16.gmra.mrb[48].mxu0 %vm673_vm2, %v2953_v56 }
  0xad   : > { %2850 = vmatmul.mubr.msk.bf16.gmra.mrb[48].mxu1 %vm673_vm2, %v2954_v57  ;;  %2789 = vmatprep.mubr.msk.bf16.mxu0 %vm673_vm2, %v2955_v58 }
  0xae   : > { %2853 = vmatprep.mubr.msk.bf16.mxu1 %vm673_vm2, %v2956_v59 }
  0xb4   : > { %2790 = vmatmul.mubr.msk.bf16.gmra.mrb[52].mxu0 %vm673_vm2, %v2957_v60 }
  0xb5   : > { %2854 = vmatmul.mubr.msk.bf16.gmra.mrb[52].mxu1 %vm673_vm2, %v2958_v61  ;;  %2793 = vmatprep.mubr.msk.bf16.mxu0 %vm673_vm2, %v2959_v62 }
  0xb6   : > { %2857 = vmatprep.mubr.msk.bf16.mxu1 %vm673_vm2, %v2960_v63 }
  0xbc   : > { %2794 = vmatmul.mubr.msk.bf16.gmra.mrb[56].mxu0 %vm673_vm2, %v2961_v0 }
  0xbd   : > { %2858 = vmatmul.mubr.msk.bf16.gmra.mrb[56].mxu1 %vm673_vm2, %v2962_v1  ;;  %2797 = vmatprep.mubr.msk.bf16.mxu0 %vm673_vm2, %v2963_v2 }
  0xbe   : > { %2861 = vmatprep.mubr.msk.bf16.mxu1 %vm673_vm2, %v2964_v3 }
  0xc4   : > { %2798 = vmatmul.mubr.msk.bf16.gmra.mrb[60].mxu0 %vm673_vm2, %v2965_v4 }
  0xc5   : > { %2862 = vmatmul.mubr.msk.bf16.gmra.mrb[60].mxu1 %vm673_vm2, %v2966_v5 }
 0x11f   : > { %v2739_v7 = vpop.f32.mrb[0].mxu0 }
 0x120   : > { %v2803_v8 = vpop.f32.mrb[0].mxu1  ;;  %v916_v9 = vadd.f32 %v2739_v7, %v3291_v6  ;;  %v907_v11 = vpop.f32.mrb[1].mxu0 }
 0x121   : > { %v1172_v10 = vadd.f32 %v2803_v8, %v3291_v6  ;;  %v1163_v12 = vpop.f32.mrb[1].mxu1  ;;  %v908_v13 = vadd.f32 %v3291_v6, %v907_v11  ;;  %v2740_v15 = vpop.f32.mrb[2].mxu0 }
 0x122   : > { %v1164_v14 = vadd.f32 %v3291_v6, %v1163_v12  ;;  %v2804_v16 = vpop.f32.mrb[2].mxu1  ;;  %v1420_v17 = vmax.f32 %v916_v9, 0.0  ;;  %v919_v19 = vadd.f32 %v2740_v15, %v3291_v6  ;;  %v910_v21 = vpop.f32.mrb[3].mxu0 }
 0x123   : > { %v1484_v18 = vmax.f32 %v1172_v10, 0.0  ;;  %v1175_v20 = vadd.f32 %v2804_v16, %v3291_v6  ;;  %v1166_v22 = vpop.f32.mrb[3].mxu1  ;;  %v1418_v23 = vmax.f32 %v908_v13, 0.0  ;;  %v911_v25 = vadd.f32 %v3291_v6, %v910_v21 }
 0x124   : > { %v1482_v24 = vmax.f32 %v1164_v14, 0.0  ;;  %v1167_v26 = vadd.f32 %v3291_v6, %v1166_v22  ;;  %v2541_v27 = vpack.c.bf16 %v1420_v17, %v1420_v17  ;;  %v1421_v29 = vmax.f32 %v919_v19, 0.0 }
 0x125   : > { %v2605_v28 = vpack.c.bf16 %v1484_v18, %v1484_v18  ;;  %v1485_v30 = vmax.f32 %v1175_v20, 0.0  ;;  %v2539_v31 = vpack.c.bf16 %v1418_v23, %v1418_v23  ;;  %v1419_v33 = vmax.f32 %v911_v25, 0.0 }
 0x126   : > { %v2603_v32 = vpack.c.bf16 %v1482_v24, %v1482_v24  ;;  %v1483_v34 = vmax.f32 %v1167_v26, 0.0  ;;  %2061 = vst.msk [vmem:[%s3304_s25 + $0x8] sm:$0xf] %vm2058_vm3, %v2541_v27  ;;  %v2542_v35 = vpack.c.bf16 %v1421_v29, %v1421_v29 }
 0x127   : > { %2125 = vst.msk [vmem:[%s3304_s25 + $0x108] sm:$0xf] %vm2058_vm3, %v2605_v28  ;;  %v2606_v36 = vpack.c.bf16 %v1485_v30, %v1485_v30  ;;  %2059 = vst.msk [vmem:[%s3304_s25] sm:$0xf] %vm2058_vm3, %v2539_v31  ;;  %v2540_v37 = vpack.c.bf16 %v1419_v33, %v1419_v33  ;;  %v2743_v39 = vpop.f32.mrb[4].mxu0 }
 0x128   : > { %2123 = vst.msk [vmem:[%s3304_s25 + $0x100] sm:$0xf] %vm2058_vm3, %v2603_v32  ;;  %v2604_v38 = vpack.c.bf16 %v1483_v34, %v1483_v34  ;;  %v2807_v40 = vpop.f32.mrb[4].mxu1  ;;  %2062 = vst.msk [vmem:[%s3304_s25 + $0xc] sm:$0xf] %vm2058_vm3, %v2542_v35  ;;  %v932_v41 = vadd.f32 %v2743_v39, %v3291_v6  ;;  %v923_v43 = vpop.f32.mrb[5].mxu0 }
 0x129   : > { %2126 = vst.msk [vmem:[%s3304_s25 + $0x10c] sm:$0xf] %vm2058_vm3, %v2606_v36  ;;  %v1188_v42 = vadd.f32 %v2807_v40, %v3291_v6  ;;  %v1179_v44 = vpop.f32.mrb[5].mxu1  ;;  %2060 = vst.msk [vmem:[%s3304_s25 + $0x4] sm:$0xf] %vm2058_vm3, %v2540_v37  ;;  %v924_v45 = vadd.f32 %v3291_v6, %v923_v43  ;;  %v2744_v47 = vpop.f32.mrb[6].mxu0 }
 0x12a   : > { %2124 = vst.msk [vmem:[%s3304_s25 + $0x104] sm:$0xf] %vm2058_vm3, %v2604_v38  ;;  %v1180_v46 = vadd.f32 %v3291_v6, %v1179_v44  ;;  %v2808_v48 = vpop.f32.mrb[6].mxu1  ;;  %v1424_v49 = vmax.f32 %v932_v41, 0.0  ;;  %v935_v51 = vadd.f32 %v2744_v47, %v3291_v6  ;;  %v926_v53 = vpop.f32.mrb[7].mxu0 }
 0x12b   : > { %v1488_v50 = vmax.f32 %v1188_v42, 0.0  ;;  %v1191_v52 = vadd.f32 %v2808_v48, %v3291_v6  ;;  %v1182_v54 = vpop.f32.mrb[7].mxu1  ;;  %v1422_v55 = vmax.f32 %v924_v45, 0.0  ;;  %v927_v57 = vadd.f32 %v3291_v6, %v926_v53 }
 0x12c   : > { %v1486_v56 = vmax.f32 %v1180_v46, 0.0  ;;  %v1183_v58 = vadd.f32 %v3291_v6, %v1182_v54  ;;  %v2545_v59 = vpack.c.bf16 %v1424_v49, %v1424_v49  ;;  %v1425_v61 = vmax.f32 %v935_v51, 0.0 }
 0x12d   : > { %v2609_v60 = vpack.c.bf16 %v1488_v50, %v1488_v50  ;;  %v1489_v62 = vmax.f32 %v1191_v52, 0.0  ;;  %v2543_v63 = vpack.c.bf16 %v1422_v55, %v1422_v55  ;;  %v1423_v1 = vmax.f32 %v927_v57, 0.0 }
 0x12e   : > { %v2607_v0 = vpack.c.bf16 %v1486_v56, %v1486_v56  ;;  %v1487_v2 = vmax.f32 %v1183_v58, 0.0  ;;  %2065 = vst.msk [vmem:[%s3304_s25 + $0x18] sm:$0xf] %vm2058_vm3, %v2545_v59  ;;  %v2546_v3 = vpack.c.bf16 %v1425_v61, %v1425_v61 }
 0x12f   : > { %2129 = vst.msk [vmem:[%s3304_s25 + $0x118] sm:$0xf] %vm2058_vm3, %v2609_v60  ;;  %v2610_v4 = vpack.c.bf16 %v1489_v62, %v1489_v62  ;;  %2063 = vst.msk [vmem:[%s3304_s25 + $0x10] sm:$0xf] %vm2058_vm3, %v2543_v63  ;;  %v2544_v5 = vpack.c.bf16 %v1423_v1, %v1423_v1  ;;  %v2747_v8 = vpop.f32.mrb[8].mxu0 }
 0x130   : > { %2127 = vst.msk [vmem:[%s3304_s25 + $0x110] sm:$0xf] %vm2058_vm3, %v2607_v0  ;;  %v2608_v7 = vpack.c.bf16 %v1487_v2, %v1487_v2  ;;  %v2811_v9 = vpop.f32.mrb[8].mxu1  ;;  %2066 = vst.msk [vmem:[%s3304_s25 + $0x1c] sm:$0xf] %vm2058_vm3, %v2546_v3  ;;  %v948_v10 = vadd.f32 %v2747_v8, %v3291_v6  ;;  %v939_v12 = vpop.f32.mrb[9].mxu0 }
 0x131   : > { %2130 = vst.msk [vmem:[%s3304_s25 + $0x11c] sm:$0xf] %vm2058_vm3, %v2610_v4  ;;  %v1204_v11 = vadd.f32 %v2811_v9, %v3291_v6  ;;  %v1195_v13 = vpop.f32.mrb[9].mxu1  ;;  %2064 = vst.msk [vmem:[%s3304_s25 + $0x14] sm:$0xf] %vm2058_vm3, %v2544_v5  ;;  %v940_v14 = vadd.f32 %v3291_v6, %v939_v12  ;;  %v2748_v16 = vpop.f32.mrb[10].mxu0 }
 0x132   : > { %2128 = vst.msk [vmem:[%s3304_s25 + $0x114] sm:$0xf] %vm2058_vm3, %v2608_v7  ;;  %v1196_v15 = vadd.f32 %v3291_v6, %v1195_v13  ;;  %v2812_v17 = vpop.f32.mrb[10].mxu1  ;;  %v1428_v18 = vmax.f32 %v948_v10, 0.0  ;;  %v951_v20 = vadd.f32 %v2748_v16, %v3291_v6  ;;  %v942_v22 = vpop.f32.mrb[11].mxu0 }
 0x133   : > { %v1492_v19 = vmax.f32 %v1204_v11, 0.0  ;;  %v1207_v21 = vadd.f32 %v2812_v17, %v3291_v6  ;;  %v1198_v23 = vpop.f32.mrb[11].mxu1  ;;  %v1426_v24 = vmax.f32 %v940_v14, 0.0  ;;  %v943_v26 = vadd.f32 %v3291_v6, %v942_v22 }
 0x134   : > { %v1490_v25 = vmax.f32 %v1196_v15, 0.0  ;;  %v1199_v27 = vadd.f32 %v3291_v6, %v1198_v23  ;;  %v2549_v28 = vpack.c.bf16 %v1428_v18, %v1428_v18  ;;  %v1429_v30 = vmax.f32 %v951_v20, 0.0 }
 0x135   : > { %v2613_v29 = vpack.c.bf16 %v1492_v19, %v1492_v19  ;;  %v1493_v31 = vmax.f32 %v1207_v21, 0.0  ;;  %v2547_v32 = vpack.c.bf16 %v1426_v24, %v1426_v24  ;;  %v1427_v34 = vmax.f32 %v943_v26, 0.0 }
 0x136   : > { %v2611_v33 = vpack.c.bf16 %v1490_v25, %v1490_v25  ;;  %v1491_v35 = vmax.f32 %v1199_v27, 0.0  ;;  %2069 = vst.msk [vmem:[%s3304_s25 + $0x28] sm:$0xf] %vm2058_vm3, %v2549_v28  ;;  %v2550_v36 = vpack.c.bf16 %v1429_v30, %v1429_v30 }
 0x137   : > { %2133 = vst.msk [vmem:[%s3304_s25 + $0x128] sm:$0xf] %vm2058_vm3, %v2613_v29  ;;  %v2614_v37 = vpack.c.bf16 %v1493_v31, %v1493_v31  ;;  %2067 = vst.msk [vmem:[%s3304_s25 + $0x20] sm:$0xf] %vm2058_vm3, %v2547_v32  ;;  %v2548_v38 = vpack.c.bf16 %v1427_v34, %v1427_v34  ;;  %v2751_v40 = vpop.f32.mrb[12].mxu0 }
 0x138   : > { %2131 = vst.msk [vmem:[%s3304_s25 + $0x120] sm:$0xf] %vm2058_vm3, %v2611_v33  ;;  %v2612_v39 = vpack.c.bf16 %v1491_v35, %v1491_v35  ;;  %v2815_v41 = vpop.f32.mrb[12].mxu1  ;;  %2070 = vst.msk [vmem:[%s3304_s25 + $0x2c] sm:$0xf] %vm2058_vm3, %v2550_v36  ;;  %v964_v42 = vadd.f32 %v2751_v40, %v3291_v6  ;;  %v955_v44 = vpop.f32.mrb[13].mxu0 }
 0x139   : > { %2134 = vst.msk [vmem:[%s3304_s25 + $0x12c] sm:$0xf] %vm2058_vm3, %v2614_v37  ;;  %v1220_v43 = vadd.f32 %v2815_v41, %v3291_v6  ;;  %v1211_v45 = vpop.f32.mrb[13].mxu1  ;;  %2068 = vst.msk [vmem:[%s3304_s25 + $0x24] sm:$0xf] %vm2058_vm3, %v2548_v38  ;;  %v956_v46 = vadd.f32 %v3291_v6, %v955_v44  ;;  %v2752_v48 = vpop.f32.mrb[14].mxu0 }
 0x13a   : > { %2132 = vst.msk [vmem:[%s3304_s25 + $0x124] sm:$0xf] %vm2058_vm3, %v2612_v39  ;;  %v1212_v47 = vadd.f32 %v3291_v6, %v1211_v45  ;;  %v2816_v49 = vpop.f32.mrb[14].mxu1  ;;  %v1432_v50 = vmax.f32 %v964_v42, 0.0  ;;  %v967_v52 = vadd.f32 %v2752_v48, %v3291_v6  ;;  %v958_v54 = vpop.f32.mrb[15].mxu0 }
 0x13b   : > { %v1496_v51 = vmax.f32 %v1220_v43, 0.0  ;;  %v1223_v53 = vadd.f32 %v2816_v49, %v3291_v6  ;;  %v1214_v55 = vpop.f32.mrb[15].mxu1  ;;  %v1430_v56 = vmax.f32 %v956_v46, 0.0  ;;  %v959_v58 = vadd.f32 %v3291_v6, %v958_v54 }
 0x13c   : > { %v1494_v57 = vmax.f32 %v1212_v47, 0.0  ;;  %v1215_v59 = vadd.f32 %v3291_v6, %v1214_v55  ;;  %v2553_v60 = vpack.c.bf16 %v1432_v50, %v1432_v50  ;;  %v1433_v62 = vmax.f32 %v967_v52, 0.0 }
 0x13d   : > { %v2617_v61 = vpack.c.bf16 %v1496_v51, %v1496_v51  ;;  %v1497_v63 = vmax.f32 %v1223_v53, 0.0  ;;  %v2551_v0 = vpack.c.bf16 %v1430_v56, %v1430_v56  ;;  %v1431_v2 = vmax.f32 %v959_v58, 0.0 }
 0x13e   : > { %v2615_v1 = vpack.c.bf16 %v1494_v57, %v1494_v57  ;;  %v1495_v3 = vmax.f32 %v1215_v59, 0.0  ;;  %2073 = vst.msk [vmem:[%s3304_s25 + $0x38] sm:$0xf] %vm2058_vm3, %v2553_v60  ;;  %v2554_v4 = vpack.c.bf16 %v1433_v62, %v1433_v62 }
 0x13f   : > { %2137 = vst.msk [vmem:[%s3304_s25 + $0x138] sm:$0xf] %vm2058_vm3, %v2617_v61  ;;  %v2618_v5 = vpack.c.bf16 %v1497_v63, %v1497_v63  ;;  %2071 = vst.msk [vmem:[%s3304_s25 + $0x30] sm:$0xf] %vm2058_vm3, %v2551_v0  ;;  %v2552_v7 = vpack.c.bf16 %v1431_v2, %v1431_v2  ;;  %v2755_v9 = vpop.f32.mrb[16].mxu0 }
 0x140   : > { %2135 = vst.msk [vmem:[%s3304_s25 + $0x130] sm:$0xf] %vm2058_vm3, %v2615_v1  ;;  %v2616_v8 = vpack.c.bf16 %v1495_v3, %v1495_v3  ;;  %v2819_v10 = vpop.f32.mrb[16].mxu1  ;;  %2074 = vst.msk [vmem:[%s3304_s25 + $0x3c] sm:$0xf] %vm2058_vm3, %v2554_v4  ;;  %v980_v11 = vadd.f32 %v2755_v9, %v3291_v6  ;;  %v971_v13 = vpop.f32.mrb[17].mxu0 }
 0x141   : > { %2138 = vst.msk [vmem:[%s3304_s25 + $0x13c] sm:$0xf] %vm2058_vm3, %v2618_v5  ;;  %v1236_v12 = vadd.f32 %v2819_v10, %v3291_v6  ;;  %v1227_v14 = vpop.f32.mrb[17].mxu1  ;;  %2072 = vst.msk [vmem:[%s3304_s25 + $0x34] sm:$0xf] %vm2058_vm3, %v2552_v7  ;;  %v972_v15 = vadd.f32 %v3291_v6, %v971_v13  ;;  %v2756_v17 = vpop.f32.mrb[18].mxu0 }
 0x142   : > { %2136 = vst.msk [vmem:[%s3304_s25 + $0x134] sm:$0xf] %vm2058_vm3, %v2616_v8  ;;  %v1228_v16 = vadd.f32 %v3291_v6, %v1227_v14  ;;  %v2820_v18 = vpop.f32.mrb[18].mxu1  ;;  %v1436_v19 = vmax.f32 %v980_v11, 0.0  ;;  %v983_v21 = vadd.f32 %v2756_v17, %v3291_v6  ;;  %v974_v23 = vpop.f32.mrb[19].mxu0 }
 0x143   : > { %v1500_v20 = vmax.f32 %v1236_v12, 0.0  ;;  %v1239_v22 = vadd.f32 %v2820_v18, %v3291_v6  ;;  %v1230_v24 = vpop.f32.mrb[19].mxu1  ;;  %v1434_v25 = vmax.f32 %v972_v15, 0.0  ;;  %v975_v27 = vadd.f32 %v3291_v6, %v974_v23 }
 0x144   : > { %v1498_v26 = vmax.f32 %v1228_v16, 0.0  ;;  %v1231_v28 = vadd.f32 %v3291_v6, %v1230_v24  ;;  %v2557_v29 = vpack.c.bf16 %v1436_v19, %v1436_v19  ;;  %v1437_v31 = vmax.f32 %v983_v21, 0.0 }
 0x145   : > { %v2621_v30 = vpack.c.bf16 %v1500_v20, %v1500_v20  ;;  %v1501_v32 = vmax.f32 %v1239_v22, 0.0  ;;  %v2555_v33 = vpack.c.bf16 %v1434_v25, %v1434_v25  ;;  %v1435_v35 = vmax.f32 %v975_v27, 0.0 }
 0x146   : > { %v2619_v34 = vpack.c.bf16 %v1498_v26, %v1498_v26  ;;  %v1499_v36 = vmax.f32 %v1231_v28, 0.0  ;;  %2077 = vst.msk [vmem:[%s3304_s25 + $0x48] sm:$0xf] %vm2058_vm3, %v2557_v29  ;;  %v2558_v37 = vpack.c.bf16 %v1437_v31, %v1437_v31 }
 0x147   : > { %2141 = vst.msk [vmem:[%s3304_s25 + $0x148] sm:$0xf] %vm2058_vm3, %v2621_v30  ;;  %v2622_v38 = vpack.c.bf16 %v1501_v32, %v1501_v32  ;;  %2075 = vst.msk [vmem:[%s3304_s25 + $0x40] sm:$0xf] %vm2058_vm3, %v2555_v33  ;;  %v2556_v39 = vpack.c.bf16 %v1435_v35, %v1435_v35  ;;  %v2759_v41 = vpop.f32.mrb[20].mxu0 }
 0x148   : > { %2139 = vst.msk [vmem:[%s3304_s25 + $0x140] sm:$0xf] %vm2058_vm3, %v2619_v34  ;;  %v2620_v40 = vpack.c.bf16 %v1499_v36, %v1499_v36  ;;  %v2823_v42 = vpop.f32.mrb[20].mxu1  ;;  %2078 = vst.msk [vmem:[%s3304_s25 + $0x4c] sm:$0xf] %vm2058_vm3, %v2558_v37  ;;  %v996_v43 = vadd.f32 %v2759_v41, %v3291_v6  ;;  %v987_v45 = vpop.f32.mrb[21].mxu0 }
 0x149   : > { %2142 = vst.msk [vmem:[%s3304_s25 + $0x14c] sm:$0xf] %vm2058_vm3, %v2622_v38  ;;  %v1252_v44 = vadd.f32 %v2823_v42, %v3291_v6  ;;  %v1243_v46 = vpop.f32.mrb[21].mxu1  ;;  %2076 = vst.msk [vmem:[%s3304_s25 + $0x44] sm:$0xf] %vm2058_vm3, %v2556_v39  ;;  %v988_v47 = vadd.f32 %v3291_v6, %v987_v45  ;;  %v2760_v49 = vpop.f32.mrb[22].mxu0 }
 0x14a   : > { %2140 = vst.msk [vmem:[%s3304_s25 + $0x144] sm:$0xf] %vm2058_vm3, %v2620_v40  ;;  %v1244_v48 = vadd.f32 %v3291_v6, %v1243_v46  ;;  %v2824_v50 = vpop.f32.mrb[22].mxu1  ;;  %v1440_v51 = vmax.f32 %v996_v43, 0.0  ;;  %v999_v53 = vadd.f32 %v2760_v49, %v3291_v6  ;;  %v990_v55 = vpop.f32.mrb[23].mxu0 }
 0x14b   : > { %v1504_v52 = vmax.f32 %v1252_v44, 0.0  ;;  %v1255_v54 = vadd.f32 %v2824_v50, %v3291_v6  ;;  %v1246_v56 = vpop.f32.mrb[23].mxu1  ;;  %v1438_v57 = vmax.f32 %v988_v47, 0.0  ;;  %v991_v59 = vadd.f32 %v3291_v6, %v990_v55 }
 0x14c   : > { %v1502_v58 = vmax.f32 %v1244_v48, 0.0  ;;  %v1247_v60 = vadd.f32 %v3291_v6, %v1246_v56  ;;  %v2561_v61 = vpack.c.bf16 %v1440_v51, %v1440_v51  ;;  %v1441_v63 = vmax.f32 %v999_v53, 0.0 }
 0x14d   : > { %v2625_v62 = vpack.c.bf16 %v1504_v52, %v1504_v52  ;;  %v1505_v0 = vmax.f32 %v1255_v54, 0.0  ;;  %v2559_v1 = vpack.c.bf16 %v1438_v57, %v1438_v57  ;;  %v1439_v3 = vmax.f32 %v991_v59, 0.0 }
 0x14e   : > { %v2623_v2 = vpack.c.bf16 %v1502_v58, %v1502_v58  ;;  %v1503_v4 = vmax.f32 %v1247_v60, 0.0  ;;  %2081 = vst.msk [vmem:[%s3304_s25 + $0x58] sm:$0xf] %vm2058_vm3, %v2561_v61  ;;  %v2562_v5 = vpack.c.bf16 %v1441_v63, %v1441_v63 }
 0x14f   : > { %2145 = vst.msk [vmem:[%s3304_s25 + $0x158] sm:$0xf] %vm2058_vm3, %v2625_v62  ;;  %v2626_v7 = vpack.c.bf16 %v1505_v0, %v1505_v0  ;;  %2079 = vst.msk [vmem:[%s3304_s25 + $0x50] sm:$0xf] %vm2058_vm3, %v2559_v1  ;;  %v2560_v8 = vpack.c.bf16 %v1439_v3, %v1439_v3  ;;  %v2763_v10 = vpop.f32.mrb[24].mxu0 }
 0x150   : > { %2143 = vst.msk [vmem:[%s3304_s25 + $0x150] sm:$0xf] %vm2058_vm3, %v2623_v2  ;;  %v2624_v9 = vpack.c.bf16 %v1503_v4, %v1503_v4  ;;  %v2827_v11 = vpop.f32.mrb[24].mxu1  ;;  %2082 = vst.msk [vmem:[%s3304_s25 + $0x5c] sm:$0xf] %vm2058_vm3, %v2562_v5  ;;  %v1012_v12 = vadd.f32 %v2763_v10, %v3291_v6  ;;  %v1003_v14 = vpop.f32.mrb[25].mxu0 }
 0x151   : > { %2146 = vst.msk [vmem:[%s3304_s25 + $0x15c] sm:$0xf] %vm2058_vm3, %v2626_v7  ;;  %v1268_v13 = vadd.f32 %v2827_v11, %v3291_v6  ;;  %v1259_v15 = vpop.f32.mrb[25].mxu1  ;;  %2080 = vst.msk [vmem:[%s3304_s25 + $0x54] sm:$0xf] %vm2058_vm3, %v2560_v8  ;;  %v1004_v16 = vadd.f32 %v3291_v6, %v1003_v14  ;;  %v2764_v18 = vpop.f32.mrb[26].mxu0 }
 0x152   : > { %2144 = vst.msk [vmem:[%s3304_s25 + $0x154] sm:$0xf] %vm2058_vm3, %v2624_v9  ;;  %v1260_v17 = vadd.f32 %v3291_v6, %v1259_v15  ;;  %v2828_v19 = vpop.f32.mrb[26].mxu1  ;;  %v1444_v20 = vmax.f32 %v1012_v12, 0.0  ;;  %v1015_v22 = vadd.f32 %v2764_v18, %v3291_v6  ;;  %v1006_v24 = vpop.f32.mrb[27].mxu0 }
 0x153   : > { %v1508_v21 = vmax.f32 %v1268_v13, 0.0  ;;  %v1271_v23 = vadd.f32 %v2828_v19, %v3291_v6  ;;  %v1262_v25 = vpop.f32.mrb[27].mxu1  ;;  %v1442_v26 = vmax.f32 %v1004_v16, 0.0  ;;  %v1007_v28 = vadd.f32 %v3291_v6, %v1006_v24 }
 0x154   : > { %v1506_v27 = vmax.f32 %v1260_v17, 0.0  ;;  %v1263_v29 = vadd.f32 %v3291_v6, %v1262_v25  ;;  %v2565_v30 = vpack.c.bf16 %v1444_v20, %v1444_v20  ;;  %v1445_v32 = vmax.f32 %v1015_v22, 0.0 }
 0x155   : > { %v2629_v31 = vpack.c.bf16 %v1508_v21, %v1508_v21  ;;  %v1509_v33 = vmax.f32 %v1271_v23, 0.0  ;;  %v2563_v34 = vpack.c.bf16 %v1442_v26, %v1442_v26  ;;  %v1443_v36 = vmax.f32 %v1007_v28, 0.0 }
 0x156   : > { %v2627_v35 = vpack.c.bf16 %v1506_v27, %v1506_v27  ;;  %v1507_v37 = vmax.f32 %v1263_v29, 0.0  ;;  %2085 = vst.msk [vmem:[%s3304_s25 + $0x68] sm:$0xf] %vm2058_vm3, %v2565_v30  ;;  %v2566_v38 = vpack.c.bf16 %v1445_v32, %v1445_v32 }
 0x157   : > { %2149 = vst.msk [vmem:[%s3304_s25 + $0x168] sm:$0xf] %vm2058_vm3, %v2629_v31  ;;  %v2630_v39 = vpack.c.bf16 %v1509_v33, %v1509_v33  ;;  %2083 = vst.msk [vmem:[%s3304_s25 + $0x60] sm:$0xf] %vm2058_vm3, %v2563_v34  ;;  %v2564_v40 = vpack.c.bf16 %v1443_v36, %v1443_v36  ;;  %v2767_v42 = vpop.f32.mrb[28].mxu0 }
 0x158   : > { %2147 = vst.msk [vmem:[%s3304_s25 + $0x160] sm:$0xf] %vm2058_vm3, %v2627_v35  ;;  %v2628_v41 = vpack.c.bf16 %v1507_v37, %v1507_v37  ;;  %v2831_v43 = vpop.f32.mrb[28].mxu1  ;;  %2086 = vst.msk [vmem:[%s3304_s25 + $0x6c] sm:$0xf] %vm2058_vm3, %v2566_v38  ;;  %v1028_v44 = vadd.f32 %v2767_v42, %v3291_v6  ;;  %v1019_v46 = vpop.f32.mrb[29].mxu0 }
 0x159   : > { %2150 = vst.msk [vmem:[%s3304_s25 + $0x16c] sm:$0xf] %vm2058_vm3, %v2630_v39  ;;  %v1284_v45 = vadd.f32 %v2831_v43, %v3291_v6  ;;  %v1275_v47 = vpop.f32.mrb[29].mxu1  ;;  %2084 = vst.msk [vmem:[%s3304_s25 + $0x64] sm:$0xf] %vm2058_vm3, %v2564_v40  ;;  %v1020_v48 = vadd.f32 %v3291_v6, %v1019_v46  ;;  %v2768_v50 = vpop.f32.mrb[30].mxu0 }
 0x15a   : > { %2148 = vst.msk [vmem:[%s3304_s25 + $0x164] sm:$0xf] %vm2058_vm3, %v2628_v41  ;;  %v1276_v49 = vadd.f32 %v3291_v6, %v1275_v47  ;;  %v2832_v51 = vpop.f32.mrb[30].mxu1  ;;  %v1448_v52 = vmax.f32 %v1028_v44, 0.0  ;;  %v1031_v54 = vadd.f32 %v2768_v50, %v3291_v6  ;;  %v1022_v56 = vpop.f32.mrb[31].mxu0 }
 0x15b   : > { %v1512_v53 = vmax.f32 %v1284_v45, 0.0  ;;  %v1287_v55 = vadd.f32 %v2832_v51, %v3291_v6  ;;  %v1278_v57 = vpop.f32.mrb[31].mxu1  ;;  %v1446_v58 = vmax.f32 %v1020_v48, 0.0  ;;  %v1023_v60 = vadd.f32 %v3291_v6, %v1022_v56 }
 0x15c   : > { %v1510_v59 = vmax.f32 %v1276_v49, 0.0  ;;  %v1279_v61 = vadd.f32 %v3291_v6, %v1278_v57  ;;  %v2569_v62 = vpack.c.bf16 %v1448_v52, %v1448_v52  ;;  %v1449_v0 = vmax.f32 %v1031_v54, 0.0 }
 0x15d   : > { %v2633_v63 = vpack.c.bf16 %v1512_v53, %v1512_v53  ;;  %v1513_v1 = vmax.f32 %v1287_v55, 0.0  ;;  %v2567_v2 = vpack.c.bf16 %v1446_v58, %v1446_v58  ;;  %v1447_v4 = vmax.f32 %v1023_v60, 0.0 }
 0x15e   : > { %v2631_v3 = vpack.c.bf16 %v1510_v59, %v1510_v59  ;;  %v1511_v5 = vmax.f32 %v1279_v61, 0.0  ;;  %2089 = vst.msk [vmem:[%s3304_s25 + $0x78] sm:$0xf] %vm2058_vm3, %v2569_v62  ;;  %v2570_v7 = vpack.c.bf16 %v1449_v0, %v1449_v0 }
 0x15f   : > { %2153 = vst.msk [vmem:[%s3304_s25 + $0x178] sm:$0xf] %vm2058_vm3, %v2633_v63  ;;  %v2634_v8 = vpack.c.bf16 %v1513_v1, %v1513_v1  ;;  %2087 = vst.msk [vmem:[%s3304_s25 + $0x70] sm:$0xf] %vm2058_vm3, %v2567_v2  ;;  %v2568_v9 = vpack.c.bf16 %v1447_v4, %v1447_v4  ;;  %v2771_v11 = vpop.f32.mrb[32].mxu0 }
 0x160   : > { %2151 = vst.msk [vmem:[%s3304_s25 + $0x170] sm:$0xf] %vm2058_vm3, %v2631_v3  ;;  %v2632_v10 = vpack.c.bf16 %v1511_v5, %v1511_v5  ;;  %v2835_v12 = vpop.f32.mrb[32].mxu1  ;;  %2090 = vst.msk [vmem:[%s3304_s25 + $0x7c] sm:$0xf] %vm2058_vm3, %v2570_v7  ;;  %v1044_v13 = vadd.f32 %v2771_v11, %v3291_v6  ;;  %v1035_v15 = vpop.f32.mrb[33].mxu0 }
 0x161   : > { %2154 = vst.msk [vmem:[%s3304_s25 + $0x17c] sm:$0xf] %vm2058_vm3, %v2634_v8  ;;  %v1300_v14 = vadd.f32 %v2835_v12, %v3291_v6  ;;  %v1291_v16 = vpop.f32.mrb[33].mxu1  ;;  %2088 = vst.msk [vmem:[%s3304_s25 + $0x74] sm:$0xf] %vm2058_vm3, %v2568_v9  ;;  %v1036_v17 = vadd.f32 %v3291_v6, %v1035_v15  ;;  %v2772_v19 = vpop.f32.mrb[34].mxu0 }
 0x162   : > { %2152 = vst.msk [vmem:[%s3304_s25 + $0x174] sm:$0xf] %vm2058_vm3, %v2632_v10  ;;  %v1292_v18 = vadd.f32 %v3291_v6, %v1291_v16  ;;  %v2836_v20 = vpop.f32.mrb[34].mxu1  ;;  %v1452_v21 = vmax.f32 %v1044_v13, 0.0  ;;  %v1047_v23 = vadd.f32 %v2772_v19, %v3291_v6  ;;  %v1038_v25 = vpop.f32.mrb[35].mxu0 }
 0x163   : > { %v1516_v22 = vmax.f32 %v1300_v14, 0.0  ;;  %v1303_v24 = vadd.f32 %v2836_v20, %v3291_v6  ;;  %v1294_v26 = vpop.f32.mrb[35].mxu1  ;;  %v1450_v27 = vmax.f32 %v1036_v17, 0.0  ;;  %v1039_v29 = vadd.f32 %v3291_v6, %v1038_v25 }
 0x164   : > { %v1514_v28 = vmax.f32 %v1292_v18, 0.0  ;;  %v1295_v30 = vadd.f32 %v3291_v6, %v1294_v26  ;;  %v2573_v31 = vpack.c.bf16 %v1452_v21, %v1452_v21  ;;  %v1453_v33 = vmax.f32 %v1047_v23, 0.0 }
 0x165   : > { %v2637_v32 = vpack.c.bf16 %v1516_v22, %v1516_v22  ;;  %v1517_v34 = vmax.f32 %v1303_v24, 0.0  ;;  %v2571_v35 = vpack.c.bf16 %v1450_v27, %v1450_v27  ;;  %v1451_v37 = vmax.f32 %v1039_v29, 0.0 }
 0x166   : > { %v2635_v36 = vpack.c.bf16 %v1514_v28, %v1514_v28  ;;  %v1515_v38 = vmax.f32 %v1295_v30, 0.0  ;;  %2093 = vst.msk [vmem:[%s3304_s25 + $0x88] sm:$0xf] %vm2058_vm3, %v2573_v31  ;;  %v2574_v39 = vpack.c.bf16 %v1453_v33, %v1453_v33 }
 0x167   : > { %2157 = vst.msk [vmem:[%s3304_s25 + $0x188] sm:$0xf] %vm2058_vm3, %v2637_v32  ;;  %v2638_v40 = vpack.c.bf16 %v1517_v34, %v1517_v34  ;;  %2091 = vst.msk [vmem:[%s3304_s25 + $0x80] sm:$0xf] %vm2058_vm3, %v2571_v35  ;;  %v2572_v41 = vpack.c.bf16 %v1451_v37, %v1451_v37  ;;  %v2775_v43 = vpop.f32.mrb[36].mxu0 }
 0x168   : > { %2155 = vst.msk [vmem:[%s3304_s25 + $0x180] sm:$0xf] %vm2058_vm3, %v2635_v36  ;;  %v2636_v42 = vpack.c.bf16 %v1515_v38, %v1515_v38  ;;  %v2839_v44 = vpop.f32.mrb[36].mxu1  ;;  %2094 = vst.msk [vmem:[%s3304_s25 + $0x8c] sm:$0xf] %vm2058_vm3, %v2574_v39  ;;  %v1060_v45 = vadd.f32 %v2775_v43, %v3291_v6  ;;  %v1051_v47 = vpop.f32.mrb[37].mxu0 }
 0x169   : > { %2158 = vst.msk [vmem:[%s3304_s25 + $0x18c] sm:$0xf] %vm2058_vm3, %v2638_v40  ;;  %v1316_v46 = vadd.f32 %v2839_v44, %v3291_v6  ;;  %v1307_v48 = vpop.f32.mrb[37].mxu1  ;;  %2092 = vst.msk [vmem:[%s3304_s25 + $0x84] sm:$0xf] %vm2058_vm3, %v2572_v41  ;;  %v1052_v49 = vadd.f32 %v3291_v6, %v1051_v47  ;;  %v2776_v51 = vpop.f32.mrb[38].mxu0 }
 0x16a   : > { %2156 = vst.msk [vmem:[%s3304_s25 + $0x184] sm:$0xf] %vm2058_vm3, %v2636_v42  ;;  %v1308_v50 = vadd.f32 %v3291_v6, %v1307_v48  ;;  %v2840_v52 = vpop.f32.mrb[38].mxu1  ;;  %v1456_v53 = vmax.f32 %v1060_v45, 0.0  ;;  %v1063_v55 = vadd.f32 %v2776_v51, %v3291_v6  ;;  %v1054_v57 = vpop.f32.mrb[39].mxu0 }
 0x16b   : > { %v1520_v54 = vmax.f32 %v1316_v46, 0.0  ;;  %v1319_v56 = vadd.f32 %v2840_v52, %v3291_v6  ;;  %v1310_v58 = vpop.f32.mrb[39].mxu1  ;;  %v1454_v59 = vmax.f32 %v1052_v49, 0.0  ;;  %v1055_v61 = vadd.f32 %v3291_v6, %v1054_v57 }
 0x16c   : > { %v1518_v60 = vmax.f32 %v1308_v50, 0.0  ;;  %v1311_v62 = vadd.f32 %v3291_v6, %v1310_v58  ;;  %v2577_v63 = vpack.c.bf16 %v1456_v53, %v1456_v53  ;;  %v1457_v1 = vmax.f32 %v1063_v55, 0.0 }
 0x16d   : > { %v2641_v0 = vpack.c.bf16 %v1520_v54, %v1520_v54  ;;  %v1521_v2 = vmax.f32 %v1319_v56, 0.0  ;;  %v2575_v3 = vpack.c.bf16 %v1454_v59, %v1454_v59  ;;  %v1455_v5 = vmax.f32 %v1055_v61, 0.0 }
 0x16e   : > { %v2639_v4 = vpack.c.bf16 %v1518_v60, %v1518_v60  ;;  %v1519_v7 = vmax.f32 %v1311_v62, 0.0  ;;  %2097 = vst.msk [vmem:[%s3304_s25 + $0x98] sm:$0xf] %vm2058_vm3, %v2577_v63  ;;  %v2578_v8 = vpack.c.bf16 %v1457_v1, %v1457_v1 }
 0x16f   : > { %2161 = vst.msk [vmem:[%s3304_s25 + $0x198] sm:$0xf] %vm2058_vm3, %v2641_v0  ;;  %v2642_v9 = vpack.c.bf16 %v1521_v2, %v1521_v2  ;;  %2095 = vst.msk [vmem:[%s3304_s25 + $0x90] sm:$0xf] %vm2058_vm3, %v2575_v3  ;;  %v2576_v10 = vpack.c.bf16 %v1455_v5, %v1455_v5  ;;  %v2779_v12 = vpop.f32.mrb[40].mxu0 }
 0x170   : > { %2159 = vst.msk [vmem:[%s3304_s25 + $0x190] sm:$0xf] %vm2058_vm3, %v2639_v4  ;;  %v2640_v11 = vpack.c.bf16 %v1519_v7, %v1519_v7  ;;  %v2843_v13 = vpop.f32.mrb[40].mxu1  ;;  %2098 = vst.msk [vmem:[%s3304_s25 + $0x9c] sm:$0xf] %vm2058_vm3, %v2578_v8  ;;  %v1076_v14 = vadd.f32 %v2779_v12, %v3291_v6  ;;  %v1067_v16 = vpop.f32.mrb[41].mxu0 }
 0x171   : > { %2162 = vst.msk [vmem:[%s3304_s25 + $0x19c] sm:$0xf] %vm2058_vm3, %v2642_v9  ;;  %v1332_v15 = vadd.f32 %v2843_v13, %v3291_v6  ;;  %v1323_v17 = vpop.f32.mrb[41].mxu1  ;;  %2096 = vst.msk [vmem:[%s3304_s25 + $0x94] sm:$0xf] %vm2058_vm3, %v2576_v10  ;;  %v1068_v18 = vadd.f32 %v3291_v6, %v1067_v16  ;;  %v2780_v20 = vpop.f32.mrb[42].mxu0 }
 0x172   : > { %2160 = vst.msk [vmem:[%s3304_s25 + $0x194] sm:$0xf] %vm2058_vm3, %v2640_v11  ;;  %v1324_v19 = vadd.f32 %v3291_v6, %v1323_v17  ;;  %v2844_v21 = vpop.f32.mrb[42].mxu1  ;;  %v1460_v22 = vmax.f32 %v1076_v14, 0.0  ;;  %v1079_v24 = vadd.f32 %v2780_v20, %v3291_v6  ;;  %v1070_v26 = vpop.f32.mrb[43].mxu0 }
 0x173   : > { %v1524_v23 = vmax.f32 %v1332_v15, 0.0  ;;  %v1335_v25 = vadd.f32 %v2844_v21, %v3291_v6  ;;  %v1326_v27 = vpop.f32.mrb[43].mxu1  ;;  %v1458_v28 = vmax.f32 %v1068_v18, 0.0  ;;  %v1071_v30 = vadd.f32 %v3291_v6, %v1070_v26 }
 0x174   : > { %v1522_v29 = vmax.f32 %v1324_v19, 0.0  ;;  %v1327_v31 = vadd.f32 %v3291_v6, %v1326_v27  ;;  %v2581_v32 = vpack.c.bf16 %v1460_v22, %v1460_v22  ;;  %v1461_v34 = vmax.f32 %v1079_v24, 0.0 }
 0x175   : > { %v2645_v33 = vpack.c.bf16 %v1524_v23, %v1524_v23  ;;  %v1525_v35 = vmax.f32 %v1335_v25, 0.0  ;;  %v2579_v36 = vpack.c.bf16 %v1458_v28, %v1458_v28  ;;  %v1459_v38 = vmax.f32 %v1071_v30, 0.0 }
 0x176   : > { %v2643_v37 = vpack.c.bf16 %v1522_v29, %v1522_v29  ;;  %v1523_v39 = vmax.f32 %v1327_v31, 0.0  ;;  %2101 = vst.msk [vmem:[%s3304_s25 + $0xa8] sm:$0xf] %vm2058_vm3, %v2581_v32  ;;  %v2582_v40 = vpack.c.bf16 %v1461_v34, %v1461_v34 }
 0x177   : > { %2165 = vst.msk [vmem:[%s3304_s25 + $0x1a8] sm:$0xf] %vm2058_vm3, %v2645_v33  ;;  %v2646_v41 = vpack.c.bf16 %v1525_v35, %v1525_v35  ;;  %2099 = vst.msk [vmem:[%s3304_s25 + $0xa0] sm:$0xf] %vm2058_vm3, %v2579_v36  ;;  %v2580_v42 = vpack.c.bf16 %v1459_v38, %v1459_v38  ;;  %v2783_v44 = vpop.f32.mrb[44].mxu0 }
 0x178   : > { %2163 = vst.msk [vmem:[%s3304_s25 + $0x1a0] sm:$0xf] %vm2058_vm3, %v2643_v37  ;;  %v2644_v43 = vpack.c.bf16 %v1523_v39, %v1523_v39  ;;  %v2847_v45 = vpop.f32.mrb[44].mxu1  ;;  %2102 = vst.msk [vmem:[%s3304_s25 + $0xac] sm:$0xf] %vm2058_vm3, %v2582_v40  ;;  %v1092_v46 = vadd.f32 %v2783_v44, %v3291_v6  ;;  %v1083_v48 = vpop.f32.mrb[45].mxu0 }
 0x179   : > { %2166 = vst.msk [vmem:[%s3304_s25 + $0x1ac] sm:$0xf] %vm2058_vm3, %v2646_v41  ;;  %v1348_v47 = vadd.f32 %v2847_v45, %v3291_v6  ;;  %v1339_v49 = vpop.f32.mrb[45].mxu1  ;;  %2100 = vst.msk [vmem:[%s3304_s25 + $0xa4] sm:$0xf] %vm2058_vm3, %v2580_v42  ;;  %v1084_v50 = vadd.f32 %v3291_v6, %v1083_v48  ;;  %v2784_v52 = vpop.f32.mrb[46].mxu0 }
 0x17a   : > { %2164 = vst.msk [vmem:[%s3304_s25 + $0x1a4] sm:$0xf] %vm2058_vm3, %v2644_v43  ;;  %v1340_v51 = vadd.f32 %v3291_v6, %v1339_v49  ;;  %v2848_v53 = vpop.f32.mrb[46].mxu1  ;;  %v1464_v54 = vmax.f32 %v1092_v46, 0.0  ;;  %v1095_v56 = vadd.f32 %v2784_v52, %v3291_v6  ;;  %v1086_v58 = vpop.f32.mrb[47].mxu0 }
 0x17b   : > { %v1528_v55 = vmax.f32 %v1348_v47, 0.0  ;;  %v1351_v57 = vadd.f32 %v2848_v53, %v3291_v6  ;;  %v1342_v59 = vpop.f32.mrb[47].mxu1  ;;  %v1462_v60 = vmax.f32 %v1084_v50, 0.0  ;;  %v1087_v62 = vadd.f32 %v3291_v6, %v1086_v58  ;;  %v3608_v46 = vld [vmem:[#allocation4] ss:$0 sm:$0xff] }
 0x17c   : > { %v1526_v61 = vmax.f32 %v1340_v51, 0.0  ;;  %v1343_v63 = vadd.f32 %v3291_v6, %v1342_v59  ;;  %v2585_v0 = vpack.c.bf16 %v1464_v54, %v1464_v54  ;;  %v1465_v2 = vmax.f32 %v1095_v56, 0.0 }
 0x17d   : > { %v2649_v1 = vpack.c.bf16 %v1528_v55, %v1528_v55  ;;  %v1529_v3 = vmax.f32 %v1351_v57, 0.0  ;;  %v2583_v4 = vpack.c.bf16 %v1462_v60, %v1462_v60  ;;  %v1463_v7 = vmax.f32 %v1087_v62, 0.0 }
 0x17e   : > { %v2647_v5 = vpack.c.bf16 %v1526_v61, %v1526_v61  ;;  %v1527_v8 = vmax.f32 %v1343_v63, 0.0  ;;  %2105 = vst.msk [vmem:[%s3304_s25 + $0xb8] sm:$0xf] %vm2058_vm3, %v2585_v0  ;;  %v2586_v9 = vpack.c.bf16 %v1465_v2, %v1465_v2 }
 0x17f   : > { %2169 = vst.msk [vmem:[%s3304_s25 + $0x1b8] sm:$0xf] %vm2058_vm3, %v2649_v1  ;;  %v2650_v10 = vpack.c.bf16 %v1529_v3, %v1529_v3  ;;  %2103 = vst.msk [vmem:[%s3304_s25 + $0xb0] sm:$0xf] %vm2058_vm3, %v2583_v4  ;;  %v2584_v11 = vpack.c.bf16 %v1463_v7, %v1463_v7  ;;  %v2787_v13 = vpop.f32.mrb[48].mxu0 }
 0x180   : > { %2167 = vst.msk [vmem:[%s3304_s25 + $0x1b0] sm:$0xf] %vm2058_vm3, %v2647_v5  ;;  %v2648_v12 = vpack.c.bf16 %v1527_v8, %v1527_v8  ;;  %v2851_v14 = vpop.f32.mrb[48].mxu1  ;;  %2106 = vst.msk [vmem:[%s3304_s25 + $0xbc] sm:$0xf] %vm2058_vm3, %v2586_v9  ;;  %v1108_v15 = vadd.f32 %v2787_v13, %v3291_v6  ;;  %v1099_v17 = vpop.f32.mrb[49].mxu0 }
 0x181   : > { %2170 = vst.msk [vmem:[%s3304_s25 + $0x1bc] sm:$0xf] %vm2058_vm3, %v2650_v10  ;;  %v1364_v16 = vadd.f32 %v2851_v14, %v3291_v6  ;;  %v1355_v18 = vpop.f32.mrb[49].mxu1  ;;  %2104 = vst.msk [vmem:[%s3304_s25 + $0xb4] sm:$0xf] %vm2058_vm3, %v2584_v11  ;;  %v1100_v19 = vadd.f32 %v3291_v6, %v1099_v17  ;;  %v2788_v21 = vpop.f32.mrb[50].mxu0 }
 0x182   : > { %2168 = vst.msk [vmem:[%s3304_s25 + $0x1b4] sm:$0xf] %vm2058_vm3, %v2648_v12  ;;  %v1356_v20 = vadd.f32 %v3291_v6, %v1355_v18  ;;  %v2852_v22 = vpop.f32.mrb[50].mxu1  ;;  %v1468_v23 = vmax.f32 %v1108_v15, 0.0  ;;  %v1111_v25 = vadd.f32 %v2788_v21, %v3291_v6  ;;  %v1102_v27 = vpop.f32.mrb[51].mxu0 }
 0x183   : > { %v1532_v24 = vmax.f32 %v1364_v16, 0.0  ;;  %v1367_v26 = vadd.f32 %v2852_v22, %v3291_v6  ;;  %v1358_v28 = vpop.f32.mrb[51].mxu1  ;;  %v1466_v29 = vmax.f32 %v1100_v19, 0.0  ;;  %v1103_v31 = vadd.f32 %v3291_v6, %v1102_v27 }
 0x184   : > { %v1530_v30 = vmax.f32 %v1356_v20, 0.0  ;;  %v1359_v32 = vadd.f32 %v3291_v6, %v1358_v28  ;;  %v2589_v33 = vpack.c.bf16 %v1468_v23, %v1468_v23  ;;  %v1469_v35 = vmax.f32 %v1111_v25, 0.0 }
 0x185   : > { %v2653_v34 = vpack.c.bf16 %v1532_v24, %v1532_v24  ;;  %v1533_v36 = vmax.f32 %v1367_v26, 0.0  ;;  %v2587_v37 = vpack.c.bf16 %v1466_v29, %v1466_v29  ;;  %v1467_v39 = vmax.f32 %v1103_v31, 0.0 }
 0x186   : > { %v2651_v38 = vpack.c.bf16 %v1530_v30, %v1530_v30  ;;  %v1531_v40 = vmax.f32 %v1359_v32, 0.0  ;;  %2109 = vst.msk [vmem:[%s3304_s25 + $0xc8] sm:$0xf] %vm2058_vm3, %v2589_v33  ;;  %v2590_v41 = vpack.c.bf16 %v1469_v35, %v1469_v35 }
 0x187   : > { %2173 = vst.msk [vmem:[%s3304_s25 + $0x1c8] sm:$0xf] %vm2058_vm3, %v2653_v34  ;;  %v2654_v42 = vpack.c.bf16 %v1533_v36, %v1533_v36  ;;  %2107 = vst.msk [vmem:[%s3304_s25 + $0xc0] sm:$0xf] %vm2058_vm3, %v2587_v37  ;;  %v2588_v6 = vpack.c.bf16 %v1467_v39, %v1467_v39  ;;  %v2791_v44 = vpop.f32.mrb[52].mxu0 }
 0x188   : > { %2171 = vst.msk [vmem:[%s3304_s25 + $0x1c0] sm:$0xf] %vm2058_vm3, %v2651_v38  ;;  %v2652_v43 = vpack.c.bf16 %v1531_v40, %v1531_v40  ;;  %v2855_v45 = vpop.f32.mrb[52].mxu1  ;;  %2110 = vst.msk [vmem:[%s3304_s25 + $0xcc] sm:$0xf] %vm2058_vm3, %v2590_v41  ;;  %v1124_v47 = vadd.f32 %v3608_v46, %v2791_v44  ;;  %v1115_v49 = vpop.f32.mrb[53].mxu0 }
 0x189   : > { %2174 = vst.msk [vmem:[%s3304_s25 + $0x1cc] sm:$0xf] %vm2058_vm3, %v2654_v42  ;;  %v1380_v48 = vadd.f32 %v3608_v46, %v2855_v45  ;;  %v1371_v50 = vpop.f32.mrb[53].mxu1  ;;  %2108 = vst.msk [vmem:[%s3304_s25 + $0xc4] sm:$0xf] %vm2058_vm3, %v2588_v6  ;;  %v1116_v51 = vadd.f32 %v3608_v46, %v1115_v49  ;;  %v2792_v53 = vpop.f32.mrb[54].mxu0 }
 0x18a   : > { %2172 = vst.msk [vmem:[%s3304_s25 + $0x1c4] sm:$0xf] %vm2058_vm3, %v2652_v43  ;;  %v1372_v52 = vadd.f32 %v3608_v46, %v1371_v50  ;;  %v2856_v54 = vpop.f32.mrb[54].mxu1  ;;  %v1472_v55 = vmax.f32 %v1124_v47, 0.0  ;;  %v1127_v57 = vadd.f32 %v3608_v46, %v2792_v53  ;;  %v1118_v59 = vpop.f32.mrb[55].mxu0 }
 0x18b   : > { %v1536_v56 = vmax.f32 %v1380_v48, 0.0  ;;  %v1383_v58 = vadd.f32 %v3608_v46, %v2856_v54  ;;  %v1374_v60 = vpop.f32.mrb[55].mxu1  ;;  %v1470_v61 = vmax.f32 %v1116_v51, 0.0  ;;  %v1119_v63 = vadd.f32 %v3608_v46, %v1118_v59 }
 0x18c   : > { %v1534_v62 = vmax.f32 %v1372_v52, 0.0  ;;  %v1375_v0 = vadd.f32 %v3608_v46, %v1374_v60  ;;  %v2593_v1 = vpack.c.bf16 %v1472_v55, %v1472_v55  ;;  %v1473_v3 = vmax.f32 %v1127_v57, 0.0 }
 0x18d   : > { %v2657_v2 = vpack.c.bf16 %v1536_v56, %v1536_v56  ;;  %v1537_v4 = vmax.f32 %v1383_v58, 0.0  ;;  %v2591_v5 = vpack.c.bf16 %v1470_v61, %v1470_v61  ;;  %v1471_v8 = vmax.f32 %v1119_v63, 0.0 }
 0x18e   : > { %v2655_v7 = vpack.c.bf16 %v1534_v62, %v1534_v62  ;;  %v1535_v9 = vmax.f32 %v1375_v0, 0.0  ;;  %2113 = vst.msk [vmem:[%s3304_s25 + $0xd8] sm:$0xf] %vm2058_vm3, %v2593_v1  ;;  %v2594_v10 = vpack.c.bf16 %v1473_v3, %v1473_v3 }
 0x18f   : > { %2177 = vst.msk [vmem:[%s3304_s25 + $0x1d8] sm:$0xf] %vm2058_vm3, %v2657_v2  ;;  %v2658_v11 = vpack.c.bf16 %v1537_v4, %v1537_v4  ;;  %2111 = vst.msk [vmem:[%s3304_s25 + $0xd0] sm:$0xf] %vm2058_vm3, %v2591_v5  ;;  %v2592_v12 = vpack.c.bf16 %v1471_v8, %v1471_v8  ;;  %v2795_v14 = vpop.f32.mrb[56].mxu0 }
 0x190   : > { %2175 = vst.msk [vmem:[%s3304_s25 + $0x1d0] sm:$0xf] %vm2058_vm3, %v2655_v7  ;;  %v2656_v13 = vpack.c.bf16 %v1535_v9, %v1535_v9  ;;  %v2859_v15 = vpop.f32.mrb[56].mxu1  ;;  %2114 = vst.msk [vmem:[%s3304_s25 + $0xdc] sm:$0xf] %vm2058_vm3, %v2594_v10  ;;  %v1140_v16 = vadd.f32 %v3608_v46, %v2795_v14  ;;  %v1131_v18 = vpop.f32.mrb[57].mxu0 }
 0x191   : > { %2178 = vst.msk [vmem:[%s3304_s25 + $0x1dc] sm:$0xf] %vm2058_vm3, %v2658_v11  ;;  %v1396_v17 = vadd.f32 %v3608_v46, %v2859_v15  ;;  %v1387_v19 = vpop.f32.mrb[57].mxu1  ;;  %2112 = vst.msk [vmem:[%s3304_s25 + $0xd4] sm:$0xf] %vm2058_vm3, %v2592_v12  ;;  %v1132_v20 = vadd.f32 %v3608_v46, %v1131_v18  ;;  %v2796_v22 = vpop.f32.mrb[58].mxu0 }
 0x192   : > { %2176 = vst.msk [vmem:[%s3304_s25 + $0x1d4] sm:$0xf] %vm2058_vm3, %v2656_v13  ;;  %v1388_v21 = vadd.f32 %v3608_v46, %v1387_v19  ;;  %v2860_v23 = vpop.f32.mrb[58].mxu1  ;;  %v1476_v24 = vmax.f32 %v1140_v16, 0.0  ;;  %v1143_v26 = vadd.f32 %v3608_v46, %v2796_v22  ;;  %v1134_v28 = vpop.f32.mrb[59].mxu0 }
 0x193   : > { %v1540_v25 = vmax.f32 %v1396_v17, 0.0  ;;  %v1399_v27 = vadd.f32 %v3608_v46, %v2860_v23  ;;  %v1390_v29 = vpop.f32.mrb[59].mxu1  ;;  %v1474_v30 = vmax.f32 %v1132_v20, 0.0  ;;  %v1135_v32 = vadd.f32 %v3608_v46, %v1134_v28 }
 0x194   : > { %v1538_v31 = vmax.f32 %v1388_v21, 0.0  ;;  %v1391_v33 = vadd.f32 %v3608_v46, %v1390_v29  ;;  %v2597_v34 = vpack.c.bf16 %v1476_v24, %v1476_v24  ;;  %v1477_v36 = vmax.f32 %v1143_v26, 0.0 }
 0x195   : > { %v2661_v35 = vpack.c.bf16 %v1540_v25, %v1540_v25  ;;  %v1541_v37 = vmax.f32 %v1399_v27, 0.0  ;;  %v2595_v38 = vpack.c.bf16 %v1474_v30, %v1474_v30  ;;  %v1475_v40 = vmax.f32 %v1135_v32, 0.0 }
 0x196   : > { %v2659_v39 = vpack.c.bf16 %v1538_v31, %v1538_v31  ;;  %v1539_v41 = vmax.f32 %v1391_v33, 0.0  ;;  %2117 = vst.msk [vmem:[%s3304_s25 + $0xe8] sm:$0xf] %vm2058_vm3, %v2597_v34  ;;  %v2598_v42 = vpack.c.bf16 %v1477_v36, %v1477_v36 }
 0x197   : > { %2181 = vst.msk [vmem:[%s3304_s25 + $0x1e8] sm:$0xf] %vm2058_vm3, %v2661_v35  ;;  %v2662_v6 = vpack.c.bf16 %v1541_v37, %v1541_v37  ;;  %2115 = vst.msk [vmem:[%s3304_s25 + $0xe0] sm:$0xf] %vm2058_vm3, %v2595_v38  ;;  %v2596_v43 = vpack.c.bf16 %v1475_v40, %v1475_v40  ;;  %v2799_v45 = vpop.f32.mrb[60].mxu0 }
 0x198   : > { %2179 = vst.msk [vmem:[%s3304_s25 + $0x1e0] sm:$0xf] %vm2058_vm3, %v2659_v39  ;;  %v2660_v44 = vpack.c.bf16 %v1539_v41, %v1539_v41  ;;  %v2863_v47 = vpop.f32.mrb[60].mxu1  ;;  %2118 = vst.msk [vmem:[%s3304_s25 + $0xec] sm:$0xf] %vm2058_vm3, %v2598_v42  ;;  %v1156_v48 = vadd.f32 %v3608_v46, %v2799_v45  ;;  %v1147_v50 = vpop.f32.mrb[61].mxu0 }
 0x199   : > { %2182 = vst.msk [vmem:[%s3304_s25 + $0x1ec] sm:$0xf] %vm2058_vm3, %v2662_v6  ;;  %v1412_v49 = vadd.f32 %v3608_v46, %v2863_v47  ;;  %v1403_v51 = vpop.f32.mrb[61].mxu1  ;;  %2116 = vst.msk [vmem:[%s3304_s25 + $0xe4] sm:$0xf] %vm2058_vm3, %v2596_v43  ;;  %v1148_v52 = vadd.f32 %v3608_v46, %v1147_v50  ;;  %v2800_v54 = vpop.f32.mrb[62].mxu0 }
 0x19a   : > { %2180 = vst.msk [vmem:[%s3304_s25 + $0x1e4] sm:$0xf] %vm2058_vm3, %v2660_v44  ;;  %v1404_v53 = vadd.f32 %v3608_v46, %v1403_v51  ;;  %v2864_v55 = vpop.f32.mrb[62].mxu1  ;;  %v1480_v56 = vmax.f32 %v1156_v48, 0.0  ;;  %v1159_v58 = vadd.f32 %v3608_v46, %v2800_v54  ;;  %v1150_v60 = vpop.f32.mrb[63].mxu0 }
 0x19b   : > { %v1544_v57 = vmax.f32 %v1412_v49, 0.0  ;;  %v1415_v59 = vadd.f32 %v3608_v46, %v2864_v55  ;;  %v1406_v61 = vpop.f32.mrb[63].mxu1  ;;  %v1478_v62 = vmax.f32 %v1148_v52, 0.0  ;;  %v1151_v0 = vadd.f32 %v3608_v46, %v1150_v60 }
 0x19c   : > { %v1542_v63 = vmax.f32 %v1404_v53, 0.0  ;;  %v1407_v1 = vadd.f32 %v3608_v46, %v1406_v61  ;;  %v2601_v2 = vpack.c.bf16 %v1480_v56, %v1480_v56  ;;  %v1481_v4 = vmax.f32 %v1159_v58, 0.0 }
 0x19d   : > { %v2665_v3 = vpack.c.bf16 %v1544_v57, %v1544_v57  ;;  %v1545_v5 = vmax.f32 %v1415_v59, 0.0  ;;  %v2599_v7 = vpack.c.bf16 %v1478_v62, %v1478_v62  ;;  %v1479_v9 = vmax.f32 %v1151_v0, 0.0 }
 0x19e   : > { %v2663_v8 = vpack.c.bf16 %v1542_v63, %v1542_v63  ;;  %v1543_v10 = vmax.f32 %v1407_v1, 0.0  ;;  %2121 = vst.msk [vmem:[%s3304_s25 + $0xf8] sm:$0xf] %vm2058_vm3, %v2601_v2  ;;  %v2602_v11 = vpack.c.bf16 %v1481_v4, %v1481_v4 }
 0x19f   : > { %2185 = vst.msk [vmem:[%s3304_s25 + $0x1f8] sm:$0xf] %vm2058_vm3, %v2665_v3  ;;  %v2666_v12 = vpack.c.bf16 %v1545_v5, %v1545_v5  ;;  %2119 = vst.msk [vmem:[%s3304_s25 + $0xf0] sm:$0xf] %vm2058_vm3, %v2599_v7  ;;  %v2600_v46 = vpack.c.bf16 %v1479_v9, %v1479_v9 }
 0x1a0   : > { %2183 = vst.msk [vmem:[%s3304_s25 + $0x1f0] sm:$0xf] %vm2058_vm3, %v2663_v8  ;;  %v2664_v13 = vpack.c.bf16 %v1543_v10, %v1543_v10  ;;  %2122 = vst.msk [vmem:[%s3304_s25 + $0xfc] sm:$0xf] %vm2058_vm3, %v2602_v11 }
 0x1a1   : > { %2186 = vst.msk [vmem:[%s3304_s25 + $0x1fc] sm:$0xf] %vm2058_vm3, %v2666_v12  ;;  %2120 = vst.msk [vmem:[%s3304_s25 + $0xf4] sm:$0xf] %vm2058_vm3, %v2600_v46 }
 0x1a2   : > { %2184 = vst.msk [vmem:[%s3304_s25 + $0x1f4] sm:$0xf] %vm2058_vm3, %v2664_v13 }
 0x1a3 PF: > { %s15_s12 = sadd.s32 1, %s3038_s12  }
 0x1a4   : > { %p12_p2 = scmp.ge.s32.totalorder %s15_s12, 4  }
 0x1a6   :  { %14 = sbr.rel (!%p12_p2) target bundleno = 2 (0x2), region = 71 }
 0x1ad   :  { %2209 = vsyncpa [#allocation3], 1 }
 0x1ae   :  { %2211 = vsyncpa [#allocation3 + $0x1], 1 }
 0x1af   :  { %2212 = vsyncpa [#allocation5], 1 }

// kernel: simple_conv_forward.6
= control target key start
LH: loop header
LB: loop body
LE: loop exit
PB: predicated region body
PF: predicated region fallthrough
CT: control target
= control target key end

     0   :  { %s2537_s12 = smov 0   ;;  %s2930_s0 = inlined_call_operand.vmem [shape: bf16[512,576], index: 0, kind: input, shape index: {}]   ;;  %s2931_s1 = inlined_call_operand.vmem [shape: bf16[576,128], index: 1, kind: input, shape index: {}]   ;;  %s2932_s2 = inlined_call_operand.vmem [shape: f32[1,128], index: 2, kind: input, shape index: {}]   ;;  %s2933_s3 = inlined_call_operand.vmem [shape: bf16[512,128], index: 3, kind: output, shape index: {}]  }
   0x1 LB: > { %s1749_s13 = sadd.s32 4294967295, %s2515_s12   ;;  %p1753_p0 = scmp.ge.s32.totalorder %s2515_s12, 1  ;;  %s2515_s12 = sphi %s2537_s12, %s13_s12  }
   0x2   : > { %p139_p1 = scmp.lt.s32.totalorder %s2515_s12, 3 }
   0x4   : > { %p140_p2 = pnand %p1753_p0, %p139_p1 }
   0x5   : > { %v2361_v0 = vld [vmem:[%s2931_s1 + $0x40] sm:$0xff] (!%p140_p2)   ;;  %s1754_s16 = sshll.u32 (!%p140_p2), %s1749_s13, 5  ;;  %v2363_v2 = vld [vmem:[%s2931_s1 + $0x48] sm:$0xff] (!%p140_p2)   ;;  %v2365_v4 = vld [vmem:[%s2931_s1 + $0x50] sm:$0xff] (!%p140_p2)   ;;  %vm969_vm0 = vcmask (!%p140_p2), 523264  }
   0x6   : > { %143 = sbr.rel (%p140_p2) target bundleno = 416 (0x1a0), region = 32  ;;  %v2362_v1 = vld [vmem:[%s2931_s1] sm:$0xff] (!%p140_p2)   ;;  %2052 = vmatprep.subr.bf16.mxu0 (!%p140_p2), %v2361_v0  ;;  %2336 = vmatprep.subr.bf16.mxu1 (!%p140_p2), %v2361_v0  ;;  %p165_p3 = scmp.lt.s32.totalorder (!%p140_p2), %s1754_s16, 63  ;;  %v2364_v3 = vld [vmem:[%s2931_s1 + $0x8] sm:$0xff] (!%p140_p2)   ;;  %v2366_v5 = vld [vmem:[%s2931_s1 + $0x10] sm:$0xff] (!%p140_p2)  }
   0x7   : > { %2053 = vmatpush3.bf16.msra.mxu0 (!%p140_p2), %v2362_v1  ;;  %2344 = vmatpush3.bf16.msra.mxu1 (!%p140_p2), %v2362_v1  ;;  %v2367_v6 = vld [vmem:[%s2931_s1 + $0x58] sm:$0xff] (!%p140_p2)   ;;  %v2369_v8 = vld [vmem:[%s2931_s1 + $0x60] sm:$0xff] (!%p140_p2)   ;;  %v2371_v10 = vld [vmem:[%s2931_s1 + $0x68] sm:$0xff] (!%p140_p2)  }
   0x8   : > { %2054 = vmatprep.subr.bf16.mxu0 (!%p140_p2), %v2363_v2  ;;  %2337 = vmatprep.subr.bf16.mxu1 (!%p140_p2), %v2363_v2  ;;  %v2368_v7 = vld [vmem:[%s2931_s1 + $0x18] sm:$0xff] (!%p140_p2)   ;;  %v2370_v9 = vld [vmem:[%s2931_s1 + $0x20] sm:$0xff] (!%p140_p2)   ;;  %v2372_v13 = vld [vmem:[%s2931_s1 + $0x28] sm:$0xff] (!%p140_p2)  }
   0x9   : > { %v2373_v14 = vld [vmem:[%s2931_s1 + $0x70] sm:$0xff] (!%p140_p2)   ;;  %v2375_v16 = vld [vmem:[%s2931_s1 + $0x78] sm:$0xff] (!%p140_p2)   ;;  %v2383_v18 = vld [vmem:[%s2931_s1 + $0xc0] sm:$0xff] (!%p140_p2)  }
   0xa   : > { %v2374_v15 = vld [vmem:[%s2931_s1 + $0x30] sm:$0xff] (!%p140_p2)   ;;  %v2376_v17 = vld [vmem:[%s2931_s1 + $0x38] sm:$0xff] (!%p140_p2)   ;;  %v2386_v19 = vld [vmem:[%s2931_s1 + $0x100] sm:$0xff] (!%p140_p2)  }
   0xb   : > { %2055 = vmatpush3.bf16.msra.mxu0 (!%p140_p2), %v2364_v3  ;;  %2345 = vmatpush3.bf16.msra.mxu1 (!%p140_p2), %v2364_v3  ;;  %v2384_v22 = vld [vmem:[%s2931_s1 + $0x80] sm:$0xff] (!%p140_p2)   ;;  %v2385_v23 = vld [vmem:[%s2931_s1 + $0xc8] sm:$0xff] (!%p140_p2)   ;;  %v2394_v28 = vld [vmem:[%s2931_s1 + $0xd0] sm:$0xff] (!%p140_p2)  }
   0xc   : > { %2056 = vmatprep.subr.bf16.mxu0 (!%p140_p2), %v2365_v4  ;;  %2338 = vmatprep.subr.bf16.mxu1 (!%p140_p2), %v2365_v4  ;;  %v2387_v26 = vld [vmem:[%s2931_s1 + $0x88] sm:$0xff] (!%p140_p2)   ;;  %v2395_v30 = vld [vmem:[%s2931_s1 + $0x90] sm:$0xff] (!%p140_p2)   ;;  %v2396_v31 = vld [vmem:[%s2931_s1 + $0xd8] sm:$0xff] (!%p140_p2)  }
   0xd   : > { %s2935_s16 = smov (!%p165_p3, %s1754_s16), 63  ;;  %v2397_v34 = vld [vmem:[%s2931_s1 + $0x98] sm:$0xff]   ;;  %v2417_v35 = vld [vmem:[%s2931_s1 + $0x108] sm:$0xff]   ;;  %v2404_v37 = vld [vmem:[%s2931_s1 + $0xe0] sm:$0xff]  }
   0xe   : > { %s2352_s29 = smul.u32 20, %s2935_s16  ;;  %v2405_v39 = vld [vmem:[%s2931_s1 + $0xa0] sm:$0xff]   ;;  %v2406_v40 = vld [vmem:[%s2931_s1 + $0xe8] sm:$0xff]   ;;  %v2414_v46 = vld [vmem:[%s2931_s1 + $0xf0] sm:$0xff]   ;;  %s1757_s19 = sshll.u32 %s2935_s16, 2 }
   0xf   : > { %2057 = vmatpush3.bf16.msra.mxu0 %v2366_v5  ;;  %2346 = vmatpush3.bf16.msra.mxu1 %v2366_v5  ;;  %v2407_v43 = vld [vmem:[%s2931_s1 + $0xa8] sm:$0xff]   ;;  %v2437_v47 = vld [vmem:[%s2931_s1 + $0x110] sm:$0xff]   ;;  %v2416_v49 = vld [vmem:[%s2931_s1 + $0xf8] sm:$0xff]   ;;  %s2853_s22 = scalar_lea.vmem %s2933_s3, %s1757_s19 }
  0x10   : > { %2058 = vmatprep.subr.bf16.mxu0 %v2367_v6  ;;  %2339 = vmatprep.subr.bf16.mxu1 %v2367_v6  ;;  %s2578_s9 = scalar_lea.vmem %s2930_s0, %s2352_s29  ;;  %v2415_v48 = vld [vmem:[%s2931_s1 + $0xb0] sm:$0xff]   ;;  %v2418_v52 = vld [vmem:[%s2931_s1 + $0xb8] sm:$0xff]  }
  0x11   : > { %v2379_v11 = vld [vmem:[%s2578_s9 + $0x4] ss:$20 sps:$4 sm:$0xff]   ;;  %v2377_v20 = vld [vmem:[%s2578_s9] ss:$20 sps:$4 sm:$0xff]   ;;  %v2392_v27 = vld [vmem:[%s2578_s9 + $0x28] ss:$20 sps:$4 sm:$0xff]  }
  0x12   : > { %v2382_v12 = vld [vmem:[%s2578_s9 + $0x1e4] ss:$20 sps:$4 sm:$0xff]   ;;  %1050 = vmatprep.mubr.bf16.mxu0 %v2379_v11  ;;  %v2380_v21 = vld [vmem:[%s2578_s9 + $0x1e0] ss:$20 sps:$4 sm:$0xff]   ;;  %v2393_v29 = vld [vmem:[%s2578_s9 + $0x208] ss:$20 sps:$4 sm:$0xff]  }
  0x13   : > { %2059 = vmatpush3.bf16.msra.mxu0 %v2368_v7  ;;  %2347 = vmatpush3.bf16.msra.mxu1 %v2368_v7  ;;  %v2388_v24 = vld [vmem:[%s2578_s9 + $0x2c] ss:$20 sps:$4 sm:$0xff]   ;;  %v2398_v32 = vld [vmem:[%s2578_s9 + $0x54] ss:$20 sps:$4 sm:$0xff]   ;;  %v2402_v36 = vld [vmem:[%s2578_s9 + $0x50] ss:$20 sps:$4 sm:$0xff]  }
  0x14   : > { %2060 = vmatprep.subr.bf16.mxu0 %v2369_v8  ;;  %2340 = vmatprep.subr.bf16.mxu1 %v2369_v8  ;;  %v2390_v25 = vld [vmem:[%s2578_s9 + $0x20c] ss:$20 sps:$4 sm:$0xff]   ;;  %v2400_v33 = vld [vmem:[%s2578_s9 + $0x234] ss:$20 sps:$4 sm:$0xff]   ;;  %v2403_v38 = vld [vmem:[%s2578_s9 + $0x230] ss:$20 sps:$4 sm:$0xff]  }
  0x15   : > { %1146 = vmatprep.mubr.bf16.mxu1 %v2382_v12  ;;  %v2408_v41 = vld [vmem:[%s2578_s9 + $0x7c] ss:$20 sps:$4 sm:$0xff]   ;;  %v2412_v44 = vld [vmem:[%s2578_s9 + $0x78] ss:$20 sps:$4 sm:$0xff]   ;;  %v2424_v54 = vld [vmem:[%s2578_s9 + $0xa0] ss:$20 sps:$4 sm:$0xff]  }
  0x16   : > { %v2410_v42 = vld [vmem:[%s2578_s9 + $0x25c] ss:$20 sps:$4 sm:$0xff]   ;;  %v2413_v45 = vld [vmem:[%s2578_s9 + $0x258] ss:$20 sps:$4 sm:$0xff]   ;;  %v2427_v57 = vld [vmem:[%s2578_s9 + $0x34] ss:$20 sps:$4 sm:$0xff]  }
  0x17   : > { %2061 = vmatpush3.bf16.msra.mxu0 %v2370_v9  ;;  %2348 = vmatpush3.bf16.msra.mxu1 %v2370_v9  ;;  %v2419_v50 = vld [vmem:[%s2578_s9 + $0xa4] ss:$20 sps:$4 sm:$0xff]   ;;  %v2423_v51 = vld [vmem:[%s2578_s9 + $0xc] ss:$20 sps:$4 sm:$0xff]   ;;  %v2421_v53 = vld [vmem:[%s2578_s9 + $0x8] ss:$20 sps:$4 sm:$0xff]  }
  0x18   : > { %2062 = vmatprep.subr.bf16.mxu0 %v2371_v10  ;;  %2341 = vmatprep.subr.bf16.mxu1 %v2371_v10  ;;  %v2425_v55 = vld [vmem:[%s2578_s9 + $0xcc] ss:$20 sps:$4 sm:$0xff]   ;;  %v2456_v56 = vld [vmem:[%s2931_s1 + $0x118] sm:$0xff]   ;;  %v2430_v59 = vld [vmem:[%s2578_s9 + $0x30] ss:$20 sps:$4 sm:$0xff]  }
  0x19   : > { %v2429_v58 = vld [vmem:[%s2578_s9 + $0xc8] ss:$20 sps:$4 sm:$0xff]   ;;  %v2435_v62 = vld [vmem:[%s2578_s9 + $0xf0] ss:$20 sps:$4 sm:$0xff]   ;;  %v2436_v63 = vld [vmem:[%s2578_s9 + $0x58] ss:$20 sps:$4 sm:$0xff]  }
  0x1a   : > { %v2431_v60 = vld [vmem:[%s2578_s9 + $0xf4] ss:$20 sps:$4 sm:$0xff]   ;;  %v2433_v61 = vld [vmem:[%s2578_s9 + $0x5c] ss:$20 sps:$4 sm:$0xff]   ;;  %v2440_v1 = vld [vmem:[%s2578_s9 + $0x84] ss:$20 sps:$4 sm:$0xff]  }
  0x1b   : > { %2063 = vmatpush3.bf16.msra.mxu0 %v2372_v13  ;;  %2349 = vmatpush3.bf16.msra.mxu1 %v2372_v13  ;;  %v2438_v0 = vld [vmem:[%s2578_s9 + $0x11c] ss:$20 sps:$4 sm:$0xff]   ;;  %v2442_v2 = vld [vmem:[%s2578_s9 + $0x118] ss:$20 sps:$4 sm:$0xff]   ;;  %v2443_v3 = vld [vmem:[%s2578_s9 + $0x80] ss:$20 sps:$4 sm:$0xff]  }
  0x1c   : > { %2064 = vmatprep.subr.bf16.mxu0 %v2373_v14  ;;  %2342 = vmatprep.subr.bf16.mxu1 %v2373_v14  ;;  %v2444_v4 = vld [vmem:[%s2578_s9 + $0x144] ss:$20 sps:$4 sm:$0xff]   ;;  %v2446_v5 = vld [vmem:[%s2578_s9 + $0xac] ss:$20 sps:$4 sm:$0xff]   ;;  %v2449_v7 = vld [vmem:[%s2578_s9 + $0xa8] ss:$20 sps:$4 sm:$0xff]  }
  0x1d   : > { %v2448_v6 = vld [vmem:[%s2578_s9 + $0x140] ss:$20 sps:$4 sm:$0xff]   ;;  %v2454_v10 = vld [vmem:[%s2578_s9 + $0x168] ss:$20 sps:$4 sm:$0xff]   ;;  %v2455_v11 = vld [vmem:[%s2578_s9 + $0xd0] ss:$20 sps:$4 sm:$0xff]  }
  0x1e   : > { %v2450_v8 = vld [vmem:[%s2578_s9 + $0x16c] ss:$20 sps:$4 sm:$0xff]   ;;  %v2452_v9 = vld [vmem:[%s2578_s9 + $0xd4] ss:$20 sps:$4 sm:$0xff]   ;;  %v2459_v13 = vld [vmem:[%s2578_s9 + $0xfc] ss:$20 sps:$4 sm:$0xff]  }
  0x1f   : > { %2065 = vmatpush3.bf16.msra.mxu0 %v2374_v15  ;;  %2350 = vmatpush3.bf16.msra.mxu1 %v2374_v15  ;;  %v2457_v12 = vld [vmem:[%s2578_s9 + $0x194] ss:$20 sps:$4 sm:$0xff]   ;;  %v2461_v14 = vld [vmem:[%s2578_s9 + $0x190] ss:$20 sps:$4 sm:$0xff]   ;;  %v2462_v15 = vld [vmem:[%s2578_s9 + $0xf8] ss:$20 sps:$4 sm:$0xff]  }
  0x20   : > { %2066 = vmatprep.subr.bf16.mxu0 %v2375_v16  ;;  %2343 = vmatprep.subr.bf16.mxu1 %v2375_v16  ;;  %v2463_v16 = vld [vmem:[%s2578_s9 + $0x1bc] ss:$20 sps:$4 sm:$0xff]  }
  0x23   : > { %2067 = vmatpush3.bf16.msra.mxu0 %v2376_v17  ;;  %2351 = vmatpush3.bf16.msra.mxu1 %v2376_v17  ;;  %v2465_v17 = vld [vmem:[%s2578_s9 + $0x124] ss:$20 sps:$4 sm:$0xff]  }
  0x24   : > { %2164 = vmatprep.subr.bf16.mxu1 %v2383_v18  ;;  %2296 = vmatprep.subr.bf16.mxu0 %v2386_v19  ;;  %v2467_v18 = vld [vmem:[%s2578_s9 + $0x1b8] ss:$20 sps:$4 sm:$0xff]  }
  0x26   : > { %1051 = vmatmul.mubr.bf16.vlgmr.msra.gmra.mrb[0].mxu0 %v2377_v20  ;;  %1147 = vmatmul.mubr.bf16.vlgmr.msra.gmra.mrb[0].mxu1 %v2380_v21  ;;  %v2469_v20 = vld [vmem:[%s2578_s9 + $0x14c] ss:$20 sps:$4 sm:$0xff]   ;;  %v2471_v21 = vld [vmem:[%s2578_s9 + $0x10] ss:$20 sps:$4 sm:$0xff]  }
  0x27   : > { %2165 = vmatpush3.bf16.msra.mxu1 %v2384_v22  ;;  %2297 = vmatpush3.bf16.msra.mxu0 %v2386_v19  ;;  %v2468_v19 = vld [vmem:[%s2578_s9 + $0x120] ss:$20 sps:$4 sm:$0xff]   ;;  %v2472_v22 = vld [vmem:[%s2578_s9 + $0x148] ss:$20 sps:$4 sm:$0xff]  }
  0x28   : > { %2166 = vmatprep.subr.bf16.mxu1 %v2385_v23  ;;  %1058 = vmatprep.mubr.bf16.mxu0 %v2388_v24  ;;  %v2473_v23 = vld [vmem:[%s2578_s9 + $0x38] ss:$20 sps:$4 sm:$0xff]   ;;  %v2474_v24 = vld [vmem:[%s2578_s9 + $0x174] ss:$20 sps:$4 sm:$0xff]  }
  0x29   : > { %1154 = vmatprep.mubr.bf16.mxu1 %v2390_v25  ;;  %2298 = vmatprep.subr.bf16.mxu0 %v2417_v35  ;;  %v2476_v25 = vld [vmem:[%s2578_s9 + $0x60] ss:$20 sps:$4 sm:$0xff]  }
  0x2b   : > { %2167 = vmatpush3.bf16.msra.mxu1 %v2387_v26  ;;  %2299 = vmatpush3.bf16.msra.mxu0 %v2417_v35  ;;  %v2477_v26 = vld [vmem:[%s2578_s9 + $0x170] ss:$20 sps:$4 sm:$0xff]   ;;  %v2488_v35 = vld [vmem:[%s2578_s9 + $0x128] ss:$20 sps:$4 sm:$0xff]  }
  0x2c   : > { %2168 = vmatprep.subr.bf16.mxu1 %v2394_v28  ;;  %2300 = vmatprep.subr.bf16.mxu0 %v2437_v47  ;;  %v2479_v28 = vld [vmem:[%s2578_s9 + $0x19c] ss:$20 sps:$4 sm:$0xff]  }
  0x2e   : > { %1059 = vmatmul.mubr.bf16.gmra.mrb[4].mxu0 %v2392_v27  ;;  %1155 = vmatmul.mubr.bf16.gmra.mrb[4].mxu1 %v2393_v29  ;;  %v2478_v27 = vld [vmem:[%s2578_s9 + $0x88] ss:$20 sps:$4 sm:$0xff]   ;;  %v2481_v29 = vld [vmem:[%s2578_s9 + $0xb0] ss:$20 sps:$4 sm:$0xff]  }
  0x2f   : > { %2169 = vmatpush3.bf16.msra.mxu1 %v2395_v30  ;;  %1066 = vmatprep.mubr.bf16.mxu0 %v2398_v32  ;;  %v2482_v30 = vld [vmem:[%s2578_s9 + $0x198] ss:$20 sps:$4 sm:$0xff]  }
  0x30   : > { %2170 = vmatprep.subr.bf16.mxu1 %v2396_v31  ;;  %1162 = vmatprep.mubr.bf16.mxu1 %v2400_v33  ;;  %v2483_v31 = vld [vmem:[%s2578_s9 + $0xd8] ss:$20 sps:$4 sm:$0xff]   ;;  %v2486_v33 = vld [vmem:[%s2578_s9 + $0x100] ss:$20 sps:$4 sm:$0xff]  }
  0x31   : > { %2301 = vmatpush3.bf16.msra.mxu0 %v2437_v47  ;;  %v2484_v32 = vld [vmem:[%s2578_s9 + $0x1c4] ss:$20 sps:$4 sm:$0xff]  }
  0x32   : > { %2302 = vmatprep.subr.bf16.mxu0 %v2456_v56  ;;  %v2503_v47 = vld [vmem:[%s2578_s9 + $0x218] ss:$20 sps:$4 sm:$0xff]  }
  0x33   : > { %2171 = vmatpush3.bf16.msra.mxu1 %v2397_v34  ;;  %v2487_v34 = vld [vmem:[%s2578_s9 + $0x1c0] ss:$20 sps:$4 sm:$0xff]  }
  0x34   : > { %2172 = vmatprep.subr.bf16.mxu1 %v2404_v37  ;;  %v2491_v37 = vld [vmem:[%s2578_s9 + $0x150] ss:$20 sps:$4 sm:$0xff]  }
  0x35   : > { %2303 = vmatpush3.bf16.msra.mxu0 %v2456_v56 }
  0x36   : > { %1067 = vmatmul.mubr.bf16.gmra.mrb[8].mxu0 %v2402_v36  ;;  %1163 = vmatmul.mubr.bf16.gmra.mrb[8].mxu1 %v2403_v38  ;;  %v2489_v36 = vld [vmem:[%s2578_s9 + $0x1ec] ss:$20 sps:$4 sm:$0xff]   ;;  %v2492_v38 = vld [vmem:[%s2578_s9 + $0x1e8] ss:$20 sps:$4 sm:$0xff]  }
  0x37   : > { %2173 = vmatpush3.bf16.msra.mxu1 %v2405_v39  ;;  %1074 = vmatprep.mubr.bf16.mxu0 %v2408_v41  ;;  %v2493_v39 = vld [vmem:[%s2578_s9 + $0x178] ss:$20 sps:$4 sm:$0xff]   ;;  %v2496_v41 = vld [vmem:[%s2578_s9 + $0x1a0] ss:$20 sps:$4 sm:$0xff]  }
  0x38   : > { %2174 = vmatprep.subr.bf16.mxu1 %v2406_v40  ;;  %1170 = vmatprep.mubr.bf16.mxu1 %v2410_v42  ;;  %v2494_v40 = vld [vmem:[%s2578_s9 + $0x214] ss:$20 sps:$4 sm:$0xff]   ;;  %v2497_v42 = vld [vmem:[%s2578_s9 + $0x210] ss:$20 sps:$4 sm:$0xff]  }
  0x3b   : > { %2175 = vmatpush3.bf16.msra.mxu1 %v2407_v43  ;;  %v2498_v43 = vld [vmem:[%s2578_s9 + $0x1c8] ss:$20 sps:$4 sm:$0xff]  }
  0x3c   : > { %2176 = vmatprep.subr.bf16.mxu1 %v2414_v46  ;;  %v2502_v46 = vld [vmem:[%s2578_s9 + $0x238] ss:$20 sps:$4 sm:$0xff]  }
  0x3e   : > { %1075 = vmatmul.mubr.bf16.gmra.mrb[12].mxu0 %v2412_v44  ;;  %1171 = vmatmul.mubr.bf16.gmra.mrb[12].mxu1 %v2413_v45  ;;  %v2499_v44 = vld [vmem:[%s2578_s9 + $0x23c] ss:$20 sps:$4 sm:$0xff]  }
  0x3f   : > { %2177 = vmatpush3.bf16.msra.mxu1 %v2415_v48  ;;  %1082 = vmatprep.mubr.bf16.mxu0 %v2419_v50  ;;  %v2501_v45 = vld [vmem:[%s2578_s9 + $0x1f0] ss:$20 sps:$4 sm:$0xff]   ;;  %v2507_v50 = vld [vmem:[%s2578_s9 + $0x260] ss:$20 sps:$4 sm:$0xff]  }
  0x40   : > { %2178 = vmatprep.subr.bf16.mxu1 %v2416_v49  ;;  %1211 = vmatprep.mubr.bf16.mxu1 %v2423_v51  ;;  %v2504_v48 = vld [vmem:[%s2578_s9 + $0x264] ss:$20 sps:$4 sm:$0xff]   ;;  %v2506_v49 = vld [vmem:[%s2578_s9 + $0x240] ss:$20 sps:$4 sm:$0xff]   ;;  %v2508_v51 = vld [vmem:[%s2578_s9 + $0x268] ss:$20 sps:$4 sm:$0xff]  }
  0x43   : > { %2179 = vmatpush3.bf16.msra.mxu1 %v2418_v52 }
  0x46   : > { %1083 = vmatmul.mubr.bf16.gmra.mrb[16].mxu0 %v2424_v54  ;;  %1212 = vmatmul.mubr.bf16.vlgmr.msra.gmra.mrb[16].mxu1 %v2421_v53 }
  0x47   : > { %1090 = vmatprep.mubr.bf16.mxu0 %v2425_v55  ;;  %1219 = vmatprep.mubr.bf16.mxu1 %v2427_v57 }
  0x4e   : > { %1091 = vmatmul.mubr.bf16.gmra.mrb[20].mxu0 %v2429_v58  ;;  %1220 = vmatmul.mubr.bf16.gmra.mrb[20].mxu1 %v2430_v59 }
  0x4f   : > { %1098 = vmatprep.mubr.bf16.mxu0 %v2431_v60  ;;  %1227 = vmatprep.mubr.bf16.mxu1 %v2433_v61 }
  0x56   : > { %1099 = vmatmul.mubr.bf16.gmra.mrb[24].mxu0 %v2435_v62  ;;  %1228 = vmatmul.mubr.bf16.gmra.mrb[24].mxu1 %v2436_v63 }
  0x57   : > { %1106 = vmatprep.mubr.bf16.mxu0 %v2438_v0  ;;  %1235 = vmatprep.mubr.bf16.mxu1 %v2440_v1 }
  0x5e   : > { %1107 = vmatmul.mubr.bf16.gmra.mrb[28].mxu0 %v2442_v2  ;;  %1236 = vmatmul.mubr.bf16.gmra.mrb[28].mxu1 %v2443_v3 }
  0x5f   : > { %1114 = vmatprep.mubr.bf16.mxu0 %v2444_v4  ;;  %1243 = vmatprep.mubr.bf16.mxu1 %v2446_v5 }
  0x66   : > { %1115 = vmatmul.mubr.bf16.gmra.mrb[32].mxu0 %v2448_v6  ;;  %1244 = vmatmul.mubr.bf16.gmra.mrb[32].mxu1 %v2449_v7 }
  0x67   : > { %1122 = vmatprep.mubr.bf16.mxu0 %v2450_v8  ;;  %1251 = vmatprep.mubr.bf16.mxu1 %v2452_v9 }
  0x6e   : > { %1123 = vmatmul.mubr.bf16.gmra.mrb[36].mxu0 %v2454_v10  ;;  %1252 = vmatmul.mubr.bf16.gmra.mrb[36].mxu1 %v2455_v11 }
  0x6f   : > { %1130 = vmatprep.mubr.bf16.mxu0 %v2457_v12  ;;  %1259 = vmatprep.mubr.bf16.mxu1 %v2459_v13 }
  0x76   : > { %1131 = vmatmul.mubr.bf16.gmra.mrb[40].mxu0 %v2461_v14  ;;  %1260 = vmatmul.mubr.bf16.gmra.mrb[40].mxu1 %v2462_v15 }
  0x77   : > { %1138 = vmatprep.mubr.bf16.mxu0 %v2463_v16  ;;  %1267 = vmatprep.mubr.bf16.mxu1 %v2465_v17 }
  0x7e   : > { %1139 = vmatmul.mubr.bf16.gmra.mrb[44].mxu0 %v2467_v18  ;;  %1268 = vmatmul.mubr.bf16.gmra.mrb[44].mxu1 %v2468_v19 }
  0x7f   : > { %1275 = vmatprep.mubr.bf16.mxu1 %v2469_v20  ;;  %2304 = vmatprep.mubr.msk.bf16.mxu0 %vm969_vm0, %v2471_v21 }
  0x86   : > { %1276 = vmatmul.mubr.bf16.gmra.mrb[48].mxu1 %v2472_v22  ;;  %2305 = vmatmul.mubr.msk.bf16.vlgmr.msra.gmra.mrb[48].mxu0 %vm969_vm0, %v2473_v23 }
  0x87   : > { %1283 = vmatprep.mubr.bf16.mxu1 %v2474_v24  ;;  %2308 = vmatprep.mubr.msk.bf16.mxu0 %vm969_vm0, %v2476_v25 }
  0x8e   : > { %1284 = vmatmul.mubr.bf16.gmra.mrb[52].mxu1 %v2477_v26  ;;  %2309 = vmatmul.mubr.msk.bf16.gmra.mrb[52].mxu0 %vm969_vm0, %v2478_v27 }
  0x8f   : > { %1291 = vmatprep.mubr.bf16.mxu1 %v2479_v28  ;;  %2312 = vmatprep.mubr.msk.bf16.mxu0 %vm969_vm0, %v2481_v29 }
  0x96   : > { %1292 = vmatmul.mubr.bf16.gmra.mrb[56].mxu1 %v2482_v30  ;;  %2313 = vmatmul.mubr.msk.bf16.gmra.mrb[56].mxu0 %vm969_vm0, %v2483_v31 }
  0x97   : > { %1299 = vmatprep.mubr.bf16.mxu1 %v2484_v32  ;;  %2316 = vmatprep.mubr.msk.bf16.mxu0 %vm969_vm0, %v2486_v33 }
  0x9e   : > { %1300 = vmatmul.mubr.bf16.gmra.mrb[60].mxu1 %v2487_v34  ;;  %2317 = vmatmul.mubr.msk.bf16.gmra.mrb[60].mxu0 %vm969_vm0, %v2488_v35 }
  0x9f   : > { %1307 = vmatprep.mubr.bf16.mxu1 %v2489_v36  ;;  %2320 = vmatprep.mubr.msk.bf16.mxu0 %vm969_vm0, %v2491_v37 }
  0xa6   : > { %1308 = vmatmul.mubr.bf16.gmra.mrb[64].mxu1 %v2492_v38  ;;  %2321 = vmatmul.mubr.msk.bf16.gmra.mrb[64].mxu0 %vm969_vm0, %v2493_v39  ;;  %v2776_v38 = vld [vmem:[%s2932_s2] ss:$0 sm:$0xff] }
  0xa7   : > { %1315 = vmatprep.mubr.bf16.mxu1 %v2494_v40  ;;  %2324 = vmatprep.mubr.msk.bf16.mxu0 %vm969_vm0, %v2496_v41 }
  0xae   : > { %1316 = vmatmul.mubr.bf16.gmra.mrb[68].mxu1 %v2497_v42  ;;  %2325 = vmatmul.mubr.msk.bf16.gmra.mrb[68].mxu0 %vm969_vm0, %v2498_v43 }
  0xaf   : > { %1323 = vmatprep.mubr.bf16.mxu1 %v2499_v44  ;;  %2328 = vmatprep.mubr.msk.bf16.mxu0 %vm969_vm0, %v2501_v45 }
  0xb6   : > { %1324 = vmatmul.mubr.bf16.gmra.mrb[72].mxu1 %v2502_v46  ;;  %2329 = vmatmul.mubr.msk.bf16.gmra.mrb[72].mxu0 %vm969_vm0, %v2503_v47 }
  0xb7   : > { %1331 = vmatprep.mubr.bf16.mxu1 %v2504_v48  ;;  %2332 = vmatprep.mubr.msk.bf16.mxu0 %vm969_vm0, %v2506_v49 }
  0xbe   : > { %1332 = vmatmul.mubr.bf16.gmra.mrb[76].mxu1 %v2507_v50  ;;  %2333 = vmatmul.mubr.msk.bf16.gmra.mrb[76].mxu0 %vm969_vm0, %v2508_v51 }
  0xf9   : > { %v2140_v52 = vpop.f32.mrb[0].mxu1  ;;  %v2068_v53 = vpop.f32.mrb[0].mxu0 }
  0xfa   : > { %v2141_v54 = vpop.f32.mrb[1].mxu1  ;;  %v2069_v55 = vpop.f32.mrb[1].mxu0 }
  0xfb   : > { %v2757_v56 = vadd.f32 %v2141_v54, %v2140_v52  ;;  %v2143_v57 = vpop.f32.mrb[2].mxu1  ;;  %v2070_v58 = vadd.f32 %v2069_v55, %v2068_v53  ;;  %v2071_v59 = vpop.f32.mrb[2].mxu0 }
  0xfc   : > { %v2144_v60 = vpop.f32.mrb[3].mxu1  ;;  %v2072_v61 = vpop.f32.mrb[3].mxu0 }
  0xfd   : > { %v2759_v62 = vadd.f32 %v2144_v60, %v2143_v57  ;;  %v2073_v63 = vadd.f32 %v2072_v61, %v2071_v59  ;;  %v1053_v41 = vadd.f32 %v2070_v58, %v2776_v38 }
  0xff   : > { %v1056_v48 = vadd.f32 %v2073_v63, %v2776_v38 }
 0x101   : > { %v2146_v0 = vpop.f32.mrb[4].mxu1  ;;  %v2074_v1 = vpop.f32.mrb[4].mxu0 }
 0x102   : > { %v2147_v2 = vpop.f32.mrb[5].mxu1  ;;  %v2075_v3 = vpop.f32.mrb[5].mxu0 }
 0x103   : > { %v2761_v4 = vadd.f32 %v2147_v2, %v2146_v0  ;;  %v2149_v5 = vpop.f32.mrb[6].mxu1  ;;  %v2076_v6 = vadd.f32 %v2075_v3, %v2074_v1  ;;  %v2077_v7 = vpop.f32.mrb[6].mxu0 }
 0x104   : > { %v2150_v8 = vpop.f32.mrb[7].mxu1  ;;  %v2078_v9 = vpop.f32.mrb[7].mxu0 }
 0x105   : > { %v2763_v10 = vadd.f32 %v2150_v8, %v2149_v5  ;;  %v2079_v11 = vadd.f32 %v2078_v9, %v2077_v7  ;;  %v1061_v58 = vadd.f32 %v2076_v6, %v2776_v38 }
 0x107   : > { %v1064_v63 = vadd.f32 %v2079_v11, %v2776_v38 }
 0x109   : > { %v2152_v12 = vpop.f32.mrb[8].mxu1  ;;  %v2080_v13 = vpop.f32.mrb[8].mxu0 }
 0x10a   : > { %v2153_v14 = vpop.f32.mrb[9].mxu1  ;;  %v2081_v15 = vpop.f32.mrb[9].mxu0 }
 0x10b   : > { %v2765_v16 = vadd.f32 %v2153_v14, %v2152_v12  ;;  %v2155_v17 = vpop.f32.mrb[10].mxu1  ;;  %v2082_v18 = vadd.f32 %v2081_v15, %v2080_v13  ;;  %v2083_v19 = vpop.f32.mrb[10].mxu0 }
 0x10c   : > { %v2156_v20 = vpop.f32.mrb[11].mxu1  ;;  %v2084_v21 = vpop.f32.mrb[11].mxu0 }
 0x10d   : > { %v2767_v22 = vadd.f32 %v2156_v20, %v2155_v17  ;;  %v2085_v23 = vadd.f32 %v2084_v21, %v2083_v19  ;;  %v1069_v6 = vadd.f32 %v2082_v18, %v2776_v38 }
 0x10f   : > { %v1072_v11 = vadd.f32 %v2085_v23, %v2776_v38 }
 0x111   : > { %v2158_v24 = vpop.f32.mrb[12].mxu1  ;;  %v2086_v25 = vpop.f32.mrb[12].mxu0 }
 0x112   : > { %v2159_v26 = vpop.f32.mrb[13].mxu1  ;;  %v2087_v27 = vpop.f32.mrb[13].mxu0 }
 0x113   : > { %v2769_v28 = vadd.f32 %v2159_v26, %v2158_v24  ;;  %v2161_v29 = vpop.f32.mrb[14].mxu1  ;;  %v2088_v30 = vadd.f32 %v2087_v27, %v2086_v25  ;;  %v2089_v31 = vpop.f32.mrb[14].mxu0 }
 0x114   : > { %v2162_v32 = vpop.f32.mrb[15].mxu1  ;;  %v2090_v33 = vpop.f32.mrb[15].mxu0 }
 0x115   : > { %v2771_v34 = vadd.f32 %v2162_v32, %v2161_v29  ;;  %v2091_v35 = vadd.f32 %v2090_v33, %v2089_v31  ;;  %v1077_v18 = vadd.f32 %v2088_v30, %v2776_v38 }
 0x117   : > { %v1080_v23 = vadd.f32 %v2091_v35, %v2776_v38 }
 0x119   : > { %v2180_v36 = vpop.f32.mrb[16].mxu1  ;;  %v2092_v37 = vpop.f32.mrb[16].mxu0 }
 0x11a   : > { %v2181_v39 = vpop.f32.mrb[17].mxu1  ;;  %v2093_v40 = vpop.f32.mrb[17].mxu0 }
 0x11b   : > { %v2182_v42 = vadd.f32 %v2181_v39, %v2180_v36  ;;  %v2183_v43 = vpop.f32.mrb[18].mxu1  ;;  %v2094_v44 = vadd.f32 %v2093_v40, %v2092_v37  ;;  %v2095_v45 = vpop.f32.mrb[18].mxu0 }
 0x11c   : > { %v2184_v46 = vpop.f32.mrb[19].mxu1  ;;  %v2096_v47 = vpop.f32.mrb[19].mxu0 }
 0x11d   : > { %v2185_v49 = vadd.f32 %v2184_v46, %v2183_v43  ;;  %v2097_v50 = vadd.f32 %v2096_v47, %v2095_v45  ;;  %v2780_v51 = vadd.f32 %v2182_v42, %v1053_v41  ;;  %v1085_v30 = vadd.f32 %v2094_v44, %v2776_v38 }
 0x11f   : > { %v2782_v52 = vadd.f32 %v2185_v49, %v1056_v48  ;;  %v1088_v35 = vadd.f32 %v2097_v50, %v2776_v38 }
 0x121   : > { %v2186_v53 = vpop.f32.mrb[20].mxu1  ;;  %v2098_v54 = vpop.f32.mrb[20].mxu0 }
 0x122   : > { %v2187_v55 = vpop.f32.mrb[21].mxu1  ;;  %v2099_v57 = vpop.f32.mrb[21].mxu0 }
 0x123   : > { %v2188_v59 = vadd.f32 %v2187_v55, %v2186_v53  ;;  %v2189_v60 = vpop.f32.mrb[22].mxu1  ;;  %v2100_v61 = vadd.f32 %v2099_v57, %v2098_v54  ;;  %v2101_v0 = vpop.f32.mrb[22].mxu0 }
 0x124   : > { %v2190_v1 = vpop.f32.mrb[23].mxu1  ;;  %v2102_v2 = vpop.f32.mrb[23].mxu0 }
 0x125   : > { %v2191_v3 = vadd.f32 %v2190_v1, %v2189_v60  ;;  %v2103_v5 = vadd.f32 %v2102_v2, %v2101_v0  ;;  %v2786_v7 = vadd.f32 %v2188_v59, %v1061_v58  ;;  %v1093_v44 = vadd.f32 %v2100_v61, %v2776_v38 }
 0x127   : > { %v2788_v8 = vadd.f32 %v2191_v3, %v1064_v63 }
 0x129   : > { %v2192_v9 = vpop.f32.mrb[24].mxu1  ;;  %v2104_v12 = vpop.f32.mrb[24].mxu0 }
 0x12a   : > { %v2193_v13 = vpop.f32.mrb[25].mxu1  ;;  %v2105_v14 = vpop.f32.mrb[25].mxu0 }
 0x12b   : > { %v2194_v15 = vadd.f32 %v2193_v13, %v2192_v9  ;;  %v2195_v17 = vpop.f32.mrb[26].mxu1  ;;  %v2106_v19 = vadd.f32 %v2105_v14, %v2104_v12  ;;  %v2107_v20 = vpop.f32.mrb[26].mxu0 }
 0x12c   : > { %v2196_v21 = vpop.f32.mrb[27].mxu1  ;;  %v2108_v24 = vpop.f32.mrb[27].mxu0 }
 0x12d   : > { %v2197_v25 = vadd.f32 %v2196_v21, %v2195_v17  ;;  %v2109_v26 = vadd.f32 %v2108_v24, %v2107_v20  ;;  %v2792_v27 = vadd.f32 %v2194_v15, %v1069_v6 }
 0x12f   : > { %v2794_v29 = vadd.f32 %v2197_v25, %v1072_v11  ;;  %v1096_v11 = vadd.f32 %v2103_v5, %v2776_v38 }
 0x131   : > { %v2198_v31 = vpop.f32.mrb[28].mxu1  ;;  %v2110_v32 = vpop.f32.mrb[28].mxu0 }
 0x132   : > { %v2199_v33 = vpop.f32.mrb[29].mxu1  ;;  %v2111_v36 = vpop.f32.mrb[29].mxu0 }
 0x133   : > { %v2200_v37 = vadd.f32 %v2199_v33, %v2198_v31  ;;  %v2201_v39 = vpop.f32.mrb[30].mxu1  ;;  %v2112_v40 = vadd.f32 %v2111_v36, %v2110_v32  ;;  %v2113_v41 = vpop.f32.mrb[30].mxu0 }
 0x134   : > { %v2202_v42 = vpop.f32.mrb[31].mxu1  ;;  %v2114_v43 = vpop.f32.mrb[31].mxu0 }
 0x135   : > { %v2203_v45 = vadd.f32 %v2202_v42, %v2201_v39  ;;  %v2115_v46 = vadd.f32 %v2114_v43, %v2113_v41  ;;  %v2798_v47 = vadd.f32 %v2200_v37, %v1077_v18  ;;  %v1101_v39 = vadd.f32 %v2106_v19, %v2776_v38 }
 0x137   : > { %v2800_v48 = vadd.f32 %v2203_v45, %v1080_v23 }
 0x139   : > { %v2204_v49 = vpop.f32.mrb[32].mxu1  ;;  %v2116_v53 = vpop.f32.mrb[32].mxu0 }
 0x13a   : > { %v2205_v54 = vpop.f32.mrb[33].mxu1  ;;  %v2117_v55 = vpop.f32.mrb[33].mxu0 }
 0x13b   : > { %v2206_v57 = vadd.f32 %v2205_v54, %v2204_v49  ;;  %v2207_v58 = vpop.f32.mrb[34].mxu1  ;;  %v2118_v59 = vadd.f32 %v2117_v55, %v2116_v53  ;;  %v2119_v60 = vpop.f32.mrb[34].mxu0  ;;  %v1104_v49 = vadd.f32 %v2109_v26, %v2776_v38 }
 0x13c   : > { %v2208_v0 = vpop.f32.mrb[35].mxu1  ;;  %v2120_v1 = vpop.f32.mrb[35].mxu0 }
 0x13d   : > { %v2209_v2 = vadd.f32 %v2208_v0, %v2207_v58  ;;  %v2804_v63 = vadd.f32 %v2120_v1, %v2119_v60  ;;  %v2806_v3 = vadd.f32 %v2206_v57, %v1085_v30  ;;  %v1109_v0 = vadd.f32 %v2112_v40, %v2776_v38 }
 0x13f   : > { %v2808_v9 = vadd.f32 %v2209_v2, %v1088_v35 }
 0x141   : > { %v2210_v12 = vpop.f32.mrb[36].mxu1  ;;  %v2122_v13 = vpop.f32.mrb[36].mxu0 }
 0x142   : > { %v2211_v14 = vpop.f32.mrb[37].mxu1  ;;  %v2123_v6 = vpop.f32.mrb[37].mxu0 }
 0x143   : > { %v2212_v15 = vadd.f32 %v2211_v14, %v2210_v12  ;;  %v2213_v17 = vpop.f32.mrb[38].mxu1  ;;  %v2811_v20 = vadd.f32 %v2123_v6, %v2122_v13  ;;  %v2125_v21 = vpop.f32.mrb[38].mxu0  ;;  %v1112_v14 = vadd.f32 %v2115_v46, %v2776_v38 }
 0x144   : > { %v2214_v24 = vpop.f32.mrb[39].mxu1  ;;  %v2126_v50 = vpop.f32.mrb[39].mxu0 }
 0x145   : > { %v2215_v25 = vadd.f32 %v2214_v24, %v2213_v17  ;;  %v2814_v31 = vadd.f32 %v2126_v50, %v2125_v21  ;;  %v2816_v32 = vadd.f32 %v2212_v15, %v1093_v44 }
 0x147   : > { %v2818_v33 = vadd.f32 %v2215_v25, %v1096_v11  ;;  %v1117_v25 = vadd.f32 %v2118_v59, %v2776_v38 }
 0x149   : > { %v2216_v36 = vpop.f32.mrb[40].mxu1  ;;  %v2128_v18 = vpop.f32.mrb[40].mxu0 }
 0x14a   : > { %v2217_v37 = vpop.f32.mrb[41].mxu1  ;;  %v2129_v61 = vpop.f32.mrb[41].mxu0 }
 0x14b   : > { %v2218_v41 = vadd.f32 %v2217_v37, %v2216_v36  ;;  %v2219_v42 = vpop.f32.mrb[42].mxu1  ;;  %v2821_v43 = vadd.f32 %v2129_v61, %v2128_v18  ;;  %v2131_v23 = vpop.f32.mrb[42].mxu0 }
 0x14c   : > { %v2220_v45 = vpop.f32.mrb[43].mxu1  ;;  %v2132_v5 = vpop.f32.mrb[43].mxu0 }
 0x14d   : > { %v2221_v53 = vadd.f32 %v2220_v45, %v2219_v42  ;;  %v2824_v54 = vadd.f32 %v2132_v5, %v2131_v23  ;;  %v2826_v55 = vadd.f32 %v2218_v41, %v1101_v39  ;;  %v1120_v42 = vadd.f32 %v2804_v63, %v2776_v38 }
 0x14f   : > { %v2828_v30 = vadd.f32 %v2221_v53, %v1104_v49 }
 0x151   : > { %v2222_v57 = vpop.f32.mrb[44].mxu1  ;;  %v2134_v58 = vpop.f32.mrb[44].mxu0 }
 0x152   : > { %v2223_v60 = vpop.f32.mrb[45].mxu1  ;;  %v2135_v19 = vpop.f32.mrb[45].mxu0 }
 0x153   : > { %v2224_v1 = vadd.f32 %v2223_v60, %v2222_v57  ;;  %v2225_v35 = vpop.f32.mrb[46].mxu1  ;;  %v2831_v2 = vadd.f32 %v2135_v19, %v2134_v58  ;;  %v2137_v12 = vpop.f32.mrb[46].mxu0 }
 0x154   : > { %v2226_v13 = vpop.f32.mrb[47].mxu1  ;;  %v2138_v26 = vpop.f32.mrb[47].mxu0 }
 0x155   : > { %v2227_v6 = vadd.f32 %v2226_v13, %v2225_v35  ;;  %v2834_v44 = vadd.f32 %v2138_v26, %v2137_v12  ;;  %v2836_v15 = vadd.f32 %v2224_v1, %v1109_v0  ;;  %v1125_v0 = vadd.f32 %v2811_v20, %v2776_v38 }
 0x157   : > { %v2838_v17 = vadd.f32 %v2227_v6, %v1112_v14 }
 0x159   : > { %v2228_v21 = vpop.f32.mrb[48].mxu1  ;;  %v2306_v24 = vpop.f32.mrb[48].mxu0 }
 0x15a   : > { %v1383_v40 = vadd.f32 %v2306_v24, %v2786_v7  ;;  %v2229_v50 = vpop.f32.mrb[49].mxu1  ;;  %v1374_v11 = vpop.f32.mrb[49].mxu0 }
 0x15b   : > { %v2230_v36 = vadd.f32 %v2229_v50, %v2228_v21  ;;  %v1375_v18 = vadd.f32 %v1374_v11, %v2780_v51  ;;  %v2231_v37 = vpop.f32.mrb[50].mxu1  ;;  %v2307_v46 = vpop.f32.mrb[50].mxu0  ;;  %v1128_v21 = vadd.f32 %v2814_v31, %v2776_v38 }
 0x15c   : > { %v1386_v61 = vadd.f32 %v2307_v46, %v2788_v8  ;;  %v2232_v39 = vpop.f32.mrb[51].mxu1  ;;  %v1377_v41 = vpop.f32.mrb[51].mxu0  ;;  %v1503_v5 = vmax.f32 %v1383_v40, 0.0 }
 0x15d   : > { %v2233_v23 = vadd.f32 %v2232_v39, %v2231_v37  ;;  %v1378_v7 = vadd.f32 %v1377_v41, %v2782_v52  ;;  %v2848_v45 = vadd.f32 %v2230_v36, %v1117_v25  ;;  %v1501_v49 = vmax.f32 %v1375_v18, 0.0 }
 0x15e   : > { %v1504_v59 = vmax.f32 %v1386_v61, 0.0 }
 0x15f   : > { %v1502_v51 = vmax.f32 %v1378_v7, 0.0  ;;  %v2855_v8 = vadd.f32 %v2233_v23, %v1120_v42 }
 0x160   : > { %v1965_v53 = vpack.c.bf16 %v1504_v59, %v1503_v5 }
 0x161   : > { %v1960_v63 = vpack.c.bf16 %v1502_v51, %v1501_v49  ;;  %v2234_v57 = vpop.f32.mrb[52].mxu1  ;;  %v2310_v58 = vpop.f32.mrb[52].mxu0  ;;  %v1136_v49 = vadd.f32 %v2824_v54, %v2776_v38 }
 0x162   : > { %2037 = vst [vmem:[%s2853_s22 + $0x8] sm:$0xff] %v1965_v53   ;;  %v1399_v52 = vadd.f32 %v2310_v58, %v2798_v47  ;;  %v2235_v60 = vpop.f32.mrb[53].mxu1  ;;  %v1390_v19 = vpop.f32.mrb[53].mxu0 }
 0x163   : > { %1961 = vst [vmem:[%s2853_s22] sm:$0xff] %v1960_v63   ;;  %v2236_v1 = vadd.f32 %v2235_v60, %v2234_v57  ;;  %v1391_v35 = vadd.f32 %v1390_v19, %v2792_v27  ;;  %v2237_v12 = vpop.f32.mrb[54].mxu1  ;;  %v2311_v13 = vpop.f32.mrb[54].mxu0 }
 0x164   : > { %v1402_v26 = vadd.f32 %v2311_v13, %v2800_v48  ;;  %v2238_v14 = vpop.f32.mrb[55].mxu1  ;;  %v1393_v6 = vpop.f32.mrb[55].mxu0  ;;  %v1507_v20 = vmax.f32 %v1399_v52, 0.0 }
 0x165   : > { %v2239_v47 = vadd.f32 %v2238_v14, %v2237_v12  ;;  %v1394_v24 = vadd.f32 %v1393_v6, %v2794_v29  ;;  %v2867_v40 = vadd.f32 %v2236_v1, %v1125_v0  ;;  %v1505_v11 = vmax.f32 %v1391_v35, 0.0 }
 0x166   : > { %v1508_v50 = vmax.f32 %v1402_v26, 0.0  ;;  %v1133_v29 = vadd.f32 %v2821_v43, %v2776_v38 }
 0x167   : > { %v1506_v27 = vmax.f32 %v1394_v24, 0.0  ;;  %v2869_v25 = vadd.f32 %v2239_v47, %v1128_v21  ;;  %v1144_v47 = vadd.f32 %v2834_v44, %v2776_v38  ;;  %v1149_v44 = vadd.f32 %v2757_v56, %v2776_v38 }
 0x168   : > { %v1975_v36 = vpack.c.bf16 %v1508_v50, %v1507_v20 }
 0x169   : > { %v1970_v48 = vpack.c.bf16 %v1506_v27, %v1505_v11  ;;  %v2240_v18 = vpop.f32.mrb[56].mxu1  ;;  %v2314_v37 = vpop.f32.mrb[56].mxu0 }
 0x16a   : > { %2039 = vst [vmem:[%s2853_s22 + $0x18] sm:$0xff] %v1975_v36   ;;  %v1415_v46 = vadd.f32 %v2314_v37, %v2816_v32  ;;  %v2241_v31 = vpop.f32.mrb[57].mxu1  ;;  %v1406_v61 = vpop.f32.mrb[57].mxu0 }
 0x16b   : > { %2038 = vst [vmem:[%s2853_s22 + $0x10] sm:$0xff] %v1970_v48   ;;  %v2242_v39 = vadd.f32 %v2241_v31, %v2240_v18  ;;  %v1407_v41 = vadd.f32 %v1406_v61, %v2806_v3  ;;  %v2243_v42 = vpop.f32.mrb[58].mxu1  ;;  %v2315_v23 = vpop.f32.mrb[58].mxu0 }
 0x16c   : > { %v1418_v7 = vadd.f32 %v2315_v23, %v2818_v33  ;;  %v2244_v5 = vpop.f32.mrb[59].mxu1  ;;  %v1409_v59 = vpop.f32.mrb[59].mxu0  ;;  %v1511_v43 = vmax.f32 %v1415_v46, 0.0 }
 0x16d   : > { %v2245_v32 = vadd.f32 %v2244_v5, %v2243_v42  ;;  %v1410_v51 = vadd.f32 %v1409_v59, %v2808_v9  ;;  %v2881_v53 = vadd.f32 %v2242_v39, %v1133_v29  ;;  %v1509_v57 = vmax.f32 %v1407_v41, 0.0 }
 0x16e   : > { %v1512_v63 = vmax.f32 %v1418_v7, 0.0  ;;  %v1141_v9 = vadd.f32 %v2831_v2, %v2776_v38  ;;  %v1152_v7 = vadd.f32 %v2759_v62, %v2776_v38  ;;  %v1157_v62 = vadd.f32 %v2761_v4, %v2776_v38 }
 0x16f   : > { %v1510_v3 = vmax.f32 %v1410_v51, 0.0  ;;  %v2883_v58 = vadd.f32 %v2245_v32, %v1136_v49 }
 0x170   : > { %v1985_v52 = vpack.c.bf16 %v1512_v63, %v1511_v43 }
 0x171   : > { %v1980_v33 = vpack.c.bf16 %v1510_v3, %v1509_v57  ;;  %v2246_v60 = vpop.f32.mrb[60].mxu1  ;;  %v2318_v19 = vpop.f32.mrb[60].mxu0 }
 0x172   : > { %2041 = vst [vmem:[%s2853_s22 + $0x28] sm:$0xff] %v1985_v52   ;;  %v1431_v0 = vadd.f32 %v2318_v19, %v2836_v15  ;;  %v2247_v54 = vpop.f32.mrb[61].mxu1  ;;  %v1422_v1 = vpop.f32.mrb[61].mxu0 }
 0x173   : > { %2040 = vst [vmem:[%s2853_s22 + $0x20] sm:$0xff] %v1980_v33   ;;  %v2248_v35 = vadd.f32 %v2247_v54, %v2246_v60  ;;  %v1423_v12 = vadd.f32 %v1422_v1, %v2826_v55  ;;  %v2249_v13 = vpop.f32.mrb[62].mxu1  ;;  %v2319_v26 = vpop.f32.mrb[62].mxu0 }
 0x174   : > { %v1434_v14 = vadd.f32 %v2319_v26, %v2838_v17  ;;  %v2250_v6 = vpop.f32.mrb[63].mxu1  ;;  %v1425_v21 = vpop.f32.mrb[63].mxu0  ;;  %v1515_v2 = vmax.f32 %v1431_v0, 0.0 }
 0x175   : > { %v2251_v15 = vadd.f32 %v2250_v6, %v2249_v13  ;;  %v1426_v24 = vadd.f32 %v1425_v21, %v2828_v30  ;;  %v1302_v20 = vadd.f32 %v2248_v35, %v1141_v9  ;;  %v1513_v11 = vmax.f32 %v1423_v12, 0.0 }
 0x176   : > { %v1516_v50 = vmax.f32 %v1434_v14, 0.0  ;;  %v1160_v35 = vadd.f32 %v2763_v10, %v2776_v38  ;;  %v1165_v10 = vadd.f32 %v2765_v16, %v2776_v38 }
 0x177   : > { %v1514_v27 = vmax.f32 %v1426_v24, 0.0  ;;  %v1305_v55 = vadd.f32 %v2251_v15, %v1144_v47 }
 0x178   : > { %v1995_v36 = vpack.c.bf16 %v1516_v50, %v1515_v2 }
 0x179   : > { %v1990_v48 = vpack.c.bf16 %v1514_v27, %v1513_v11  ;;  %v2252_v18 = vpop.f32.mrb[64].mxu1  ;;  %v2322_v17 = vpop.f32.mrb[64].mxu0 }
 0x17a   : > { %2043 = vst [vmem:[%s2853_s22 + $0x38] sm:$0xff] %v1995_v36   ;;  %v1447_v37 = vadd.f32 %v2322_v17, %v2867_v40  ;;  %v2253_v46 = vpop.f32.mrb[65].mxu1  ;;  %v1438_v31 = vpop.f32.mrb[65].mxu0 }
 0x17b   : > { %2042 = vst [vmem:[%s2853_s22 + $0x30] sm:$0xff] %v1990_v48   ;;  %v2254_v30 = vadd.f32 %v2253_v46, %v2252_v18  ;;  %v1439_v61 = vadd.f32 %v1438_v31, %v2848_v45  ;;  %v2255_v29 = vpop.f32.mrb[66].mxu1  ;;  %v2323_v39 = vpop.f32.mrb[66].mxu0 }
 0x17c   : > { %v1450_v41 = vadd.f32 %v2323_v39, %v2869_v25  ;;  %v2256_v42 = vpop.f32.mrb[67].mxu1  ;;  %v1441_v23 = vpop.f32.mrb[67].mxu0  ;;  %v1519_v56 = vmax.f32 %v1447_v37, 0.0  ;;  %v1168_v37 = vadd.f32 %v2767_v22, %v2776_v38 }
 0x17d   : > { %v2257_v40 = vadd.f32 %v2256_v42, %v2255_v29  ;;  %v1442_v5 = vadd.f32 %v1441_v23, %v2855_v8  ;;  %v1310_v59 = vadd.f32 %v2254_v30, %v1149_v44  ;;  %v1517_v32 = vmax.f32 %v1439_v61, 0.0 }
 0x17e   : > { %v1520_v49 = vmax.f32 %v1450_v41, 0.0 }
 0x17f   : > { %v1518_v51 = vmax.f32 %v1442_v5, 0.0  ;;  %v1313_v45 = vadd.f32 %v2257_v40, %v1152_v7 }
 0x180   : > { %v2005_v43 = vpack.c.bf16 %v1520_v49, %v1519_v56 }
 0x181   : > { %v2000_v63 = vpack.c.bf16 %v1518_v51, %v1517_v32  ;;  %v2258_v57 = vpop.f32.mrb[68].mxu1  ;;  %v2326_v25 = vpop.f32.mrb[68].mxu0 }
 0x182   : > { %2045 = vst [vmem:[%s2853_s22 + $0x48] sm:$0xff] %v2005_v43   ;;  %v1463_v3 = vadd.f32 %v2326_v25, %v1302_v20  ;;  %v2259_v52 = vpop.f32.mrb[69].mxu1  ;;  %v1454_v33 = vpop.f32.mrb[69].mxu0  ;;  %v1176_v43 = vadd.f32 %v2771_v34, %v2776_v38 }
 0x183   : > { %2044 = vst [vmem:[%s2853_s22 + $0x40] sm:$0xff] %v2000_v63   ;;  %v2260_v8 = vadd.f32 %v2259_v52, %v2258_v57  ;;  %v1455_v60 = vadd.f32 %v1454_v33, %v2881_v53  ;;  %v2261_v19 = vpop.f32.mrb[70].mxu1  ;;  %v2327_v0 = vpop.f32.mrb[70].mxu0 }
 0x184   : > { %v1466_v54 = vadd.f32 %v2327_v0, %v1305_v55  ;;  %v2262_v1 = vpop.f32.mrb[71].mxu1  ;;  %v1457_v9 = vpop.f32.mrb[71].mxu0  ;;  %v1523_v14 = vmax.f32 %v1463_v3, 0.0 }
 0x185   : > { %v2263_v12 = vadd.f32 %v2262_v1, %v2261_v19  ;;  %v1458_v13 = vadd.f32 %v1457_v9, %v2883_v58  ;;  %v1318_v26 = vadd.f32 %v2260_v8, %v1157_v62  ;;  %v1521_v6 = vmax.f32 %v1455_v60, 0.0 }
 0x186   : > { %v1524_v4 = vmax.f32 %v1466_v54, 0.0 }
 0x187   : > { %v1522_v21 = vmax.f32 %v1458_v13, 0.0  ;;  %v1321_v47 = vadd.f32 %v2263_v12, %v1160_v35 }
 0x188   : > { %v2015_v53 = vpack.c.bf16 %v1524_v4, %v1523_v14 }
 0x189   : > { %v2010_v15 = vpack.c.bf16 %v1522_v21, %v1521_v6  ;;  %v2264_v24 = vpop.f32.mrb[72].mxu1  ;;  %v2330_v20 = vpop.f32.mrb[72].mxu0 }
 0x18a   : > { %2047 = vst [vmem:[%s2853_s22 + $0x58] sm:$0xff] %v2015_v53   ;;  %v1479_v2 = vadd.f32 %v2330_v20, %v1318_v26  ;;  %v2265_v50 = vpop.f32.mrb[73].mxu1  ;;  %v1470_v11 = vpop.f32.mrb[73].mxu0 }
 0x18b   : > { %2046 = vst [vmem:[%s2853_s22 + $0x50] sm:$0xff] %v2010_v15   ;;  %v2266_v58 = vadd.f32 %v2265_v50, %v2264_v24  ;;  %v1471_v27 = vadd.f32 %v1470_v11, %v1310_v59  ;;  %v2267_v55 = vpop.f32.mrb[74].mxu1  ;;  %v2331_v36 = vpop.f32.mrb[74].mxu0  ;;  %v1173_v59 = vadd.f32 %v2769_v28, %v2776_v38 }
 0x18c   : > { %v1482_v48 = vadd.f32 %v2331_v36, %v1321_v47  ;;  %v2268_v18 = vpop.f32.mrb[75].mxu1  ;;  %v1473_v17 = vpop.f32.mrb[75].mxu0  ;;  %v1527_v30 = vmax.f32 %v1479_v2, 0.0 }
 0x18d   : > { %v2269_v46 = vadd.f32 %v2268_v18, %v2267_v55  ;;  %v1474_v31 = vadd.f32 %v1473_v17, %v1313_v45  ;;  %v1326_v44 = vadd.f32 %v2266_v58, %v1165_v10  ;;  %v1525_v29 = vmax.f32 %v1471_v27, 0.0 }
 0x18e   : > { %v1528_v61 = vmax.f32 %v1482_v48, 0.0 }
 0x18f   : > { %v1526_v16 = vmax.f32 %v1474_v31, 0.0  ;;  %v1329_v39 = vadd.f32 %v2269_v46, %v1168_v37 }
 0x190   : > { %v2025_v41 = vpack.c.bf16 %v1528_v61, %v1527_v30 }
 0x191   : > { %v2020_v42 = vpack.c.bf16 %v1526_v16, %v1525_v29  ;;  %v2270_v23 = vpop.f32.mrb[76].mxu1  ;;  %v2334_v7 = vpop.f32.mrb[76].mxu0 }
 0x192   : > { %2049 = vst [vmem:[%s2853_s22 + $0x68] sm:$0xff] %v2025_v41   ;;  %v2271_v40 = vpop.f32.mrb[77].mxu1  ;;  %v1486_v5 = vpop.f32.mrb[77].mxu0 }
 0x193   : > { %2048 = vst [vmem:[%s2853_s22 + $0x60] sm:$0xff] %v2020_v42   ;;  %v2272_v22 = vadd.f32 %v2271_v40, %v2270_v23  ;;  %v1487_v56 = vadd.f32 %v1486_v5, %v1326_v44  ;;  %v2273_v49 = vpop.f32.mrb[78].mxu1  ;;  %v2335_v32 = vpop.f32.mrb[78].mxu0 }
 0x194   : > { %v2274_v51 = vpop.f32.mrb[79].mxu1  ;;  %v1489_v45 = vpop.f32.mrb[79].mxu0 }
 0x195   : > { %v1334_v63 = vadd.f32 %v2272_v22, %v1173_v59  ;;  %v2275_v57 = vadd.f32 %v2274_v51, %v2273_v49  ;;  %v1490_v25 = vadd.f32 %v1489_v45, %v1329_v39  ;;  %v1529_v52 = vmax.f32 %v1487_v56, 0.0 }
 0x197   : > { %v1495_v3 = vadd.f32 %v2334_v7, %v1334_v63  ;;  %v1337_v33 = vadd.f32 %v2275_v57, %v1176_v43  ;;  %v1530_v62 = vmax.f32 %v1490_v25, 0.0 }
 0x199   : > { %v1498_v28 = vadd.f32 %v2335_v32, %v1337_v33  ;;  %v2030_v8 = vpack.c.bf16 %v1530_v62, %v1529_v52  ;;  %v1531_v60 = vmax.f32 %v1495_v3, 0.0 }
 0x19b   : > { %v1532_v19 = vmax.f32 %v1498_v28, 0.0  ;;  %2050 = vst [vmem:[%s2853_s22 + $0x70] sm:$0xff] %v2030_v8  }
 0x19d   : > { %v2035_v0 = vpack.c.bf16 %v1532_v19, %v1531_v60 }
 0x19f   : > { %2051 = vst [vmem:[%s2853_s22 + $0x78] sm:$0xff] %v2035_v0  }
 0x1a0 PF: > { %s13_s12 = sadd.s32 1, %s2515_s12  }
 0x1a1   : > { %p10_p4 = scmp.ge.s32.totalorder %s13_s12, 4  }
 0x1a3   :  { %12 = sbr.rel (!%p10_p4) target bundleno = 1 (0x1), region = 62 }

// kernel: simple_conv_forward.7
= control target key start
LH: loop header
LB: loop body
LE: loop exit
PB: predicated region body
PF: predicated region fallthrough
CT: control target
= control target key end

     0   :  { %s3819_s1 = inlined_call_operand.vmem [shape: bf16[1152,256], index: 1, kind: input, shape index: {}]   ;;  %s3820_s0 = inlined_call_operand.vmem [shape: bf16[128,1152], index: 0, kind: input, shape index: {}]   ;;  %s3821_s2 = inlined_call_operand.vmem [shape: f32[1,256], index: 2, kind: input, shape index: {}]   ;;  %s3822_s3 = inlined_call_operand.vmem [shape: bf16[128,256], index: 3, kind: output, shape index: {}]  }
   0x1   :  { %v2493_v0 = vld [vmem:[%s3819_s1 + $0x4] ss:$8 sps:$4 sm:$0xff]   ;;  %v2497_v2 = vld [vmem:[%s3819_s1] ss:$8 sps:$4 sm:$0xff]   ;;  %v2499_v4 = vld [vmem:[%s3819_s1 + $0x14] ss:$8 sps:$4 sm:$0xff]  }
   0x2   :  { %v2495_v1 = vld [vmem:[%s3819_s1 + $0x204] ss:$8 sps:$4 sm:$0xff]   ;;  %1339 = vmatprep.subr.bf16.mxu1 %v2493_v0  ;;  %v2498_v3 = vld [vmem:[%s3819_s1 + $0x200] ss:$8 sps:$4 sm:$0xff]   ;;  %v2501_v5 = vld [vmem:[%s3819_s1 + $0x214] ss:$8 sps:$4 sm:$0xff]  }
   0x3   :  { %1565 = vmatprep.subr.bf16.mxu0 %v2495_v1  ;;  %1340 = vmatpush1.bf16.msra.mxu1 %v2497_v2  ;;  %v2503_v6 = vld [vmem:[%s3819_s1 + $0x10] ss:$8 sps:$4 sm:$0xff]   ;;  %v2505_v8 = vld [vmem:[%s3819_s1 + $0x24] ss:$8 sps:$4 sm:$0xff]   ;;  %v2509_v10 = vld [vmem:[%s3819_s1 + $0x20] ss:$8 sps:$4 sm:$0xff]  }
   0x4   :  { %1566 = vmatpush1.bf16.msra.mxu0 %v2498_v3  ;;  %1341 = vmatprep.subr.bf16.mxu1 %v2499_v4  ;;  %v2504_v7 = vld [vmem:[%s3819_s1 + $0x210] ss:$8 sps:$4 sm:$0xff]   ;;  %v2507_v9 = vld [vmem:[%s3819_s1 + $0x224] ss:$8 sps:$4 sm:$0xff]   ;;  %v2510_v11 = vld [vmem:[%s3819_s1 + $0x220] ss:$8 sps:$4 sm:$0xff]  }
   0x5   :  { %1567 = vmatprep.subr.bf16.mxu0 %v2501_v5  ;;  %v2511_v12 = vld [vmem:[%s3819_s1 + $0x34] ss:$8 sps:$4 sm:$0xff]   ;;  %v2515_v14 = vld [vmem:[%s3819_s1 + $0x30] ss:$8 sps:$4 sm:$0xff]   ;;  %v2517_v16 = vld [vmem:[%s3819_s1 + $0x44] ss:$8 sps:$4 sm:$0xff]  }
   0x6   :  { %v2513_v13 = vld [vmem:[%s3819_s1 + $0x234] ss:$8 sps:$4 sm:$0xff]   ;;  %v2516_v15 = vld [vmem:[%s3819_s1 + $0x230] ss:$8 sps:$4 sm:$0xff]   ;;  %v2519_v17 = vld [vmem:[%s3819_s1 + $0x244] ss:$8 sps:$4 sm:$0xff]  }
   0x7   :  { %1342 = vmatpush1.bf16.msra.mxu1 %v2503_v6  ;;  %v2521_v18 = vld [vmem:[%s3819_s1 + $0x40] ss:$8 sps:$4 sm:$0xff]   ;;  %v2523_v20 = vld [vmem:[%s3819_s1 + $0x54] ss:$8 sps:$4 sm:$0xff]   ;;  %v2527_v22 = vld [vmem:[%s3819_s1 + $0x50] ss:$8 sps:$4 sm:$0xff]  }
   0x8   :  { %1568 = vmatpush1.bf16.msra.mxu0 %v2504_v7  ;;  %1343 = vmatprep.subr.bf16.mxu1 %v2505_v8  ;;  %v2522_v19 = vld [vmem:[%s3819_s1 + $0x240] ss:$8 sps:$4 sm:$0xff]   ;;  %v2525_v21 = vld [vmem:[%s3819_s1 + $0x254] ss:$8 sps:$4 sm:$0xff]   ;;  %v2528_v23 = vld [vmem:[%s3819_s1 + $0x250] ss:$8 sps:$4 sm:$0xff]  }
   0x9   :  { %1569 = vmatprep.subr.bf16.mxu0 %v2507_v9  ;;  %v2529_v24 = vld [vmem:[%s3819_s1 + $0x64] ss:$8 sps:$4 sm:$0xff]   ;;  %v2533_v26 = vld [vmem:[%s3819_s1 + $0x60] ss:$8 sps:$4 sm:$0xff]   ;;  %v2535_v28 = vld [vmem:[%s3819_s1 + $0x74] ss:$8 sps:$4 sm:$0xff]  }
   0xa   :  { %v2531_v25 = vld [vmem:[%s3819_s1 + $0x264] ss:$8 sps:$4 sm:$0xff]   ;;  %v2534_v27 = vld [vmem:[%s3819_s1 + $0x260] ss:$8 sps:$4 sm:$0xff]   ;;  %v2537_v29 = vld [vmem:[%s3819_s1 + $0x274] ss:$8 sps:$4 sm:$0xff]  }
   0xb   :  { %1344 = vmatpush1.bf16.msra.mxu1 %v2509_v10  ;;  %v2539_v30 = vld [vmem:[%s3819_s1 + $0x70] ss:$8 sps:$4 sm:$0xff]   ;;  %v2541_v32 = vld [vmem:[%s3819_s1 + $0x84] ss:$8 sps:$4 sm:$0xff]   ;;  %v2545_v34 = vld [vmem:[%s3819_s1 + $0x80] ss:$8 sps:$4 sm:$0xff]  }
   0xc   :  { %1570 = vmatpush1.bf16.msra.mxu0 %v2510_v11  ;;  %1345 = vmatprep.subr.bf16.mxu1 %v2511_v12  ;;  %v2540_v31 = vld [vmem:[%s3819_s1 + $0x270] ss:$8 sps:$4 sm:$0xff]   ;;  %v2543_v33 = vld [vmem:[%s3819_s1 + $0x284] ss:$8 sps:$4 sm:$0xff]   ;;  %v2546_v35 = vld [vmem:[%s3819_s1 + $0x280] ss:$8 sps:$4 sm:$0xff]  }
   0xd   :  { %1571 = vmatprep.subr.bf16.mxu0 %v2513_v13  ;;  %v2547_v36 = vld [vmem:[%s3819_s1 + $0x94] ss:$8 sps:$4 sm:$0xff]   ;;  %v2551_v38 = vld [vmem:[%s3819_s1 + $0x90] ss:$8 sps:$4 sm:$0xff]   ;;  %v2553_v40 = vld [vmem:[%s3819_s1 + $0xa4] ss:$8 sps:$4 sm:$0xff]  }
   0xe   :  { %v2549_v37 = vld [vmem:[%s3819_s1 + $0x294] ss:$8 sps:$4 sm:$0xff]   ;;  %v2552_v39 = vld [vmem:[%s3819_s1 + $0x290] ss:$8 sps:$4 sm:$0xff]   ;;  %v2555_v41 = vld [vmem:[%s3819_s1 + $0x2a4] ss:$8 sps:$4 sm:$0xff]  }
   0xf   :  { %1346 = vmatpush1.bf16.msra.mxu1 %v2515_v14  ;;  %v2557_v42 = vld [vmem:[%s3819_s1 + $0xa0] ss:$8 sps:$4 sm:$0xff]   ;;  %v2559_v44 = vld [vmem:[%s3819_s1 + $0xb4] ss:$8 sps:$4 sm:$0xff]   ;;  %v2563_v46 = vld [vmem:[%s3819_s1 + $0xb0] ss:$8 sps:$4 sm:$0xff]  }
  0x10   :  { %1572 = vmatpush1.bf16.msra.mxu0 %v2516_v15  ;;  %1347 = vmatprep.subr.bf16.mxu1 %v2517_v16  ;;  %v2558_v43 = vld [vmem:[%s3819_s1 + $0x2a0] ss:$8 sps:$4 sm:$0xff]   ;;  %v2561_v45 = vld [vmem:[%s3819_s1 + $0x2b4] ss:$8 sps:$4 sm:$0xff]   ;;  %v2564_v47 = vld [vmem:[%s3819_s1 + $0x2b0] ss:$8 sps:$4 sm:$0xff]  }
  0x11   :  { %1573 = vmatprep.subr.bf16.mxu0 %v2519_v17  ;;  %v2565_v48 = vld [vmem:[%s3819_s1 + $0xc4] ss:$8 sps:$4 sm:$0xff]   ;;  %v2594_v51 = vld [vmem:[%s3820_s0 + $0x14] ss:$36 sps:$4 sm:$0xff]   ;;  %v2569_v52 = vld [vmem:[%s3819_s1 + $0xc0] ss:$8 sps:$4 sm:$0xff]  }
  0x12   :  { %v2591_v49 = vld [vmem:[%s3820_s0 + $0x4] ss:$36 sps:$4 sm:$0xff]   ;;  %1597 = vmatprep.mubr.bf16.mxu0 %v2594_v51  ;;  %v2571_v54 = vld [vmem:[%s3819_s1 + $0xd4] ss:$8 sps:$4 sm:$0xff]   ;;  %v2575_v56 = vld [vmem:[%s3819_s1 + $0xd0] ss:$8 sps:$4 sm:$0xff]  }
  0x13   :  { %1348 = vmatpush1.bf16.msra.mxu1 %v2521_v18  ;;  %v2567_v50 = vld [vmem:[%s3819_s1 + $0x2c4] ss:$8 sps:$4 sm:$0xff]   ;;  %1371 = vmatprep.mubr.bf16.mxu1 %v2591_v49  ;;  %v2570_v53 = vld [vmem:[%s3819_s1 + $0x2c0] ss:$8 sps:$4 sm:$0xff]   ;;  %v2573_v55 = vld [vmem:[%s3819_s1 + $0x2d4] ss:$8 sps:$4 sm:$0xff]  }
  0x14   :  { %1574 = vmatpush1.bf16.msra.mxu0 %v2522_v19  ;;  %1349 = vmatprep.subr.bf16.mxu1 %v2523_v20  ;;  %v2576_v57 = vld [vmem:[%s3819_s1 + $0x2d0] ss:$8 sps:$4 sm:$0xff]   ;;  %v2577_v58 = vld [vmem:[%s3819_s1 + $0xe4] ss:$8 sps:$4 sm:$0xff]   ;;  %v2581_v60 = vld [vmem:[%s3819_s1 + $0xe0] ss:$8 sps:$4 sm:$0xff]  }
  0x15   :  { %1575 = vmatprep.subr.bf16.mxu0 %v2525_v21  ;;  %v2579_v59 = vld [vmem:[%s3819_s1 + $0x2e4] ss:$8 sps:$4 sm:$0xff]   ;;  %v2582_v61 = vld [vmem:[%s3819_s1 + $0x2e0] ss:$8 sps:$4 sm:$0xff]   ;;  %v2583_v62 = vld [vmem:[%s3819_s1 + $0xf4] ss:$8 sps:$4 sm:$0xff]  }
  0x16   :  { %v2585_v63 = vld [vmem:[%s3819_s1 + $0x2f4] ss:$8 sps:$4 sm:$0xff]   ;;  %v2587_v0 = vld [vmem:[%s3819_s1 + $0xf0] ss:$8 sps:$4 sm:$0xff]   ;;  %v2597_v2 = vld [vmem:[%s3819_s1 + $0x104] ss:$8 sps:$4 sm:$0xff]  }
  0x17   :  { %1350 = vmatpush1.bf16.msra.mxu1 %v2527_v22  ;;  %v2588_v1 = vld [vmem:[%s3819_s1 + $0x2f0] ss:$8 sps:$4 sm:$0xff]   ;;  %v3038_v3 = vld [vmem:[%s3819_s1 + $0x304] ss:$8 sps:$4 sm:$0xff]   ;;  %v2595_v6 = vld [vmem:[%s3819_s1 + $0x100] ss:$8 sps:$4 sm:$0xff]  }
  0x18   :  { %1576 = vmatpush1.bf16.msra.mxu0 %v2528_v23  ;;  %1351 = vmatprep.subr.bf16.mxu1 %v2529_v24  ;;  %v2589_v4 = vld [vmem:[%s3820_s0] ss:$36 sps:$4 sm:$0xff]   ;;  %v2592_v5 = vld [vmem:[%s3820_s0 + $0x10] ss:$36 sps:$4 sm:$0xff]   ;;  %v2611_v16 = vld [vmem:[%s3820_s0 + $0x48] ss:$36 sps:$4 sm:$0xff]  }
  0x19   :  { %1577 = vmatprep.subr.bf16.mxu0 %v2531_v25  ;;  %v3052_v7 = vld [vmem:[%s3819_s1 + $0x300] ss:$8 sps:$4 sm:$0xff]   ;;  %v2603_v8 = vld [vmem:[%s3819_s1 + $0x114] ss:$8 sps:$4 sm:$0xff]   ;;  %v2607_v10 = vld [vmem:[%s3820_s0 + $0x4c] ss:$36 sps:$4 sm:$0xff]  }
  0x1a   :  { %v3061_v9 = vld [vmem:[%s3819_s1 + $0x314] ss:$8 sps:$4 sm:$0xff]   ;;  %v2601_v12 = vld [vmem:[%s3819_s1 + $0x110] ss:$8 sps:$4 sm:$0xff]   ;;  %v2614_v14 = vld [vmem:[%s3819_s1 + $0x124] ss:$8 sps:$4 sm:$0xff]  }
  0x1b   :  { %1352 = vmatpush1.bf16.msra.mxu1 %v2533_v26  ;;  %v2609_v11 = vld [vmem:[%s3820_s0 + $0x5c] ss:$36 sps:$4 sm:$0xff]   ;;  %v3076_v13 = vld [vmem:[%s3819_s1 + $0x310] ss:$8 sps:$4 sm:$0xff]   ;;  %v3085_v15 = vld [vmem:[%s3819_s1 + $0x324] ss:$8 sps:$4 sm:$0xff]  }
  0x1c   :  { %1578 = vmatpush1.bf16.msra.mxu0 %v2534_v27  ;;  %1353 = vmatprep.subr.bf16.mxu1 %v2535_v28  ;;  %v2612_v17 = vld [vmem:[%s3819_s1 + $0x120] ss:$8 sps:$4 sm:$0xff]   ;;  %v2615_v18 = vld [vmem:[%s3820_s0 + $0x58] ss:$36 sps:$4 sm:$0xff]   ;;  %v2632_v26 = vld [vmem:[%s3819_s1 + $0x144] ss:$8 sps:$4 sm:$0xff]  }
  0x1d   :  { %1579 = vmatprep.subr.bf16.mxu0 %v2537_v29  ;;  %v3099_v19 = vld [vmem:[%s3819_s1 + $0x320] ss:$8 sps:$4 sm:$0xff]   ;;  %v2621_v20 = vld [vmem:[%s3819_s1 + $0x134] ss:$8 sps:$4 sm:$0xff]   ;;  %v2619_v24 = vld [vmem:[%s3819_s1 + $0x130] ss:$8 sps:$4 sm:$0xff]  }
  0x1e   :  { %v3109_v21 = vld [vmem:[%s3819_s1 + $0x334] ss:$8 sps:$4 sm:$0xff]   ;;  %v2627_v23 = vld [vmem:[%s3820_s0 + $0xa4] ss:$36 sps:$4 sm:$0xff]   ;;  %v3124_v25 = vld [vmem:[%s3819_s1 + $0x330] ss:$8 sps:$4 sm:$0xff]  }
  0x1f   :  { %1354 = vmatpush1.bf16.msra.mxu1 %v2539_v30  ;;  %v2625_v22 = vld [vmem:[%s3820_s0 + $0x94] ss:$36 sps:$4 sm:$0xff]   ;;  %v3133_v27 = vld [vmem:[%s3819_s1 + $0x344] ss:$8 sps:$4 sm:$0xff]   ;;  %v2630_v29 = vld [vmem:[%s3819_s1 + $0x140] ss:$8 sps:$4 sm:$0xff]  }
  0x20   :  { %1580 = vmatpush1.bf16.msra.mxu0 %v2540_v31  ;;  %1355 = vmatprep.subr.bf16.mxu1 %v2541_v32  ;;  %v2629_v28 = vld [vmem:[%s3820_s0 + $0x90] ss:$36 sps:$4 sm:$0xff]   ;;  %v2633_v30 = vld [vmem:[%s3820_s0 + $0xa0] ss:$36 sps:$4 sm:$0xff]  }
  0x21   :  { %1581 = vmatprep.subr.bf16.mxu0 %v2543_v33  ;;  %v3147_v31 = vld [vmem:[%s3819_s1 + $0x340] ss:$8 sps:$4 sm:$0xff]   ;;  %v2639_v32 = vld [vmem:[%s3819_s1 + $0x154] ss:$8 sps:$4 sm:$0xff]   ;;  %v3220_v49 = vld [vmem:[%s3819_s1 + $0x370] ss:$8 sps:$4 sm:$0xff]  }
  0x22   :  { %v3157_v33 = vld [vmem:[%s3819_s1 + $0x354] ss:$8 sps:$4 sm:$0xff]   ;;  %v3229_v51 = vld [vmem:[%s3819_s1 + $0x384] ss:$8 sps:$4 sm:$0xff]  }
  0x23   :  { %1356 = vmatpush1.bf16.msra.mxu1 %v2545_v34  ;;  %v2643_v34 = vld [vmem:[%s3820_s0 + $0xdc] ss:$36 sps:$4 sm:$0xff]  }
  0x24   :  { %1582 = vmatpush1.bf16.msra.mxu0 %v2546_v35  ;;  %1357 = vmatprep.subr.bf16.mxu1 %v2547_v36  ;;  %v2645_v35 = vld [vmem:[%s3820_s0 + $0xec] ss:$36 sps:$4 sm:$0xff]  }
  0x25   :  { %1583 = vmatprep.subr.bf16.mxu0 %v2549_v37  ;;  %v2637_v36 = vld [vmem:[%s3819_s1 + $0x150] ss:$8 sps:$4 sm:$0xff]  }
  0x26   :  { %v3172_v37 = vld [vmem:[%s3819_s1 + $0x350] ss:$8 sps:$4 sm:$0xff]  }
  0x27   :  { %1358 = vmatpush1.bf16.msra.mxu1 %v2551_v38  ;;  %v2650_v38 = vld [vmem:[%s3819_s1 + $0x164] ss:$8 sps:$4 sm:$0xff]  }
  0x28   :  { %1584 = vmatpush1.bf16.msra.mxu0 %v2552_v39  ;;  %1359 = vmatprep.subr.bf16.mxu1 %v2553_v40  ;;  %v3181_v39 = vld [vmem:[%s3819_s1 + $0x364] ss:$8 sps:$4 sm:$0xff]   ;;  %v2647_v40 = vld [vmem:[%s3820_s0 + $0xd8] ss:$36 sps:$4 sm:$0xff]  }
  0x29   :  { %1585 = vmatprep.subr.bf16.mxu0 %v2555_v41  ;;  %v2648_v41 = vld [vmem:[%s3819_s1 + $0x160] ss:$8 sps:$4 sm:$0xff]  }
  0x2b   :  { %1360 = vmatpush1.bf16.msra.mxu1 %v2557_v42  ;;  %v2651_v42 = vld [vmem:[%s3820_s0 + $0xe8] ss:$36 sps:$4 sm:$0xff]  }
  0x2c   :  { %1586 = vmatpush1.bf16.msra.mxu0 %v2558_v43  ;;  %1361 = vmatprep.subr.bf16.mxu1 %v2559_v44  ;;  %v3195_v43 = vld [vmem:[%s3819_s1 + $0x360] ss:$8 sps:$4 sm:$0xff]   ;;  %v2657_v44 = vld [vmem:[%s3819_s1 + $0x174] ss:$8 sps:$4 sm:$0xff]  }
  0x2d   :  { %1587 = vmatprep.subr.bf16.mxu0 %v2561_v45  ;;  %v3205_v45 = vld [vmem:[%s3819_s1 + $0x374] ss:$8 sps:$4 sm:$0xff]  }
  0x2f   :  { %1362 = vmatpush1.bf16.msra.mxu1 %v2563_v46  ;;  %v2661_v46 = vld [vmem:[%s3820_s0 + $0x124] ss:$36 sps:$4 sm:$0xff]  }
  0x30   :  { %1588 = vmatpush1.bf16.msra.mxu0 %v2564_v47  ;;  %1363 = vmatprep.subr.bf16.mxu1 %v2565_v48  ;;  %v2663_v47 = vld [vmem:[%s3820_s0 + $0x134] ss:$36 sps:$4 sm:$0xff]  }
  0x31   :  { %1589 = vmatprep.subr.bf16.mxu0 %v2567_v50  ;;  %v2655_v48 = vld [vmem:[%s3819_s1 + $0x170] ss:$8 sps:$4 sm:$0xff]   ;;  %v2668_v50 = vld [vmem:[%s3819_s1 + $0x184] ss:$8 sps:$4 sm:$0xff]  }
  0x33   :  { %1364 = vmatpush1.bf16.msra.mxu1 %v2569_v52  ;;  %v2665_v52 = vld [vmem:[%s3820_s0 + $0x120] ss:$36 sps:$4 sm:$0xff]  }
  0x34   :  { %1590 = vmatpush1.bf16.msra.mxu0 %v2570_v53  ;;  %1365 = vmatprep.subr.bf16.mxu1 %v2571_v54  ;;  %v2666_v53 = vld [vmem:[%s3819_s1 + $0x180] ss:$8 sps:$4 sm:$0xff]   ;;  %v2669_v54 = vld [vmem:[%s3820_s0 + $0x130] ss:$36 sps:$4 sm:$0xff]  }
  0x35   :  { %1591 = vmatprep.subr.bf16.mxu0 %v2573_v55  ;;  %v3243_v55 = vld [vmem:[%s3819_s1 + $0x380] ss:$8 sps:$4 sm:$0xff]  }
  0x37   :  { %1366 = vmatpush1.bf16.msra.mxu1 %v2575_v56  ;;  %v2675_v56 = vld [vmem:[%s3819_s1 + $0x194] ss:$8 sps:$4 sm:$0xff]  }
  0x38   :  { %1592 = vmatpush1.bf16.msra.mxu0 %v2576_v57  ;;  %1367 = vmatprep.subr.bf16.mxu1 %v2577_v58  ;;  %v3253_v57 = vld [vmem:[%s3819_s1 + $0x394] ss:$8 sps:$4 sm:$0xff]   ;;  %v2679_v58 = vld [vmem:[%s3820_s0 + $0x16c] ss:$36 sps:$4 sm:$0xff]  }
  0x39   :  { %1593 = vmatprep.subr.bf16.mxu0 %v2579_v59  ;;  %v2681_v59 = vld [vmem:[%s3820_s0 + $0x17c] ss:$36 sps:$4 sm:$0xff]  }
  0x3b   :  { %1368 = vmatpush1.bf16.msra.mxu1 %v2581_v60  ;;  %v2673_v60 = vld [vmem:[%s3819_s1 + $0x190] ss:$8 sps:$4 sm:$0xff]  }
  0x3c   :  { %1594 = vmatpush1.bf16.msra.mxu0 %v2582_v61  ;;  %1369 = vmatprep.subr.bf16.mxu1 %v2583_v62  ;;  %v3268_v61 = vld [vmem:[%s3819_s1 + $0x390] ss:$8 sps:$4 sm:$0xff]   ;;  %v2686_v62 = vld [vmem:[%s3819_s1 + $0x1a4] ss:$8 sps:$4 sm:$0xff]  }
  0x3d   :  { %1595 = vmatprep.subr.bf16.mxu0 %v2585_v63  ;;  %v3277_v63 = vld [vmem:[%s3819_s1 + $0x3a4] ss:$8 sps:$4 sm:$0xff]  }
  0x3f   :  { %1370 = vmatpush1.bf16.msra.mxu1 %v2587_v0  ;;  %v2683_v0 = vld [vmem:[%s3820_s0 + $0x168] ss:$36 sps:$4 sm:$0xff]  }
  0x40   :  { %1596 = vmatpush1.bf16.msra.mxu0 %v2588_v1  ;;  %1452 = vmatprep.subr.bf16.mxu1 %v2597_v2  ;;  %v2684_v1 = vld [vmem:[%s3819_s1 + $0x1a0] ss:$8 sps:$4 sm:$0xff]   ;;  %v2687_v2 = vld [vmem:[%s3820_s0 + $0x178] ss:$36 sps:$4 sm:$0xff]  }
  0x41   :  { %1678 = vmatprep.subr.bf16.mxu0 %v3038_v3 }
  0x42   :  { %1372 = vmatmul.mubr.bf16.vlgmr.msra.gmra.mrb[0].mxu1 %v2589_v4  ;;  %v3291_v4 = vld [vmem:[%s3819_s1 + $0x3a0] ss:$8 sps:$4 sm:$0xff]  }
  0x43   :  { %1598 = vmatmul.mubr.bf16.vlgmr.msra.gmra.mrb[0].mxu0 %v2592_v5  ;;  %1453 = vmatpush1.bf16.msra.mxu1 %v2595_v6  ;;  %v2693_v5 = vld [vmem:[%s3819_s1 + $0x1b4] ss:$8 sps:$4 sm:$0xff]  }
  0x44   :  { %1679 = vmatpush1.bf16.msra.mxu0 %v3052_v7  ;;  %1454 = vmatprep.subr.bf16.mxu1 %v2603_v8  ;;  %v3301_v6 = vld [vmem:[%s3819_s1 + $0x3b4] ss:$8 sps:$4 sm:$0xff]  }
  0x45   :  { %1680 = vmatprep.subr.bf16.mxu0 %v3061_v9  ;;  %1381 = vmatprep.mubr.bf16.mxu1 %v2607_v10  ;;  %v2697_v8 = vld [vmem:[%s3820_s0 + $0x1b4] ss:$36 sps:$4 sm:$0xff]   ;;  %v2699_v10 = vld [vmem:[%s3820_s0 + $0x1c4] ss:$36 sps:$4 sm:$0xff]  }
  0x46   :  { %1607 = vmatprep.mubr.bf16.mxu0 %v2609_v11  ;;  %v2691_v11 = vld [vmem:[%s3819_s1 + $0x1b0] ss:$8 sps:$4 sm:$0xff]  }
  0x47   :  { %1455 = vmatpush1.bf16.msra.mxu1 %v2601_v12  ;;  %v3315_v12 = vld [vmem:[%s3819_s1 + $0x3b0] ss:$8 sps:$4 sm:$0xff]  }
  0x48   :  { %1681 = vmatpush1.bf16.msra.mxu0 %v3076_v13  ;;  %1456 = vmatprep.subr.bf16.mxu1 %v2614_v14  ;;  %v2704_v14 = vld [vmem:[%s3819_s1 + $0x1c4] ss:$8 sps:$4 sm:$0xff]  }
  0x49   :  { %1682 = vmatprep.subr.bf16.mxu0 %v3085_v15 }
  0x4a   :  { %1382 = vmatmul.mubr.bf16.gmra.mrb[4].mxu1 %v2611_v16  ;;  %v3325_v16 = vld [vmem:[%s3819_s1 + $0x3c4] ss:$8 sps:$4 sm:$0xff]  }
  0x4b   :  { %1608 = vmatmul.mubr.bf16.gmra.mrb[4].mxu0 %v2615_v18  ;;  %1457 = vmatpush1.bf16.msra.mxu1 %v2612_v17  ;;  %v2701_v17 = vld [vmem:[%s3820_s0 + $0x1b0] ss:$36 sps:$4 sm:$0xff]   ;;  %v2702_v18 = vld [vmem:[%s3819_s1 + $0x1c0] ss:$8 sps:$4 sm:$0xff]  }
  0x4c   :  { %1683 = vmatpush1.bf16.msra.mxu0 %v3099_v19  ;;  %1458 = vmatprep.subr.bf16.mxu1 %v2621_v20  ;;  %v2705_v20 = vld [vmem:[%s3820_s0 + $0x1c0] ss:$36 sps:$4 sm:$0xff]  }
  0x4d   :  { %1684 = vmatprep.subr.bf16.mxu0 %v3109_v21  ;;  %1391 = vmatprep.mubr.bf16.mxu1 %v2625_v22  ;;  %v3339_v22 = vld [vmem:[%s3819_s1 + $0x3c0] ss:$8 sps:$4 sm:$0xff]  }
  0x4e   :  { %1617 = vmatprep.mubr.bf16.mxu0 %v2627_v23  ;;  %v2711_v23 = vld [vmem:[%s3819_s1 + $0x1d4] ss:$8 sps:$4 sm:$0xff]  }
  0x4f   :  { %1459 = vmatpush1.bf16.msra.mxu1 %v2619_v24  ;;  %v3349_v24 = vld [vmem:[%s3819_s1 + $0x3d4] ss:$8 sps:$4 sm:$0xff]  }
  0x50   :  { %1685 = vmatpush1.bf16.msra.mxu0 %v3124_v25  ;;  %1460 = vmatprep.subr.bf16.mxu1 %v2632_v26  ;;  %v2715_v26 = vld [vmem:[%s3820_s0 + $0x1fc] ss:$36 sps:$4 sm:$0xff]  }
  0x51   :  { %1686 = vmatprep.subr.bf16.mxu0 %v3133_v27 }
  0x52   :  { %1392 = vmatmul.mubr.bf16.gmra.mrb[8].mxu1 %v2629_v28  ;;  %v2717_v28 = vld [vmem:[%s3820_s0 + $0x20c] ss:$36 sps:$4 sm:$0xff]  }
  0x53   :  { %1618 = vmatmul.mubr.bf16.gmra.mrb[8].mxu0 %v2633_v30  ;;  %1461 = vmatpush1.bf16.msra.mxu1 %v2630_v29  ;;  %v2709_v29 = vld [vmem:[%s3819_s1 + $0x1d0] ss:$8 sps:$4 sm:$0xff]  }
  0x54   :  { %1687 = vmatpush1.bf16.msra.mxu0 %v3147_v31  ;;  %1462 = vmatprep.subr.bf16.mxu1 %v2639_v32  ;;  %v3363_v30 = vld [vmem:[%s3819_s1 + $0x3d0] ss:$8 sps:$4 sm:$0xff]   ;;  %v2722_v32 = vld [vmem:[%s3819_s1 + $0x1e4] ss:$8 sps:$4 sm:$0xff]  }
  0x55   :  { %1688 = vmatprep.subr.bf16.mxu0 %v3157_v33  ;;  %1401 = vmatprep.mubr.bf16.mxu1 %v2643_v34  ;;  %v3373_v34 = vld [vmem:[%s3819_s1 + $0x3e4] ss:$8 sps:$4 sm:$0xff]  }
  0x56   :  { %1627 = vmatprep.mubr.bf16.mxu0 %v2645_v35  ;;  %v2719_v35 = vld [vmem:[%s3820_s0 + $0x1f8] ss:$36 sps:$4 sm:$0xff]  }
  0x57   :  { %1463 = vmatpush1.bf16.msra.mxu1 %v2637_v36  ;;  %v2720_v36 = vld [vmem:[%s3819_s1 + $0x1e0] ss:$8 sps:$4 sm:$0xff]  }
  0x58   :  { %1689 = vmatpush1.bf16.msra.mxu0 %v3172_v37  ;;  %1464 = vmatprep.subr.bf16.mxu1 %v2650_v38  ;;  %v2723_v38 = vld [vmem:[%s3820_s0 + $0x208] ss:$36 sps:$4 sm:$0xff]  }
  0x59   :  { %1690 = vmatprep.subr.bf16.mxu0 %v3181_v39 }
  0x5a   :  { %1402 = vmatmul.mubr.bf16.gmra.mrb[12].mxu1 %v2647_v40  ;;  %v3387_v40 = vld [vmem:[%s3819_s1 + $0x3e0] ss:$8 sps:$4 sm:$0xff]  }
  0x5b   :  { %1628 = vmatmul.mubr.bf16.gmra.mrb[12].mxu0 %v2651_v42  ;;  %1465 = vmatpush1.bf16.msra.mxu1 %v2648_v41  ;;  %v2729_v41 = vld [vmem:[%s3819_s1 + $0x1f4] ss:$8 sps:$4 sm:$0xff]  }
  0x5c   :  { %1691 = vmatpush1.bf16.msra.mxu0 %v3195_v43  ;;  %1466 = vmatprep.subr.bf16.mxu1 %v2657_v44  ;;  %v3397_v42 = vld [vmem:[%s3819_s1 + $0x3f4] ss:$8 sps:$4 sm:$0xff]   ;;  %v2735_v44 = vld [vmem:[%s3820_s0 + $0xc] ss:$36 sps:$4 sm:$0xff]  }
  0x5d   :  { %1692 = vmatprep.subr.bf16.mxu0 %v3205_v45  ;;  %1411 = vmatprep.mubr.bf16.mxu1 %v2661_v46  ;;  %v2738_v46 = vld [vmem:[%s3820_s0 + $0x1c] ss:$36 sps:$4 sm:$0xff]  }
  0x5e   :  { %1637 = vmatprep.mubr.bf16.mxu0 %v2663_v47  ;;  %v2727_v47 = vld [vmem:[%s3819_s1 + $0x1f0] ss:$8 sps:$4 sm:$0xff]  }
  0x5f   :  { %1467 = vmatpush1.bf16.msra.mxu1 %v2655_v48  ;;  %v3412_v48 = vld [vmem:[%s3819_s1 + $0x3f0] ss:$8 sps:$4 sm:$0xff]  }
  0x60   :  { %1693 = vmatpush1.bf16.msra.mxu0 %v3220_v49  ;;  %1468 = vmatprep.subr.bf16.mxu1 %v2668_v50  ;;  %v2741_v50 = vld [vmem:[%s3819_s1 + $0x404] ss:$8 sps:$4 sm:$0xff]  }
  0x61   :  { %1694 = vmatprep.subr.bf16.mxu0 %v3229_v51 }
  0x62   :  { %1412 = vmatmul.mubr.bf16.gmra.mrb[16].mxu1 %v2665_v52  ;;  %v2733_v52 = vld [vmem:[%s3820_s0 + $0x8] ss:$36 sps:$4 sm:$0xff]  }
  0x63   :  { %1638 = vmatmul.mubr.bf16.gmra.mrb[16].mxu0 %v2669_v54  ;;  %1469 = vmatpush1.bf16.msra.mxu1 %v2666_v53  ;;  %v2736_v53 = vld [vmem:[%s3820_s0 + $0x18] ss:$36 sps:$4 sm:$0xff]   ;;  %v2739_v54 = vld [vmem:[%s3819_s1 + $0x400] ss:$8 sps:$4 sm:$0xff]  }
  0x64   :  { %1695 = vmatpush1.bf16.msra.mxu0 %v3243_v55  ;;  %1470 = vmatprep.subr.bf16.mxu1 %v2675_v56  ;;  %v2744_v56 = vld [vmem:[%s3819_s1 + $0x414] ss:$8 sps:$4 sm:$0xff]  }
  0x65   :  { %1696 = vmatprep.subr.bf16.mxu0 %v3253_v57  ;;  %1421 = vmatprep.mubr.bf16.mxu1 %v2679_v58  ;;  %v2745_v58 = vld [vmem:[%s3820_s0 + $0x54] ss:$36 sps:$4 sm:$0xff]  }
  0x66   :  { %1647 = vmatprep.mubr.bf16.mxu0 %v2681_v59  ;;  %v2747_v59 = vld [vmem:[%s3820_s0 + $0x64] ss:$36 sps:$4 sm:$0xff]  }
  0x67   :  { %1471 = vmatpush1.bf16.msra.mxu1 %v2673_v60  ;;  %v2742_v60 = vld [vmem:[%s3819_s1 + $0x410] ss:$8 sps:$4 sm:$0xff]  }
  0x68   :  { %1697 = vmatpush1.bf16.msra.mxu0 %v3268_v61  ;;  %1472 = vmatprep.subr.bf16.mxu1 %v2686_v62  ;;  %v2749_v62 = vld [vmem:[%s3820_s0 + $0x50] ss:$36 sps:$4 sm:$0xff]  }
  0x69   :  { %1698 = vmatprep.subr.bf16.mxu0 %v3277_v63 }
  0x6a   :  { %1422 = vmatmul.mubr.bf16.gmra.mrb[20].mxu1 %v2683_v0  ;;  %v2756_v0 = vld [vmem:[%s3819_s1 + $0x434] ss:$8 sps:$4 sm:$0xff]  }
  0x6b   :  { %1648 = vmatmul.mubr.bf16.gmra.mrb[20].mxu0 %v2687_v2  ;;  %1473 = vmatpush1.bf16.msra.mxu1 %v2684_v1  ;;  %v2757_v1 = vld [vmem:[%s3820_s0 + $0x9c] ss:$36 sps:$4 sm:$0xff]   ;;  %v2765_v2 = vld [vmem:[%s3819_s1 + $0x444] ss:$8 sps:$4 sm:$0xff]  }
  0x6c   :  { %1699 = vmatpush1.bf16.msra.mxu0 %v3291_v4  ;;  %1474 = vmatprep.subr.bf16.mxu1 %v2693_v5  ;;  %v2761_v5 = vld [vmem:[%s3820_s0 + $0x98] ss:$36 sps:$4 sm:$0xff]  }
  0x6d   :  { %1700 = vmatprep.subr.bf16.mxu0 %v3301_v6  ;;  %1431 = vmatprep.mubr.bf16.mxu1 %v2697_v8  ;;  %v2768_v8 = vld [vmem:[%s3819_s1 + $0x454] ss:$8 sps:$4 sm:$0xff]  }
  0x6e   :  { %1657 = vmatprep.mubr.bf16.mxu0 %v2699_v10  ;;  %v2769_v10 = vld [vmem:[%s3820_s0 + $0xe4] ss:$36 sps:$4 sm:$0xff]  }
  0x6f   :  { %1475 = vmatpush1.bf16.msra.mxu1 %v2691_v11  ;;  %v2777_v11 = vld [vmem:[%s3819_s1 + $0x464] ss:$8 sps:$4 sm:$0xff]  }
  0x70   :  { %1701 = vmatpush1.bf16.msra.mxu0 %v3315_v12  ;;  %1476 = vmatprep.subr.bf16.mxu1 %v2704_v14  ;;  %v2773_v14 = vld [vmem:[%s3820_s0 + $0xe0] ss:$36 sps:$4 sm:$0xff]  }
  0x71   :  { %1702 = vmatprep.subr.bf16.mxu0 %v3325_v16 }
  0x72   :  { %1432 = vmatmul.mubr.bf16.gmra.mrb[24].mxu1 %v2701_v17  ;;  %v2780_v17 = vld [vmem:[%s3819_s1 + $0x474] ss:$8 sps:$4 sm:$0xff]  }
  0x73   :  { %1658 = vmatmul.mubr.bf16.gmra.mrb[24].mxu0 %v2705_v20  ;;  %1477 = vmatpush1.bf16.msra.mxu1 %v2702_v18  ;;  %v2781_v18 = vld [vmem:[%s3820_s0 + $0x12c] ss:$36 sps:$4 sm:$0xff]  }
  0x74   :  { %1703 = vmatpush1.bf16.msra.mxu0 %v3339_v22  ;;  %1478 = vmatprep.subr.bf16.mxu1 %v2711_v23  ;;  %v2783_v20 = vld [vmem:[%s3820_s0 + $0x128] ss:$36 sps:$4 sm:$0xff]  }
  0x75   :  { %1704 = vmatprep.subr.bf16.mxu0 %v3349_v24  ;;  %1441 = vmatprep.mubr.bf16.mxu1 %v2715_v26  ;;  %v2788_v23 = vld [vmem:[%s3820_s0 + $0x68] ss:$36 sps:$4 sm:$0xff]  }
  0x76   :  { %1667 = vmatprep.mubr.bf16.mxu0 %v2717_v28  ;;  %v2804_v26 = vld [vmem:[%s3820_s0 + $0x188] ss:$36 sps:$4 sm:$0xff]  }
  0x77   :  { %1479 = vmatpush1.bf16.msra.mxu1 %v2709_v29  ;;  %v2805_v28 = vld [vmem:[%s3820_s0 + $0x1cc] ss:$36 sps:$4 sm:$0xff]  }
  0x78   :  { %1705 = vmatpush1.bf16.msra.mxu0 %v3363_v30  ;;  %1480 = vmatprep.subr.bf16.mxu1 %v2722_v32  ;;  %v2807_v29 = vld [vmem:[%s3820_s0 + $0x1c8] ss:$36 sps:$4 sm:$0xff]   ;;  %v2809_v32 = vld [vmem:[%s3820_s0 + $0x214] ss:$36 sps:$4 sm:$0xff]  }
  0x79   :  { %1706 = vmatprep.subr.bf16.mxu0 %v3373_v34 }
  0x7a   :  { %1442 = vmatmul.mubr.bf16.gmra.mrb[28].mxu1 %v2719_v35  ;;  %v2812_v35 = vld [vmem:[%s3820_s0 + $0x218] ss:$36 sps:$4 sm:$0xff]  }
  0x7b   :  { %1668 = vmatmul.mubr.bf16.gmra.mrb[28].mxu0 %v2723_v38  ;;  %1481 = vmatpush1.bf16.msra.mxu1 %v2720_v36 }
  0x7c   :  { %1707 = vmatpush1.bf16.msra.mxu0 %v3387_v40  ;;  %1482 = vmatprep.subr.bf16.mxu1 %v2729_v41 }
  0x7d   :  { %1708 = vmatprep.subr.bf16.mxu0 %v3397_v42  ;;  %1484 = vmatprep.mubr.bf16.mxu1 %v2735_v44 }
  0x7e   :  { %1710 = vmatprep.mubr.bf16.mxu0 %v2738_v46 }
  0x7f   :  { %1483 = vmatpush1.bf16.msra.mxu1 %v2727_v47 }
  0x80   :  { %1709 = vmatpush1.bf16.msra.mxu0 %v3412_v48  ;;  %2300 = vmatprep.subr.bf16.mxu1 %v3038_v3  ;;  %v2753_v3 = vld [vmem:[%s3819_s1 + $0x424] ss:$8 sps:$4 sm:$0xff]  }
  0x81   :  { %1791 = vmatprep.subr.bf16.mxu0 %v2741_v50 }
  0x82   :  { %1485 = vmatmul.mubr.bf16.vlgmr.msra.gmra.mrb[0].mxu1 %v2733_v52 }
  0x83   :  { %1711 = vmatmul.mubr.bf16.vlgmr.msra.gmra.mrb[0].mxu0 %v2736_v53  ;;  %2316 = vmatpush1.bf16.msra.mxu1 %v3052_v7  ;;  %v2750_v7 = vld [vmem:[%s3820_s0 + $0x60] ss:$36 sps:$4 sm:$0xff]  }
  0x84   :  { %1792 = vmatpush1.bf16.msra.mxu0 %v2739_v54  ;;  %2301 = vmatprep.subr.bf16.mxu1 %v3061_v9  ;;  %v2751_v9 = vld [vmem:[%s3819_s1 + $0x420] ss:$8 sps:$4 sm:$0xff]  }
  0x85   :  { %1793 = vmatprep.subr.bf16.mxu0 %v2744_v56  ;;  %1494 = vmatprep.mubr.bf16.mxu1 %v2745_v58 }
  0x86   :  { %1720 = vmatprep.mubr.bf16.mxu0 %v2747_v59 }
  0x87   :  { %2317 = vmatpush1.bf16.msra.mxu1 %v3076_v13  ;;  %v2759_v13 = vld [vmem:[%s3820_s0 + $0xac] ss:$36 sps:$4 sm:$0xff]  }
  0x88   :  { %1794 = vmatpush1.bf16.msra.mxu0 %v2742_v60  ;;  %2302 = vmatprep.subr.bf16.mxu1 %v3085_v15  ;;  %v2754_v15 = vld [vmem:[%s3819_s1 + $0x430] ss:$8 sps:$4 sm:$0xff]  }
  0x89   :  { %1795 = vmatprep.subr.bf16.mxu0 %v2753_v3 }
  0x8a   :  { %1495 = vmatmul.mubr.bf16.gmra.mrb[4].mxu1 %v2749_v62 }
  0x8b   :  { %1721 = vmatmul.mubr.bf16.gmra.mrb[4].mxu0 %v2750_v7  ;;  %2318 = vmatpush1.bf16.msra.mxu1 %v3099_v19  ;;  %v2762_v19 = vld [vmem:[%s3820_s0 + $0xa8] ss:$36 sps:$4 sm:$0xff]  }
  0x8c   :  { %1796 = vmatpush1.bf16.msra.mxu0 %v2751_v9  ;;  %2303 = vmatprep.subr.bf16.mxu1 %v3109_v21  ;;  %v2763_v21 = vld [vmem:[%s3819_s1 + $0x440] ss:$8 sps:$4 sm:$0xff]  }
  0x8d   :  { %1797 = vmatprep.subr.bf16.mxu0 %v2756_v0  ;;  %1504 = vmatprep.mubr.bf16.mxu1 %v2757_v1 }
  0x8e   :  { %1730 = vmatprep.mubr.bf16.mxu0 %v2759_v13 }
  0x8f   :  { %2319 = vmatpush1.bf16.msra.mxu1 %v3124_v25  ;;  %v2771_v25 = vld [vmem:[%s3820_s0 + $0xf4] ss:$36 sps:$4 sm:$0xff]  }
  0x90   :  { %1798 = vmatpush1.bf16.msra.mxu0 %v2754_v15  ;;  %2304 = vmatprep.subr.bf16.mxu1 %v3133_v27  ;;  %v2766_v27 = vld [vmem:[%s3819_s1 + $0x450] ss:$8 sps:$4 sm:$0xff]   ;;  %v241_v15 = vlaneseq }
  0x91   :  { %1799 = vmatprep.subr.bf16.mxu0 %v2765_v2 }
  0x92   :  { %1505 = vmatmul.mubr.bf16.gmra.mrb[8].mxu1 %v2761_v5 }
  0x93   :  { %1731 = vmatmul.mubr.bf16.gmra.mrb[8].mxu0 %v2762_v19  ;;  %2320 = vmatpush1.bf16.msra.mxu1 %v3147_v31  ;;  %v2774_v31 = vld [vmem:[%s3820_s0 + $0xf0] ss:$36 sps:$4 sm:$0xff]  }
  0x94   :  { %1800 = vmatpush1.bf16.msra.mxu0 %v2763_v21  ;;  %2305 = vmatprep.subr.bf16.mxu1 %v3157_v33  ;;  %v2775_v33 = vld [vmem:[%s3819_s1 + $0x460] ss:$8 sps:$4 sm:$0xff]   ;;  %v242_v21 = vshrl.u32 %v241_v15, 7 }
  0x95   :  { %1801 = vmatprep.subr.bf16.mxu0 %v2768_v8  ;;  %1514 = vmatprep.mubr.bf16.mxu1 %v2769_v10 }
  0x96   :  { %1740 = vmatprep.mubr.bf16.mxu0 %v2771_v25  ;;  %v243_v10 = vsub.s32 0, %v242_v21  ;;  %v239_v25 = vld [vmem:[%s3821_s2] sm:$0x3] }
  0x97   :  { %2321 = vmatpush1.bf16.msra.mxu1 %v3172_v37  ;;  %v2778_v37 = vld [vmem:[%s3819_s1 + $0x470] ss:$8 sps:$4 sm:$0xff]  }
  0x98   :  { %1802 = vmatpush1.bf16.msra.mxu0 %v2766_v27  ;;  %2306 = vmatprep.subr.bf16.mxu1 %v3181_v39  ;;  %v2813_v39 = vmov 0   ;;  %v247_v27 = vsub.s32 1, %v242_v21 }
  0x99   :  { %1803 = vmatprep.subr.bf16.mxu0 %v2777_v11 }
  0x9a   :  { %1515 = vmatmul.mubr.bf16.gmra.mrb[12].mxu1 %v2773_v14 }
  0x9b   :  { %1741 = vmatmul.mubr.bf16.gmra.mrb[12].mxu0 %v2774_v31  ;;  %2322 = vmatpush1.bf16.msra.mxu1 %v3195_v43  ;;  %v2784_v43 = vld [vmem:[%s3820_s0 + $0x20] ss:$36 sps:$4 sm:$0xff]  }
  0x9c   :  { %1804 = vmatpush1.bf16.msra.mxu0 %v2775_v33  ;;  %2307 = vmatprep.subr.bf16.mxu1 %v3205_v45  ;;  %v2785_v45 = vld [vmem:[%s3820_s0 + $0x174] ss:$36 sps:$4 sm:$0xff]   ;;  %v3663_v33 = vrot.slane %v239_v25, %v243_v10 }
  0x9d   :  { %1805 = vmatprep.subr.bf16.mxu0 %v2780_v17  ;;  %1524 = vmatprep.mubr.bf16.mxu1 %v2781_v18  ;;  %v3667_v18 = vrot.slane %v239_v25, %v247_v27 }
  0x9e   :  { %1823 = vmatprep.mubr.bf16.mxu0 %v2813_v39 }
  0x9f   :  { %2323 = vmatpush1.bf16.msra.mxu1 %v3220_v49  ;;  %v2787_v49 = vld [vmem:[%s3820_s0 + $0x170] ss:$36 sps:$4 sm:$0xff]  }
  0xa0   :  { %1806 = vmatpush1.bf16.msra.mxu0 %v2778_v37  ;;  %2308 = vmatprep.subr.bf16.mxu1 %v3229_v51  ;;  %v2789_v51 = vld [vmem:[%s3820_s0 + $0x1bc] ss:$36 sps:$4 sm:$0xff]  }
  0xa2   :  { %1525 = vmatmul.mubr.bf16.gmra.mrb[16].mxu1 %v2783_v20 }
  0xa3   :  { %1824 = vmatmul.mubr.bf16.vlgmr.msra.gmra.mrb[0].mxu0 %v2784_v43  ;;  %2324 = vmatpush1.bf16.msra.mxu1 %v3243_v55  ;;  %v2791_v55 = vld [vmem:[%s3820_s0 + $0x1b8] ss:$36 sps:$4 sm:$0xff]  }
  0xa4   :  { %1534 = vmatprep.mubr.bf16.mxu1 %v2785_v45  ;;  %2309 = vmatprep.subr.bf16.mxu1 %v3253_v57  ;;  %v2792_v57 = vld [vmem:[%s3820_s0 + $0xb0] ss:$36 sps:$4 sm:$0xff]  }
  0xa5   :  { %1833 = vmatprep.mubr.bf16.mxu0 %v2813_v39 }
  0xa7   :  { %2325 = vmatpush1.bf16.msra.mxu1 %v3268_v61  ;;  %v2793_v61 = vld [vmem:[%s3820_s0 + $0x204] ss:$36 sps:$4 sm:$0xff]  }
  0xa8   :  { %2310 = vmatprep.subr.bf16.mxu1 %v3277_v63  ;;  %v2795_v63 = vld [vmem:[%s3820_s0 + $0x200] ss:$36 sps:$4 sm:$0xff]  }
  0xaa   :  { %1535 = vmatmul.mubr.bf16.gmra.mrb[20].mxu1 %v2787_v49 }
  0xab   :  { %1834 = vmatmul.mubr.bf16.gmra.mrb[4].mxu0 %v2788_v23  ;;  %2326 = vmatpush1.bf16.msra.mxu1 %v3291_v4  ;;  %v2796_v4 = vld [vmem:[%s3820_s0 + $0xf8] ss:$36 sps:$4 sm:$0xff]  }
  0xac   :  { %1544 = vmatprep.mubr.bf16.mxu1 %v2789_v51  ;;  %2311 = vmatprep.subr.bf16.mxu1 %v3301_v6  ;;  %v2799_v6 = vld [vmem:[%s3820_s0 + $0x13c] ss:$36 sps:$4 sm:$0xff]  }
  0xad   :  { %1843 = vmatprep.mubr.bf16.mxu0 %v2813_v39 }
  0xaf   :  { %2327 = vmatpush1.bf16.msra.mxu1 %v3315_v12  ;;  %v2797_v12 = vld [vmem:[%s3820_s0 + $0x138] ss:$36 sps:$4 sm:$0xff]  }
  0xb0   :  { %2312 = vmatprep.subr.bf16.mxu1 %v3325_v16  ;;  %v2800_v16 = vld [vmem:[%s3820_s0 + $0x140] ss:$36 sps:$4 sm:$0xff]  }
  0xb2   :  { %1545 = vmatmul.mubr.bf16.gmra.mrb[24].mxu1 %v2791_v55 }
  0xb3   :  { %1844 = vmatmul.mubr.bf16.gmra.mrb[8].mxu0 %v2792_v57  ;;  %2328 = vmatpush1.bf16.msra.mxu1 %v3339_v22  ;;  %v2801_v22 = vld [vmem:[%s3820_s0 + $0x184] ss:$36 sps:$4 sm:$0xff]  }
  0xb4   :  { %1554 = vmatprep.mubr.bf16.mxu1 %v2793_v61  ;;  %2313 = vmatprep.subr.bf16.mxu1 %v3349_v24  ;;  %v2803_v24 = vld [vmem:[%s3820_s0 + $0x180] ss:$36 sps:$4 sm:$0xff]  }
  0xb5   :  { %1853 = vmatprep.mubr.bf16.mxu0 %v2813_v39 }
  0xb7   :  { %2329 = vmatpush1.bf16.msra.mxu1 %v3363_v30  ;;  %v2808_v30 = vld [vmem:[%s3820_s0 + $0x1d0] ss:$36 sps:$4 sm:$0xff]  }
  0xb8   :  { %2314 = vmatprep.subr.bf16.mxu1 %v3373_v34  ;;  %v2811_v34 = vld [vmem:[%s3820_s0 + $0x210] ss:$36 sps:$4 sm:$0xff]  }
  0xba   :  { %1555 = vmatmul.mubr.bf16.gmra.mrb[28].mxu1 %v2795_v63 }
  0xbb   :  { %1854 = vmatmul.mubr.bf16.gmra.mrb[12].mxu0 %v2796_v4  ;;  %2330 = vmatpush1.bf16.msra.mxu1 %v3387_v40 }
  0xbc   :  { %1750 = vmatprep.mubr.bf16.mxu1 %v2799_v6  ;;  %2315 = vmatprep.subr.bf16.mxu1 %v3397_v42 }
  0xbd   :  { %1863 = vmatprep.mubr.bf16.mxu0 %v2813_v39 }
  0xbf   :  { %2331 = vmatpush1.bf16.msra.mxu1 %v3412_v48 }
  0xc2   :  { %1751 = vmatmul.mubr.bf16.vlgmr.msra.gmra.mrb[32].mxu1 %v2797_v12 }
  0xc3   :  { %1864 = vmatmul.mubr.bf16.gmra.mrb[32].mxu0 %v2800_v16  ;;  %1760 = vmatprep.mubr.bf16.mxu1 %v2801_v22 }
  0xc4   :  { %1873 = vmatprep.mubr.bf16.mxu0 %v2813_v39 }
  0xca   :  { %1761 = vmatmul.mubr.bf16.gmra.mrb[36].mxu1 %v2803_v24 }
  0xcb   :  { %1874 = vmatmul.mubr.bf16.gmra.mrb[36].mxu0 %v2804_v26  ;;  %1770 = vmatprep.mubr.bf16.mxu1 %v2805_v28 }
  0xcc   :  { %1883 = vmatprep.mubr.bf16.mxu0 %v2813_v39 }
  0xd2   :  { %1771 = vmatmul.mubr.bf16.gmra.mrb[40].mxu1 %v2807_v29 }
  0xd3   :  { %1884 = vmatmul.mubr.bf16.gmra.mrb[40].mxu0 %v2808_v30  ;;  %1780 = vmatprep.mubr.bf16.mxu1 %v2809_v32 }
  0xd4   :  { %1893 = vmatprep.mubr.bf16.mxu0 %v2813_v39 }
  0xda   :  { %1781 = vmatmul.mubr.bf16.gmra.mrb[44].mxu1 %v2811_v34 }
  0xdb   :  { %1894 = vmatmul.mubr.bf16.gmra.mrb[44].mxu0 %v2812_v35 }
 0x136   :  { %v1639_v36 = vpop.f32.mrb[16].mxu0 }
 0x137   :  { %v1641_v38 = vpop.f32.mrb[17].mxu0 }
 0x138   :  { %v3618_v40 = vpop.f32.mrb[18].mxu0 }
 0x139   :  { %v3620_v41 = vpop.f32.mrb[19].mxu0 }
 0x13e   :  { %v3622_v42 = vpop.f32.mrb[20].mxu0 }
 0x13f   :  { %v3624_v44 = vpop.f32.mrb[21].mxu0 }
 0x140   :  { %v3626_v46 = vpop.f32.mrb[22].mxu0 }
 0x141   :  { %v3628_v47 = vpop.f32.mrb[23].mxu0 }
 0x146   :  { %v3630_v48 = vpop.f32.mrb[24].mxu0 }
 0x147   :  { %v3632_v50 = vpop.f32.mrb[25].mxu0 }
 0x148   :  { %v3634_v52 = vpop.f32.mrb[26].mxu0 }
 0x149   :  { %v3636_v53 = vpop.f32.mrb[27].mxu0 }
 0x14e   :  { %v3638_v54 = vpop.f32.mrb[28].mxu0 }
 0x14f   :  { %v3640_v56 = vpop.f32.mrb[29].mxu0 }
 0x150   :  { %v3642_v58 = vpop.f32.mrb[30].mxu0 }
 0x151   :  { %v3644_v59 = vpop.f32.mrb[31].mxu0 }
 0x155   :  { %v1486_v60 = vpop.f32.mrb[0].mxu1 }
 0x156   :  { %v1488_v3 = vpop.f32.mrb[1].mxu1  ;;  %v2332_v37 = vadd.f32 %v1486_v60, %v3663_v33 }
 0x157   :  { %v1490_v62 = vpop.f32.mrb[2].mxu1  ;;  %v2334_v39 = vadd.f32 %v1488_v3, %v3667_v18 }
 0x158   :  { %v1492_v7 = vpop.f32.mrb[3].mxu1  ;;  %v2336_v45 = vadd.f32 %v1490_v62, %v3663_v33 }
 0x159   :  { %v2338_v57 = vadd.f32 %v1492_v7, %v3667_v18 }
 0x15d   :  { %v1496_v9 = vpop.f32.mrb[4].mxu1 }
 0x15e   :  { %v1498_v0 = vpop.f32.mrb[5].mxu1  ;;  %v2340_v15 = vadd.f32 %v1496_v9, %v3663_v33 }
 0x15f   :  { %v1500_v1 = vpop.f32.mrb[6].mxu1 }
 0x160   :  { %v1502_v13 = vpop.f32.mrb[7].mxu1  ;;  %v2344_v25 = vadd.f32 %v1500_v1, %v3663_v33 }
 0x165   :  { %v3646_v2 = vpop.f32.mrb[8].mxu1 }
 0x166   :  { %v3648_v5 = vpop.f32.mrb[9].mxu1 }
 0x167   :  { %v3650_v19 = vpop.f32.mrb[10].mxu1 }
 0x168   :  { %v3652_v8 = vpop.f32.mrb[11].mxu1 }
 0x16d   :  { %v3657_v11 = vpop.f32.mrb[12].mxu1 }
 0x16e   :  { %v3659_v14 = vpop.f32.mrb[13].mxu1 }
 0x16f   :  { %v3661_v31 = vpop.f32.mrb[14].mxu1 }
 0x170   :  { %v3665_v17 = vpop.f32.mrb[15].mxu1 }
 0x175   :  { %v1526_v20 = vpop.f32.mrb[16].mxu1 }
 0x176   :  { %v1825_v43 = vpop.f32.mrb[0].mxu0  ;;  %v2364_v49 = vadd.f32 %v1526_v20, %v3663_v33  ;;  %v1528_v51 = vpop.f32.mrb[17].mxu1 }
 0x177   :  { %v2333_v23 = vadd.f32 %v2332_v37, %v1825_v43  ;;  %v1827_v55 = vpop.f32.mrb[1].mxu0  ;;  %v2368_v61 = vadd.f32 %v1528_v51, %v3667_v18  ;;  %v1530_v4 = vpop.f32.mrb[18].mxu1 }
 0x178   :  { %v2335_v63 = vadd.f32 %v2334_v39, %v1827_v55  ;;  %v1829_v6 = vpop.f32.mrb[2].mxu0  ;;  %v2372_v16 = vadd.f32 %v1530_v4, %v3663_v33  ;;  %v1532_v24 = vpop.f32.mrb[19].mxu1  ;;  %v3676_v28 = vadd.f32 %v2364_v49, %v1639_v36  ;;  %v2342_v36 = vadd.f32 %v1498_v0, %v3667_v18 }
 0x179   :  { %v1904_v12 = vmax.f32 %v2333_v23, 0.0  ;;  %v2337_v22 = vadd.f32 %v2336_v45, %v1829_v6  ;;  %v1831_v26 = vpop.f32.mrb[3].mxu0  ;;  %v2376_v30 = vadd.f32 %v1532_v24, %v3667_v18  ;;  %v3679_v34 = vadd.f32 %v2368_v61, %v1641_v38 }
 0x17a   :  { %v1905_v29 = vmax.f32 %v2335_v63, 0.0  ;;  %v2339_v32 = vadd.f32 %v2338_v57, %v1831_v26  ;;  %v3682_v60 = vadd.f32 %v2372_v16, %v3618_v40  ;;  %v2350_v24 = vadd.f32 %v3648_v5, %v3667_v18 }
 0x17b   :  { %v1906_v35 = vmax.f32 %v2337_v22, 0.0  ;;  %v3685_v7 = vadd.f32 %v2376_v30, %v3620_v41  ;;  %v2346_v41 = vadd.f32 %v1502_v13, %v3667_v18 }
 0x17c   :  { %v2284_v3 = vpack.c.bf16 %v1905_v29, %v1904_v12  ;;  %v1907_v62 = vmax.f32 %v2339_v32, 0.0 }
 0x17d   :  { %v1536_v38 = vpop.f32.mrb[20].mxu1 }
 0x17e   :  { %2032 = vst [vmem:[%s3822_s3] sm:$0xff] %v2284_v3  ;;  %v2285_v21 = vpack.c.bf16 %v1907_v62, %v1906_v35  ;;  %v1835_v10 = vpop.f32.mrb[4].mxu0  ;;  %v2380_v40 = vadd.f32 %v1536_v38, %v3663_v33  ;;  %v1538_v37 = vpop.f32.mrb[21].mxu1 }
 0x17f   :  { %v2341_v27 = vadd.f32 %v2340_v15, %v1835_v10  ;;  %v1837_v39 = vpop.f32.mrb[5].mxu0  ;;  %v2384_v9 = vadd.f32 %v1538_v37, %v3667_v18  ;;  %v1540_v20 = vpop.f32.mrb[22].mxu1 }
 0x180   :  { %2033 = vst [vmem:[%s3822_s3 + $0x8] sm:$0xff] %v2285_v21  ;;  %v2343_v0 = vadd.f32 %v2342_v36, %v1837_v39  ;;  %v1839_v43 = vpop.f32.mrb[6].mxu0  ;;  %v2388_v49 = vadd.f32 %v1540_v20, %v3663_v33  ;;  %v1542_v23 = vpop.f32.mrb[23].mxu1  ;;  %v3701_v55 = vadd.f32 %v2380_v40, %v3622_v42  ;;  %v2348_v42 = vadd.f32 %v3646_v2, %v3663_v33 }
 0x181   :  { %v1908_v45 = vmax.f32 %v2341_v27, 0.0  ;;  %v2345_v1 = vadd.f32 %v2344_v25, %v1839_v43  ;;  %v1841_v51 = vpop.f32.mrb[7].mxu0  ;;  %v2392_v13 = vadd.f32 %v1542_v23, %v3667_v18  ;;  %v3705_v63 = vadd.f32 %v2384_v9, %v3624_v44 }
 0x182   :  { %v1909_v57 = vmax.f32 %v2343_v0, 0.0  ;;  %v2347_v61 = vadd.f32 %v2346_v41, %v1841_v51  ;;  %v3708_v6 = vadd.f32 %v2388_v49, %v3626_v46  ;;  %v2352_v46 = vadd.f32 %v3650_v19, %v3663_v33 }
 0x183   :  { %v1910_v4 = vmax.f32 %v2345_v1, 0.0  ;;  %v3711_v22 = vadd.f32 %v2392_v13, %v3628_v47  ;;  %v2354_v2 = vadd.f32 %v3652_v8, %v3667_v18  ;;  %v2358_v43 = vadd.f32 %v3659_v14, %v3667_v18 }
 0x184   :  { %v2286_v12 = vpack.c.bf16 %v1909_v57, %v1908_v45  ;;  %v1911_v16 = vmax.f32 %v2347_v61, 0.0 }
 0x185   :  { %v1546_v26 = vpop.f32.mrb[24].mxu1 }
 0x186   :  { %2034 = vst [vmem:[%s3822_s3 + $0x10] sm:$0xff] %v2286_v12  ;;  %v2287_v44 = vpack.c.bf16 %v1911_v16, %v1910_v4  ;;  %v1845_v29 = vpop.f32.mrb[8].mxu0  ;;  %v2396_v30 = vadd.f32 %v1546_v26, %v3663_v33  ;;  %v1548_v32 = vpop.f32.mrb[25].mxu1 }
 0x187   :  { %v2349_v47 = vadd.f32 %v2348_v42, %v1845_v29  ;;  %v1847_v35 = vpop.f32.mrb[9].mxu0  ;;  %v2400_v5 = vadd.f32 %v1548_v32, %v3667_v18  ;;  %v1550_v62 = vpop.f32.mrb[26].mxu1 }
 0x188   :  { %2035 = vst [vmem:[%s3822_s3 + $0x18] sm:$0xff] %v2287_v44  ;;  %v2351_v3 = vadd.f32 %v2350_v24, %v1847_v35  ;;  %v1849_v15 = vpop.f32.mrb[10].mxu0  ;;  %v2404_v19 = vadd.f32 %v1550_v62, %v3663_v33  ;;  %v1552_v38 = vpop.f32.mrb[27].mxu1  ;;  %v3731_v25 = vadd.f32 %v2396_v30, %v3630_v48  ;;  %v2356_v48 = vadd.f32 %v3657_v11, %v3663_v33 }
 0x189   :  { %v1912_v36 = vmax.f32 %v2349_v47, 0.0  ;;  %v2353_v21 = vadd.f32 %v2352_v46, %v1849_v15  ;;  %v1851_v10 = vpop.f32.mrb[11].mxu0  ;;  %v2408_v8 = vadd.f32 %v1552_v38, %v3667_v18  ;;  %v3735_v37 = vadd.f32 %v2400_v5, %v3632_v50 }
 0x18a   :  { %v1913_v40 = vmax.f32 %v2351_v3, 0.0  ;;  %v2355_v27 = vadd.f32 %v2354_v2, %v1851_v10  ;;  %v3738_v41 = vadd.f32 %v2404_v19, %v3634_v52  ;;  %v2360_v52 = vadd.f32 %v3661_v31, %v3663_v33 }
 0x18b   :  { %v1914_v39 = vmax.f32 %v2353_v21, 0.0  ;;  %v3741_v20 = vadd.f32 %v2408_v8, %v3636_v53  ;;  %v2362_v11 = vadd.f32 %v3665_v17, %v3667_v18 }
 0x18c   :  { %v2288_v9 = vpack.c.bf16 %v1913_v40, %v1912_v36  ;;  %v1915_v0 = vmax.f32 %v2355_v27, 0.0 }
 0x18d   :  { %v1556_v45 = vpop.f32.mrb[28].mxu1 }
 0x18e   :  { %2036 = vst [vmem:[%s3822_s3 + $0x20] sm:$0xff] %v2288_v9  ;;  %v2289_v50 = vpack.c.bf16 %v1915_v0, %v1914_v39  ;;  %v1855_v49 = vpop.f32.mrb[12].mxu0  ;;  %v2412_v1 = vadd.f32 %v1556_v45, %v3663_v33  ;;  %v1558_v23 = vpop.f32.mrb[29].mxu1 }
 0x18f   :  { %v2357_v53 = vadd.f32 %v2356_v48, %v1855_v49  ;;  %v1857_v51 = vpop.f32.mrb[13].mxu0  ;;  %v2416_v14 = vadd.f32 %v1558_v23, %v3667_v18  ;;  %v1560_v13 = vpop.f32.mrb[30].mxu1 }
 0x190   :  { %2037 = vst [vmem:[%s3822_s3 + $0x28] sm:$0xff] %v2289_v50  ;;  %v2359_v57 = vadd.f32 %v2358_v43, %v1857_v51  ;;  %v1859_v61 = vpop.f32.mrb[14].mxu0  ;;  %v2420_v31 = vadd.f32 %v1560_v13, %v3663_v33  ;;  %v1562_v16 = vpop.f32.mrb[31].mxu1  ;;  %v3761_v24 = vadd.f32 %v2412_v1, %v3638_v54 }
 0x191   :  { %v1916_v4 = vmax.f32 %v2357_v53, 0.0  ;;  %v2361_v12 = vadd.f32 %v2360_v52, %v1859_v61  ;;  %v1861_v42 = vpop.f32.mrb[15].mxu0  ;;  %v2424_v17 = vadd.f32 %v1562_v16, %v3667_v18  ;;  %v3765_v29 = vadd.f32 %v2416_v14, %v3640_v56 }
 0x192   :  { %v1917_v44 = vmax.f32 %v2359_v57, 0.0  ;;  %v2363_v26 = vadd.f32 %v2362_v11, %v1861_v42  ;;  %v3768_v30 = vadd.f32 %v2420_v31, %v3642_v58 }
 0x193   :  { %v1918_v46 = vmax.f32 %v2361_v12, 0.0  ;;  %v3771_v33 = vadd.f32 %v2424_v17, %v3644_v59 }
 0x194   :  { %v2290_v47 = vpack.c.bf16 %v1917_v44, %v1916_v4  ;;  %v1919_v32 = vmax.f32 %v2363_v26, 0.0 }
 0x195   :  { %v1752_v35 = vpop.f32.mrb[32].mxu1 }
 0x196   :  { %2038 = vst [vmem:[%s3822_s3 + $0x30] sm:$0xff] %v2290_v47  ;;  %v2291_v54 = vpack.c.bf16 %v1919_v32, %v1918_v46  ;;  %v1865_v18 = vpop.f32.mrb[32].mxu0  ;;  %v2366_v2 = vadd.f32 %v3676_v28, %v1752_v35  ;;  %v1754_v56 = vpop.f32.mrb[33].mxu1 }
 0x197   :  { %v1867_v5 = vpop.f32.mrb[33].mxu0  ;;  %v2370_v58 = vadd.f32 %v3679_v34, %v1754_v56  ;;  %v1756_v3 = vpop.f32.mrb[34].mxu1 }
 0x198   :  { %2039 = vst [vmem:[%s3822_s3 + $0x38] sm:$0xff] %v2291_v54  ;;  %v1869_v59 = vpop.f32.mrb[34].mxu0  ;;  %v2367_v62 = vadd.f32 %v2366_v2, %v1865_v18  ;;  %v2374_v15 = vadd.f32 %v3682_v60, %v1756_v3  ;;  %v1758_v36 = vpop.f32.mrb[35].mxu1 }
 0x199   :  { %v1871_v19 = vpop.f32.mrb[35].mxu0  ;;  %v2371_v21 = vadd.f32 %v2370_v58, %v1867_v5  ;;  %v2378_v38 = vadd.f32 %v3685_v7, %v1758_v36 }
 0x19a   :  { %v1920_v10 = vmax.f32 %v2367_v62, 0.0  ;;  %v2375_v28 = vadd.f32 %v2374_v15, %v1869_v59 }
 0x19b   :  { %v1921_v40 = vmax.f32 %v2371_v21, 0.0  ;;  %v2379_v8 = vadd.f32 %v2378_v38, %v1871_v19 }
 0x19c   :  { %v1922_v27 = vmax.f32 %v2375_v28, 0.0 }
 0x19d   :  { %v2292_v39 = vpack.c.bf16 %v1921_v40, %v1920_v10  ;;  %v1923_v9 = vmax.f32 %v2379_v8, 0.0  ;;  %v1762_v0 = vpop.f32.mrb[36].mxu1 }
 0x19e   :  { %v1875_v48 = vpop.f32.mrb[36].mxu0  ;;  %v2382_v34 = vadd.f32 %v3701_v55, %v1762_v0  ;;  %v1764_v43 = vpop.f32.mrb[37].mxu1 }
 0x19f   :  { %v1877_v50 = vpop.f32.mrb[37].mxu0  ;;  %2040 = vst [vmem:[%s3822_s3 + $0x40] sm:$0xff] %v2292_v39  ;;  %v2293_v60 = vpack.c.bf16 %v1923_v9, %v1922_v27  ;;  %v2386_v7 = vadd.f32 %v3705_v63, %v1764_v43  ;;  %v1766_v45 = vpop.f32.mrb[38].mxu1 }
 0x1a0   :  { %v1879_v49 = vpop.f32.mrb[38].mxu0  ;;  %v2383_v52 = vadd.f32 %v2382_v34, %v1875_v48  ;;  %v2390_v1 = vadd.f32 %v3708_v6, %v1766_v45  ;;  %v1768_v53 = vpop.f32.mrb[39].mxu1 }
 0x1a1   :  { %v1881_v23 = vpop.f32.mrb[39].mxu0  ;;  %2041 = vst [vmem:[%s3822_s3 + $0x48] sm:$0xff] %v2293_v60  ;;  %v2387_v55 = vadd.f32 %v2386_v7, %v1877_v50  ;;  %v2394_v51 = vadd.f32 %v3711_v22, %v1768_v53 }
 0x1a2   :  { %v1924_v11 = vmax.f32 %v2383_v52, 0.0  ;;  %v2391_v14 = vadd.f32 %v2390_v1, %v1879_v49 }
 0x1a3   :  { %v1925_v57 = vmax.f32 %v2387_v55, 0.0  ;;  %v2395_v13 = vadd.f32 %v2394_v51, %v1881_v23 }
 0x1a4   :  { %v1926_v61 = vmax.f32 %v2391_v14, 0.0 }
 0x1a5   :  { %v2294_v63 = vpack.c.bf16 %v1925_v57, %v1924_v11  ;;  %v1927_v4 = vmax.f32 %v2395_v13, 0.0  ;;  %v1772_v31 = vpop.f32.mrb[40].mxu1 }
 0x1a6   :  { %v1885_v12 = vpop.f32.mrb[40].mxu0  ;;  %v2398_v6 = vadd.f32 %v3731_v25, %v1772_v31  ;;  %v1774_v16 = vpop.f32.mrb[41].mxu1 }
 0x1a7   :  { %v1887_v42 = vpop.f32.mrb[41].mxu0  ;;  %2042 = vst [vmem:[%s3822_s3 + $0x50] sm:$0xff] %v2294_v63  ;;  %v2295_v44 = vpack.c.bf16 %v1927_v4, %v1926_v61  ;;  %v2402_v22 = vadd.f32 %v3735_v37, %v1774_v16  ;;  %v1776_v17 = vpop.f32.mrb[42].mxu1 }
 0x1a8   :  { %v1889_v26 = vpop.f32.mrb[42].mxu0  ;;  %v2399_v46 = vadd.f32 %v2398_v6, %v1885_v12  ;;  %v2406_v47 = vadd.f32 %v3738_v41, %v1776_v17  ;;  %v1778_v32 = vpop.f32.mrb[43].mxu1 }
 0x1a9   :  { %v1891_v54 = vpop.f32.mrb[43].mxu0  ;;  %2043 = vst [vmem:[%s3822_s3 + $0x58] sm:$0xff] %v2295_v44  ;;  %v2403_v25 = vadd.f32 %v2402_v22, %v1887_v42  ;;  %v2410_v35 = vadd.f32 %v3741_v20, %v1778_v32 }
 0x1aa   :  { %v1928_v18 = vmax.f32 %v2399_v46, 0.0  ;;  %v2407_v2 = vadd.f32 %v2406_v47, %v1889_v26 }
 0x1ab   :  { %v1929_v56 = vmax.f32 %v2403_v25, 0.0  ;;  %v2411_v5 = vadd.f32 %v2410_v35, %v1891_v54 }
 0x1ac   :  { %v1930_v58 = vmax.f32 %v2407_v2, 0.0 }
 0x1ad   :  { %v2296_v37 = vpack.c.bf16 %v1929_v56, %v1928_v18  ;;  %v1931_v3 = vmax.f32 %v2411_v5, 0.0  ;;  %v1782_v59 = vpop.f32.mrb[44].mxu1 }
 0x1ae   :  { %v1895_v62 = vpop.f32.mrb[44].mxu0  ;;  %v2414_v41 = vadd.f32 %v3761_v24, %v1782_v59  ;;  %v1784_v15 = vpop.f32.mrb[45].mxu1 }
 0x1af   :  { %v1897_v36 = vpop.f32.mrb[45].mxu0  ;;  %2044 = vst [vmem:[%s3822_s3 + $0x60] sm:$0xff] %v2296_v37  ;;  %v2297_v19 = vpack.c.bf16 %v1931_v3, %v1930_v58  ;;  %v2418_v20 = vadd.f32 %v3765_v29, %v1784_v15  ;;  %v1786_v21 = vpop.f32.mrb[46].mxu1 }
 0x1b0   :  { %v1899_v38 = vpop.f32.mrb[46].mxu0  ;;  %v2415_v10 = vadd.f32 %v2414_v41, %v1895_v62  ;;  %v2422_v28 = vadd.f32 %v3768_v30, %v1786_v21  ;;  %v1788_v40 = vpop.f32.mrb[47].mxu1 }
 0x1b1   :  { %v1901_v8 = vpop.f32.mrb[47].mxu0  ;;  %2045 = vst [vmem:[%s3822_s3 + $0x68] sm:$0xff] %v2297_v19  ;;  %v2419_v24 = vadd.f32 %v2418_v20, %v1897_v36  ;;  %v2426_v27 = vadd.f32 %v3771_v33, %v1788_v40 }
 0x1b2   :  { %v1932_v39 = vmax.f32 %v2415_v10, 0.0  ;;  %v2423_v9 = vadd.f32 %v2422_v28, %v1899_v38 }
 0x1b3   :  { %v1933_v0 = vmax.f32 %v2419_v24, 0.0  ;;  %v2427_v48 = vadd.f32 %v2426_v27, %v1901_v8 }
 0x1b4   :  { %v1934_v34 = vmax.f32 %v2423_v9, 0.0 }
 0x1b5   :  { %v2298_v29 = vpack.c.bf16 %v1933_v0, %v1932_v39  ;;  %v1935_v43 = vmax.f32 %v2427_v48, 0.0 }
 0x1b7   :  { %2046 = vst [vmem:[%s3822_s3 + $0x70] sm:$0xff] %v2298_v29  ;;  %v2299_v30 = vpack.c.bf16 %v1935_v43, %v1934_v34 }
 0x1b9   :  { %2047 = vst [vmem:[%s3822_s3 + $0x78] sm:$0xff] %v2299_v30 }

// kernel: simple_conv_forward.8
= control target key start
LH: loop header
LB: loop body
LE: loop exit
PB: predicated region body
PF: predicated region fallthrough
CT: control target
= control target key end

     0   :  { %s8311_s1 = inlined_call_operand.vmem [shape: bf16[2304,512], index: 1, kind: input, shape index: {}]   ;;  %s8312_s0 = inlined_call_operand.vmem [shape: bf16[32,2304], index: 0, kind: input, shape index: {}]   ;;  %s8313_s2 = inlined_call_operand.vmem [shape: f32[1,512], index: 2, kind: input, shape index: {}]   ;;  %s8314_s3 = inlined_call_operand.vmem [shape: bf16[32,512], index: 3, kind: output, shape index: {}]  }
   0x1   :  { %v5510_v0 = vld [vmem:[%s8311_s1 + $0x4] ss:$16 sps:$4 sm:$0xff]   ;;  %v5512_v1 = vld [vmem:[%s8311_s1 + $0xc] ss:$16 sps:$4 sm:$0xff]   ;;  %v5514_v2 = vld [vmem:[%s8311_s1] ss:$16 sps:$4 sm:$0xff]  }
   0x2   :  { %3708 = vmatprep.subr.bf16.mxu0 %v5510_v0  ;;  %v5515_v3 = vld [vmem:[%s8311_s1 + $0x8] ss:$16 sps:$4 sm:$0xff]   ;;  %4185 = vmatprep.subr.bf16.mxu1 %v5512_v1  ;;  %v5516_v4 = vld [vmem:[%s8311_s1 + $0x24] ss:$16 sps:$4 sm:$0xff]   ;;  %v5518_v5 = vld [vmem:[%s8311_s1 + $0x2c] ss:$16 sps:$4 sm:$0xff]  }
   0x3   :  { %3709 = vmatpush1.bf16.msra.mxu0 %v5514_v2  ;;  %4186 = vmatpush1.bf16.msra.mxu1 %v5515_v3  ;;  %v5520_v6 = vld [vmem:[%s8311_s1 + $0x20] ss:$16 sps:$4 sm:$0xff]   ;;  %v5521_v7 = vld [vmem:[%s8311_s1 + $0x28] ss:$16 sps:$4 sm:$0xff]   ;;  %v5522_v8 = vld [vmem:[%s8311_s1 + $0x44] ss:$16 sps:$4 sm:$0xff]  }
   0x4   :  { %3710 = vmatprep.subr.bf16.mxu0 %v5516_v4  ;;  %4187 = vmatprep.subr.bf16.mxu1 %v5518_v5  ;;  %v5524_v9 = vld [vmem:[%s8311_s1 + $0x4c] ss:$16 sps:$4 sm:$0xff]   ;;  %v5526_v10 = vld [vmem:[%s8311_s1 + $0x40] ss:$16 sps:$4 sm:$0xff]   ;;  %v5527_v11 = vld [vmem:[%s8311_s1 + $0x48] ss:$16 sps:$4 sm:$0xff]  }
   0x5   :  { %v5528_v12 = vld [vmem:[%s8311_s1 + $0x64] ss:$16 sps:$4 sm:$0xff]   ;;  %v5530_v13 = vld [vmem:[%s8311_s1 + $0x6c] ss:$16 sps:$4 sm:$0xff]   ;;  %v5532_v14 = vld [vmem:[%s8311_s1 + $0x60] ss:$16 sps:$4 sm:$0xff]  }
   0x6   :  { %v5533_v15 = vld [vmem:[%s8311_s1 + $0x68] ss:$16 sps:$4 sm:$0xff]   ;;  %v5534_v16 = vld [vmem:[%s8311_s1 + $0x84] ss:$16 sps:$4 sm:$0xff]   ;;  %v5536_v17 = vld [vmem:[%s8311_s1 + $0x8c] ss:$16 sps:$4 sm:$0xff]  }
   0x7   :  { %3711 = vmatpush1.bf16.msra.mxu0 %v5520_v6  ;;  %4188 = vmatpush1.bf16.msra.mxu1 %v5521_v7  ;;  %v5538_v18 = vld [vmem:[%s8311_s1 + $0x80] ss:$16 sps:$4 sm:$0xff]   ;;  %v5539_v19 = vld [vmem:[%s8311_s1 + $0x88] ss:$16 sps:$4 sm:$0xff]   ;;  %v5540_v20 = vld [vmem:[%s8311_s1 + $0xa4] ss:$16 sps:$4 sm:$0xff]  }
   0x8   :  { %3712 = vmatprep.subr.bf16.mxu0 %v5522_v8  ;;  %4189 = vmatprep.subr.bf16.mxu1 %v5524_v9  ;;  %v5542_v21 = vld [vmem:[%s8311_s1 + $0xac] ss:$16 sps:$4 sm:$0xff]   ;;  %v5544_v22 = vld [vmem:[%s8311_s1 + $0xa0] ss:$16 sps:$4 sm:$0xff]   ;;  %v5545_v23 = vld [vmem:[%s8311_s1 + $0xa8] ss:$16 sps:$4 sm:$0xff]  }
   0x9   :  { %v5546_v24 = vld [vmem:[%s8311_s1 + $0xc4] ss:$16 sps:$4 sm:$0xff]   ;;  %v5548_v25 = vld [vmem:[%s8311_s1 + $0xcc] ss:$16 sps:$4 sm:$0xff]   ;;  %v5550_v26 = vld [vmem:[%s8311_s1 + $0xc0] ss:$16 sps:$4 sm:$0xff]  }
   0xa   :  { %v5551_v27 = vld [vmem:[%s8311_s1 + $0xc8] ss:$16 sps:$4 sm:$0xff]   ;;  %v5552_v28 = vld [vmem:[%s8311_s1 + $0xe4] ss:$16 sps:$4 sm:$0xff]   ;;  %v5554_v29 = vld [vmem:[%s8311_s1 + $0xec] ss:$16 sps:$4 sm:$0xff]  }
   0xb   :  { %3713 = vmatpush1.bf16.msra.mxu0 %v5526_v10  ;;  %4190 = vmatpush1.bf16.msra.mxu1 %v5527_v11  ;;  %v5556_v30 = vld [vmem:[%s8311_s1 + $0xe0] ss:$16 sps:$4 sm:$0xff]   ;;  %v5557_v31 = vld [vmem:[%s8311_s1 + $0xe8] ss:$16 sps:$4 sm:$0xff]   ;;  %v5558_v32 = vld [vmem:[%s8311_s1 + $0x104] ss:$16 sps:$4 sm:$0xff]  }
   0xc   :  { %3714 = vmatprep.subr.bf16.mxu0 %v5528_v12  ;;  %4191 = vmatprep.subr.bf16.mxu1 %v5530_v13  ;;  %v5560_v33 = vld [vmem:[%s8311_s1 + $0x10c] ss:$16 sps:$4 sm:$0xff]   ;;  %v5562_v34 = vld [vmem:[%s8311_s1 + $0x100] ss:$16 sps:$4 sm:$0xff]   ;;  %v5563_v35 = vld [vmem:[%s8311_s1 + $0x108] ss:$16 sps:$4 sm:$0xff]  }
   0xd   :  { %v5564_v36 = vld [vmem:[%s8311_s1 + $0x124] ss:$16 sps:$4 sm:$0xff]   ;;  %v5566_v37 = vld [vmem:[%s8311_s1 + $0x12c] ss:$16 sps:$4 sm:$0xff]   ;;  %v5568_v38 = vld [vmem:[%s8311_s1 + $0x120] ss:$16 sps:$4 sm:$0xff]  }
   0xe   :  { %v5569_v39 = vld [vmem:[%s8311_s1 + $0x128] ss:$16 sps:$4 sm:$0xff]   ;;  %v5570_v40 = vld [vmem:[%s8311_s1 + $0x144] ss:$16 sps:$4 sm:$0xff]   ;;  %v5572_v41 = vld [vmem:[%s8311_s1 + $0x14c] ss:$16 sps:$4 sm:$0xff]  }
   0xf   :  { %3715 = vmatpush1.bf16.msra.mxu0 %v5532_v14  ;;  %4192 = vmatpush1.bf16.msra.mxu1 %v5533_v15  ;;  %v5574_v42 = vld [vmem:[%s8311_s1 + $0x140] ss:$16 sps:$4 sm:$0xff]   ;;  %v5575_v43 = vld [vmem:[%s8311_s1 + $0x148] ss:$16 sps:$4 sm:$0xff]   ;;  %v5576_v44 = vld [vmem:[%s8311_s1 + $0x164] ss:$16 sps:$4 sm:$0xff]  }
  0x10   :  { %3716 = vmatprep.subr.bf16.mxu0 %v5534_v16  ;;  %4193 = vmatprep.subr.bf16.mxu1 %v5536_v17  ;;  %v5578_v45 = vld [vmem:[%s8311_s1 + $0x16c] ss:$16 sps:$4 sm:$0xff]   ;;  %v5580_v46 = vld [vmem:[%s8311_s1 + $0x160] ss:$16 sps:$4 sm:$0xff]   ;;  %v5581_v47 = vld [vmem:[%s8311_s1 + $0x168] ss:$16 sps:$4 sm:$0xff]  }
  0x11   :  { %v5608_v48 = vld [vmem:[%s8312_s0 + $0x4] ss:$72 sps:$4 sm:$0xff]   ;;  %v5586_v51 = vld [vmem:[%s8311_s1 + $0x180] ss:$16 sps:$4 sm:$0xff]   ;;  %v5587_v52 = vld [vmem:[%s8311_s1 + $0x188] ss:$16 sps:$4 sm:$0xff]  }
  0x12   :  { %v5582_v49 = vld [vmem:[%s8311_s1 + $0x184] ss:$16 sps:$4 sm:$0xff]   ;;  %v5584_v50 = vld [vmem:[%s8311_s1 + $0x18c] ss:$16 sps:$4 sm:$0xff]   ;;  %3740 = vmatprep.mubr.bf16.mxu0 %v5608_v48  ;;  %4217 = vmatprep.mubr.bf16.mxu1 %v5608_v48  ;;  %v5592_v55 = vld [vmem:[%s8311_s1 + $0x1a0] ss:$16 sps:$4 sm:$0xff]  }
  0x13   :  { %3717 = vmatpush1.bf16.msra.mxu0 %v5538_v18  ;;  %4194 = vmatpush1.bf16.msra.mxu1 %v5539_v19  ;;  %v5588_v53 = vld [vmem:[%s8311_s1 + $0x1a4] ss:$16 sps:$4 sm:$0xff]   ;;  %v5590_v54 = vld [vmem:[%s8311_s1 + $0x1ac] ss:$16 sps:$4 sm:$0xff]   ;;  %v5593_v56 = vld [vmem:[%s8311_s1 + $0x1a8] ss:$16 sps:$4 sm:$0xff]  }
  0x14   :  { %3718 = vmatprep.subr.bf16.mxu0 %v5540_v20  ;;  %4195 = vmatprep.subr.bf16.mxu1 %v5542_v21  ;;  %v5594_v57 = vld [vmem:[%s8311_s1 + $0x1c4] ss:$16 sps:$4 sm:$0xff]   ;;  %v5596_v58 = vld [vmem:[%s8311_s1 + $0x1cc] ss:$16 sps:$4 sm:$0xff]   ;;  %v5598_v59 = vld [vmem:[%s8311_s1 + $0x1c0] ss:$16 sps:$4 sm:$0xff]  }
  0x15   :  { %v5599_v60 = vld [vmem:[%s8311_s1 + $0x1c8] ss:$16 sps:$4 sm:$0xff]   ;;  %v5600_v61 = vld [vmem:[%s8311_s1 + $0x1e4] ss:$16 sps:$4 sm:$0xff]   ;;  %v5602_v62 = vld [vmem:[%s8311_s1 + $0x1ec] ss:$16 sps:$4 sm:$0xff]  }
  0x16   :  { %v5604_v63 = vld [vmem:[%s8311_s1 + $0x1e0] ss:$16 sps:$4 sm:$0xff]   ;;  %v5605_v0 = vld [vmem:[%s8311_s1 + $0x1e8] ss:$16 sps:$4 sm:$0xff]   ;;  %v5611_v1 = vld [vmem:[%s8311_s1 + $0x204] ss:$16 sps:$4 sm:$0xff]  }
  0x17   :  { %3719 = vmatpush1.bf16.msra.mxu0 %v5544_v22  ;;  %4196 = vmatpush1.bf16.msra.mxu1 %v5545_v23  ;;  %v5614_v2 = vld [vmem:[%s8311_s1 + $0x20c] ss:$16 sps:$4 sm:$0xff]   ;;  %v5606_v3 = vld [vmem:[%s8312_s0] ss:$72 sps:$4 sm:$0xff]   ;;  %v5617_v6 = vld [vmem:[%s8311_s1 + $0x224] ss:$16 sps:$4 sm:$0xff]  }
  0x18   :  { %3720 = vmatprep.subr.bf16.mxu0 %v5546_v24  ;;  %4197 = vmatprep.subr.bf16.mxu1 %v5548_v25  ;;  %v5609_v4 = vld [vmem:[%s8311_s1 + $0x200] ss:$16 sps:$4 sm:$0xff]   ;;  %v5612_v5 = vld [vmem:[%s8311_s1 + $0x208] ss:$16 sps:$4 sm:$0xff]   ;;  %v5620_v7 = vld [vmem:[%s8311_s1 + $0x22c] ss:$16 sps:$4 sm:$0xff]  }
  0x19   :  { %v5615_v8 = vld [vmem:[%s8311_s1 + $0x220] ss:$16 sps:$4 sm:$0xff]   ;;  %v5618_v9 = vld [vmem:[%s8311_s1 + $0x228] ss:$16 sps:$4 sm:$0xff]   ;;  %v5623_v10 = vld [vmem:[%s8311_s1 + $0x244] ss:$16 sps:$4 sm:$0xff]  }
  0x1a   :  { %v5626_v11 = vld [vmem:[%s8311_s1 + $0x24c] ss:$16 sps:$4 sm:$0xff]   ;;  %v5621_v12 = vld [vmem:[%s8311_s1 + $0x240] ss:$16 sps:$4 sm:$0xff]   ;;  %v5624_v13 = vld [vmem:[%s8311_s1 + $0x248] ss:$16 sps:$4 sm:$0xff]  }
  0x1b   :  { %3721 = vmatpush1.bf16.msra.mxu0 %v5550_v26  ;;  %4198 = vmatpush1.bf16.msra.mxu1 %v5551_v27  ;;  %v5629_v14 = vld [vmem:[%s8311_s1 + $0x264] ss:$16 sps:$4 sm:$0xff]   ;;  %v5632_v15 = vld [vmem:[%s8311_s1 + $0x26c] ss:$16 sps:$4 sm:$0xff]   ;;  %v5627_v16 = vld [vmem:[%s8311_s1 + $0x260] ss:$16 sps:$4 sm:$0xff]  }
  0x1c   :  { %3722 = vmatprep.subr.bf16.mxu0 %v5552_v28  ;;  %4199 = vmatprep.subr.bf16.mxu1 %v5554_v29  ;;  %v5630_v17 = vld [vmem:[%s8311_s1 + $0x268] ss:$16 sps:$4 sm:$0xff]   ;;  %v5635_v18 = vld [vmem:[%s8311_s1 + $0x284] ss:$16 sps:$4 sm:$0xff]   ;;  %v5638_v19 = vld [vmem:[%s8311_s1 + $0x28c] ss:$16 sps:$4 sm:$0xff]  }
  0x1d   :  { %v5633_v20 = vld [vmem:[%s8311_s1 + $0x280] ss:$16 sps:$4 sm:$0xff]   ;;  %v5636_v21 = vld [vmem:[%s8311_s1 + $0x288] ss:$16 sps:$4 sm:$0xff]   ;;  %v5641_v22 = vld [vmem:[%s8311_s1 + $0x2a4] ss:$16 sps:$4 sm:$0xff]  }
  0x1e   :  { %v5644_v23 = vld [vmem:[%s8311_s1 + $0x2ac] ss:$16 sps:$4 sm:$0xff]   ;;  %v5639_v25 = vld [vmem:[%s8311_s1 + $0x2a0] ss:$16 sps:$4 sm:$0xff]   ;;  %v5642_v26 = vld [vmem:[%s8311_s1 + $0x2a8] ss:$16 sps:$4 sm:$0xff]  }
  0x1f   :  { %3723 = vmatpush1.bf16.msra.mxu0 %v5556_v30  ;;  %4200 = vmatpush1.bf16.msra.mxu1 %v5557_v31  ;;  %v5693_v24 = vld [vmem:[%s8312_s0 + $0x94] ss:$72 sps:$4 sm:$0xff]   ;;  %v5701_v29 = vld [vmem:[%s8312_s0 + $0x90] ss:$72 sps:$4 sm:$0xff]  }
  0x20   :  { %3724 = vmatprep.subr.bf16.mxu0 %v5558_v32  ;;  %4201 = vmatprep.subr.bf16.mxu1 %v5560_v33  ;;  %v5647_v27 = vld [vmem:[%s8311_s1 + $0x2c4] ss:$16 sps:$4 sm:$0xff]   ;;  %v5650_v28 = vld [vmem:[%s8311_s1 + $0x2cc] ss:$16 sps:$4 sm:$0xff]   ;;  %v5645_v30 = vld [vmem:[%s8311_s1 + $0x2c0] ss:$16 sps:$4 sm:$0xff]  }
  0x21   :  { %v5648_v31 = vld [vmem:[%s8311_s1 + $0x2c8] ss:$16 sps:$4 sm:$0xff]   ;;  %v5653_v32 = vld [vmem:[%s8311_s1 + $0x2e4] ss:$16 sps:$4 sm:$0xff]   ;;  %v5656_v33 = vld [vmem:[%s8311_s1 + $0x2ec] ss:$16 sps:$4 sm:$0xff]  }
  0x22   :  { %v5672_v48 = vld [vmem:[%s8311_s1 + $0x348] ss:$16 sps:$4 sm:$0xff]  }
  0x23   :  { %3725 = vmatpush1.bf16.msra.mxu0 %v5562_v34  ;;  %4202 = vmatpush1.bf16.msra.mxu1 %v5563_v35  ;;  %v5710_v34 = vld [vmem:[%s8312_s0 + $0xc] ss:$72 sps:$4 sm:$0xff]   ;;  %v5651_v35 = vld [vmem:[%s8311_s1 + $0x2e0] ss:$16 sps:$4 sm:$0xff]  }
  0x24   :  { %3726 = vmatprep.subr.bf16.mxu0 %v5564_v36  ;;  %4203 = vmatprep.subr.bf16.mxu1 %v5566_v37  ;;  %v5654_v36 = vld [vmem:[%s8311_s1 + $0x2e8] ss:$16 sps:$4 sm:$0xff]   ;;  %v5659_v37 = vld [vmem:[%s8311_s1 + $0x304] ss:$16 sps:$4 sm:$0xff]  }
  0x27   :  { %3727 = vmatpush1.bf16.msra.mxu0 %v5568_v38  ;;  %4204 = vmatpush1.bf16.msra.mxu1 %v5569_v39  ;;  %v5662_v38 = vld [vmem:[%s8311_s1 + $0x30c] ss:$16 sps:$4 sm:$0xff]   ;;  %v5657_v39 = vld [vmem:[%s8311_s1 + $0x300] ss:$16 sps:$4 sm:$0xff]  }
  0x28   :  { %3728 = vmatprep.subr.bf16.mxu0 %v5570_v40  ;;  %4205 = vmatprep.subr.bf16.mxu1 %v5572_v41  ;;  %v5660_v40 = vld [vmem:[%s8311_s1 + $0x308] ss:$16 sps:$4 sm:$0xff]   ;;  %v5665_v41 = vld [vmem:[%s8311_s1 + $0x324] ss:$16 sps:$4 sm:$0xff]  }
  0x2b   :  { %3729 = vmatpush1.bf16.msra.mxu0 %v5574_v42  ;;  %4206 = vmatpush1.bf16.msra.mxu1 %v5575_v43  ;;  %v5668_v42 = vld [vmem:[%s8311_s1 + $0x32c] ss:$16 sps:$4 sm:$0xff]   ;;  %v5663_v43 = vld [vmem:[%s8311_s1 + $0x320] ss:$16 sps:$4 sm:$0xff]  }
  0x2c   :  { %3730 = vmatprep.subr.bf16.mxu0 %v5576_v44  ;;  %4207 = vmatprep.subr.bf16.mxu1 %v5578_v45  ;;  %v5666_v44 = vld [vmem:[%s8311_s1 + $0x328] ss:$16 sps:$4 sm:$0xff]   ;;  %v5671_v45 = vld [vmem:[%s8311_s1 + $0x344] ss:$16 sps:$4 sm:$0xff]  }
  0x2f   :  { %3731 = vmatpush1.bf16.msra.mxu0 %v5580_v46  ;;  %4208 = vmatpush1.bf16.msra.mxu1 %v5581_v47  ;;  %v5674_v46 = vld [vmem:[%s8311_s1 + $0x34c] ss:$16 sps:$4 sm:$0xff]   ;;  %v5669_v47 = vld [vmem:[%s8311_s1 + $0x340] ss:$16 sps:$4 sm:$0xff]  }
  0x30   :  { %3732 = vmatprep.subr.bf16.mxu0 %v5582_v49  ;;  %4209 = vmatprep.subr.bf16.mxu1 %v5584_v50  ;;  %v5677_v49 = vld [vmem:[%s8311_s1 + $0x364] ss:$16 sps:$4 sm:$0xff]   ;;  %v5680_v50 = vld [vmem:[%s8311_s1 + $0x36c] ss:$16 sps:$4 sm:$0xff]  }
  0x33   :  { %3733 = vmatpush1.bf16.msra.mxu0 %v5586_v51  ;;  %4210 = vmatpush1.bf16.msra.mxu1 %v5587_v52  ;;  %v5675_v51 = vld [vmem:[%s8311_s1 + $0x360] ss:$16 sps:$4 sm:$0xff]   ;;  %v5678_v52 = vld [vmem:[%s8311_s1 + $0x368] ss:$16 sps:$4 sm:$0xff]  }
  0x34   :  { %3734 = vmatprep.subr.bf16.mxu0 %v5588_v53  ;;  %4211 = vmatprep.subr.bf16.mxu1 %v5590_v54  ;;  %v5683_v53 = vld [vmem:[%s8311_s1 + $0x384] ss:$16 sps:$4 sm:$0xff]   ;;  %v5686_v54 = vld [vmem:[%s8311_s1 + $0x38c] ss:$16 sps:$4 sm:$0xff]  }
  0x37   :  { %3735 = vmatpush1.bf16.msra.mxu0 %v5592_v55  ;;  %4212 = vmatpush1.bf16.msra.mxu1 %v5593_v56  ;;  %v5681_v55 = vld [vmem:[%s8311_s1 + $0x380] ss:$16 sps:$4 sm:$0xff]   ;;  %v5684_v56 = vld [vmem:[%s8311_s1 + $0x388] ss:$16 sps:$4 sm:$0xff]  }
  0x38   :  { %3736 = vmatprep.subr.bf16.mxu0 %v5594_v57  ;;  %4213 = vmatprep.subr.bf16.mxu1 %v5596_v58  ;;  %v5689_v57 = vld [vmem:[%s8311_s1 + $0x3a4] ss:$16 sps:$4 sm:$0xff]   ;;  %v5692_v58 = vld [vmem:[%s8311_s1 + $0x3ac] ss:$16 sps:$4 sm:$0xff]  }
  0x3b   :  { %3737 = vmatpush1.bf16.msra.mxu0 %v5598_v59  ;;  %4214 = vmatpush1.bf16.msra.mxu1 %v5599_v60  ;;  %v5687_v59 = vld [vmem:[%s8311_s1 + $0x3a0] ss:$16 sps:$4 sm:$0xff]   ;;  %v5690_v60 = vld [vmem:[%s8311_s1 + $0x3a8] ss:$16 sps:$4 sm:$0xff]  }
  0x3c   :  { %3738 = vmatprep.subr.bf16.mxu0 %v5600_v61  ;;  %4215 = vmatprep.subr.bf16.mxu1 %v5602_v62  ;;  %v5697_v61 = vld [vmem:[%s8311_s1 + $0x3c4] ss:$16 sps:$4 sm:$0xff]   ;;  %v5700_v62 = vld [vmem:[%s8311_s1 + $0x3cc] ss:$16 sps:$4 sm:$0xff]  }
  0x3f   :  { %3739 = vmatpush1.bf16.msra.mxu0 %v5604_v63  ;;  %4216 = vmatpush1.bf16.msra.mxu1 %v5605_v0  ;;  %v5695_v63 = vld [vmem:[%s8311_s1 + $0x3c0] ss:$16 sps:$4 sm:$0xff]   ;;  %v5698_v0 = vld [vmem:[%s8311_s1 + $0x3c8] ss:$16 sps:$4 sm:$0xff]  }
  0x40   :  { %3761 = vmatprep.subr.bf16.mxu0 %v5611_v1  ;;  %4238 = vmatprep.subr.bf16.mxu1 %v5614_v2  ;;  %v5704_v1 = vld [vmem:[%s8311_s1 + $0x3e4] ss:$16 sps:$4 sm:$0xff]   ;;  %v5707_v2 = vld [vmem:[%s8311_s1 + $0x3ec] ss:$16 sps:$4 sm:$0xff]  }
  0x42   :  { %3741 = vmatmul.mubr.bf16.vlgmr.msra.gmra.mrb[0].mxu0 %v5606_v3  ;;  %4218 = vmatmul.mubr.bf16.vlgmr.msra.gmra.mrb[0].mxu1 %v5606_v3  ;;  %v5702_v3 = vld [vmem:[%s8311_s1 + $0x3e0] ss:$16 sps:$4 sm:$0xff]  }
  0x43   :  { %3762 = vmatpush1.bf16.msra.mxu0 %v5609_v4  ;;  %4239 = vmatpush1.bf16.msra.mxu1 %v5612_v5  ;;  %v5705_v4 = vld [vmem:[%s8311_s1 + $0x3e8] ss:$16 sps:$4 sm:$0xff]   ;;  %v5713_v5 = vld [vmem:[%s8311_s1 + $0x404] ss:$16 sps:$4 sm:$0xff]  }
  0x44   :  { %3763 = vmatprep.subr.bf16.mxu0 %v5617_v6  ;;  %4240 = vmatprep.subr.bf16.mxu1 %v5620_v7  ;;  %v5716_v6 = vld [vmem:[%s8311_s1 + $0x40c] ss:$16 sps:$4 sm:$0xff]   ;;  %v5708_v7 = vld [vmem:[%s8312_s0 + $0x8] ss:$72 sps:$4 sm:$0xff]  }
  0x45   :  { %3750 = vmatprep.mubr.bf16.mxu0 %v5693_v24  ;;  %4227 = vmatprep.mubr.bf16.mxu1 %v5693_v24  ;;  %v5732_v24 = vld [vmem:[%s8311_s1 + $0x468] ss:$16 sps:$4 sm:$0xff]  }
  0x47   :  { %3764 = vmatpush1.bf16.msra.mxu0 %v5615_v8  ;;  %4241 = vmatpush1.bf16.msra.mxu1 %v5618_v9  ;;  %v5711_v8 = vld [vmem:[%s8311_s1 + $0x400] ss:$16 sps:$4 sm:$0xff]   ;;  %v5714_v9 = vld [vmem:[%s8311_s1 + $0x408] ss:$16 sps:$4 sm:$0xff]  }
  0x48   :  { %3765 = vmatprep.subr.bf16.mxu0 %v5623_v10  ;;  %4242 = vmatprep.subr.bf16.mxu1 %v5626_v11  ;;  %v5719_v10 = vld [vmem:[%s8311_s1 + $0x424] ss:$16 sps:$4 sm:$0xff]   ;;  %v5722_v11 = vld [vmem:[%s8311_s1 + $0x42c] ss:$16 sps:$4 sm:$0xff]  }
  0x4a   :  { %3751 = vmatmul.mubr.bf16.gmra.mrb[4].mxu0 %v5701_v29  ;;  %4228 = vmatmul.mubr.bf16.gmra.mrb[4].mxu1 %v5701_v29  ;;  %v5743_v29 = vld [vmem:[%s8311_s1 + $0x4a4] ss:$16 sps:$4 sm:$0xff]  }
  0x4b   :  { %3766 = vmatpush1.bf16.msra.mxu0 %v5621_v12  ;;  %4243 = vmatpush1.bf16.msra.mxu1 %v5624_v13  ;;  %v5795_v12 = vld [vmem:[%s8312_s0 + $0x9c] ss:$72 sps:$4 sm:$0xff]   ;;  %v5717_v13 = vld [vmem:[%s8311_s1 + $0x420] ss:$16 sps:$4 sm:$0xff]  }
  0x4c   :  { %3767 = vmatprep.subr.bf16.mxu0 %v5629_v14  ;;  %4244 = vmatprep.subr.bf16.mxu1 %v5632_v15  ;;  %v5720_v14 = vld [vmem:[%s8311_s1 + $0x428] ss:$16 sps:$4 sm:$0xff]   ;;  %v5725_v15 = vld [vmem:[%s8311_s1 + $0x444] ss:$16 sps:$4 sm:$0xff]  }
  0x4d   :  { %3793 = vmatprep.mubr.bf16.mxu0 %v5710_v34  ;;  %4270 = vmatprep.mubr.bf16.mxu1 %v5710_v34  ;;  %v5752_v34 = vld [vmem:[%s8311_s1 + $0x4cc] ss:$16 sps:$4 sm:$0xff]  }
  0x4f   :  { %3768 = vmatpush1.bf16.msra.mxu0 %v5627_v16  ;;  %4245 = vmatpush1.bf16.msra.mxu1 %v5630_v17  ;;  %v5728_v16 = vld [vmem:[%s8311_s1 + $0x44c] ss:$16 sps:$4 sm:$0xff]   ;;  %v5723_v17 = vld [vmem:[%s8311_s1 + $0x440] ss:$16 sps:$4 sm:$0xff]  }
  0x50   :  { %3769 = vmatprep.subr.bf16.mxu0 %v5635_v18  ;;  %4246 = vmatprep.subr.bf16.mxu1 %v5638_v19  ;;  %v5726_v18 = vld [vmem:[%s8311_s1 + $0x448] ss:$16 sps:$4 sm:$0xff]  }
  0x51   :  { %v5803_v19 = vld [vmem:[%s8312_s0 + $0x98] ss:$72 sps:$4 sm:$0xff]  }
  0x53   :  { %3770 = vmatpush1.bf16.msra.mxu0 %v5633_v20  ;;  %4247 = vmatpush1.bf16.msra.mxu1 %v5636_v21  ;;  %v5731_v20 = vld [vmem:[%s8311_s1 + $0x464] ss:$16 sps:$4 sm:$0xff]   ;;  %v5734_v21 = vld [vmem:[%s8311_s1 + $0x46c] ss:$16 sps:$4 sm:$0xff]  }
  0x54   :  { %3771 = vmatprep.subr.bf16.mxu0 %v5641_v22  ;;  %4248 = vmatprep.subr.bf16.mxu1 %v5644_v23  ;;  %v5812_v22 = vld [vmem:[%s8312_s0 + $0x14] ss:$72 sps:$4 sm:$0xff]   ;;  %v5729_v23 = vld [vmem:[%s8311_s1 + $0x460] ss:$16 sps:$4 sm:$0xff]  }
  0x57   :  { %3772 = vmatpush1.bf16.msra.mxu0 %v5639_v25  ;;  %4249 = vmatpush1.bf16.msra.mxu1 %v5642_v26  ;;  %v5737_v25 = vld [vmem:[%s8311_s1 + $0x484] ss:$16 sps:$4 sm:$0xff]   ;;  %v5740_v26 = vld [vmem:[%s8311_s1 + $0x48c] ss:$16 sps:$4 sm:$0xff]  }
  0x58   :  { %3773 = vmatprep.subr.bf16.mxu0 %v5647_v27  ;;  %4250 = vmatprep.subr.bf16.mxu1 %v5650_v28  ;;  %v5735_v27 = vld [vmem:[%s8311_s1 + $0x480] ss:$16 sps:$4 sm:$0xff]   ;;  %v5738_v28 = vld [vmem:[%s8311_s1 + $0x488] ss:$16 sps:$4 sm:$0xff]  }
  0x5b   :  { %3774 = vmatpush1.bf16.msra.mxu0 %v5645_v30  ;;  %4251 = vmatpush1.bf16.msra.mxu1 %v5648_v31  ;;  %v5746_v30 = vld [vmem:[%s8311_s1 + $0x4ac] ss:$16 sps:$4 sm:$0xff]   ;;  %v5741_v31 = vld [vmem:[%s8311_s1 + $0x4a0] ss:$16 sps:$4 sm:$0xff]  }
  0x5c   :  { %3775 = vmatprep.subr.bf16.mxu0 %v5653_v32  ;;  %4252 = vmatprep.subr.bf16.mxu1 %v5656_v33  ;;  %v5744_v32 = vld [vmem:[%s8311_s1 + $0x4a8] ss:$16 sps:$4 sm:$0xff]   ;;  %v5749_v33 = vld [vmem:[%s8311_s1 + $0x4c4] ss:$16 sps:$4 sm:$0xff]  }
  0x5f   :  { %3776 = vmatpush1.bf16.msra.mxu0 %v5651_v35  ;;  %4253 = vmatpush1.bf16.msra.mxu1 %v5654_v36  ;;  %v5747_v35 = vld [vmem:[%s8311_s1 + $0x4c0] ss:$16 sps:$4 sm:$0xff]   ;;  %v5750_v36 = vld [vmem:[%s8311_s1 + $0x4c8] ss:$16 sps:$4 sm:$0xff]  }
  0x60   :  { %3777 = vmatprep.subr.bf16.mxu0 %v5659_v37  ;;  %4254 = vmatprep.subr.bf16.mxu1 %v5662_v38  ;;  %v5755_v37 = vld [vmem:[%s8311_s1 + $0x4e4] ss:$16 sps:$4 sm:$0xff]   ;;  %v5758_v38 = vld [vmem:[%s8311_s1 + $0x4ec] ss:$16 sps:$4 sm:$0xff]  }
  0x63   :  { %3778 = vmatpush1.bf16.msra.mxu0 %v5657_v39  ;;  %4255 = vmatpush1.bf16.msra.mxu1 %v5660_v40  ;;  %v5753_v39 = vld [vmem:[%s8311_s1 + $0x4e0] ss:$16 sps:$4 sm:$0xff]   ;;  %v5756_v40 = vld [vmem:[%s8311_s1 + $0x4e8] ss:$16 sps:$4 sm:$0xff]  }
  0x64   :  { %3779 = vmatprep.subr.bf16.mxu0 %v5665_v41  ;;  %4256 = vmatprep.subr.bf16.mxu1 %v5668_v42  ;;  %v5761_v41 = vld [vmem:[%s8311_s1 + $0x504] ss:$16 sps:$4 sm:$0xff]   ;;  %v5764_v42 = vld [vmem:[%s8311_s1 + $0x50c] ss:$16 sps:$4 sm:$0xff]  }
  0x67   :  { %3780 = vmatpush1.bf16.msra.mxu0 %v5663_v43  ;;  %4257 = vmatpush1.bf16.msra.mxu1 %v5666_v44  ;;  %v5759_v43 = vld [vmem:[%s8311_s1 + $0x500] ss:$16 sps:$4 sm:$0xff]   ;;  %v5762_v44 = vld [vmem:[%s8311_s1 + $0x508] ss:$16 sps:$4 sm:$0xff]  }
  0x68   :  { %3781 = vmatprep.subr.bf16.mxu0 %v5671_v45  ;;  %4258 = vmatprep.subr.bf16.mxu1 %v5674_v46  ;;  %v5767_v45 = vld [vmem:[%s8311_s1 + $0x524] ss:$16 sps:$4 sm:$0xff]   ;;  %v5770_v46 = vld [vmem:[%s8311_s1 + $0x52c] ss:$16 sps:$4 sm:$0xff]  }
  0x6b   :  { %3782 = vmatpush1.bf16.msra.mxu0 %v5669_v47  ;;  %4259 = vmatpush1.bf16.msra.mxu1 %v5672_v48  ;;  %v5765_v47 = vld [vmem:[%s8311_s1 + $0x520] ss:$16 sps:$4 sm:$0xff]   ;;  %v5768_v48 = vld [vmem:[%s8311_s1 + $0x528] ss:$16 sps:$4 sm:$0xff]  }
  0x6c   :  { %3783 = vmatprep.subr.bf16.mxu0 %v5677_v49  ;;  %4260 = vmatprep.subr.bf16.mxu1 %v5680_v50  ;;  %v5773_v49 = vld [vmem:[%s8311_s1 + $0x544] ss:$16 sps:$4 sm:$0xff]   ;;  %v5776_v50 = vld [vmem:[%s8311_s1 + $0x54c] ss:$16 sps:$4 sm:$0xff]  }
  0x6f   :  { %3784 = vmatpush1.bf16.msra.mxu0 %v5675_v51  ;;  %4261 = vmatpush1.bf16.msra.mxu1 %v5678_v52  ;;  %v5771_v51 = vld [vmem:[%s8311_s1 + $0x540] ss:$16 sps:$4 sm:$0xff]   ;;  %v5774_v52 = vld [vmem:[%s8311_s1 + $0x548] ss:$16 sps:$4 sm:$0xff]  }
  0x70   :  { %3785 = vmatprep.subr.bf16.mxu0 %v5683_v53  ;;  %4262 = vmatprep.subr.bf16.mxu1 %v5686_v54  ;;  %v5779_v53 = vld [vmem:[%s8311_s1 + $0x564] ss:$16 sps:$4 sm:$0xff]   ;;  %v5782_v54 = vld [vmem:[%s8311_s1 + $0x56c] ss:$16 sps:$4 sm:$0xff]  }
  0x73   :  { %3786 = vmatpush1.bf16.msra.mxu0 %v5681_v55  ;;  %4263 = vmatpush1.bf16.msra.mxu1 %v5684_v56  ;;  %v5777_v55 = vld [vmem:[%s8311_s1 + $0x560] ss:$16 sps:$4 sm:$0xff]   ;;  %v5780_v56 = vld [vmem:[%s8311_s1 + $0x568] ss:$16 sps:$4 sm:$0xff]  }
  0x74   :  { %3787 = vmatprep.subr.bf16.mxu0 %v5689_v57  ;;  %4264 = vmatprep.subr.bf16.mxu1 %v5692_v58  ;;  %v5785_v57 = vld [vmem:[%s8311_s1 + $0x584] ss:$16 sps:$4 sm:$0xff]   ;;  %v5788_v58 = vld [vmem:[%s8311_s1 + $0x58c] ss:$16 sps:$4 sm:$0xff]  }
  0x77   :  { %3788 = vmatpush1.bf16.msra.mxu0 %v5687_v59  ;;  %4265 = vmatpush1.bf16.msra.mxu1 %v5690_v60  ;;  %v5783_v59 = vld [vmem:[%s8311_s1 + $0x580] ss:$16 sps:$4 sm:$0xff]   ;;  %v5786_v60 = vld [vmem:[%s8311_s1 + $0x588] ss:$16 sps:$4 sm:$0xff]  }
  0x78   :  { %3789 = vmatprep.subr.bf16.mxu0 %v5697_v61  ;;  %4266 = vmatprep.subr.bf16.mxu1 %v5700_v62  ;;  %v5791_v61 = vld [vmem:[%s8311_s1 + $0x5a4] ss:$16 sps:$4 sm:$0xff]   ;;  %v5794_v62 = vld [vmem:[%s8311_s1 + $0x5ac] ss:$16 sps:$4 sm:$0xff]  }
  0x7b   :  { %3790 = vmatpush1.bf16.msra.mxu0 %v5695_v63  ;;  %4267 = vmatpush1.bf16.msra.mxu1 %v5698_v0  ;;  %v5789_v63 = vld [vmem:[%s8311_s1 + $0x5a0] ss:$16 sps:$4 sm:$0xff]   ;;  %v5792_v0 = vld [vmem:[%s8311_s1 + $0x5a8] ss:$16 sps:$4 sm:$0xff]  }
  0x7c   :  { %3791 = vmatprep.subr.bf16.mxu0 %v5704_v1  ;;  %4268 = vmatprep.subr.bf16.mxu1 %v5707_v2  ;;  %v5799_v1 = vld [vmem:[%s8311_s1 + $0x5c4] ss:$16 sps:$4 sm:$0xff]   ;;  %v5802_v2 = vld [vmem:[%s8311_s1 + $0x5cc] ss:$16 sps:$4 sm:$0xff]  }
  0x7f   :  { %3792 = vmatpush1.bf16.msra.mxu0 %v5702_v3  ;;  %4269 = vmatpush1.bf16.msra.mxu1 %v5705_v4  ;;  %v5797_v3 = vld [vmem:[%s8311_s1 + $0x5c0] ss:$16 sps:$4 sm:$0xff]   ;;  %v5800_v4 = vld [vmem:[%s8311_s1 + $0x5c8] ss:$16 sps:$4 sm:$0xff]  }
  0x80   :  { %3814 = vmatprep.subr.bf16.mxu0 %v5713_v5  ;;  %4291 = vmatprep.subr.bf16.mxu1 %v5716_v6  ;;  %v5806_v5 = vld [vmem:[%s8311_s1 + $0x5e4] ss:$16 sps:$4 sm:$0xff]   ;;  %v5809_v6 = vld [vmem:[%s8311_s1 + $0x5ec] ss:$16 sps:$4 sm:$0xff]  }
  0x82   :  { %3794 = vmatmul.mubr.bf16.vlgmr.msra.gmra.mrb[0].mxu0 %v5708_v7  ;;  %4271 = vmatmul.mubr.bf16.vlgmr.msra.gmra.mrb[0].mxu1 %v5708_v7  ;;  %v5804_v7 = vld [vmem:[%s8311_s1 + $0x5e0] ss:$16 sps:$4 sm:$0xff]  }
  0x83   :  { %3815 = vmatpush1.bf16.msra.mxu0 %v5711_v8  ;;  %4292 = vmatpush1.bf16.msra.mxu1 %v5714_v9  ;;  %v5807_v8 = vld [vmem:[%s8311_s1 + $0x5e8] ss:$16 sps:$4 sm:$0xff]   ;;  %v5815_v9 = vld [vmem:[%s8311_s1 + $0x604] ss:$16 sps:$4 sm:$0xff]  }
  0x84   :  { %3816 = vmatprep.subr.bf16.mxu0 %v5719_v10  ;;  %4293 = vmatprep.subr.bf16.mxu1 %v5722_v11  ;;  %v5818_v10 = vld [vmem:[%s8311_s1 + $0x60c] ss:$16 sps:$4 sm:$0xff]   ;;  %v5810_v11 = vld [vmem:[%s8312_s0 + $0x10] ss:$72 sps:$4 sm:$0xff]  }
  0x85   :  { %3803 = vmatprep.mubr.bf16.mxu0 %v5795_v12  ;;  %4280 = vmatprep.mubr.bf16.mxu1 %v5795_v12  ;;  %v5813_v12 = vld [vmem:[%s8311_s1 + $0x600] ss:$16 sps:$4 sm:$0xff]  }
  0x87   :  { %3817 = vmatpush1.bf16.msra.mxu0 %v5717_v13  ;;  %4294 = vmatpush1.bf16.msra.mxu1 %v5720_v14  ;;  %v5816_v13 = vld [vmem:[%s8311_s1 + $0x608] ss:$16 sps:$4 sm:$0xff]   ;;  %v5821_v14 = vld [vmem:[%s8311_s1 + $0x624] ss:$16 sps:$4 sm:$0xff]  }
  0x88   :  { %3818 = vmatprep.subr.bf16.mxu0 %v5725_v15  ;;  %4295 = vmatprep.subr.bf16.mxu1 %v5728_v16  ;;  %v5824_v15 = vld [vmem:[%s8311_s1 + $0x62c] ss:$16 sps:$4 sm:$0xff]  }
  0x89   :  { %v5897_v16 = vld [vmem:[%s8312_s0 + $0xa4] ss:$72 sps:$4 sm:$0xff]  }
  0x8a   :  { %3804 = vmatmul.mubr.bf16.gmra.mrb[4].mxu0 %v5803_v19  ;;  %4281 = vmatmul.mubr.bf16.gmra.mrb[4].mxu1 %v5803_v19  ;;  %v5827_v19 = vld [vmem:[%s8311_s1 + $0x644] ss:$16 sps:$4 sm:$0xff]  }
  0x8b   :  { %3819 = vmatpush1.bf16.msra.mxu0 %v5723_v17  ;;  %4296 = vmatpush1.bf16.msra.mxu1 %v5726_v18  ;;  %v5819_v17 = vld [vmem:[%s8311_s1 + $0x620] ss:$16 sps:$4 sm:$0xff]   ;;  %v5822_v18 = vld [vmem:[%s8311_s1 + $0x628] ss:$16 sps:$4 sm:$0xff]  }
  0x8c   :  { %3820 = vmatprep.subr.bf16.mxu0 %v5731_v20  ;;  %4297 = vmatprep.subr.bf16.mxu1 %v5734_v21  ;;  %v5830_v20 = vld [vmem:[%s8311_s1 + $0x64c] ss:$16 sps:$4 sm:$0xff]   ;;  %v5825_v21 = vld [vmem:[%s8311_s1 + $0x640] ss:$16 sps:$4 sm:$0xff]  }
  0x8d   :  { %3846 = vmatprep.mubr.bf16.mxu0 %v5812_v22  ;;  %4323 = vmatprep.mubr.bf16.mxu1 %v5812_v22  ;;  %v5828_v22 = vld [vmem:[%s8311_s1 + $0x648] ss:$16 sps:$4 sm:$0xff]  }
  0x8f   :  { %3821 = vmatpush1.bf16.msra.mxu0 %v5729_v23  ;;  %4298 = vmatpush1.bf16.msra.mxu1 %v5732_v24  ;;  %v5905_v23 = vld [vmem:[%s8312_s0 + $0xa0] ss:$72 sps:$4 sm:$0xff]   ;;  %v5833_v24 = vld [vmem:[%s8311_s1 + $0x664] ss:$16 sps:$4 sm:$0xff]  }
  0x90   :  { %3822 = vmatprep.subr.bf16.mxu0 %v5737_v25  ;;  %4299 = vmatprep.subr.bf16.mxu1 %v5740_v26  ;;  %v5836_v25 = vld [vmem:[%s8311_s1 + $0x66c] ss:$16 sps:$4 sm:$0xff]  }
  0x91   :  { %v5914_v26 = vld [vmem:[%s8312_s0 + $0x1c] ss:$72 sps:$4 sm:$0xff]  }
  0x93   :  { %3823 = vmatpush1.bf16.msra.mxu0 %v5735_v27  ;;  %4300 = vmatpush1.bf16.msra.mxu1 %v5738_v28  ;;  %v5831_v27 = vld [vmem:[%s8311_s1 + $0x660] ss:$16 sps:$4 sm:$0xff]   ;;  %v5834_v28 = vld [vmem:[%s8311_s1 + $0x668] ss:$16 sps:$4 sm:$0xff]  }
  0x94   :  { %3824 = vmatprep.subr.bf16.mxu0 %v5743_v29  ;;  %4301 = vmatprep.subr.bf16.mxu1 %v5746_v30  ;;  %v5839_v29 = vld [vmem:[%s8311_s1 + $0x684] ss:$16 sps:$4 sm:$0xff]   ;;  %v5842_v30 = vld [vmem:[%s8311_s1 + $0x68c] ss:$16 sps:$4 sm:$0xff]  }
  0x97   :  { %3825 = vmatpush1.bf16.msra.mxu0 %v5741_v31  ;;  %4302 = vmatpush1.bf16.msra.mxu1 %v5744_v32  ;;  %v5837_v31 = vld [vmem:[%s8311_s1 + $0x680] ss:$16 sps:$4 sm:$0xff]   ;;  %v5840_v32 = vld [vmem:[%s8311_s1 + $0x688] ss:$16 sps:$4 sm:$0xff]  }
  0x98   :  { %3826 = vmatprep.subr.bf16.mxu0 %v5749_v33  ;;  %4303 = vmatprep.subr.bf16.mxu1 %v5752_v34  ;;  %v5845_v33 = vld [vmem:[%s8311_s1 + $0x6a4] ss:$16 sps:$4 sm:$0xff]   ;;  %v5848_v34 = vld [vmem:[%s8311_s1 + $0x6ac] ss:$16 sps:$4 sm:$0xff]  }
  0x9b   :  { %3827 = vmatpush1.bf16.msra.mxu0 %v5747_v35  ;;  %4304 = vmatpush1.bf16.msra.mxu1 %v5750_v36  ;;  %v5843_v35 = vld [vmem:[%s8311_s1 + $0x6a0] ss:$16 sps:$4 sm:$0xff]   ;;  %v5846_v36 = vld [vmem:[%s8311_s1 + $0x6a8] ss:$16 sps:$4 sm:$0xff]  }
  0x9c   :  { %3828 = vmatprep.subr.bf16.mxu0 %v5755_v37  ;;  %4305 = vmatprep.subr.bf16.mxu1 %v5758_v38  ;;  %v5851_v37 = vld [vmem:[%s8311_s1 + $0x6c4] ss:$16 sps:$4 sm:$0xff]   ;;  %v5854_v38 = vld [vmem:[%s8311_s1 + $0x6cc] ss:$16 sps:$4 sm:$0xff]  }
  0x9f   :  { %3829 = vmatpush1.bf16.msra.mxu0 %v5753_v39  ;;  %4306 = vmatpush1.bf16.msra.mxu1 %v5756_v40  ;;  %v5849_v39 = vld [vmem:[%s8311_s1 + $0x6c0] ss:$16 sps:$4 sm:$0xff]   ;;  %v5852_v40 = vld [vmem:[%s8311_s1 + $0x6c8] ss:$16 sps:$4 sm:$0xff]  }
  0xa0   :  { %3830 = vmatprep.subr.bf16.mxu0 %v5761_v41  ;;  %4307 = vmatprep.subr.bf16.mxu1 %v5764_v42  ;;  %v5857_v41 = vld [vmem:[%s8311_s1 + $0x6e4] ss:$16 sps:$4 sm:$0xff]   ;;  %v5860_v42 = vld [vmem:[%s8311_s1 + $0x6ec] ss:$16 sps:$4 sm:$0xff]  }
  0xa3   :  { %3831 = vmatpush1.bf16.msra.mxu0 %v5759_v43  ;;  %4308 = vmatpush1.bf16.msra.mxu1 %v5762_v44  ;;  %v5855_v43 = vld [vmem:[%s8311_s1 + $0x6e0] ss:$16 sps:$4 sm:$0xff]   ;;  %v5858_v44 = vld [vmem:[%s8311_s1 + $0x6e8] ss:$16 sps:$4 sm:$0xff]  }
  0xa4   :  { %3832 = vmatprep.subr.bf16.mxu0 %v5767_v45  ;;  %4309 = vmatprep.subr.bf16.mxu1 %v5770_v46  ;;  %v5863_v45 = vld [vmem:[%s8311_s1 + $0x704] ss:$16 sps:$4 sm:$0xff]   ;;  %v5866_v46 = vld [vmem:[%s8311_s1 + $0x70c] ss:$16 sps:$4 sm:$0xff]  }
  0xa7   :  { %3833 = vmatpush1.bf16.msra.mxu0 %v5765_v47  ;;  %4310 = vmatpush1.bf16.msra.mxu1 %v5768_v48  ;;  %v5861_v47 = vld [vmem:[%s8311_s1 + $0x700] ss:$16 sps:$4 sm:$0xff]   ;;  %v5864_v48 = vld [vmem:[%s8311_s1 + $0x708] ss:$16 sps:$4 sm:$0xff]  }
  0xa8   :  { %3834 = vmatprep.subr.bf16.mxu0 %v5773_v49  ;;  %4311 = vmatprep.subr.bf16.mxu1 %v5776_v50  ;;  %v5869_v49 = vld [vmem:[%s8311_s1 + $0x724] ss:$16 sps:$4 sm:$0xff]   ;;  %v5872_v50 = vld [vmem:[%s8311_s1 + $0x72c] ss:$16 sps:$4 sm:$0xff]  }
  0xab   :  { %3835 = vmatpush1.bf16.msra.mxu0 %v5771_v51  ;;  %4312 = vmatpush1.bf16.msra.mxu1 %v5774_v52  ;;  %v5867_v51 = vld [vmem:[%s8311_s1 + $0x720] ss:$16 sps:$4 sm:$0xff]   ;;  %v5870_v52 = vld [vmem:[%s8311_s1 + $0x728] ss:$16 sps:$4 sm:$0xff]  }
  0xac   :  { %3836 = vmatprep.subr.bf16.mxu0 %v5779_v53  ;;  %4313 = vmatprep.subr.bf16.mxu1 %v5782_v54  ;;  %v5875_v53 = vld [vmem:[%s8311_s1 + $0x744] ss:$16 sps:$4 sm:$0xff]   ;;  %v5878_v54 = vld [vmem:[%s8311_s1 + $0x74c] ss:$16 sps:$4 sm:$0xff]  }
  0xaf   :  { %3837 = vmatpush1.bf16.msra.mxu0 %v5777_v55  ;;  %4314 = vmatpush1.bf16.msra.mxu1 %v5780_v56  ;;  %v5873_v55 = vld [vmem:[%s8311_s1 + $0x740] ss:$16 sps:$4 sm:$0xff]   ;;  %v5876_v56 = vld [vmem:[%s8311_s1 + $0x748] ss:$16 sps:$4 sm:$0xff]  }
  0xb0   :  { %3838 = vmatprep.subr.bf16.mxu0 %v5785_v57  ;;  %4315 = vmatprep.subr.bf16.mxu1 %v5788_v58  ;;  %v5881_v57 = vld [vmem:[%s8311_s1 + $0x764] ss:$16 sps:$4 sm:$0xff]   ;;  %v5884_v58 = vld [vmem:[%s8311_s1 + $0x76c] ss:$16 sps:$4 sm:$0xff]  }
  0xb3   :  { %3839 = vmatpush1.bf16.msra.mxu0 %v5783_v59  ;;  %4316 = vmatpush1.bf16.msra.mxu1 %v5786_v60  ;;  %v5879_v59 = vld [vmem:[%s8311_s1 + $0x760] ss:$16 sps:$4 sm:$0xff]   ;;  %v5882_v60 = vld [vmem:[%s8311_s1 + $0x768] ss:$16 sps:$4 sm:$0xff]  }
  0xb4   :  { %3840 = vmatprep.subr.bf16.mxu0 %v5791_v61  ;;  %4317 = vmatprep.subr.bf16.mxu1 %v5794_v62  ;;  %v5887_v61 = vld [vmem:[%s8311_s1 + $0x784] ss:$16 sps:$4 sm:$0xff]   ;;  %v5890_v62 = vld [vmem:[%s8311_s1 + $0x78c] ss:$16 sps:$4 sm:$0xff]  }
  0xb7   :  { %3841 = vmatpush1.bf16.msra.mxu0 %v5789_v63  ;;  %4318 = vmatpush1.bf16.msra.mxu1 %v5792_v0  ;;  %v5885_v63 = vld [vmem:[%s8311_s1 + $0x780] ss:$16 sps:$4 sm:$0xff]   ;;  %v5888_v0 = vld [vmem:[%s8311_s1 + $0x788] ss:$16 sps:$4 sm:$0xff]  }
  0xb8   :  { %3842 = vmatprep.subr.bf16.mxu0 %v5799_v1  ;;  %4319 = vmatprep.subr.bf16.mxu1 %v5802_v2  ;;  %v5893_v1 = vld [vmem:[%s8311_s1 + $0x7a4] ss:$16 sps:$4 sm:$0xff]   ;;  %v5896_v2 = vld [vmem:[%s8311_s1 + $0x7ac] ss:$16 sps:$4 sm:$0xff]  }
  0xbb   :  { %3843 = vmatpush1.bf16.msra.mxu0 %v5797_v3  ;;  %4320 = vmatpush1.bf16.msra.mxu1 %v5800_v4  ;;  %v5891_v3 = vld [vmem:[%s8311_s1 + $0x7a0] ss:$16 sps:$4 sm:$0xff]   ;;  %v5894_v4 = vld [vmem:[%s8311_s1 + $0x7a8] ss:$16 sps:$4 sm:$0xff]  }
  0xbc   :  { %3844 = vmatprep.subr.bf16.mxu0 %v5806_v5  ;;  %4321 = vmatprep.subr.bf16.mxu1 %v5809_v6  ;;  %v5901_v5 = vld [vmem:[%s8311_s1 + $0x7c4] ss:$16 sps:$4 sm:$0xff]   ;;  %v5904_v6 = vld [vmem:[%s8311_s1 + $0x7cc] ss:$16 sps:$4 sm:$0xff]  }
  0xbf   :  { %3845 = vmatpush1.bf16.msra.mxu0 %v5804_v7  ;;  %4322 = vmatpush1.bf16.msra.mxu1 %v5807_v8  ;;  %v5899_v7 = vld [vmem:[%s8311_s1 + $0x7c0] ss:$16 sps:$4 sm:$0xff]   ;;  %v5902_v8 = vld [vmem:[%s8311_s1 + $0x7c8] ss:$16 sps:$4 sm:$0xff]  }
  0xc0   :  { %3867 = vmatprep.subr.bf16.mxu0 %v5815_v9  ;;  %4344 = vmatprep.subr.bf16.mxu1 %v5818_v10  ;;  %v5908_v9 = vld [vmem:[%s8311_s1 + $0x7e4] ss:$16 sps:$4 sm:$0xff]   ;;  %v5911_v10 = vld [vmem:[%s8311_s1 + $0x7ec] ss:$16 sps:$4 sm:$0xff]  }
  0xc2   :  { %3847 = vmatmul.mubr.bf16.vlgmr.msra.gmra.mrb[0].mxu0 %v5810_v11  ;;  %4324 = vmatmul.mubr.bf16.vlgmr.msra.gmra.mrb[0].mxu1 %v5810_v11  ;;  %v5906_v11 = vld [vmem:[%s8311_s1 + $0x7e0] ss:$16 sps:$4 sm:$0xff]  }
  0xc3   :  { %3868 = vmatpush1.bf16.msra.mxu0 %v5813_v12  ;;  %4345 = vmatpush1.bf16.msra.mxu1 %v5816_v13  ;;  %v5909_v12 = vld [vmem:[%s8311_s1 + $0x7e8] ss:$16 sps:$4 sm:$0xff]   ;;  %v5917_v13 = vld [vmem:[%s8311_s1 + $0x804] ss:$16 sps:$4 sm:$0xff]  }
  0xc4   :  { %3869 = vmatprep.subr.bf16.mxu0 %v5821_v14  ;;  %4346 = vmatprep.subr.bf16.mxu1 %v5824_v15  ;;  %v5920_v14 = vld [vmem:[%s8311_s1 + $0x80c] ss:$16 sps:$4 sm:$0xff]   ;;  %v5912_v15 = vld [vmem:[%s8312_s0 + $0x18] ss:$72 sps:$4 sm:$0xff]  }
  0xc5   :  { %3856 = vmatprep.mubr.bf16.mxu0 %v5897_v16  ;;  %4333 = vmatprep.mubr.bf16.mxu1 %v5897_v16  ;;  %v5915_v16 = vld [vmem:[%s8311_s1 + $0x800] ss:$16 sps:$4 sm:$0xff]  }
  0xc7   :  { %3870 = vmatpush1.bf16.msra.mxu0 %v5819_v17  ;;  %4347 = vmatpush1.bf16.msra.mxu1 %v5822_v18  ;;  %v5918_v17 = vld [vmem:[%s8311_s1 + $0x808] ss:$16 sps:$4 sm:$0xff]   ;;  %v5923_v18 = vld [vmem:[%s8311_s1 + $0x824] ss:$16 sps:$4 sm:$0xff]  }
  0xc8   :  { %3871 = vmatprep.subr.bf16.mxu0 %v5827_v19  ;;  %4348 = vmatprep.subr.bf16.mxu1 %v5830_v20  ;;  %v5926_v19 = vld [vmem:[%s8311_s1 + $0x82c] ss:$16 sps:$4 sm:$0xff]  }
  0xc9   :  { %v5999_v20 = vld [vmem:[%s8312_s0 + $0xac] ss:$72 sps:$4 sm:$0xff]  }
  0xca   :  { %3857 = vmatmul.mubr.bf16.gmra.mrb[4].mxu0 %v5905_v23  ;;  %4334 = vmatmul.mubr.bf16.gmra.mrb[4].mxu1 %v5905_v23  ;;  %v5929_v23 = vld [vmem:[%s8311_s1 + $0x844] ss:$16 sps:$4 sm:$0xff]  }
  0xcb   :  { %3872 = vmatpush1.bf16.msra.mxu0 %v5825_v21  ;;  %4349 = vmatpush1.bf16.msra.mxu1 %v5828_v22  ;;  %v5921_v21 = vld [vmem:[%s8311_s1 + $0x820] ss:$16 sps:$4 sm:$0xff]   ;;  %v5924_v22 = vld [vmem:[%s8311_s1 + $0x828] ss:$16 sps:$4 sm:$0xff]  }
  0xcc   :  { %3873 = vmatprep.subr.bf16.mxu0 %v5833_v24  ;;  %4350 = vmatprep.subr.bf16.mxu1 %v5836_v25  ;;  %v5932_v24 = vld [vmem:[%s8311_s1 + $0x84c] ss:$16 sps:$4 sm:$0xff]   ;;  %v5927_v25 = vld [vmem:[%s8311_s1 + $0x840] ss:$16 sps:$4 sm:$0xff]  }
  0xcd   :  { %3899 = vmatprep.mubr.bf16.mxu0 %v5914_v26  ;;  %4376 = vmatprep.mubr.bf16.mxu1 %v5914_v26  ;;  %v6007_v26 = vld [vmem:[%s8312_s0 + $0xa8] ss:$72 sps:$4 sm:$0xff]  }
  0xcf   :  { %3874 = vmatpush1.bf16.msra.mxu0 %v5831_v27  ;;  %4351 = vmatpush1.bf16.msra.mxu1 %v5834_v28  ;;  %v5930_v27 = vld [vmem:[%s8311_s1 + $0x848] ss:$16 sps:$4 sm:$0xff]   ;;  %v5935_v28 = vld [vmem:[%s8311_s1 + $0x864] ss:$16 sps:$4 sm:$0xff]  }
  0xd0   :  { %3875 = vmatprep.subr.bf16.mxu0 %v5839_v29  ;;  %4352 = vmatprep.subr.bf16.mxu1 %v5842_v30  ;;  %v5938_v29 = vld [vmem:[%s8311_s1 + $0x86c] ss:$16 sps:$4 sm:$0xff]  }
  0xd1   :  { %v6016_v30 = vld [vmem:[%s8312_s0 + $0x24] ss:$72 sps:$4 sm:$0xff]  }
  0xd3   :  { %3876 = vmatpush1.bf16.msra.mxu0 %v5837_v31  ;;  %4353 = vmatpush1.bf16.msra.mxu1 %v5840_v32  ;;  %v5933_v31 = vld [vmem:[%s8311_s1 + $0x860] ss:$16 sps:$4 sm:$0xff]   ;;  %v5936_v32 = vld [vmem:[%s8311_s1 + $0x868] ss:$16 sps:$4 sm:$0xff]  }
  0xd4   :  { %3877 = vmatprep.subr.bf16.mxu0 %v5845_v33  ;;  %4354 = vmatprep.subr.bf16.mxu1 %v5848_v34  ;;  %v5941_v33 = vld [vmem:[%s8311_s1 + $0x884] ss:$16 sps:$4 sm:$0xff]   ;;  %v5944_v34 = vld [vmem:[%s8311_s1 + $0x88c] ss:$16 sps:$4 sm:$0xff]  }
  0xd7   :  { %3878 = vmatpush1.bf16.msra.mxu0 %v5843_v35  ;;  %4355 = vmatpush1.bf16.msra.mxu1 %v5846_v36  ;;  %v5939_v35 = vld [vmem:[%s8311_s1 + $0x880] ss:$16 sps:$4 sm:$0xff]   ;;  %v5942_v36 = vld [vmem:[%s8311_s1 + $0x888] ss:$16 sps:$4 sm:$0xff]  }
  0xd8   :  { %3879 = vmatprep.subr.bf16.mxu0 %v5851_v37  ;;  %4356 = vmatprep.subr.bf16.mxu1 %v5854_v38  ;;  %v5947_v37 = vld [vmem:[%s8311_s1 + $0x8a4] ss:$16 sps:$4 sm:$0xff]   ;;  %v5950_v38 = vld [vmem:[%s8311_s1 + $0x8ac] ss:$16 sps:$4 sm:$0xff]  }
  0xdb   :  { %3880 = vmatpush1.bf16.msra.mxu0 %v5849_v39  ;;  %4357 = vmatpush1.bf16.msra.mxu1 %v5852_v40  ;;  %v5945_v39 = vld [vmem:[%s8311_s1 + $0x8a0] ss:$16 sps:$4 sm:$0xff]   ;;  %v5948_v40 = vld [vmem:[%s8311_s1 + $0x8a8] ss:$16 sps:$4 sm:$0xff]  }
  0xdc   :  { %3881 = vmatprep.subr.bf16.mxu0 %v5857_v41  ;;  %4358 = vmatprep.subr.bf16.mxu1 %v5860_v42  ;;  %v5953_v41 = vld [vmem:[%s8311_s1 + $0x8c4] ss:$16 sps:$4 sm:$0xff]   ;;  %v5956_v42 = vld [vmem:[%s8311_s1 + $0x8cc] ss:$16 sps:$4 sm:$0xff]  }
  0xdf   :  { %3882 = vmatpush1.bf16.msra.mxu0 %v5855_v43  ;;  %4359 = vmatpush1.bf16.msra.mxu1 %v5858_v44  ;;  %v5951_v43 = vld [vmem:[%s8311_s1 + $0x8c0] ss:$16 sps:$4 sm:$0xff]   ;;  %v5954_v44 = vld [vmem:[%s8311_s1 + $0x8c8] ss:$16 sps:$4 sm:$0xff]  }
  0xe0   :  { %3883 = vmatprep.subr.bf16.mxu0 %v5863_v45  ;;  %4360 = vmatprep.subr.bf16.mxu1 %v5866_v46  ;;  %v5959_v45 = vld [vmem:[%s8311_s1 + $0x8e4] ss:$16 sps:$4 sm:$0xff]   ;;  %v5962_v46 = vld [vmem:[%s8311_s1 + $0x8ec] ss:$16 sps:$4 sm:$0xff]  }
  0xe3   :  { %3884 = vmatpush1.bf16.msra.mxu0 %v5861_v47  ;;  %4361 = vmatpush1.bf16.msra.mxu1 %v5864_v48  ;;  %v5957_v47 = vld [vmem:[%s8311_s1 + $0x8e0] ss:$16 sps:$4 sm:$0xff]   ;;  %v5960_v48 = vld [vmem:[%s8311_s1 + $0x8e8] ss:$16 sps:$4 sm:$0xff]  }
  0xe4   :  { %3885 = vmatprep.subr.bf16.mxu0 %v5869_v49  ;;  %4362 = vmatprep.subr.bf16.mxu1 %v5872_v50  ;;  %v5965_v49 = vld [vmem:[%s8311_s1 + $0x904] ss:$16 sps:$4 sm:$0xff]   ;;  %v5968_v50 = vld [vmem:[%s8311_s1 + $0x90c] ss:$16 sps:$4 sm:$0xff]  }
  0xe7   :  { %3886 = vmatpush1.bf16.msra.mxu0 %v5867_v51  ;;  %4363 = vmatpush1.bf16.msra.mxu1 %v5870_v52  ;;  %v5963_v51 = vld [vmem:[%s8311_s1 + $0x900] ss:$16 sps:$4 sm:$0xff]   ;;  %v5966_v52 = vld [vmem:[%s8311_s1 + $0x908] ss:$16 sps:$4 sm:$0xff]  }
  0xe8   :  { %3887 = vmatprep.subr.bf16.mxu0 %v5875_v53  ;;  %4364 = vmatprep.subr.bf16.mxu1 %v5878_v54  ;;  %v5971_v53 = vld [vmem:[%s8311_s1 + $0x924] ss:$16 sps:$4 sm:$0xff]   ;;  %v5974_v54 = vld [vmem:[%s8311_s1 + $0x92c] ss:$16 sps:$4 sm:$0xff]  }
  0xeb   :  { %3888 = vmatpush1.bf16.msra.mxu0 %v5873_v55  ;;  %4365 = vmatpush1.bf16.msra.mxu1 %v5876_v56  ;;  %v5969_v55 = vld [vmem:[%s8311_s1 + $0x920] ss:$16 sps:$4 sm:$0xff]   ;;  %v5972_v56 = vld [vmem:[%s8311_s1 + $0x928] ss:$16 sps:$4 sm:$0xff]  }
  0xec   :  { %3889 = vmatprep.subr.bf16.mxu0 %v5881_v57  ;;  %4366 = vmatprep.subr.bf16.mxu1 %v5884_v58  ;;  %v5977_v57 = vld [vmem:[%s8311_s1 + $0x944] ss:$16 sps:$4 sm:$0xff]   ;;  %v5980_v58 = vld [vmem:[%s8311_s1 + $0x94c] ss:$16 sps:$4 sm:$0xff]  }
  0xef   :  { %3890 = vmatpush1.bf16.msra.mxu0 %v5879_v59  ;;  %4367 = vmatpush1.bf16.msra.mxu1 %v5882_v60  ;;  %v5975_v59 = vld [vmem:[%s8311_s1 + $0x940] ss:$16 sps:$4 sm:$0xff]   ;;  %v5978_v60 = vld [vmem:[%s8311_s1 + $0x948] ss:$16 sps:$4 sm:$0xff]  }
  0xf0   :  { %3891 = vmatprep.subr.bf16.mxu0 %v5887_v61  ;;  %4368 = vmatprep.subr.bf16.mxu1 %v5890_v62  ;;  %v5983_v61 = vld [vmem:[%s8311_s1 + $0x964] ss:$16 sps:$4 sm:$0xff]   ;;  %v5986_v62 = vld [vmem:[%s8311_s1 + $0x96c] ss:$16 sps:$4 sm:$0xff]  }
  0xf3   :  { %3892 = vmatpush1.bf16.msra.mxu0 %v5885_v63  ;;  %4369 = vmatpush1.bf16.msra.mxu1 %v5888_v0  ;;  %v5981_v63 = vld [vmem:[%s8311_s1 + $0x960] ss:$16 sps:$4 sm:$0xff]   ;;  %v5984_v0 = vld [vmem:[%s8311_s1 + $0x968] ss:$16 sps:$4 sm:$0xff]  }
  0xf4   :  { %3893 = vmatprep.subr.bf16.mxu0 %v5893_v1  ;;  %4370 = vmatprep.subr.bf16.mxu1 %v5896_v2  ;;  %v5989_v1 = vld [vmem:[%s8311_s1 + $0x984] ss:$16 sps:$4 sm:$0xff]   ;;  %v5992_v2 = vld [vmem:[%s8311_s1 + $0x98c] ss:$16 sps:$4 sm:$0xff]  }
  0xf7   :  { %3894 = vmatpush1.bf16.msra.mxu0 %v5891_v3  ;;  %4371 = vmatpush1.bf16.msra.mxu1 %v5894_v4  ;;  %v5987_v3 = vld [vmem:[%s8311_s1 + $0x980] ss:$16 sps:$4 sm:$0xff]   ;;  %v5990_v4 = vld [vmem:[%s8311_s1 + $0x988] ss:$16 sps:$4 sm:$0xff]  }
  0xf8   :  { %3895 = vmatprep.subr.bf16.mxu0 %v5901_v5  ;;  %4372 = vmatprep.subr.bf16.mxu1 %v5904_v6  ;;  %v5995_v5 = vld [vmem:[%s8311_s1 + $0x9a4] ss:$16 sps:$4 sm:$0xff]   ;;  %v5998_v6 = vld [vmem:[%s8311_s1 + $0x9ac] ss:$16 sps:$4 sm:$0xff]  }
  0xfb   :  { %3896 = vmatpush1.bf16.msra.mxu0 %v5899_v7  ;;  %4373 = vmatpush1.bf16.msra.mxu1 %v5902_v8  ;;  %v5993_v7 = vld [vmem:[%s8311_s1 + $0x9a0] ss:$16 sps:$4 sm:$0xff]   ;;  %v5996_v8 = vld [vmem:[%s8311_s1 + $0x9a8] ss:$16 sps:$4 sm:$0xff]  }
  0xfc   :  { %3897 = vmatprep.subr.bf16.mxu0 %v5908_v9  ;;  %4374 = vmatprep.subr.bf16.mxu1 %v5911_v10  ;;  %v6003_v9 = vld [vmem:[%s8311_s1 + $0x9c4] ss:$16 sps:$4 sm:$0xff]   ;;  %v6006_v10 = vld [vmem:[%s8311_s1 + $0x9cc] ss:$16 sps:$4 sm:$0xff]  }
  0xff   :  { %3898 = vmatpush1.bf16.msra.mxu0 %v5906_v11  ;;  %4375 = vmatpush1.bf16.msra.mxu1 %v5909_v12  ;;  %v6001_v11 = vld [vmem:[%s8311_s1 + $0x9c0] ss:$16 sps:$4 sm:$0xff]   ;;  %v6004_v12 = vld [vmem:[%s8311_s1 + $0x9c8] ss:$16 sps:$4 sm:$0xff]  }
 0x100   :  { %3920 = vmatprep.subr.bf16.mxu0 %v5917_v13  ;;  %4397 = vmatprep.subr.bf16.mxu1 %v5920_v14  ;;  %v6010_v13 = vld [vmem:[%s8311_s1 + $0x9e4] ss:$16 sps:$4 sm:$0xff]   ;;  %v6013_v14 = vld [vmem:[%s8311_s1 + $0x9ec] ss:$16 sps:$4 sm:$0xff]  }
 0x102   :  { %3900 = vmatmul.mubr.bf16.vlgmr.msra.gmra.mrb[0].mxu0 %v5912_v15  ;;  %4377 = vmatmul.mubr.bf16.vlgmr.msra.gmra.mrb[0].mxu1 %v5912_v15  ;;  %v6008_v15 = vld [vmem:[%s8311_s1 + $0x9e0] ss:$16 sps:$4 sm:$0xff]  }
 0x103   :  { %3921 = vmatpush1.bf16.msra.mxu0 %v5915_v16  ;;  %4398 = vmatpush1.bf16.msra.mxu1 %v5918_v17  ;;  %v6011_v16 = vld [vmem:[%s8311_s1 + $0x9e8] ss:$16 sps:$4 sm:$0xff]  }
 0x104   :  { %3922 = vmatprep.subr.bf16.mxu0 %v5923_v18  ;;  %4399 = vmatprep.subr.bf16.mxu1 %v5926_v19  ;;  %v6014_v17 = vld [vmem:[%s8312_s0 + $0x20] ss:$72 sps:$4 sm:$0xff]   ;;  %v6019_v18 = vld [vmem:[%s8311_s1 + $0xa04] ss:$16 sps:$4 sm:$0xff]   ;;  %v6022_v19 = vld [vmem:[%s8311_s1 + $0xa0c] ss:$16 sps:$4 sm:$0xff]  }
 0x105   :  { %3909 = vmatprep.mubr.bf16.mxu0 %v5999_v20  ;;  %4386 = vmatprep.mubr.bf16.mxu1 %v5999_v20  ;;  %v6017_v20 = vld [vmem:[%s8311_s1 + $0xa00] ss:$16 sps:$4 sm:$0xff]  }
 0x107   :  { %3923 = vmatpush1.bf16.msra.mxu0 %v5921_v21  ;;  %4400 = vmatpush1.bf16.msra.mxu1 %v5924_v22  ;;  %v6020_v21 = vld [vmem:[%s8311_s1 + $0xa08] ss:$16 sps:$4 sm:$0xff]   ;;  %v6025_v22 = vld [vmem:[%s8311_s1 + $0xa24] ss:$16 sps:$4 sm:$0xff]  }
 0x108   :  { %3924 = vmatprep.subr.bf16.mxu0 %v5929_v23  ;;  %4401 = vmatprep.subr.bf16.mxu1 %v5932_v24  ;;  %v6028_v23 = vld [vmem:[%s8311_s1 + $0xa2c] ss:$16 sps:$4 sm:$0xff]  }
 0x109   :  { %v6101_v24 = vld [vmem:[%s8312_s0 + $0xb4] ss:$72 sps:$4 sm:$0xff]  }
 0x10a   :  { %3910 = vmatmul.mubr.bf16.gmra.mrb[4].mxu0 %v6007_v26  ;;  %4387 = vmatmul.mubr.bf16.gmra.mrb[4].mxu1 %v6007_v26  ;;  %v6026_v26 = vld [vmem:[%s8311_s1 + $0xa28] ss:$16 sps:$4 sm:$0xff]  }
 0x10b   :  { %3925 = vmatpush1.bf16.msra.mxu0 %v5927_v25  ;;  %4402 = vmatpush1.bf16.msra.mxu1 %v5930_v27  ;;  %v6023_v25 = vld [vmem:[%s8311_s1 + $0xa20] ss:$16 sps:$4 sm:$0xff]   ;;  %v6031_v27 = vld [vmem:[%s8311_s1 + $0xa44] ss:$16 sps:$4 sm:$0xff]  }
 0x10c   :  { %3926 = vmatprep.subr.bf16.mxu0 %v5935_v28  ;;  %4403 = vmatprep.subr.bf16.mxu1 %v5938_v29  ;;  %v6034_v28 = vld [vmem:[%s8311_s1 + $0xa4c] ss:$16 sps:$4 sm:$0xff]   ;;  %v6109_v29 = vld [vmem:[%s8312_s0 + $0xb0] ss:$72 sps:$4 sm:$0xff]  }
 0x10d   :  { %3952 = vmatprep.mubr.bf16.mxu0 %v6016_v30  ;;  %4429 = vmatprep.mubr.bf16.mxu1 %v6016_v30  ;;  %v6029_v30 = vld [vmem:[%s8311_s1 + $0xa40] ss:$16 sps:$4 sm:$0xff]  }
 0x10f   :  { %3927 = vmatpush1.bf16.msra.mxu0 %v5933_v31  ;;  %4404 = vmatpush1.bf16.msra.mxu1 %v5936_v32  ;;  %v6032_v31 = vld [vmem:[%s8311_s1 + $0xa48] ss:$16 sps:$4 sm:$0xff]   ;;  %v6037_v32 = vld [vmem:[%s8311_s1 + $0xa64] ss:$16 sps:$4 sm:$0xff]  }
 0x110   :  { %3928 = vmatprep.subr.bf16.mxu0 %v5941_v33  ;;  %4405 = vmatprep.subr.bf16.mxu1 %v5944_v34  ;;  %v6040_v33 = vld [vmem:[%s8311_s1 + $0xa6c] ss:$16 sps:$4 sm:$0xff]  }
 0x111   :  { %v6118_v34 = vld [vmem:[%s8312_s0 + $0x2c] ss:$72 sps:$4 sm:$0xff]  }
 0x113   :  { %3929 = vmatpush1.bf16.msra.mxu0 %v5939_v35  ;;  %4406 = vmatpush1.bf16.msra.mxu1 %v5942_v36  ;;  %v6035_v35 = vld [vmem:[%s8311_s1 + $0xa60] ss:$16 sps:$4 sm:$0xff]   ;;  %v6038_v36 = vld [vmem:[%s8311_s1 + $0xa68] ss:$16 sps:$4 sm:$0xff]  }
 0x114   :  { %3930 = vmatprep.subr.bf16.mxu0 %v5947_v37  ;;  %4407 = vmatprep.subr.bf16.mxu1 %v5950_v38  ;;  %v6043_v37 = vld [vmem:[%s8311_s1 + $0xa84] ss:$16 sps:$4 sm:$0xff]   ;;  %v6046_v38 = vld [vmem:[%s8311_s1 + $0xa8c] ss:$16 sps:$4 sm:$0xff]  }
 0x117   :  { %3931 = vmatpush1.bf16.msra.mxu0 %v5945_v39  ;;  %4408 = vmatpush1.bf16.msra.mxu1 %v5948_v40  ;;  %v6041_v39 = vld [vmem:[%s8311_s1 + $0xa80] ss:$16 sps:$4 sm:$0xff]   ;;  %v6044_v40 = vld [vmem:[%s8311_s1 + $0xa88] ss:$16 sps:$4 sm:$0xff]  }
 0x118   :  { %3932 = vmatprep.subr.bf16.mxu0 %v5953_v41  ;;  %4409 = vmatprep.subr.bf16.mxu1 %v5956_v42  ;;  %v6049_v41 = vld [vmem:[%s8311_s1 + $0xaa4] ss:$16 sps:$4 sm:$0xff]   ;;  %v6052_v42 = vld [vmem:[%s8311_s1 + $0xaac] ss:$16 sps:$4 sm:$0xff]  }
 0x11b   :  { %3933 = vmatpush1.bf16.msra.mxu0 %v5951_v43  ;;  %4410 = vmatpush1.bf16.msra.mxu1 %v5954_v44  ;;  %v6047_v43 = vld [vmem:[%s8311_s1 + $0xaa0] ss:$16 sps:$4 sm:$0xff]   ;;  %v6050_v44 = vld [vmem:[%s8311_s1 + $0xaa8] ss:$16 sps:$4 sm:$0xff]  }
 0x11c   :  { %3934 = vmatprep.subr.bf16.mxu0 %v5959_v45  ;;  %4411 = vmatprep.subr.bf16.mxu1 %v5962_v46  ;;  %v6055_v45 = vld [vmem:[%s8311_s1 + $0xac4] ss:$16 sps:$4 sm:$0xff]   ;;  %v6058_v46 = vld [vmem:[%s8311_s1 + $0xacc] ss:$16 sps:$4 sm:$0xff]  }
 0x11f   :  { %3935 = vmatpush1.bf16.msra.mxu0 %v5957_v47  ;;  %4412 = vmatpush1.bf16.msra.mxu1 %v5960_v48  ;;  %v6053_v47 = vld [vmem:[%s8311_s1 + $0xac0] ss:$16 sps:$4 sm:$0xff]   ;;  %v6056_v48 = vld [vmem:[%s8311_s1 + $0xac8] ss:$16 sps:$4 sm:$0xff]  }
 0x120   :  { %3936 = vmatprep.subr.bf16.mxu0 %v5965_v49  ;;  %4413 = vmatprep.subr.bf16.mxu1 %v5968_v50  ;;  %v6061_v49 = vld [vmem:[%s8311_s1 + $0xae4] ss:$16 sps:$4 sm:$0xff]   ;;  %v6064_v50 = vld [vmem:[%s8311_s1 + $0xaec] ss:$16 sps:$4 sm:$0xff]  }
 0x123   :  { %3937 = vmatpush1.bf16.msra.mxu0 %v5963_v51  ;;  %4414 = vmatpush1.bf16.msra.mxu1 %v5966_v52  ;;  %v6059_v51 = vld [vmem:[%s8311_s1 + $0xae0] ss:$16 sps:$4 sm:$0xff]   ;;  %v6062_v52 = vld [vmem:[%s8311_s1 + $0xae8] ss:$16 sps:$4 sm:$0xff]  }
 0x124   :  { %3938 = vmatprep.subr.bf16.mxu0 %v5971_v53  ;;  %4415 = vmatprep.subr.bf16.mxu1 %v5974_v54  ;;  %v6067_v53 = vld [vmem:[%s8311_s1 + $0xb04] ss:$16 sps:$4 sm:$0xff]   ;;  %v6070_v54 = vld [vmem:[%s8311_s1 + $0xb0c] ss:$16 sps:$4 sm:$0xff]  }
 0x127   :  { %3939 = vmatpush1.bf16.msra.mxu0 %v5969_v55  ;;  %4416 = vmatpush1.bf16.msra.mxu1 %v5972_v56  ;;  %v6065_v55 = vld [vmem:[%s8311_s1 + $0xb00] ss:$16 sps:$4 sm:$0xff]   ;;  %v6068_v56 = vld [vmem:[%s8311_s1 + $0xb08] ss:$16 sps:$4 sm:$0xff]  }
 0x128   :  { %3940 = vmatprep.subr.bf16.mxu0 %v5977_v57  ;;  %4417 = vmatprep.subr.bf16.mxu1 %v5980_v58  ;;  %v6073_v57 = vld [vmem:[%s8311_s1 + $0xb24] ss:$16 sps:$4 sm:$0xff]   ;;  %v6076_v58 = vld [vmem:[%s8311_s1 + $0xb2c] ss:$16 sps:$4 sm:$0xff]  }
 0x12b   :  { %3941 = vmatpush1.bf16.msra.mxu0 %v5975_v59  ;;  %4418 = vmatpush1.bf16.msra.mxu1 %v5978_v60  ;;  %v6071_v59 = vld [vmem:[%s8311_s1 + $0xb20] ss:$16 sps:$4 sm:$0xff]   ;;  %v6074_v60 = vld [vmem:[%s8311_s1 + $0xb28] ss:$16 sps:$4 sm:$0xff]  }
 0x12c   :  { %3942 = vmatprep.subr.bf16.mxu0 %v5983_v61  ;;  %4419 = vmatprep.subr.bf16.mxu1 %v5986_v62  ;;  %v6079_v61 = vld [vmem:[%s8311_s1 + $0xb44] ss:$16 sps:$4 sm:$0xff]   ;;  %v6082_v62 = vld [vmem:[%s8311_s1 + $0xb4c] ss:$16 sps:$4 sm:$0xff]  }
 0x12f   :  { %3943 = vmatpush1.bf16.msra.mxu0 %v5981_v63  ;;  %4420 = vmatpush1.bf16.msra.mxu1 %v5984_v0  ;;  %v6077_v63 = vld [vmem:[%s8311_s1 + $0xb40] ss:$16 sps:$4 sm:$0xff]   ;;  %v6080_v0 = vld [vmem:[%s8311_s1 + $0xb48] ss:$16 sps:$4 sm:$0xff]  }
 0x130   :  { %3944 = vmatprep.subr.bf16.mxu0 %v5989_v1  ;;  %4421 = vmatprep.subr.bf16.mxu1 %v5992_v2  ;;  %v6085_v1 = vld [vmem:[%s8311_s1 + $0xb64] ss:$16 sps:$4 sm:$0xff]   ;;  %v6088_v2 = vld [vmem:[%s8311_s1 + $0xb6c] ss:$16 sps:$4 sm:$0xff]  }
 0x133   :  { %3945 = vmatpush1.bf16.msra.mxu0 %v5987_v3  ;;  %4422 = vmatpush1.bf16.msra.mxu1 %v5990_v4  ;;  %v6083_v3 = vld [vmem:[%s8311_s1 + $0xb60] ss:$16 sps:$4 sm:$0xff]   ;;  %v6086_v4 = vld [vmem:[%s8311_s1 + $0xb68] ss:$16 sps:$4 sm:$0xff]  }
 0x134   :  { %3946 = vmatprep.subr.bf16.mxu0 %v5995_v5  ;;  %4423 = vmatprep.subr.bf16.mxu1 %v5998_v6  ;;  %v6091_v5 = vld [vmem:[%s8311_s1 + $0xb84] ss:$16 sps:$4 sm:$0xff]   ;;  %v6094_v6 = vld [vmem:[%s8311_s1 + $0xb8c] ss:$16 sps:$4 sm:$0xff]  }
 0x137   :  { %3947 = vmatpush1.bf16.msra.mxu0 %v5993_v7  ;;  %4424 = vmatpush1.bf16.msra.mxu1 %v5996_v8  ;;  %v6089_v7 = vld [vmem:[%s8311_s1 + $0xb80] ss:$16 sps:$4 sm:$0xff]   ;;  %v6092_v8 = vld [vmem:[%s8311_s1 + $0xb88] ss:$16 sps:$4 sm:$0xff]  }
 0x138   :  { %3948 = vmatprep.subr.bf16.mxu0 %v6003_v9  ;;  %4425 = vmatprep.subr.bf16.mxu1 %v6006_v10  ;;  %v6097_v9 = vld [vmem:[%s8311_s1 + $0xba4] ss:$16 sps:$4 sm:$0xff]   ;;  %v6100_v10 = vld [vmem:[%s8311_s1 + $0xbac] ss:$16 sps:$4 sm:$0xff]  }
 0x13b   :  { %3949 = vmatpush1.bf16.msra.mxu0 %v6001_v11  ;;  %4426 = vmatpush1.bf16.msra.mxu1 %v6004_v12  ;;  %v6095_v11 = vld [vmem:[%s8311_s1 + $0xba0] ss:$16 sps:$4 sm:$0xff]   ;;  %v6098_v12 = vld [vmem:[%s8311_s1 + $0xba8] ss:$16 sps:$4 sm:$0xff]  }
 0x13c   :  { %3950 = vmatprep.subr.bf16.mxu0 %v6010_v13  ;;  %4427 = vmatprep.subr.bf16.mxu1 %v6013_v14  ;;  %v6105_v13 = vld [vmem:[%s8311_s1 + $0xbc4] ss:$16 sps:$4 sm:$0xff]   ;;  %v6108_v14 = vld [vmem:[%s8311_s1 + $0xbcc] ss:$16 sps:$4 sm:$0xff]  }
 0x13f   :  { %3951 = vmatpush1.bf16.msra.mxu0 %v6008_v15  ;;  %4428 = vmatpush1.bf16.msra.mxu1 %v6011_v16  ;;  %v6103_v15 = vld [vmem:[%s8311_s1 + $0xbc0] ss:$16 sps:$4 sm:$0xff]   ;;  %v6106_v16 = vld [vmem:[%s8311_s1 + $0xbc8] ss:$16 sps:$4 sm:$0xff]  }
 0x140   :  { %3973 = vmatprep.subr.bf16.mxu0 %v6019_v18  ;;  %4450 = vmatprep.subr.bf16.mxu1 %v6022_v19  ;;  %v6115_v18 = vld [vmem:[%s8311_s1 + $0xbec] ss:$16 sps:$4 sm:$0xff]   ;;  %v6110_v19 = vld [vmem:[%s8311_s1 + $0xbe0] ss:$16 sps:$4 sm:$0xff]  }
 0x142   :  { %3953 = vmatmul.mubr.bf16.vlgmr.msra.gmra.mrb[0].mxu0 %v6014_v17  ;;  %4430 = vmatmul.mubr.bf16.vlgmr.msra.gmra.mrb[0].mxu1 %v6014_v17  ;;  %v6112_v17 = vld [vmem:[%s8311_s1 + $0xbe4] ss:$16 sps:$4 sm:$0xff]  }
 0x143   :  { %3974 = vmatpush1.bf16.msra.mxu0 %v6017_v20  ;;  %4451 = vmatpush1.bf16.msra.mxu1 %v6020_v21  ;;  %v6113_v20 = vld [vmem:[%s8311_s1 + $0xbe8] ss:$16 sps:$4 sm:$0xff]  }
 0x144   :  { %3975 = vmatprep.subr.bf16.mxu0 %v6025_v22  ;;  %4452 = vmatprep.subr.bf16.mxu1 %v6028_v23  ;;  %v6116_v21 = vld [vmem:[%s8312_s0 + $0x28] ss:$72 sps:$4 sm:$0xff]   ;;  %v6121_v22 = vld [vmem:[%s8311_s1 + $0xc04] ss:$16 sps:$4 sm:$0xff]   ;;  %v6124_v23 = vld [vmem:[%s8311_s1 + $0xc0c] ss:$16 sps:$4 sm:$0xff]  }
 0x145   :  { %3962 = vmatprep.mubr.bf16.mxu0 %v6101_v24  ;;  %4439 = vmatprep.mubr.bf16.mxu1 %v6101_v24  ;;  %v6119_v24 = vld [vmem:[%s8311_s1 + $0xc00] ss:$16 sps:$4 sm:$0xff]  }
 0x147   :  { %3976 = vmatpush1.bf16.msra.mxu0 %v6023_v25  ;;  %4453 = vmatpush1.bf16.msra.mxu1 %v6026_v26  ;;  %v6122_v25 = vld [vmem:[%s8311_s1 + $0xc08] ss:$16 sps:$4 sm:$0xff]   ;;  %v6127_v26 = vld [vmem:[%s8311_s1 + $0xc24] ss:$16 sps:$4 sm:$0xff]  }
 0x148   :  { %3977 = vmatprep.subr.bf16.mxu0 %v6031_v27  ;;  %4454 = vmatprep.subr.bf16.mxu1 %v6034_v28  ;;  %v6130_v27 = vld [vmem:[%s8311_s1 + $0xc2c] ss:$16 sps:$4 sm:$0xff]  }
 0x149   :  { %v6203_v28 = vld [vmem:[%s8312_s0 + $0xbc] ss:$72 sps:$4 sm:$0xff]  }
 0x14a   :  { %3963 = vmatmul.mubr.bf16.gmra.mrb[4].mxu0 %v6109_v29  ;;  %4440 = vmatmul.mubr.bf16.gmra.mrb[4].mxu1 %v6109_v29  ;;  %v6125_v29 = vld [vmem:[%s8311_s1 + $0xc20] ss:$16 sps:$4 sm:$0xff]  }
 0x14b   :  { %3978 = vmatpush1.bf16.msra.mxu0 %v6029_v30  ;;  %4455 = vmatpush1.bf16.msra.mxu1 %v6032_v31  ;;  %v6128_v30 = vld [vmem:[%s8311_s1 + $0xc28] ss:$16 sps:$4 sm:$0xff]   ;;  %v6133_v31 = vld [vmem:[%s8311_s1 + $0xc44] ss:$16 sps:$4 sm:$0xff]  }
 0x14c   :  { %3979 = vmatprep.subr.bf16.mxu0 %v6037_v32  ;;  %4456 = vmatprep.subr.bf16.mxu1 %v6040_v33  ;;  %v6136_v32 = vld [vmem:[%s8311_s1 + $0xc4c] ss:$16 sps:$4 sm:$0xff]   ;;  %v6211_v33 = vld [vmem:[%s8312_s0 + $0xb8] ss:$72 sps:$4 sm:$0xff]  }
 0x14d   :  { %4005 = vmatprep.mubr.bf16.mxu0 %v6118_v34  ;;  %4482 = vmatprep.mubr.bf16.mxu1 %v6118_v34  ;;  %v6131_v34 = vld [vmem:[%s8311_s1 + $0xc40] ss:$16 sps:$4 sm:$0xff]  }
 0x14f   :  { %3980 = vmatpush1.bf16.msra.mxu0 %v6035_v35  ;;  %4457 = vmatpush1.bf16.msra.mxu1 %v6038_v36  ;;  %v6134_v35 = vld [vmem:[%s8311_s1 + $0xc48] ss:$16 sps:$4 sm:$0xff]   ;;  %v6139_v36 = vld [vmem:[%s8311_s1 + $0xc64] ss:$16 sps:$4 sm:$0xff]  }
 0x150   :  { %3981 = vmatprep.subr.bf16.mxu0 %v6043_v37  ;;  %4458 = vmatprep.subr.bf16.mxu1 %v6046_v38  ;;  %v6142_v37 = vld [vmem:[%s8311_s1 + $0xc6c] ss:$16 sps:$4 sm:$0xff]  }
 0x151   :  { %v6220_v38 = vld [vmem:[%s8312_s0 + $0x34] ss:$72 sps:$4 sm:$0xff]  }
 0x153   :  { %3982 = vmatpush1.bf16.msra.mxu0 %v6041_v39  ;;  %4459 = vmatpush1.bf16.msra.mxu1 %v6044_v40  ;;  %v6137_v39 = vld [vmem:[%s8311_s1 + $0xc60] ss:$16 sps:$4 sm:$0xff]   ;;  %v6140_v40 = vld [vmem:[%s8311_s1 + $0xc68] ss:$16 sps:$4 sm:$0xff]  }
 0x154   :  { %3983 = vmatprep.subr.bf16.mxu0 %v6049_v41  ;;  %4460 = vmatprep.subr.bf16.mxu1 %v6052_v42  ;;  %v6145_v41 = vld [vmem:[%s8311_s1 + $0xc84] ss:$16 sps:$4 sm:$0xff]   ;;  %v6148_v42 = vld [vmem:[%s8311_s1 + $0xc8c] ss:$16 sps:$4 sm:$0xff]  }
 0x157   :  { %3984 = vmatpush1.bf16.msra.mxu0 %v6047_v43  ;;  %4461 = vmatpush1.bf16.msra.mxu1 %v6050_v44  ;;  %v6143_v43 = vld [vmem:[%s8311_s1 + $0xc80] ss:$16 sps:$4 sm:$0xff]   ;;  %v6146_v44 = vld [vmem:[%s8311_s1 + $0xc88] ss:$16 sps:$4 sm:$0xff]  }
 0x158   :  { %3985 = vmatprep.subr.bf16.mxu0 %v6055_v45  ;;  %4462 = vmatprep.subr.bf16.mxu1 %v6058_v46  ;;  %v6151_v45 = vld [vmem:[%s8311_s1 + $0xca4] ss:$16 sps:$4 sm:$0xff]   ;;  %v6154_v46 = vld [vmem:[%s8311_s1 + $0xcac] ss:$16 sps:$4 sm:$0xff]  }
 0x15b   :  { %3986 = vmatpush1.bf16.msra.mxu0 %v6053_v47  ;;  %4463 = vmatpush1.bf16.msra.mxu1 %v6056_v48  ;;  %v6149_v47 = vld [vmem:[%s8311_s1 + $0xca0] ss:$16 sps:$4 sm:$0xff]   ;;  %v6152_v48 = vld [vmem:[%s8311_s1 + $0xca8] ss:$16 sps:$4 sm:$0xff]  }
 0x15c   :  { %3987 = vmatprep.subr.bf16.mxu0 %v6061_v49  ;;  %4464 = vmatprep.subr.bf16.mxu1 %v6064_v50  ;;  %v6157_v49 = vld [vmem:[%s8311_s1 + $0xcc4] ss:$16 sps:$4 sm:$0xff]   ;;  %v6160_v50 = vld [vmem:[%s8311_s1 + $0xccc] ss:$16 sps:$4 sm:$0xff]  }
 0x15f   :  { %3988 = vmatpush1.bf16.msra.mxu0 %v6059_v51  ;;  %4465 = vmatpush1.bf16.msra.mxu1 %v6062_v52  ;;  %v6155_v51 = vld [vmem:[%s8311_s1 + $0xcc0] ss:$16 sps:$4 sm:$0xff]   ;;  %v6158_v52 = vld [vmem:[%s8311_s1 + $0xcc8] ss:$16 sps:$4 sm:$0xff]  }
 0x160   :  { %3989 = vmatprep.subr.bf16.mxu0 %v6067_v53  ;;  %4466 = vmatprep.subr.bf16.mxu1 %v6070_v54  ;;  %v6163_v53 = vld [vmem:[%s8311_s1 + $0xce4] ss:$16 sps:$4 sm:$0xff]   ;;  %v6166_v54 = vld [vmem:[%s8311_s1 + $0xcec] ss:$16 sps:$4 sm:$0xff]  }
 0x163   :  { %3990 = vmatpush1.bf16.msra.mxu0 %v6065_v55  ;;  %4467 = vmatpush1.bf16.msra.mxu1 %v6068_v56  ;;  %v6161_v55 = vld [vmem:[%s8311_s1 + $0xce0] ss:$16 sps:$4 sm:$0xff]   ;;  %v6164_v56 = vld [vmem:[%s8311_s1 + $0xce8] ss:$16 sps:$4 sm:$0xff]  }
 0x164   :  { %3991 = vmatprep.subr.bf16.mxu0 %v6073_v57  ;;  %4468 = vmatprep.subr.bf16.mxu1 %v6076_v58  ;;  %v6169_v57 = vld [vmem:[%s8311_s1 + $0xd04] ss:$16 sps:$4 sm:$0xff]   ;;  %v6172_v58 = vld [vmem:[%s8311_s1 + $0xd0c] ss:$16 sps:$4 sm:$0xff]  }
 0x167   :  { %3992 = vmatpush1.bf16.msra.mxu0 %v6071_v59  ;;  %4469 = vmatpush1.bf16.msra.mxu1 %v6074_v60  ;;  %v6167_v59 = vld [vmem:[%s8311_s1 + $0xd00] ss:$16 sps:$4 sm:$0xff]   ;;  %v6170_v60 = vld [vmem:[%s8311_s1 + $0xd08] ss:$16 sps:$4 sm:$0xff]  }
 0x168   :  { %3993 = vmatprep.subr.bf16.mxu0 %v6079_v61  ;;  %4470 = vmatprep.subr.bf16.mxu1 %v6082_v62  ;;  %v6175_v61 = vld [vmem:[%s8311_s1 + $0xd24] ss:$16 sps:$4 sm:$0xff]   ;;  %v6178_v62 = vld [vmem:[%s8311_s1 + $0xd2c] ss:$16 sps:$4 sm:$0xff]  }
 0x16b   :  { %3994 = vmatpush1.bf16.msra.mxu0 %v6077_v63  ;;  %4471 = vmatpush1.bf16.msra.mxu1 %v6080_v0  ;;  %v6173_v63 = vld [vmem:[%s8311_s1 + $0xd20] ss:$16 sps:$4 sm:$0xff]   ;;  %v6176_v0 = vld [vmem:[%s8311_s1 + $0xd28] ss:$16 sps:$4 sm:$0xff]  }
 0x16c   :  { %3995 = vmatprep.subr.bf16.mxu0 %v6085_v1  ;;  %4472 = vmatprep.subr.bf16.mxu1 %v6088_v2  ;;  %v6181_v1 = vld [vmem:[%s8311_s1 + $0xd44] ss:$16 sps:$4 sm:$0xff]   ;;  %v6184_v2 = vld [vmem:[%s8311_s1 + $0xd4c] ss:$16 sps:$4 sm:$0xff]  }
 0x16f   :  { %3996 = vmatpush1.bf16.msra.mxu0 %v6083_v3  ;;  %4473 = vmatpush1.bf16.msra.mxu1 %v6086_v4  ;;  %v6179_v3 = vld [vmem:[%s8311_s1 + $0xd40] ss:$16 sps:$4 sm:$0xff]   ;;  %v6182_v4 = vld [vmem:[%s8311_s1 + $0xd48] ss:$16 sps:$4 sm:$0xff]  }
 0x170   :  { %3997 = vmatprep.subr.bf16.mxu0 %v6091_v5  ;;  %4474 = vmatprep.subr.bf16.mxu1 %v6094_v6  ;;  %v6187_v5 = vld [vmem:[%s8311_s1 + $0xd64] ss:$16 sps:$4 sm:$0xff]   ;;  %v6190_v6 = vld [vmem:[%s8311_s1 + $0xd6c] ss:$16 sps:$4 sm:$0xff]  }
 0x173   :  { %3998 = vmatpush1.bf16.msra.mxu0 %v6089_v7  ;;  %4475 = vmatpush1.bf16.msra.mxu1 %v6092_v8  ;;  %v6185_v7 = vld [vmem:[%s8311_s1 + $0xd60] ss:$16 sps:$4 sm:$0xff]   ;;  %v6188_v8 = vld [vmem:[%s8311_s1 + $0xd68] ss:$16 sps:$4 sm:$0xff]  }
 0x174   :  { %3999 = vmatprep.subr.bf16.mxu0 %v6097_v9  ;;  %4476 = vmatprep.subr.bf16.mxu1 %v6100_v10  ;;  %v6193_v9 = vld [vmem:[%s8311_s1 + $0xd84] ss:$16 sps:$4 sm:$0xff]   ;;  %v6196_v10 = vld [vmem:[%s8311_s1 + $0xd8c] ss:$16 sps:$4 sm:$0xff]  }
 0x177   :  { %4000 = vmatpush1.bf16.msra.mxu0 %v6095_v11  ;;  %4477 = vmatpush1.bf16.msra.mxu1 %v6098_v12  ;;  %v6191_v11 = vld [vmem:[%s8311_s1 + $0xd80] ss:$16 sps:$4 sm:$0xff]   ;;  %v6194_v12 = vld [vmem:[%s8311_s1 + $0xd88] ss:$16 sps:$4 sm:$0xff]  }
 0x178   :  { %4001 = vmatprep.subr.bf16.mxu0 %v6105_v13  ;;  %4478 = vmatprep.subr.bf16.mxu1 %v6108_v14  ;;  %v6199_v13 = vld [vmem:[%s8311_s1 + $0xda4] ss:$16 sps:$4 sm:$0xff]   ;;  %v6202_v14 = vld [vmem:[%s8311_s1 + $0xdac] ss:$16 sps:$4 sm:$0xff]  }
 0x17b   :  { %4002 = vmatpush1.bf16.msra.mxu0 %v6103_v15  ;;  %4479 = vmatpush1.bf16.msra.mxu1 %v6106_v16  ;;  %v6197_v15 = vld [vmem:[%s8311_s1 + $0xda0] ss:$16 sps:$4 sm:$0xff]   ;;  %v6200_v16 = vld [vmem:[%s8311_s1 + $0xda8] ss:$16 sps:$4 sm:$0xff]  }
 0x17c   :  { %4003 = vmatprep.subr.bf16.mxu0 %v6112_v17  ;;  %4480 = vmatprep.subr.bf16.mxu1 %v6115_v18  ;;  %v6207_v17 = vld [vmem:[%s8311_s1 + $0xdc4] ss:$16 sps:$4 sm:$0xff]   ;;  %v6210_v18 = vld [vmem:[%s8311_s1 + $0xdcc] ss:$16 sps:$4 sm:$0xff]  }
 0x17f   :  { %4004 = vmatpush1.bf16.msra.mxu0 %v6110_v19  ;;  %4481 = vmatpush1.bf16.msra.mxu1 %v6113_v20  ;;  %v6205_v19 = vld [vmem:[%s8311_s1 + $0xdc0] ss:$16 sps:$4 sm:$0xff]   ;;  %v6208_v20 = vld [vmem:[%s8311_s1 + $0xdc8] ss:$16 sps:$4 sm:$0xff]  }
 0x180   :  { %4026 = vmatprep.subr.bf16.mxu0 %v6121_v22  ;;  %4503 = vmatprep.subr.bf16.mxu1 %v6124_v23  ;;  %v6217_v22 = vld [vmem:[%s8311_s1 + $0xdec] ss:$16 sps:$4 sm:$0xff]   ;;  %v6212_v23 = vld [vmem:[%s8311_s1 + $0xde0] ss:$16 sps:$4 sm:$0xff]  }
 0x182   :  { %4006 = vmatmul.mubr.bf16.vlgmr.msra.gmra.mrb[0].mxu0 %v6116_v21  ;;  %4483 = vmatmul.mubr.bf16.vlgmr.msra.gmra.mrb[0].mxu1 %v6116_v21  ;;  %v6214_v21 = vld [vmem:[%s8311_s1 + $0xde4] ss:$16 sps:$4 sm:$0xff]  }
 0x183   :  { %4027 = vmatpush1.bf16.msra.mxu0 %v6119_v24  ;;  %4504 = vmatpush1.bf16.msra.mxu1 %v6122_v25  ;;  %v6215_v24 = vld [vmem:[%s8311_s1 + $0xde8] ss:$16 sps:$4 sm:$0xff]   ;;  %v6223_v25 = vld [vmem:[%s8311_s1 + $0xe04] ss:$16 sps:$4 sm:$0xff]  }
 0x184   :  { %4028 = vmatprep.subr.bf16.mxu0 %v6127_v26  ;;  %4505 = vmatprep.subr.bf16.mxu1 %v6130_v27  ;;  %v6226_v26 = vld [vmem:[%s8311_s1 + $0xe0c] ss:$16 sps:$4 sm:$0xff]   ;;  %v6218_v27 = vld [vmem:[%s8312_s0 + $0x30] ss:$72 sps:$4 sm:$0xff]  }
 0x185   :  { %4015 = vmatprep.mubr.bf16.mxu0 %v6203_v28  ;;  %4492 = vmatprep.mubr.bf16.mxu1 %v6203_v28  ;;  %v6221_v28 = vld [vmem:[%s8311_s1 + $0xe00] ss:$16 sps:$4 sm:$0xff]  }
 0x187   :  { %4029 = vmatpush1.bf16.msra.mxu0 %v6125_v29  ;;  %4506 = vmatpush1.bf16.msra.mxu1 %v6128_v30  ;;  %v6224_v29 = vld [vmem:[%s8311_s1 + $0xe08] ss:$16 sps:$4 sm:$0xff]   ;;  %v6229_v30 = vld [vmem:[%s8311_s1 + $0xe24] ss:$16 sps:$4 sm:$0xff]  }
 0x188   :  { %4030 = vmatprep.subr.bf16.mxu0 %v6133_v31  ;;  %4507 = vmatprep.subr.bf16.mxu1 %v6136_v32  ;;  %v6232_v31 = vld [vmem:[%s8311_s1 + $0xe2c] ss:$16 sps:$4 sm:$0xff]  }
 0x189   :  { %v6305_v32 = vld [vmem:[%s8312_s0 + $0xc4] ss:$72 sps:$4 sm:$0xff]  }
 0x18a   :  { %4016 = vmatmul.mubr.bf16.gmra.mrb[4].mxu0 %v6211_v33  ;;  %4493 = vmatmul.mubr.bf16.gmra.mrb[4].mxu1 %v6211_v33  ;;  %v6227_v33 = vld [vmem:[%s8311_s1 + $0xe20] ss:$16 sps:$4 sm:$0xff]  }
 0x18b   :  { %4031 = vmatpush1.bf16.msra.mxu0 %v6131_v34  ;;  %4508 = vmatpush1.bf16.msra.mxu1 %v6134_v35  ;;  %v6230_v34 = vld [vmem:[%s8311_s1 + $0xe28] ss:$16 sps:$4 sm:$0xff]   ;;  %v6235_v35 = vld [vmem:[%s8311_s1 + $0xe44] ss:$16 sps:$4 sm:$0xff]  }
 0x18c   :  { %4032 = vmatprep.subr.bf16.mxu0 %v6139_v36  ;;  %4509 = vmatprep.subr.bf16.mxu1 %v6142_v37  ;;  %v6238_v36 = vld [vmem:[%s8311_s1 + $0xe4c] ss:$16 sps:$4 sm:$0xff]   ;;  %v6313_v37 = vld [vmem:[%s8312_s0 + $0xc0] ss:$72 sps:$4 sm:$0xff]  }
 0x18d   :  { %4058 = vmatprep.mubr.bf16.mxu0 %v6220_v38  ;;  %4535 = vmatprep.mubr.bf16.mxu1 %v6220_v38  ;;  %v6233_v38 = vld [vmem:[%s8311_s1 + $0xe40] ss:$16 sps:$4 sm:$0xff]  }
 0x18f   :  { %4033 = vmatpush1.bf16.msra.mxu0 %v6137_v39  ;;  %4510 = vmatpush1.bf16.msra.mxu1 %v6140_v40  ;;  %v6236_v39 = vld [vmem:[%s8311_s1 + $0xe48] ss:$16 sps:$4 sm:$0xff]   ;;  %v6241_v40 = vld [vmem:[%s8311_s1 + $0xe64] ss:$16 sps:$4 sm:$0xff]  }
 0x190   :  { %4034 = vmatprep.subr.bf16.mxu0 %v6145_v41  ;;  %4511 = vmatprep.subr.bf16.mxu1 %v6148_v42  ;;  %v6244_v41 = vld [vmem:[%s8311_s1 + $0xe6c] ss:$16 sps:$4 sm:$0xff]  }
 0x191   :  { %v6322_v42 = vld [vmem:[%s8312_s0 + $0x3c] ss:$72 sps:$4 sm:$0xff]  }
 0x193   :  { %4035 = vmatpush1.bf16.msra.mxu0 %v6143_v43  ;;  %4512 = vmatpush1.bf16.msra.mxu1 %v6146_v44  ;;  %v6239_v43 = vld [vmem:[%s8311_s1 + $0xe60] ss:$16 sps:$4 sm:$0xff]   ;;  %v6242_v44 = vld [vmem:[%s8311_s1 + $0xe68] ss:$16 sps:$4 sm:$0xff]  }
 0x194   :  { %4036 = vmatprep.subr.bf16.mxu0 %v6151_v45  ;;  %4513 = vmatprep.subr.bf16.mxu1 %v6154_v46  ;;  %v6247_v45 = vld [vmem:[%s8311_s1 + $0xe84] ss:$16 sps:$4 sm:$0xff]   ;;  %v6250_v46 = vld [vmem:[%s8311_s1 + $0xe8c] ss:$16 sps:$4 sm:$0xff]  }
 0x197   :  { %4037 = vmatpush1.bf16.msra.mxu0 %v6149_v47  ;;  %4514 = vmatpush1.bf16.msra.mxu1 %v6152_v48  ;;  %v6245_v47 = vld [vmem:[%s8311_s1 + $0xe80] ss:$16 sps:$4 sm:$0xff]   ;;  %v6248_v48 = vld [vmem:[%s8311_s1 + $0xe88] ss:$16 sps:$4 sm:$0xff]  }
 0x198   :  { %4038 = vmatprep.subr.bf16.mxu0 %v6157_v49  ;;  %4515 = vmatprep.subr.bf16.mxu1 %v6160_v50  ;;  %v6253_v49 = vld [vmem:[%s8311_s1 + $0xea4] ss:$16 sps:$4 sm:$0xff]   ;;  %v6256_v50 = vld [vmem:[%s8311_s1 + $0xeac] ss:$16 sps:$4 sm:$0xff]  }
 0x19b   :  { %4039 = vmatpush1.bf16.msra.mxu0 %v6155_v51  ;;  %4516 = vmatpush1.bf16.msra.mxu1 %v6158_v52  ;;  %v6251_v51 = vld [vmem:[%s8311_s1 + $0xea0] ss:$16 sps:$4 sm:$0xff]   ;;  %v6254_v52 = vld [vmem:[%s8311_s1 + $0xea8] ss:$16 sps:$4 sm:$0xff]  }
 0x19c   :  { %4040 = vmatprep.subr.bf16.mxu0 %v6163_v53  ;;  %4517 = vmatprep.subr.bf16.mxu1 %v6166_v54  ;;  %v6259_v53 = vld [vmem:[%s8311_s1 + $0xec4] ss:$16 sps:$4 sm:$0xff]   ;;  %v6262_v54 = vld [vmem:[%s8311_s1 + $0xecc] ss:$16 sps:$4 sm:$0xff]  }
 0x19f   :  { %4041 = vmatpush1.bf16.msra.mxu0 %v6161_v55  ;;  %4518 = vmatpush1.bf16.msra.mxu1 %v6164_v56  ;;  %v6257_v55 = vld [vmem:[%s8311_s1 + $0xec0] ss:$16 sps:$4 sm:$0xff]   ;;  %v6260_v56 = vld [vmem:[%s8311_s1 + $0xec8] ss:$16 sps:$4 sm:$0xff]  }
 0x1a0   :  { %4042 = vmatprep.subr.bf16.mxu0 %v6169_v57  ;;  %4519 = vmatprep.subr.bf16.mxu1 %v6172_v58  ;;  %v6265_v57 = vld [vmem:[%s8311_s1 + $0xee4] ss:$16 sps:$4 sm:$0xff]   ;;  %v6268_v58 = vld [vmem:[%s8311_s1 + $0xeec] ss:$16 sps:$4 sm:$0xff]  }
 0x1a3   :  { %4043 = vmatpush1.bf16.msra.mxu0 %v6167_v59  ;;  %4520 = vmatpush1.bf16.msra.mxu1 %v6170_v60  ;;  %v6263_v59 = vld [vmem:[%s8311_s1 + $0xee0] ss:$16 sps:$4 sm:$0xff]   ;;  %v6266_v60 = vld [vmem:[%s8311_s1 + $0xee8] ss:$16 sps:$4 sm:$0xff]  }
 0x1a4   :  { %4044 = vmatprep.subr.bf16.mxu0 %v6175_v61  ;;  %4521 = vmatprep.subr.bf16.mxu1 %v6178_v62  ;;  %v6271_v61 = vld [vmem:[%s8311_s1 + $0xf04] ss:$16 sps:$4 sm:$0xff]   ;;  %v6274_v62 = vld [vmem:[%s8311_s1 + $0xf0c] ss:$16 sps:$4 sm:$0xff]  }
 0x1a7   :  { %4045 = vmatpush1.bf16.msra.mxu0 %v6173_v63  ;;  %4522 = vmatpush1.bf16.msra.mxu1 %v6176_v0  ;;  %v6269_v63 = vld [vmem:[%s8311_s1 + $0xf00] ss:$16 sps:$4 sm:$0xff]   ;;  %v6272_v0 = vld [vmem:[%s8311_s1 + $0xf08] ss:$16 sps:$4 sm:$0xff]  }
 0x1a8   :  { %4046 = vmatprep.subr.bf16.mxu0 %v6181_v1  ;;  %4523 = vmatprep.subr.bf16.mxu1 %v6184_v2  ;;  %v6277_v1 = vld [vmem:[%s8311_s1 + $0xf24] ss:$16 sps:$4 sm:$0xff]   ;;  %v6280_v2 = vld [vmem:[%s8311_s1 + $0xf2c] ss:$16 sps:$4 sm:$0xff]  }
 0x1ab   :  { %4047 = vmatpush1.bf16.msra.mxu0 %v6179_v3  ;;  %4524 = vmatpush1.bf16.msra.mxu1 %v6182_v4  ;;  %v6275_v3 = vld [vmem:[%s8311_s1 + $0xf20] ss:$16 sps:$4 sm:$0xff]   ;;  %v6278_v4 = vld [vmem:[%s8311_s1 + $0xf28] ss:$16 sps:$4 sm:$0xff]  }
 0x1ac   :  { %4048 = vmatprep.subr.bf16.mxu0 %v6187_v5  ;;  %4525 = vmatprep.subr.bf16.mxu1 %v6190_v6  ;;  %v6283_v5 = vld [vmem:[%s8311_s1 + $0xf44] ss:$16 sps:$4 sm:$0xff]   ;;  %v6286_v6 = vld [vmem:[%s8311_s1 + $0xf4c] ss:$16 sps:$4 sm:$0xff]  }
 0x1af   :  { %4049 = vmatpush1.bf16.msra.mxu0 %v6185_v7  ;;  %4526 = vmatpush1.bf16.msra.mxu1 %v6188_v8  ;;  %v6281_v7 = vld [vmem:[%s8311_s1 + $0xf40] ss:$16 sps:$4 sm:$0xff]   ;;  %v6284_v8 = vld [vmem:[%s8311_s1 + $0xf48] ss:$16 sps:$4 sm:$0xff]  }
 0x1b0   :  { %4050 = vmatprep.subr.bf16.mxu0 %v6193_v9  ;;  %4527 = vmatprep.subr.bf16.mxu1 %v6196_v10  ;;  %v6289_v9 = vld [vmem:[%s8311_s1 + $0xf64] ss:$16 sps:$4 sm:$0xff]   ;;  %v6292_v10 = vld [vmem:[%s8311_s1 + $0xf6c] ss:$16 sps:$4 sm:$0xff]  }
 0x1b3   :  { %4051 = vmatpush1.bf16.msra.mxu0 %v6191_v11  ;;  %4528 = vmatpush1.bf16.msra.mxu1 %v6194_v12  ;;  %v6287_v11 = vld [vmem:[%s8311_s1 + $0xf60] ss:$16 sps:$4 sm:$0xff]   ;;  %v6290_v12 = vld [vmem:[%s8311_s1 + $0xf68] ss:$16 sps:$4 sm:$0xff]  }
 0x1b4   :  { %4052 = vmatprep.subr.bf16.mxu0 %v6199_v13  ;;  %4529 = vmatprep.subr.bf16.mxu1 %v6202_v14  ;;  %v6295_v13 = vld [vmem:[%s8311_s1 + $0xf84] ss:$16 sps:$4 sm:$0xff]   ;;  %v6298_v14 = vld [vmem:[%s8311_s1 + $0xf8c] ss:$16 sps:$4 sm:$0xff]  }
 0x1b7   :  { %4053 = vmatpush1.bf16.msra.mxu0 %v6197_v15  ;;  %4530 = vmatpush1.bf16.msra.mxu1 %v6200_v16  ;;  %v6293_v15 = vld [vmem:[%s8311_s1 + $0xf80] ss:$16 sps:$4 sm:$0xff]   ;;  %v6296_v16 = vld [vmem:[%s8311_s1 + $0xf88] ss:$16 sps:$4 sm:$0xff]  }
 0x1b8   :  { %4054 = vmatprep.subr.bf16.mxu0 %v6207_v17  ;;  %4531 = vmatprep.subr.bf16.mxu1 %v6210_v18  ;;  %v6301_v17 = vld [vmem:[%s8311_s1 + $0xfa4] ss:$16 sps:$4 sm:$0xff]   ;;  %v6304_v18 = vld [vmem:[%s8311_s1 + $0xfac] ss:$16 sps:$4 sm:$0xff]  }
 0x1bb   :  { %4055 = vmatpush1.bf16.msra.mxu0 %v6205_v19  ;;  %4532 = vmatpush1.bf16.msra.mxu1 %v6208_v20  ;;  %v6299_v19 = vld [vmem:[%s8311_s1 + $0xfa0] ss:$16 sps:$4 sm:$0xff]   ;;  %v6302_v20 = vld [vmem:[%s8311_s1 + $0xfa8] ss:$16 sps:$4 sm:$0xff]  }
 0x1bc   :  { %4056 = vmatprep.subr.bf16.mxu0 %v6214_v21  ;;  %4533 = vmatprep.subr.bf16.mxu1 %v6217_v22  ;;  %v6309_v21 = vld [vmem:[%s8311_s1 + $0xfc4] ss:$16 sps:$4 sm:$0xff]   ;;  %v6312_v22 = vld [vmem:[%s8311_s1 + $0xfcc] ss:$16 sps:$4 sm:$0xff]  }
 0x1bf   :  { %4057 = vmatpush1.bf16.msra.mxu0 %v6212_v23  ;;  %4534 = vmatpush1.bf16.msra.mxu1 %v6215_v24  ;;  %v6307_v23 = vld [vmem:[%s8311_s1 + $0xfc0] ss:$16 sps:$4 sm:$0xff]   ;;  %v6310_v24 = vld [vmem:[%s8311_s1 + $0xfc8] ss:$16 sps:$4 sm:$0xff]  }
 0x1c0   :  { %4079 = vmatprep.subr.bf16.mxu0 %v6223_v25  ;;  %4556 = vmatprep.subr.bf16.mxu1 %v6226_v26  ;;  %v6316_v25 = vld [vmem:[%s8311_s1 + $0xfe4] ss:$16 sps:$4 sm:$0xff]   ;;  %v6319_v26 = vld [vmem:[%s8311_s1 + $0xfec] ss:$16 sps:$4 sm:$0xff]  }
 0x1c2   :  { %4059 = vmatmul.mubr.bf16.vlgmr.msra.gmra.mrb[0].mxu0 %v6218_v27  ;;  %4536 = vmatmul.mubr.bf16.vlgmr.msra.gmra.mrb[0].mxu1 %v6218_v27  ;;  %v6314_v27 = vld [vmem:[%s8311_s1 + $0xfe0] ss:$16 sps:$4 sm:$0xff]  }
 0x1c3   :  { %4080 = vmatpush1.bf16.msra.mxu0 %v6221_v28  ;;  %4557 = vmatpush1.bf16.msra.mxu1 %v6224_v29  ;;  %v6317_v28 = vld [vmem:[%s8311_s1 + $0xfe8] ss:$16 sps:$4 sm:$0xff]   ;;  %v6325_v29 = vld [vmem:[%s8311_s1 + $0x1004] ss:$16 sps:$4 sm:$0xff]  }
 0x1c4   :  { %4081 = vmatprep.subr.bf16.mxu0 %v6229_v30  ;;  %4558 = vmatprep.subr.bf16.mxu1 %v6232_v31  ;;  %v6328_v30 = vld [vmem:[%s8311_s1 + $0x100c] ss:$16 sps:$4 sm:$0xff]   ;;  %v6320_v31 = vld [vmem:[%s8312_s0 + $0x38] ss:$72 sps:$4 sm:$0xff]  }
 0x1c5   :  { %4068 = vmatprep.mubr.bf16.mxu0 %v6305_v32  ;;  %4545 = vmatprep.mubr.bf16.mxu1 %v6305_v32  ;;  %v6323_v32 = vld [vmem:[%s8311_s1 + $0x1000] ss:$16 sps:$4 sm:$0xff]  }
 0x1c7   :  { %4082 = vmatpush1.bf16.msra.mxu0 %v6227_v33  ;;  %4559 = vmatpush1.bf16.msra.mxu1 %v6230_v34  ;;  %v6326_v33 = vld [vmem:[%s8311_s1 + $0x1008] ss:$16 sps:$4 sm:$0xff]   ;;  %v6331_v34 = vld [vmem:[%s8311_s1 + $0x1024] ss:$16 sps:$4 sm:$0xff]  }
 0x1c8   :  { %4083 = vmatprep.subr.bf16.mxu0 %v6235_v35  ;;  %4560 = vmatprep.subr.bf16.mxu1 %v6238_v36  ;;  %v6334_v35 = vld [vmem:[%s8311_s1 + $0x102c] ss:$16 sps:$4 sm:$0xff]  }
 0x1c9   :  { %v6407_v36 = vld [vmem:[%s8312_s0 + $0xcc] ss:$72 sps:$4 sm:$0xff]  }
 0x1ca   :  { %4069 = vmatmul.mubr.bf16.gmra.mrb[4].mxu0 %v6313_v37  ;;  %4546 = vmatmul.mubr.bf16.gmra.mrb[4].mxu1 %v6313_v37  ;;  %v6329_v37 = vld [vmem:[%s8311_s1 + $0x1020] ss:$16 sps:$4 sm:$0xff]  }
 0x1cb   :  { %4084 = vmatpush1.bf16.msra.mxu0 %v6233_v38  ;;  %4561 = vmatpush1.bf16.msra.mxu1 %v6236_v39  ;;  %v6332_v38 = vld [vmem:[%s8311_s1 + $0x1028] ss:$16 sps:$4 sm:$0xff]   ;;  %v6337_v39 = vld [vmem:[%s8311_s1 + $0x1044] ss:$16 sps:$4 sm:$0xff]  }
 0x1cc   :  { %4085 = vmatprep.subr.bf16.mxu0 %v6241_v40  ;;  %4562 = vmatprep.subr.bf16.mxu1 %v6244_v41  ;;  %v6340_v40 = vld [vmem:[%s8311_s1 + $0x104c] ss:$16 sps:$4 sm:$0xff]   ;;  %v6409_v41 = vld [vmem:[%s8312_s0 + $0xc8] ss:$72 sps:$4 sm:$0xff]  }
 0x1cd   :  { %4111 = vmatprep.mubr.bf16.mxu0 %v6322_v42  ;;  %4588 = vmatprep.mubr.bf16.mxu1 %v6322_v42  ;;  %v6335_v42 = vld [vmem:[%s8311_s1 + $0x1040] ss:$16 sps:$4 sm:$0xff]  }
 0x1cf   :  { %4086 = vmatpush1.bf16.msra.mxu0 %v6239_v43  ;;  %4563 = vmatpush1.bf16.msra.mxu1 %v6242_v44  ;;  %v6338_v43 = vld [vmem:[%s8311_s1 + $0x1048] ss:$16 sps:$4 sm:$0xff]   ;;  %v6343_v44 = vld [vmem:[%s8311_s1 + $0x1064] ss:$16 sps:$4 sm:$0xff]  }
 0x1d0   :  { %4087 = vmatprep.subr.bf16.mxu0 %v6247_v45  ;;  %4564 = vmatprep.subr.bf16.mxu1 %v6250_v46  ;;  %v6346_v45 = vld [vmem:[%s8311_s1 + $0x106c] ss:$16 sps:$4 sm:$0xff]  }
 0x1d1   :  { %v6424_v46 = vld [vmem:[%s8312_s0 + $0x44] ss:$72 sps:$4 sm:$0xff]  }
 0x1d3   :  { %4088 = vmatpush1.bf16.msra.mxu0 %v6245_v47  ;;  %4565 = vmatpush1.bf16.msra.mxu1 %v6248_v48  ;;  %v6341_v47 = vld [vmem:[%s8311_s1 + $0x1060] ss:$16 sps:$4 sm:$0xff]   ;;  %v6344_v48 = vld [vmem:[%s8311_s1 + $0x1068] ss:$16 sps:$4 sm:$0xff]  }
 0x1d4   :  { %4089 = vmatprep.subr.bf16.mxu0 %v6253_v49  ;;  %4566 = vmatprep.subr.bf16.mxu1 %v6256_v50  ;;  %v6349_v49 = vld [vmem:[%s8311_s1 + $0x1084] ss:$16 sps:$4 sm:$0xff]   ;;  %v6352_v50 = vld [vmem:[%s8311_s1 + $0x108c] ss:$16 sps:$4 sm:$0xff]  }
 0x1d7   :  { %4090 = vmatpush1.bf16.msra.mxu0 %v6251_v51  ;;  %4567 = vmatpush1.bf16.msra.mxu1 %v6254_v52  ;;  %v6347_v51 = vld [vmem:[%s8311_s1 + $0x1080] ss:$16 sps:$4 sm:$0xff]   ;;  %v6350_v52 = vld [vmem:[%s8311_s1 + $0x1088] ss:$16 sps:$4 sm:$0xff]  }
 0x1d8   :  { %4091 = vmatprep.subr.bf16.mxu0 %v6259_v53  ;;  %4568 = vmatprep.subr.bf16.mxu1 %v6262_v54  ;;  %v6355_v53 = vld [vmem:[%s8311_s1 + $0x10a4] ss:$16 sps:$4 sm:$0xff]   ;;  %v6358_v54 = vld [vmem:[%s8311_s1 + $0x10ac] ss:$16 sps:$4 sm:$0xff]  }
 0x1db   :  { %4092 = vmatpush1.bf16.msra.mxu0 %v6257_v55  ;;  %4569 = vmatpush1.bf16.msra.mxu1 %v6260_v56  ;;  %v6353_v55 = vld [vmem:[%s8311_s1 + $0x10a0] ss:$16 sps:$4 sm:$0xff]   ;;  %v6356_v56 = vld [vmem:[%s8311_s1 + $0x10a8] ss:$16 sps:$4 sm:$0xff]  }
 0x1dc   :  { %4093 = vmatprep.subr.bf16.mxu0 %v6265_v57  ;;  %4570 = vmatprep.subr.bf16.mxu1 %v6268_v58  ;;  %v6361_v57 = vld [vmem:[%s8311_s1 + $0x10c4] ss:$16 sps:$4 sm:$0xff]   ;;  %v6364_v58 = vld [vmem:[%s8311_s1 + $0x10cc] ss:$16 sps:$4 sm:$0xff]  }
 0x1df   :  { %4094 = vmatpush1.bf16.msra.mxu0 %v6263_v59  ;;  %4571 = vmatpush1.bf16.msra.mxu1 %v6266_v60  ;;  %v6359_v59 = vld [vmem:[%s8311_s1 + $0x10c0] ss:$16 sps:$4 sm:$0xff]   ;;  %v6362_v60 = vld [vmem:[%s8311_s1 + $0x10c8] ss:$16 sps:$4 sm:$0xff]  }
 0x1e0   :  { %4095 = vmatprep.subr.bf16.mxu0 %v6271_v61  ;;  %4572 = vmatprep.subr.bf16.mxu1 %v6274_v62  ;;  %v6367_v61 = vld [vmem:[%s8311_s1 + $0x10e4] ss:$16 sps:$4 sm:$0xff]   ;;  %v6370_v62 = vld [vmem:[%s8311_s1 + $0x10ec] ss:$16 sps:$4 sm:$0xff]  }
 0x1e3   :  { %4096 = vmatpush1.bf16.msra.mxu0 %v6269_v63  ;;  %4573 = vmatpush1.bf16.msra.mxu1 %v6272_v0  ;;  %v6365_v63 = vld [vmem:[%s8311_s1 + $0x10e0] ss:$16 sps:$4 sm:$0xff]   ;;  %v6368_v0 = vld [vmem:[%s8311_s1 + $0x10e8] ss:$16 sps:$4 sm:$0xff]  }
 0x1e4   :  { %4097 = vmatprep.subr.bf16.mxu0 %v6277_v1  ;;  %4574 = vmatprep.subr.bf16.mxu1 %v6280_v2  ;;  %v6373_v1 = vld [vmem:[%s8311_s1 + $0x1104] ss:$16 sps:$4 sm:$0xff]   ;;  %v6376_v2 = vld [vmem:[%s8311_s1 + $0x110c] ss:$16 sps:$4 sm:$0xff]  }
 0x1e7   :  { %4098 = vmatpush1.bf16.msra.mxu0 %v6275_v3  ;;  %4575 = vmatpush1.bf16.msra.mxu1 %v6278_v4  ;;  %v6371_v3 = vld [vmem:[%s8311_s1 + $0x1100] ss:$16 sps:$4 sm:$0xff]   ;;  %v6374_v4 = vld [vmem:[%s8311_s1 + $0x1108] ss:$16 sps:$4 sm:$0xff]  }
 0x1e8   :  { %4099 = vmatprep.subr.bf16.mxu0 %v6283_v5  ;;  %4576 = vmatprep.subr.bf16.mxu1 %v6286_v6  ;;  %v6379_v5 = vld [vmem:[%s8311_s1 + $0x1124] ss:$16 sps:$4 sm:$0xff]   ;;  %v6382_v6 = vld [vmem:[%s8311_s1 + $0x112c] ss:$16 sps:$4 sm:$0xff]  }
 0x1eb   :  { %4100 = vmatpush1.bf16.msra.mxu0 %v6281_v7  ;;  %4577 = vmatpush1.bf16.msra.mxu1 %v6284_v8  ;;  %v6377_v7 = vld [vmem:[%s8311_s1 + $0x1120] ss:$16 sps:$4 sm:$0xff]   ;;  %v6380_v8 = vld [vmem:[%s8311_s1 + $0x1128] ss:$16 sps:$4 sm:$0xff]  }
 0x1ec   :  { %4101 = vmatprep.subr.bf16.mxu0 %v6289_v9  ;;  %4578 = vmatprep.subr.bf16.mxu1 %v6292_v10  ;;  %v6385_v9 = vld [vmem:[%s8311_s1 + $0x1144] ss:$16 sps:$4 sm:$0xff]   ;;  %v6388_v10 = vld [vmem:[%s8311_s1 + $0x114c] ss:$16 sps:$4 sm:$0xff]  }
 0x1ef   :  { %4102 = vmatpush1.bf16.msra.mxu0 %v6287_v11  ;;  %4579 = vmatpush1.bf16.msra.mxu1 %v6290_v12  ;;  %v6383_v11 = vld [vmem:[%s8311_s1 + $0x1140] ss:$16 sps:$4 sm:$0xff]   ;;  %v6386_v12 = vld [vmem:[%s8311_s1 + $0x1148] ss:$16 sps:$4 sm:$0xff]  }
 0x1f0   :  { %4103 = vmatprep.subr.bf16.mxu0 %v6295_v13  ;;  %4580 = vmatprep.subr.bf16.mxu1 %v6298_v14  ;;  %v6391_v13 = vld [vmem:[%s8311_s1 + $0x1164] ss:$16 sps:$4 sm:$0xff]   ;;  %v6394_v14 = vld [vmem:[%s8311_s1 + $0x116c] ss:$16 sps:$4 sm:$0xff]  }
 0x1f3   :  { %4104 = vmatpush1.bf16.msra.mxu0 %v6293_v15  ;;  %4581 = vmatpush1.bf16.msra.mxu1 %v6296_v16  ;;  %v6389_v15 = vld [vmem:[%s8311_s1 + $0x1160] ss:$16 sps:$4 sm:$0xff]   ;;  %v6392_v16 = vld [vmem:[%s8311_s1 + $0x1168] ss:$16 sps:$4 sm:$0xff]  }
 0x1f4   :  { %4105 = vmatprep.subr.bf16.mxu0 %v6301_v17  ;;  %4582 = vmatprep.subr.bf16.mxu1 %v6304_v18  ;;  %v6397_v17 = vld [vmem:[%s8311_s1 + $0x1184] ss:$16 sps:$4 sm:$0xff]   ;;  %v6400_v18 = vld [vmem:[%s8311_s1 + $0x118c] ss:$16 sps:$4 sm:$0xff]  }
 0x1f7   :  { %4106 = vmatpush1.bf16.msra.mxu0 %v6299_v19  ;;  %4583 = vmatpush1.bf16.msra.mxu1 %v6302_v20  ;;  %v6395_v19 = vld [vmem:[%s8311_s1 + $0x1180] ss:$16 sps:$4 sm:$0xff]   ;;  %v6398_v20 = vld [vmem:[%s8311_s1 + $0x1188] ss:$16 sps:$4 sm:$0xff]  }
 0x1f8   :  { %4107 = vmatprep.subr.bf16.mxu0 %v6309_v21  ;;  %4584 = vmatprep.subr.bf16.mxu1 %v6312_v22  ;;  %v6403_v21 = vld [vmem:[%s8311_s1 + $0x11a4] ss:$16 sps:$4 sm:$0xff]   ;;  %v6406_v22 = vld [vmem:[%s8311_s1 + $0x11ac] ss:$16 sps:$4 sm:$0xff]  }
 0x1fb   :  { %4108 = vmatpush1.bf16.msra.mxu0 %v6307_v23  ;;  %4585 = vmatpush1.bf16.msra.mxu1 %v6310_v24  ;;  %v6401_v23 = vld [vmem:[%s8311_s1 + $0x11a0] ss:$16 sps:$4 sm:$0xff]   ;;  %v6404_v24 = vld [vmem:[%s8311_s1 + $0x11a8] ss:$16 sps:$4 sm:$0xff]  }
 0x1fc   :  { %4109 = vmatprep.subr.bf16.mxu0 %v6316_v25  ;;  %4586 = vmatprep.subr.bf16.mxu1 %v6319_v26  ;;  %v6412_v25 = vld [vmem:[%s8311_s1 + $0x11c4] ss:$16 sps:$4 sm:$0xff]   ;;  %v6415_v26 = vld [vmem:[%s8311_s1 + $0x11cc] ss:$16 sps:$4 sm:$0xff]  }
 0x1ff   :  { %4110 = vmatpush1.bf16.msra.mxu0 %v6314_v27  ;;  %4587 = vmatpush1.bf16.msra.mxu1 %v6317_v28  ;;  %v6410_v27 = vld [vmem:[%s8311_s1 + $0x11c0] ss:$16 sps:$4 sm:$0xff]   ;;  %v6413_v28 = vld [vmem:[%s8311_s1 + $0x11c8] ss:$16 sps:$4 sm:$0xff]  }
 0x200   :  { %4132 = vmatprep.subr.bf16.mxu0 %v6325_v29  ;;  %4609 = vmatprep.subr.bf16.mxu1 %v6328_v30  ;;  %v6418_v29 = vld [vmem:[%s8311_s1 + $0x11e4] ss:$16 sps:$4 sm:$0xff]   ;;  %v6421_v30 = vld [vmem:[%s8311_s1 + $0x11ec] ss:$16 sps:$4 sm:$0xff]  }
 0x202   :  { %4112 = vmatmul.mubr.bf16.vlgmr.msra.gmra.mrb[0].mxu0 %v6320_v31  ;;  %4589 = vmatmul.mubr.bf16.vlgmr.msra.gmra.mrb[0].mxu1 %v6320_v31  ;;  %v6416_v31 = vld [vmem:[%s8311_s1 + $0x11e0] ss:$16 sps:$4 sm:$0xff]  }
 0x203   :  { %4133 = vmatpush1.bf16.msra.mxu0 %v6323_v32  ;;  %4610 = vmatpush1.bf16.msra.mxu1 %v6326_v33  ;;  %v6419_v32 = vld [vmem:[%s8311_s1 + $0x11e8] ss:$16 sps:$4 sm:$0xff]  }
 0x204   :  { %4134 = vmatprep.subr.bf16.mxu0 %v6331_v34  ;;  %4611 = vmatprep.subr.bf16.mxu1 %v6334_v35  ;;  %v6422_v33 = vld [vmem:[%s8312_s0 + $0x40] ss:$72 sps:$4 sm:$0xff]   ;;  %v6425_v34 = vld [vmem:[%s8312_s0 + $0xd4] ss:$72 sps:$4 sm:$0xff]   ;;  %v6427_v35 = vld [vmem:[%s8312_s0 + $0xd0] ss:$72 sps:$4 sm:$0xff]  }
 0x205   :  { %4121 = vmatprep.mubr.bf16.mxu0 %v6407_v36  ;;  %4598 = vmatprep.mubr.bf16.mxu1 %v6407_v36  ;;  %v628_v36 = vlaneseq }
 0x207   :  { %4135 = vmatpush1.bf16.msra.mxu0 %v6329_v37  ;;  %4612 = vmatpush1.bf16.msra.mxu1 %v6332_v38  ;;  %v629_v37 = vshrl.u32 %v628_v36, 7 }
 0x208   :  { %4136 = vmatprep.subr.bf16.mxu0 %v6337_v39  ;;  %4613 = vmatprep.subr.bf16.mxu1 %v6340_v40  ;;  %v626_v40 = vld [vmem:[%s8313_s2] sm:$0xf] }
 0x209   :  { %v630_v38 = vsub.s32 0, %v629_v37  ;;  %v638_v39 = vsub.s32 2, %v629_v37 }
 0x20a   :  { %4122 = vmatmul.mubr.bf16.gmra.mrb[4].mxu0 %v6409_v41  ;;  %4599 = vmatmul.mubr.bf16.gmra.mrb[4].mxu1 %v6409_v41  ;;  %v634_v41 = vsub.s32 1, %v629_v37 }
 0x20b   :  { %4137 = vmatpush1.bf16.msra.mxu0 %v6335_v42  ;;  %4614 = vmatpush1.bf16.msra.mxu1 %v6338_v43  ;;  %v642_v42 = vsub.s32 3, %v629_v37  ;;  %v631_v43 = vrot.slane %v626_v40, %v630_v38 }
 0x20c   :  { %4138 = vmatprep.subr.bf16.mxu0 %v6343_v44  ;;  %4615 = vmatprep.subr.bf16.mxu1 %v6346_v45  ;;  %v639_v44 = vrot.slane %v626_v40, %v638_v39  ;;  %v635_v45 = vrot.slane %v626_v40, %v634_v41 }
 0x20d   :  { %4164 = vmatprep.mubr.bf16.mxu0 %v6424_v46  ;;  %4641 = vmatprep.mubr.bf16.mxu1 %v6424_v46  ;;  %v643_v46 = vrot.slane %v626_v40, %v642_v42 }
 0x20f   :  { %4139 = vmatpush1.bf16.msra.mxu0 %v6341_v47  ;;  %4616 = vmatpush1.bf16.msra.mxu1 %v6344_v48 }
 0x210   :  { %4140 = vmatprep.subr.bf16.mxu0 %v6349_v49  ;;  %4617 = vmatprep.subr.bf16.mxu1 %v6352_v50 }
 0x213   :  { %4141 = vmatpush1.bf16.msra.mxu0 %v6347_v51  ;;  %4618 = vmatpush1.bf16.msra.mxu1 %v6350_v52 }
 0x214   :  { %4142 = vmatprep.subr.bf16.mxu0 %v6355_v53  ;;  %4619 = vmatprep.subr.bf16.mxu1 %v6358_v54 }
 0x217   :  { %4143 = vmatpush1.bf16.msra.mxu0 %v6353_v55  ;;  %4620 = vmatpush1.bf16.msra.mxu1 %v6356_v56 }
 0x218   :  { %4144 = vmatprep.subr.bf16.mxu0 %v6361_v57  ;;  %4621 = vmatprep.subr.bf16.mxu1 %v6364_v58 }
 0x21b   :  { %4145 = vmatpush1.bf16.msra.mxu0 %v6359_v59  ;;  %4622 = vmatpush1.bf16.msra.mxu1 %v6362_v60 }
 0x21c   :  { %4146 = vmatprep.subr.bf16.mxu0 %v6367_v61  ;;  %4623 = vmatprep.subr.bf16.mxu1 %v6370_v62 }
 0x21f   :  { %4147 = vmatpush1.bf16.msra.mxu0 %v6365_v63  ;;  %4624 = vmatpush1.bf16.msra.mxu1 %v6368_v0 }
 0x220   :  { %4148 = vmatprep.subr.bf16.mxu0 %v6373_v1  ;;  %4625 = vmatprep.subr.bf16.mxu1 %v6376_v2 }
 0x223   :  { %4149 = vmatpush1.bf16.msra.mxu0 %v6371_v3  ;;  %4626 = vmatpush1.bf16.msra.mxu1 %v6374_v4 }
 0x224   :  { %4150 = vmatprep.subr.bf16.mxu0 %v6379_v5  ;;  %4627 = vmatprep.subr.bf16.mxu1 %v6382_v6 }
 0x227   :  { %4151 = vmatpush1.bf16.msra.mxu0 %v6377_v7  ;;  %4628 = vmatpush1.bf16.msra.mxu1 %v6380_v8 }
 0x228   :  { %4152 = vmatprep.subr.bf16.mxu0 %v6385_v9  ;;  %4629 = vmatprep.subr.bf16.mxu1 %v6388_v10 }
 0x22b   :  { %4153 = vmatpush1.bf16.msra.mxu0 %v6383_v11  ;;  %4630 = vmatpush1.bf16.msra.mxu1 %v6386_v12 }
 0x22c   :  { %4154 = vmatprep.subr.bf16.mxu0 %v6391_v13  ;;  %4631 = vmatprep.subr.bf16.mxu1 %v6394_v14 }
 0x22f   :  { %4155 = vmatpush1.bf16.msra.mxu0 %v6389_v15  ;;  %4632 = vmatpush1.bf16.msra.mxu1 %v6392_v16 }
 0x230   :  { %4156 = vmatprep.subr.bf16.mxu0 %v6397_v17  ;;  %4633 = vmatprep.subr.bf16.mxu1 %v6400_v18 }
 0x233   :  { %4157 = vmatpush1.bf16.msra.mxu0 %v6395_v19  ;;  %4634 = vmatpush1.bf16.msra.mxu1 %v6398_v20 }
 0x234   :  { %4158 = vmatprep.subr.bf16.mxu0 %v6403_v21  ;;  %4635 = vmatprep.subr.bf16.mxu1 %v6406_v22 }
 0x237   :  { %4159 = vmatpush1.bf16.msra.mxu0 %v6401_v23  ;;  %4636 = vmatpush1.bf16.msra.mxu1 %v6404_v24 }
 0x238   :  { %4160 = vmatprep.subr.bf16.mxu0 %v6412_v25  ;;  %4637 = vmatprep.subr.bf16.mxu1 %v6415_v26 }
 0x23b   :  { %4161 = vmatpush1.bf16.msra.mxu0 %v6410_v27  ;;  %4638 = vmatpush1.bf16.msra.mxu1 %v6413_v28 }
 0x23c   :  { %4162 = vmatprep.subr.bf16.mxu0 %v6418_v29  ;;  %4639 = vmatprep.subr.bf16.mxu1 %v6421_v30 }
 0x23f   :  { %4163 = vmatpush1.bf16.msra.mxu0 %v6416_v31  ;;  %4640 = vmatpush1.bf16.msra.mxu1 %v6419_v32 }
 0x242   :  { %4165 = vmatmul.mubr.bf16.vlgmr.msra.gmra.mrb[0].mxu0 %v6422_v33  ;;  %4642 = vmatmul.mubr.bf16.vlgmr.msra.gmra.mrb[0].mxu1 %v6422_v33 }
 0x243   :  { %4174 = vmatprep.mubr.bf16.mxu0 %v6425_v34  ;;  %4651 = vmatprep.mubr.bf16.mxu1 %v6425_v34 }
 0x24a   :  { %4175 = vmatmul.mubr.bf16.gmra.mrb[4].mxu0 %v6427_v35  ;;  %4652 = vmatmul.mubr.bf16.gmra.mrb[4].mxu1 %v6427_v35 }
 0x315   :  { %v4166_v47 = vpop.f32.mrb[0].mxu0  ;;  %v4643_v48 = vpop.f32.mrb[0].mxu1 }
 0x316   :  { %v5366_v49 = vadd.f32 %v4166_v47, %v631_v43  ;;  %v5374_v50 = vadd.f32 %v4643_v48, %v639_v44  ;;  %v4168_v51 = vpop.f32.mrb[1].mxu0  ;;  %v4645_v52 = vpop.f32.mrb[1].mxu1 }
 0x317   :  { %v5367_v53 = vadd.f32 %v4168_v51, %v635_v45  ;;  %v5375_v54 = vadd.f32 %v4645_v52, %v643_v46  ;;  %v4170_v55 = vpop.f32.mrb[2].mxu0  ;;  %v4647_v56 = vpop.f32.mrb[2].mxu1 }
 0x318   :  { %v4662_v57 = vmax.f32 %v5366_v49, 0.0  ;;  %v4664_v58 = vmax.f32 %v5374_v50, 0.0  ;;  %v5368_v59 = vadd.f32 %v4170_v55, %v631_v43  ;;  %v5376_v60 = vadd.f32 %v4647_v56, %v639_v44  ;;  %v4172_v61 = vpop.f32.mrb[3].mxu0  ;;  %v4649_v62 = vpop.f32.mrb[3].mxu1 }
 0x319   :  { %v4663_v63 = vmax.f32 %v5367_v53, 0.0  ;;  %v4665_v0 = vmax.f32 %v5375_v54, 0.0  ;;  %v5369_v1 = vadd.f32 %v4172_v61, %v635_v45  ;;  %v5377_v2 = vadd.f32 %v4649_v62, %v643_v46 }
 0x31a   :  { %v4666_v3 = vmax.f32 %v5368_v59, 0.0  ;;  %v4668_v4 = vmax.f32 %v5376_v60, 0.0 }
 0x31b   :  { %v5358_v5 = vpack.c.bf16 %v4663_v63, %v4662_v57  ;;  %v5359_v6 = vpack.c.bf16 %v4665_v0, %v4664_v58  ;;  %v4667_v7 = vmax.f32 %v5369_v1, 0.0  ;;  %v4669_v8 = vmax.f32 %v5377_v2, 0.0 }
 0x31d   :  { %4726 = vst [vmem:[%s8314_s3] sm:$0xff] %v5358_v5  ;;  %4727 = vst [vmem:[%s8314_s3 + $0x8] sm:$0xff] %v5359_v6  ;;  %v5360_v9 = vpack.c.bf16 %v4667_v7, %v4666_v3  ;;  %v5361_v10 = vpack.c.bf16 %v4669_v8, %v4668_v4  ;;  %v4176_v11 = vpop.f32.mrb[4].mxu0  ;;  %v4653_v12 = vpop.f32.mrb[4].mxu1 }
 0x31e   :  { %v5370_v13 = vadd.f32 %v4176_v11, %v631_v43  ;;  %v5378_v14 = vadd.f32 %v4653_v12, %v639_v44  ;;  %v4178_v15 = vpop.f32.mrb[5].mxu0  ;;  %v4655_v16 = vpop.f32.mrb[5].mxu1 }
 0x31f   :  { %4728 = vst [vmem:[%s8314_s3 + $0x10] sm:$0xff] %v5360_v9  ;;  %4729 = vst [vmem:[%s8314_s3 + $0x18] sm:$0xff] %v5361_v10  ;;  %v5371_v17 = vadd.f32 %v4178_v15, %v635_v45  ;;  %v5379_v18 = vadd.f32 %v4655_v16, %v643_v46  ;;  %v4180_v19 = vpop.f32.mrb[6].mxu0  ;;  %v4657_v20 = vpop.f32.mrb[6].mxu1 }
 0x320   :  { %v4670_v21 = vmax.f32 %v5370_v13, 0.0  ;;  %v4672_v22 = vmax.f32 %v5378_v14, 0.0  ;;  %v5372_v23 = vadd.f32 %v4180_v19, %v631_v43  ;;  %v5380_v24 = vadd.f32 %v4657_v20, %v639_v44  ;;  %v4182_v25 = vpop.f32.mrb[7].mxu0  ;;  %v4659_v26 = vpop.f32.mrb[7].mxu1 }
 0x321   :  { %v4671_v27 = vmax.f32 %v5371_v17, 0.0  ;;  %v4673_v28 = vmax.f32 %v5379_v18, 0.0  ;;  %v5373_v29 = vadd.f32 %v4182_v25, %v635_v45  ;;  %v5381_v30 = vadd.f32 %v4659_v26, %v643_v46 }
 0x322   :  { %v4674_v31 = vmax.f32 %v5372_v23, 0.0  ;;  %v4676_v32 = vmax.f32 %v5380_v24, 0.0 }
 0x323   :  { %v5362_v33 = vpack.c.bf16 %v4671_v27, %v4670_v21  ;;  %v5363_v34 = vpack.c.bf16 %v4673_v28, %v4672_v22  ;;  %v4675_v35 = vmax.f32 %v5373_v29, 0.0  ;;  %v4677_v36 = vmax.f32 %v5381_v30, 0.0 }
 0x325   :  { %4730 = vst [vmem:[%s8314_s3 + $0x20] sm:$0xff] %v5362_v33  ;;  %4731 = vst [vmem:[%s8314_s3 + $0x28] sm:$0xff] %v5363_v34  ;;  %v5364_v37 = vpack.c.bf16 %v4675_v35, %v4674_v31  ;;  %v5365_v38 = vpack.c.bf16 %v4677_v36, %v4676_v32 }
 0x327   :  { %4732 = vst [vmem:[%s8314_s3 + $0x30] sm:$0xff] %v5364_v37  ;;  %4733 = vst [vmem:[%s8314_s3 + $0x38] sm:$0xff] %v5365_v38 }

// kernel: simple_conv_forward.9
= control target key start
LH: loop header
LB: loop body
LE: loop exit
PB: predicated region body
PF: predicated region fallthrough
CT: control target
= control target key end

     0   :  { %v1067_v28 = vlaneseq  ;;  %v7650_v36 = vmov 1966171168   ;;  %s9361_s0 = inlined_call_operand.vmem [shape: bf16[2,8192], index: 0, kind: input, shape index: {}]   ;;  %s9362_s1 = inlined_call_operand.vmem [shape: bf16[8192,10], index: 1, kind: input, shape index: {}]   ;;  %s9363_s2 = inlined_call_operand.vmem [shape: f32[1,10], index: 2, kind: input, shape index: {}]   ;;  %s9364_s3 = inlined_call_operand.hbm [shape: f32[2,10], index: 3, kind: output, shape index: {}]  }
   0x1   :  { %v7106_v0 = vld [vmem:[%s9362_s1 + $0x40] sm:$0xff]   ;;  %v7110_v4 = vld [vmem:[%s9362_s1 + $0x48] sm:$0xff]   ;;  %v7114_v8 = vld [vmem:[%s9362_s1 + $0x50] sm:$0xff]   ;;  %v1065_v37 = vunpack.c.l.s4 %v7650_v36 }
   0x2   :  { %v7107_v1 = vld [vmem:[%s9362_s1 + $0xc0] sm:$0xff]   ;;  %6400 = vmatprep.subr.bf16.mxu0 %v7106_v0  ;;  %v7111_v5 = vld [vmem:[%s9362_s1 + $0xc8] sm:$0xff]   ;;  %v7115_v9 = vld [vmem:[%s9362_s1 + $0xd0] sm:$0xff]   ;;  %v1068_v33 = vshrl.u32 %v1067_v28, 7 }
   0x3   :  { %v7108_v2 = vld [vmem:[%s9362_s1] sm:$0xff]   ;;  %6422 = vmatprep.subr.bf16.mxu1 %v7107_v1  ;;  %v7112_v6 = vld [vmem:[%s9362_s1 + $0x8] sm:$0xff]   ;;  %v7116_v10 = vld [vmem:[%s9362_s1 + $0x10] sm:$0xff]   ;;  %v1066_v40 = vunpack.c.0.s8 %v1065_v37 }
   0x4   :  { %v7109_v3 = vld [vmem:[%s9362_s1 + $0x80] sm:$0xff]   ;;  %6401 = vmatpush3.bf16.msra.mxu0 %v7108_v2  ;;  %v7113_v7 = vld [vmem:[%s9362_s1 + $0x88] sm:$0xff]   ;;  %v7117_v11 = vld [vmem:[%s9362_s1 + $0x90] sm:$0xff]  }
   0x5   :  { %6423 = vmatpush3.bf16.msra.mxu1 %v7109_v3  ;;  %6402 = vmatprep.subr.bf16.mxu0 %v7110_v4  ;;  %v7118_v12 = vld [vmem:[%s9362_s1 + $0x58] sm:$0xff]   ;;  %v7122_v16 = vld [vmem:[%s9362_s1 + $0x60] sm:$0xff]   ;;  %v7126_v20 = vld [vmem:[%s9362_s1 + $0x68] sm:$0xff]   ;;  %v7777_v41 = vsub.s32 %v1066_v40, %v1068_v33 }
   0x6   :  { %6424 = vmatprep.subr.bf16.mxu1 %v7111_v5  ;;  %v7119_v13 = vld [vmem:[%s9362_s1 + $0xd8] sm:$0xff]   ;;  %v7123_v17 = vld [vmem:[%s9362_s1 + $0xe0] sm:$0xff]   ;;  %v7127_v21 = vld [vmem:[%s9362_s1 + $0xe8] sm:$0xff]  }
   0x7   :  { %v7120_v14 = vld [vmem:[%s9362_s1 + $0x18] sm:$0xff]   ;;  %v7124_v18 = vld [vmem:[%s9362_s1 + $0x20] sm:$0xff]   ;;  %v7128_v22 = vld [vmem:[%s9362_s1 + $0x28] sm:$0xff]  }
   0x8   :  { %6403 = vmatpush3.bf16.msra.mxu0 %v7112_v6  ;;  %v7121_v15 = vld [vmem:[%s9362_s1 + $0x98] sm:$0xff]   ;;  %v7125_v19 = vld [vmem:[%s9362_s1 + $0xa0] sm:$0xff]   ;;  %v7129_v23 = vld [vmem:[%s9362_s1 + $0xa8] sm:$0xff]  }
   0x9   :  { %6425 = vmatpush3.bf16.msra.mxu1 %v7113_v7  ;;  %6404 = vmatprep.subr.bf16.mxu0 %v7114_v8  ;;  %v7130_v24 = vld [vmem:[%s9362_s1 + $0x70] sm:$0xff]   ;;  %v7134_v29 = vld [vmem:[%s9362_s1 + $0x78] sm:$0xff]   ;;  %v16_v34 = vld [vmem:[%s9361_s0] sm:$0xff] }
   0xa   :  { %6426 = vmatprep.subr.bf16.mxu1 %v7115_v9  ;;  %v7131_v25 = vld [vmem:[%s9362_s1 + $0xf0] sm:$0xff]   ;;  %v7135_v30 = vld [vmem:[%s9362_s1 + $0xf8] sm:$0xff]   ;;  %v7139_v35 = vld [vmem:[%s9362_s1 + $0x140] sm:$0xff]   ;;  %v1063_v39 = vcombine.high %v16_v34, %v16_v34  ;;  %v1070_v42 = vrot.slane %v16_v34, %v7777_v41 }
   0xb   :  { %v7132_v26 = vld [vmem:[%s9362_s1 + $0x30] sm:$0xff]   ;;  %v7136_v31 = vld [vmem:[%s9362_s1 + $0x38] sm:$0xff]   ;;  %v7140_v38 = vld [vmem:[%s9362_s1 + $0x1c0] sm:$0xff]  }
   0xc   :  { %6405 = vmatpush3.bf16.msra.mxu0 %v7116_v10  ;;  %v7133_v27 = vld [vmem:[%s9362_s1 + $0xb0] sm:$0xff]   ;;  %v7137_v32 = vld [vmem:[%s9362_s1 + $0xb8] sm:$0xff]   ;;  %v7781_v43 = vrot.slane %v1063_v39, %v7777_v41  ;;  %v1078_v44 = vcombine.high %v1070_v42, %v1070_v42  ;;  %v1086_v45 = vrot.slane %v1070_v42, %v7777_v41  ;;  %v7141_v47 = vld [vmem:[%s9362_s1 + $0x100] sm:$0xff]  }
   0xd   :  { %6427 = vmatpush3.bf16.msra.mxu1 %v7117_v11  ;;  %6406 = vmatprep.subr.bf16.mxu0 %v7118_v12  ;;  %v7142_v49 = vld [vmem:[%s9362_s1 + $0x180] sm:$0xff]   ;;  %v7143_v52 = vld [vmem:[%s9362_s1 + $0x148] sm:$0xff]   ;;  %v7147_v58 = vld [vmem:[%s9362_s1 + $0x150] sm:$0xff]  }
   0xe   :  { %6428 = vmatprep.subr.bf16.mxu1 %v7119_v13  ;;  %v1079_v46 = vcombine.high %v7781_v43, %v7781_v43  ;;  %v1100_v48 = vrot.slane %v1078_v44, %v7777_v41  ;;  %v1108_v51 = vcombine.high %v1086_v45, %v1086_v45  ;;  %v7144_v54 = vld [vmem:[%s9362_s1 + $0x1c8] sm:$0xff]   ;;  %v7148_v59 = vld [vmem:[%s9362_s1 + $0x1d0] sm:$0xff]   ;;  %v7151_v62 = vld [vmem:[%s9362_s1 + $0x158] sm:$0xff]  }
   0xf   :  { %v7145_v55 = vld [vmem:[%s9362_s1 + $0x108] sm:$0xff]   ;;  %v7149_v60 = vld [vmem:[%s9362_s1 + $0x110] sm:$0xff]   ;;  %v7152_v63 = vld [vmem:[%s9362_s1 + $0x1d8] sm:$0xff]  }
  0x10   :  { %6407 = vmatpush3.bf16.msra.mxu0 %v7120_v14  ;;  %v1107_v50 = vrot.slane %v1079_v46, %v7777_v41  ;;  %4623 = vmatprep.mubr.bf16.mxu0 %v1100_v48  ;;  %v1110_v53 = vcombine.high %v1100_v48, %v1100_v48  ;;  %v7146_v57 = vld [vmem:[%s9362_s1 + $0x188] sm:$0xff]   ;;  %v7150_v61 = vld [vmem:[%s9362_s1 + $0x190] sm:$0xff]   ;;  %v7153_v0 = vld [vmem:[%s9362_s1 + $0x118] sm:$0xff]  }
  0x11   :  { %6429 = vmatpush3.bf16.msra.mxu1 %v7121_v15  ;;  %6408 = vmatprep.subr.bf16.mxu0 %v7122_v16  ;;  %v7154_v1 = vld [vmem:[%s9362_s1 + $0x198] sm:$0xff]   ;;  %v7155_v2 = vld [vmem:[%s9362_s1 + $0x160] sm:$0xff]   ;;  %v7159_v6 = vld [vmem:[%s9362_s1 + $0x168] sm:$0xff]  }
  0x12   :  { %6430 = vmatprep.subr.bf16.mxu1 %v7123_v17  ;;  %v1111_v56 = vcombine.high %v1107_v50, %v1107_v50  ;;  %4663 = vmatprep.mubr.bf16.mxu1 %v1110_v53  ;;  %v7156_v3 = vld [vmem:[%s9362_s1 + $0x1e0] sm:$0xff]   ;;  %v7160_v7 = vld [vmem:[%s9362_s1 + $0x1e8] sm:$0xff]   ;;  %v7163_v10 = vld [vmem:[%s9362_s1 + $0x170] sm:$0xff]  }
  0x13   :  { %v7157_v4 = vld [vmem:[%s9362_s1 + $0x120] sm:$0xff]   ;;  %v7161_v8 = vld [vmem:[%s9362_s1 + $0x128] sm:$0xff]   ;;  %v7164_v11 = vld [vmem:[%s9362_s1 + $0x1f0] sm:$0xff]  }
  0x14   :  { %6409 = vmatpush3.bf16.msra.mxu0 %v7124_v18  ;;  %v7158_v5 = vld [vmem:[%s9362_s1 + $0x1a0] sm:$0xff]   ;;  %v7162_v9 = vld [vmem:[%s9362_s1 + $0x1a8] sm:$0xff]   ;;  %v7165_v12 = vld [vmem:[%s9362_s1 + $0x130] sm:$0xff]   ;;  %v1093_v18 = vrot.slane %v7781_v43, %v7777_v41 }
  0x15   :  { %6431 = vmatpush3.bf16.msra.mxu1 %v7125_v19  ;;  %6410 = vmatprep.subr.bf16.mxu0 %v7126_v20  ;;  %v7166_v13 = vld [vmem:[%s9362_s1 + $0x1b0] sm:$0xff]   ;;  %v7167_v14 = vld [vmem:[%s9362_s1 + $0x178] sm:$0xff]   ;;  %v7171_v19 = vld [vmem:[%s9362_s1 + $0x240] sm:$0xff]  }
  0x16   :  { %6432 = vmatprep.subr.bf16.mxu1 %v7127_v21  ;;  %v7168_v15 = vld [vmem:[%s9362_s1 + $0x1f8] sm:$0xff]   ;;  %v7172_v20 = vld [vmem:[%s9362_s1 + $0x2c0] sm:$0xff]   ;;  %v7179_v28 = vld [vmem:[%s9362_s1 + $0x250] sm:$0xff]  }
  0x17   :  { %v7169_v16 = vld [vmem:[%s9362_s1 + $0x138] sm:$0xff]   ;;  %v7173_v21 = vld [vmem:[%s9362_s1 + $0x200] sm:$0xff]   ;;  %v7191_v40 = vld [vmem:[%s9362_s1 + $0x268] sm:$0xff]  }
  0x18   :  { %6411 = vmatpush3.bf16.msra.mxu0 %v7128_v22  ;;  %v7170_v17 = vld [vmem:[%s9362_s1 + $0x1b8] sm:$0xff]   ;;  %v7174_v22 = vld [vmem:[%s9362_s1 + $0x280] sm:$0xff]   ;;  %v7192_v42 = vld [vmem:[%s9362_s1 + $0x2e8] sm:$0xff]  }
  0x19   :  { %6433 = vmatpush3.bf16.msra.mxu1 %v7129_v23  ;;  %6412 = vmatprep.subr.bf16.mxu0 %v7130_v24  ;;  %v1109_v23 = vcombine.high %v1093_v18, %v1093_v18  ;;  %v7175_v24 = vld [vmem:[%s9362_s1 + $0x248] sm:$0xff]   ;;  %v7184_v33 = vld [vmem:[%s9362_s1 + $0x2d8] sm:$0xff]   ;;  %v7187_v36 = vld [vmem:[%s9362_s1 + $0x260] sm:$0xff]  }
  0x1a   :  { %6434 = vmatprep.subr.bf16.mxu1 %v7131_v25  ;;  %v7176_v25 = vld [vmem:[%s9362_s1 + $0x2c8] sm:$0xff]   ;;  %v7185_v34 = vld [vmem:[%s9362_s1 + $0x218] sm:$0xff]   ;;  %v7188_v37 = vld [vmem:[%s9362_s1 + $0x2e0] sm:$0xff]  }
  0x1b   :  { %v7190_v39 = vld [vmem:[%s9362_s1 + $0x2a0] sm:$0xff]   ;;  %v7193_v43 = vld [vmem:[%s9362_s1 + $0x228] sm:$0xff]  }
  0x1c   :  { %6413 = vmatpush3.bf16.msra.mxu0 %v7132_v26  ;;  %v7177_v26 = vld [vmem:[%s9362_s1 + $0x208] sm:$0xff]  }
  0x1d   :  { %6435 = vmatpush3.bf16.msra.mxu1 %v7133_v27  ;;  %6414 = vmatprep.subr.bf16.mxu0 %v7134_v29  ;;  %v7178_v27 = vld [vmem:[%s9362_s1 + $0x288] sm:$0xff]   ;;  %v7180_v29 = vld [vmem:[%s9362_s1 + $0x2d0] sm:$0xff]  }
  0x1e   :  { %6436 = vmatprep.subr.bf16.mxu1 %v7135_v30  ;;  %v7181_v30 = vld [vmem:[%s9362_s1 + $0x210] sm:$0xff]   ;;  %v7194_v44 = vld [vmem:[%s9362_s1 + $0x2a8] sm:$0xff]  }
  0x1f   :  { %v17_v46 = vld [vmem:[%s9361_s0 + $0x8] sm:$0xff] }
  0x20   :  { %6415 = vmatpush3.bf16.msra.mxu0 %v7136_v31  ;;  %v7182_v31 = vld [vmem:[%s9362_s1 + $0x290] sm:$0xff]   ;;  %v1119_v48 = vrot.slane %v17_v46, %v7777_v41 }
  0x21   :  { %6437 = vmatpush3.bf16.msra.mxu1 %v7137_v32  ;;  %6444 = vmatprep.subr.bf16.mxu0 %v7139_v35  ;;  %v7183_v32 = vld [vmem:[%s9362_s1 + $0x258] sm:$0xff]  }
  0x22   :  { %6466 = vmatprep.subr.bf16.mxu1 %v7140_v38  ;;  %v7186_v35 = vld [vmem:[%s9362_s1 + $0x298] sm:$0xff]   ;;  %v7189_v38 = vld [vmem:[%s9362_s1 + $0x220] sm:$0xff]  }
  0x23   :  { %4624 = vmatmul.mubr.bf16.vlgmr.msra.gmra.mrb[0].mxu0 %v1086_v45  ;;  %v7195_v45 = vld [vmem:[%s9362_s1 + $0x270] sm:$0xff]  }
  0x24   :  { %6445 = vmatpush3.bf16.msra.mxu0 %v7141_v47  ;;  %4664 = vmatmul.mubr.bf16.vlgmr.msra.gmra.mrb[0].mxu1 %v1108_v51  ;;  %v7196_v47 = vld [vmem:[%s9362_s1 + $0x2f0] sm:$0xff]  }
  0x25   :  { %6446 = vmatprep.subr.bf16.mxu0 %v7143_v52  ;;  %6467 = vmatpush3.bf16.msra.mxu1 %v7142_v49  ;;  %v1112_v49 = vcombine.high %v17_v46, %v17_v46  ;;  %v7198_v51 = vld [vmem:[%s9362_s1 + $0x2b0] sm:$0xff]   ;;  %v1127_v52 = vcombine.high %v1119_v48, %v1119_v48 }
  0x26   :  { %4703 = vmatprep.mubr.bf16.mxu0 %v1107_v50  ;;  %6468 = vmatprep.subr.bf16.mxu1 %v7144_v54  ;;  %v7197_v50 = vld [vmem:[%s9362_s1 + $0x230] sm:$0xff]   ;;  %v7199_v54 = vld [vmem:[%s9362_s1 + $0x278] sm:$0xff]  }
  0x27   :  { %4743 = vmatprep.mubr.bf16.mxu1 %v1111_v56  ;;  %v7969_v53 = vrot.slane %v1112_v49, %v7777_v41  ;;  %v1149_v56 = vrot.slane %v1127_v52, %v7777_v41  ;;  %v7246_v46 = vld [vmem:[%s9362_s1 + $0x410] sm:$0xff]   ;;  %v7249_v49 = vld [vmem:[%s9362_s1 + $0x4d8] sm:$0xff]   ;;  %v7252_v52 = vld [vmem:[%s9362_s1 + $0x460] sm:$0xff]  }
  0x28   :  { %6447 = vmatpush3.bf16.msra.mxu0 %v7145_v55  ;;  %v7200_v55 = vld [vmem:[%s9362_s1 + $0x2f8] sm:$0xff]  }
  0x29   :  { %6448 = vmatprep.subr.bf16.mxu0 %v7147_v58  ;;  %6469 = vmatpush3.bf16.msra.mxu1 %v7146_v57  ;;  %v1128_v57 = vcombine.high %v7969_v53, %v7969_v53  ;;  %v7201_v58 = vld [vmem:[%s9362_s1 + $0x238] sm:$0xff]  }
  0x2a   :  { %6470 = vmatprep.subr.bf16.mxu1 %v7148_v59  ;;  %v7202_v59 = vld [vmem:[%s9362_s1 + $0x2b8] sm:$0xff]  }
  0x2c   :  { %6449 = vmatpush3.bf16.msra.mxu0 %v7149_v60  ;;  %v1159_v60 = vcombine.high %v1149_v56, %v1149_v56 }
  0x2d   :  { %6450 = vmatprep.subr.bf16.mxu0 %v7151_v62  ;;  %6471 = vmatpush3.bf16.msra.mxu1 %v7150_v61  ;;  %v1135_v61 = vrot.slane %v1119_v48, %v7777_v41  ;;  %v7203_v62 = vld [vmem:[%s9362_s1 + $0x340] sm:$0xff]   ;;  %v7248_v48 = vld [vmem:[%s9362_s1 + $0x458] sm:$0xff]  }
  0x2e   :  { %6472 = vmatprep.subr.bf16.mxu1 %v7152_v63  ;;  %v7204_v63 = vld [vmem:[%s9362_s1 + $0x3c0] sm:$0xff]  }
  0x30   :  { %6451 = vmatpush3.bf16.msra.mxu0 %v7153_v0  ;;  %v1156_v0 = vrot.slane %v1128_v57, %v7777_v41  ;;  %v7257_v57 = vld [vmem:[%s9362_s1 + $0x4e8] sm:$0xff]  }
  0x31   :  { %6452 = vmatprep.subr.bf16.mxu0 %v7155_v2  ;;  %6473 = vmatpush3.bf16.msra.mxu1 %v7154_v1  ;;  %v7205_v1 = vld [vmem:[%s9362_s1 + $0x300] sm:$0xff]  }
  0x32   :  { %6474 = vmatprep.subr.bf16.mxu1 %v7156_v3  ;;  %v7206_v2 = vld [vmem:[%s9362_s1 + $0x380] sm:$0xff]   ;;  %v1157_v3 = vcombine.high %v1135_v61, %v1135_v61 }
  0x34   :  { %6453 = vmatpush3.bf16.msra.mxu0 %v7157_v4  ;;  %v7207_v4 = vld [vmem:[%s9362_s1 + $0x348] sm:$0xff]  }
  0x35   :  { %6454 = vmatprep.subr.bf16.mxu0 %v7159_v6  ;;  %6475 = vmatpush3.bf16.msra.mxu1 %v7158_v5  ;;  %v7208_v5 = vld [vmem:[%s9362_s1 + $0x3c8] sm:$0xff]   ;;  %v1160_v6 = vcombine.high %v1156_v0, %v1156_v0 }
  0x36   :  { %6476 = vmatprep.subr.bf16.mxu1 %v7160_v7  ;;  %v7209_v7 = vld [vmem:[%s9362_s1 + $0x308] sm:$0xff]  }
  0x38   :  { %6455 = vmatpush3.bf16.msra.mxu0 %v7161_v8  ;;  %v7210_v8 = vld [vmem:[%s9362_s1 + $0x388] sm:$0xff]  }
  0x39   :  { %6456 = vmatprep.subr.bf16.mxu0 %v7163_v10  ;;  %6477 = vmatpush3.bf16.msra.mxu1 %v7162_v9  ;;  %v7211_v9 = vld [vmem:[%s9362_s1 + $0x350] sm:$0xff]  }
  0x3a   :  { %6478 = vmatprep.subr.bf16.mxu1 %v7164_v11  ;;  %v7212_v10 = vld [vmem:[%s9362_s1 + $0x3d0] sm:$0xff]  }
  0x3b   :  { %v7213_v11 = vld [vmem:[%s9362_s1 + $0x310] sm:$0xff]  }
  0x3c   :  { %6457 = vmatpush3.bf16.msra.mxu0 %v7165_v12  ;;  %v7214_v12 = vld [vmem:[%s9362_s1 + $0x390] sm:$0xff]  }
  0x3d   :  { %6458 = vmatprep.subr.bf16.mxu0 %v7167_v14  ;;  %6479 = vmatpush3.bf16.msra.mxu1 %v7166_v13  ;;  %v7215_v13 = vld [vmem:[%s9362_s1 + $0x358] sm:$0xff]  }
  0x3e   :  { %6480 = vmatprep.subr.bf16.mxu1 %v7168_v15  ;;  %v7216_v14 = vld [vmem:[%s9362_s1 + $0x3d8] sm:$0xff]  }
  0x3f   :  { %v7217_v15 = vld [vmem:[%s9362_s1 + $0x318] sm:$0xff]  }
  0x40   :  { %6459 = vmatpush3.bf16.msra.mxu0 %v7169_v16  ;;  %v7218_v16 = vld [vmem:[%s9362_s1 + $0x398] sm:$0xff]  }
  0x41   :  { %6488 = vmatprep.subr.bf16.mxu0 %v7171_v19  ;;  %6481 = vmatpush3.bf16.msra.mxu1 %v7170_v17  ;;  %v7219_v17 = vld [vmem:[%s9362_s1 + $0x360] sm:$0xff]  }
  0x42   :  { %6510 = vmatprep.subr.bf16.mxu1 %v7172_v20  ;;  %v7221_v19 = vld [vmem:[%s9362_s1 + $0x320] sm:$0xff]  }
  0x43   :  { %4704 = vmatmul.mubr.bf16.vlgmr.msra.gmra.mrb[4].mxu0 %v1093_v18  ;;  %v7220_v18 = vld [vmem:[%s9362_s1 + $0x3e0] sm:$0xff]  }
  0x44   :  { %6489 = vmatpush3.bf16.msra.mxu0 %v7173_v21  ;;  %4744 = vmatmul.mubr.bf16.vlgmr.msra.gmra.mrb[4].mxu1 %v1109_v23  ;;  %v7222_v20 = vld [vmem:[%s9362_s1 + $0x3a0] sm:$0xff]   ;;  %v7223_v21 = vld [vmem:[%s9362_s1 + $0x368] sm:$0xff]  }
  0x45   :  { %6490 = vmatprep.subr.bf16.mxu0 %v7175_v24  ;;  %6511 = vmatpush3.bf16.msra.mxu1 %v7174_v22  ;;  %v7224_v22 = vld [vmem:[%s9362_s1 + $0x3e8] sm:$0xff]  }
  0x46   :  { %6512 = vmatprep.subr.bf16.mxu1 %v7176_v25  ;;  %4783 = vmatprep.mubr.bf16.mxu0 %v1149_v56  ;;  %v7225_v23 = vld [vmem:[%s9362_s1 + $0x328] sm:$0xff]   ;;  %v7227_v25 = vld [vmem:[%s9362_s1 + $0x370] sm:$0xff]  }
  0x47   :  { %4823 = vmatprep.mubr.bf16.mxu1 %v1159_v60  ;;  %v7226_v24 = vld [vmem:[%s9362_s1 + $0x3a8] sm:$0xff]   ;;  %v7260_v60 = vld [vmem:[%s9362_s1 + $0x470] sm:$0xff]  }
  0x48   :  { %6491 = vmatpush3.bf16.msra.mxu0 %v7177_v26  ;;  %v7228_v26 = vld [vmem:[%s9362_s1 + $0x3f0] sm:$0xff]   ;;  %v7256_v56 = vld [vmem:[%s9362_s1 + $0x468] sm:$0xff]  }
  0x49   :  { %6492 = vmatprep.subr.bf16.mxu0 %v7179_v28  ;;  %6513 = vmatpush3.bf16.msra.mxu1 %v7178_v27  ;;  %v7229_v27 = vld [vmem:[%s9362_s1 + $0x330] sm:$0xff]  }
  0x4a   :  { %6514 = vmatprep.subr.bf16.mxu1 %v7180_v29  ;;  %v7230_v28 = vld [vmem:[%s9362_s1 + $0x3b0] sm:$0xff]   ;;  %v7231_v29 = vld [vmem:[%s9362_s1 + $0x378] sm:$0xff]  }
  0x4c   :  { %6493 = vmatpush3.bf16.msra.mxu0 %v7181_v30  ;;  %v7232_v30 = vld [vmem:[%s9362_s1 + $0x3f8] sm:$0xff]  }
  0x4d   :  { %6494 = vmatprep.subr.bf16.mxu0 %v7183_v32  ;;  %6515 = vmatpush3.bf16.msra.mxu1 %v7182_v31  ;;  %v7233_v31 = vld [vmem:[%s9362_s1 + $0x338] sm:$0xff]  }
  0x4e   :  { %6516 = vmatprep.subr.bf16.mxu1 %v7184_v33  ;;  %v7234_v32 = vld [vmem:[%s9362_s1 + $0x3b8] sm:$0xff]   ;;  %v1142_v33 = vrot.slane %v7969_v53, %v7777_v41  ;;  %v7253_v53 = vld [vmem:[%s9362_s1 + $0x4e0] sm:$0xff]  }
  0x50   :  { %6495 = vmatpush3.bf16.msra.mxu0 %v7185_v34  ;;  %v7236_v34 = vld [vmem:[%s9362_s1 + $0x440] sm:$0xff]  }
  0x51   :  { %6496 = vmatprep.subr.bf16.mxu0 %v7187_v36  ;;  %6517 = vmatpush3.bf16.msra.mxu1 %v7186_v35  ;;  %v7237_v35 = vld [vmem:[%s9362_s1 + $0x4c0] sm:$0xff]  }
  0x52   :  { %6518 = vmatprep.subr.bf16.mxu1 %v7188_v37  ;;  %v7238_v36 = vld [vmem:[%s9362_s1 + $0x400] sm:$0xff]  }
  0x53   :  { %v7239_v37 = vld [vmem:[%s9362_s1 + $0x480] sm:$0xff]  }
  0x54   :  { %6497 = vmatpush3.bf16.msra.mxu0 %v7189_v38  ;;  %v1158_v38 = vcombine.high %v1142_v33, %v1142_v33 }
  0x55   :  { %6498 = vmatprep.subr.bf16.mxu0 %v7191_v40  ;;  %6519 = vmatpush3.bf16.msra.mxu1 %v7190_v39  ;;  %v7240_v39 = vld [vmem:[%s9362_s1 + $0x448] sm:$0xff]  }
  0x56   :  { %6520 = vmatprep.subr.bf16.mxu1 %v7192_v42  ;;  %v7241_v40 = vld [vmem:[%s9362_s1 + $0x4c8] sm:$0xff]  }
  0x57   :  { %v7242_v42 = vld [vmem:[%s9362_s1 + $0x408] sm:$0xff]  }
  0x58   :  { %6499 = vmatpush3.bf16.msra.mxu0 %v7193_v43  ;;  %v7243_v43 = vld [vmem:[%s9362_s1 + $0x488] sm:$0xff]  }
  0x59   :  { %6500 = vmatprep.subr.bf16.mxu0 %v7195_v45  ;;  %6521 = vmatpush3.bf16.msra.mxu1 %v7194_v44  ;;  %v7244_v44 = vld [vmem:[%s9362_s1 + $0x450] sm:$0xff]  }
  0x5a   :  { %6522 = vmatprep.subr.bf16.mxu1 %v7196_v47  ;;  %v7245_v45 = vld [vmem:[%s9362_s1 + $0x4d0] sm:$0xff]  }
  0x5b   :  { %v7247_v47 = vld [vmem:[%s9362_s1 + $0x490] sm:$0xff]  }
  0x5c   :  { %6501 = vmatpush3.bf16.msra.mxu0 %v7197_v50  ;;  %v7250_v50 = vld [vmem:[%s9362_s1 + $0x418] sm:$0xff]  }
  0x5d   :  { %6502 = vmatprep.subr.bf16.mxu0 %v7199_v54  ;;  %6523 = vmatpush3.bf16.msra.mxu1 %v7198_v51  ;;  %v7251_v51 = vld [vmem:[%s9362_s1 + $0x498] sm:$0xff]   ;;  %v7254_v54 = vld [vmem:[%s9362_s1 + $0x420] sm:$0xff]  }
  0x5e   :  { %6524 = vmatprep.subr.bf16.mxu1 %v7200_v55  ;;  %v7255_v55 = vld [vmem:[%s9362_s1 + $0x4a0] sm:$0xff]  }
  0x60   :  { %6503 = vmatpush3.bf16.msra.mxu0 %v7201_v58  ;;  %v7258_v58 = vld [vmem:[%s9362_s1 + $0x428] sm:$0xff]  }
  0x61   :  { %6532 = vmatprep.subr.bf16.mxu0 %v7203_v62  ;;  %6525 = vmatpush3.bf16.msra.mxu1 %v7202_v59  ;;  %v7259_v59 = vld [vmem:[%s9362_s1 + $0x4a8] sm:$0xff]   ;;  %v7261_v62 = vld [vmem:[%s9362_s1 + $0x4f0] sm:$0xff]  }
  0x62   :  { %6554 = vmatprep.subr.bf16.mxu1 %v7204_v63 }
  0x63   :  { %4784 = vmatmul.mubr.bf16.vlgmr.msra.gmra.mrb[8].mxu0 %v1135_v61  ;;  %v18_v61 = vld [vmem:[%s9361_s0 + $0x10] sm:$0xff] }
  0x64   :  { %6533 = vmatpush3.bf16.msra.mxu0 %v7205_v1  ;;  %4863 = vmatprep.mubr.bf16.mxu0 %v1156_v0  ;;  %v1168_v63 = vrot.slane %v18_v61, %v7777_v41  ;;  %v1161_v0 = vcombine.high %v18_v61, %v18_v61  ;;  %v7262_v1 = vld [vmem:[%s9362_s1 + $0x430] sm:$0xff]  }
  0x65   :  { %4824 = vmatmul.mubr.bf16.vlgmr.msra.gmra.mrb[8].mxu1 %v1157_v3  ;;  %6534 = vmatprep.subr.bf16.mxu0 %v7207_v4  ;;  %v7311_v61 = vld [vmem:[%s9362_s1 + $0x610] sm:$0xff]  }
  0x66   :  { %6555 = vmatpush3.bf16.msra.mxu1 %v7206_v2  ;;  %4903 = vmatprep.mubr.bf16.mxu1 %v1160_v6  ;;  %v7263_v2 = vld [vmem:[%s9362_s1 + $0x4b0] sm:$0xff]   ;;  %v1176_v3 = vcombine.high %v1168_v63, %v1168_v63  ;;  %v8175_v4 = vrot.slane %v1161_v0, %v7777_v41  ;;  %v7265_v6 = vld [vmem:[%s9362_s1 + $0x4f8] sm:$0xff]  }
  0x67   :  { %6556 = vmatprep.subr.bf16.mxu1 %v7208_v5  ;;  %v7264_v5 = vld [vmem:[%s9362_s1 + $0x478] sm:$0xff]  }
  0x68   :  { %6535 = vmatpush3.bf16.msra.mxu0 %v7209_v7  ;;  %v1198_v7 = vrot.slane %v1176_v3, %v7777_v41  ;;  %v7314_v0 = vld [vmem:[%s9362_s1 + $0x6d8] sm:$0xff]   ;;  %v7317_v3 = vld [vmem:[%s9362_s1 + $0x660] sm:$0xff]  }
  0x69   :  { %6536 = vmatprep.subr.bf16.mxu0 %v7211_v9  ;;  %v7266_v9 = vld [vmem:[%s9362_s1 + $0x438] sm:$0xff]  }
  0x6a   :  { %6557 = vmatpush3.bf16.msra.mxu1 %v7210_v8  ;;  %v1177_v8 = vcombine.high %v8175_v4, %v8175_v4 }
  0x6b   :  { %6558 = vmatprep.subr.bf16.mxu1 %v7212_v10  ;;  %v7267_v10 = vld [vmem:[%s9362_s1 + $0x4b8] sm:$0xff]  }
  0x6c   :  { %6537 = vmatpush3.bf16.msra.mxu0 %v7213_v11  ;;  %v1208_v11 = vcombine.high %v1198_v7, %v1198_v7 }
  0x6d   :  { %6538 = vmatprep.subr.bf16.mxu0 %v7215_v13  ;;  %v7268_v13 = vld [vmem:[%s9362_s1 + $0x540] sm:$0xff]  }
  0x6e   :  { %6559 = vmatpush3.bf16.msra.mxu1 %v7214_v12  ;;  %v1184_v12 = vrot.slane %v1168_v63, %v7777_v41  ;;  %v7313_v63 = vld [vmem:[%s9362_s1 + $0x658] sm:$0xff]  }
  0x6f   :  { %6560 = vmatprep.subr.bf16.mxu1 %v7216_v14  ;;  %v7269_v14 = vld [vmem:[%s9362_s1 + $0x5c0] sm:$0xff]  }
  0x70   :  { %6539 = vmatpush3.bf16.msra.mxu0 %v7217_v15  ;;  %v1205_v15 = vrot.slane %v1177_v8, %v7777_v41  ;;  %v7322_v8 = vld [vmem:[%s9362_s1 + $0x6e8] sm:$0xff]  }
  0x71   :  { %6540 = vmatprep.subr.bf16.mxu0 %v7219_v17  ;;  %v7271_v17 = vld [vmem:[%s9362_s1 + $0x580] sm:$0xff]  }
  0x72   :  { %6561 = vmatpush3.bf16.msra.mxu1 %v7218_v16  ;;  %v7270_v16 = vld [vmem:[%s9362_s1 + $0x500] sm:$0xff]  }
  0x73   :  { %6562 = vmatprep.subr.bf16.mxu1 %v7220_v18  ;;  %v1206_v18 = vcombine.high %v1184_v12, %v1184_v12 }
  0x74   :  { %6541 = vmatpush3.bf16.msra.mxu0 %v7221_v19  ;;  %v7272_v19 = vld [vmem:[%s9362_s1 + $0x548] sm:$0xff]  }
  0x75   :  { %6542 = vmatprep.subr.bf16.mxu0 %v7223_v21  ;;  %v1209_v21 = vcombine.high %v1205_v15, %v1205_v15 }
  0x76   :  { %6563 = vmatpush3.bf16.msra.mxu1 %v7222_v20  ;;  %v7273_v20 = vld [vmem:[%s9362_s1 + $0x5c8] sm:$0xff]  }
  0x77   :  { %6564 = vmatprep.subr.bf16.mxu1 %v7224_v22  ;;  %v7274_v22 = vld [vmem:[%s9362_s1 + $0x508] sm:$0xff]  }
  0x78   :  { %6543 = vmatpush3.bf16.msra.mxu0 %v7225_v23  ;;  %v7275_v23 = vld [vmem:[%s9362_s1 + $0x588] sm:$0xff]  }
  0x79   :  { %6544 = vmatprep.subr.bf16.mxu0 %v7227_v25  ;;  %v7277_v25 = vld [vmem:[%s9362_s1 + $0x5d0] sm:$0xff]  }
  0x7a   :  { %6565 = vmatpush3.bf16.msra.mxu1 %v7226_v24  ;;  %v7276_v24 = vld [vmem:[%s9362_s1 + $0x550] sm:$0xff]  }
  0x7b   :  { %6566 = vmatprep.subr.bf16.mxu1 %v7228_v26  ;;  %v7278_v26 = vld [vmem:[%s9362_s1 + $0x510] sm:$0xff]  }
  0x7c   :  { %6545 = vmatpush3.bf16.msra.mxu0 %v7229_v27  ;;  %v7279_v27 = vld [vmem:[%s9362_s1 + $0x590] sm:$0xff]  }
  0x7d   :  { %6546 = vmatprep.subr.bf16.mxu0 %v7231_v29  ;;  %v7281_v29 = vld [vmem:[%s9362_s1 + $0x5d8] sm:$0xff]  }
  0x7e   :  { %6567 = vmatpush3.bf16.msra.mxu1 %v7230_v28  ;;  %v7280_v28 = vld [vmem:[%s9362_s1 + $0x558] sm:$0xff]  }
  0x7f   :  { %6568 = vmatprep.subr.bf16.mxu1 %v7232_v30  ;;  %v7282_v30 = vld [vmem:[%s9362_s1 + $0x518] sm:$0xff]  }
  0x80   :  { %6547 = vmatpush3.bf16.msra.mxu0 %v7233_v31  ;;  %v7283_v31 = vld [vmem:[%s9362_s1 + $0x598] sm:$0xff]  }
  0x81   :  { %6576 = vmatprep.subr.bf16.mxu0 %v7236_v34  ;;  %v7286_v34 = vld [vmem:[%s9362_s1 + $0x520] sm:$0xff]  }
  0x82   :  { %6569 = vmatpush3.bf16.msra.mxu1 %v7234_v32  ;;  %v7284_v32 = vld [vmem:[%s9362_s1 + $0x560] sm:$0xff]  }
  0x83   :  { %4864 = vmatmul.mubr.bf16.vlgmr.msra.gmra.mrb[12].mxu0 %v1142_v33  ;;  %6598 = vmatprep.subr.bf16.mxu1 %v7237_v35  ;;  %v7285_v33 = vld [vmem:[%s9362_s1 + $0x5e0] sm:$0xff]  }
  0x84   :  { %6577 = vmatpush3.bf16.msra.mxu0 %v7238_v36  ;;  %4943 = vmatprep.mubr.bf16.mxu0 %v1198_v7  ;;  %v7287_v35 = vld [vmem:[%s9362_s1 + $0x5a0] sm:$0xff]   ;;  %v7288_v36 = vld [vmem:[%s9362_s1 + $0x568] sm:$0xff]  }
  0x85   :  { %4904 = vmatmul.mubr.bf16.vlgmr.msra.gmra.mrb[12].mxu1 %v1158_v38  ;;  %6578 = vmatprep.subr.bf16.mxu0 %v7240_v39  ;;  %v7290_v38 = vld [vmem:[%s9362_s1 + $0x528] sm:$0xff]  }
  0x86   :  { %6599 = vmatpush3.bf16.msra.mxu1 %v7239_v37  ;;  %4983 = vmatprep.mubr.bf16.mxu1 %v1208_v11  ;;  %v7289_v37 = vld [vmem:[%s9362_s1 + $0x5e8] sm:$0xff]   ;;  %v7325_v11 = vld [vmem:[%s9362_s1 + $0x670] sm:$0xff]  }
  0x87   :  { %6600 = vmatprep.subr.bf16.mxu1 %v7241_v40  ;;  %v7291_v39 = vld [vmem:[%s9362_s1 + $0x5a8] sm:$0xff]   ;;  %v7292_v40 = vld [vmem:[%s9362_s1 + $0x570] sm:$0xff]  }
  0x88   :  { %6579 = vmatpush3.bf16.msra.mxu0 %v7242_v42  ;;  %v7293_v42 = vld [vmem:[%s9362_s1 + $0x5f0] sm:$0xff]   ;;  %v7321_v7 = vld [vmem:[%s9362_s1 + $0x668] sm:$0xff]  }
  0x89   :  { %6580 = vmatprep.subr.bf16.mxu0 %v7244_v44  ;;  %v7295_v44 = vld [vmem:[%s9362_s1 + $0x5b0] sm:$0xff]  }
  0x8a   :  { %6601 = vmatpush3.bf16.msra.mxu1 %v7243_v43  ;;  %v7294_v43 = vld [vmem:[%s9362_s1 + $0x530] sm:$0xff]  }
  0x8b   :  { %6602 = vmatprep.subr.bf16.mxu1 %v7245_v45  ;;  %v7296_v45 = vld [vmem:[%s9362_s1 + $0x578] sm:$0xff]  }
  0x8c   :  { %6581 = vmatpush3.bf16.msra.mxu0 %v7246_v46  ;;  %v7297_v46 = vld [vmem:[%s9362_s1 + $0x5f8] sm:$0xff]  }
  0x8d   :  { %6582 = vmatprep.subr.bf16.mxu0 %v7248_v48  ;;  %v7299_v48 = vld [vmem:[%s9362_s1 + $0x5b8] sm:$0xff]  }
  0x8e   :  { %6603 = vmatpush3.bf16.msra.mxu1 %v7247_v47  ;;  %v7298_v47 = vld [vmem:[%s9362_s1 + $0x538] sm:$0xff]  }
  0x8f   :  { %6604 = vmatprep.subr.bf16.mxu1 %v7249_v49  ;;  %v1191_v49 = vrot.slane %v8175_v4, %v7777_v41  ;;  %v7318_v4 = vld [vmem:[%s9362_s1 + $0x6e0] sm:$0xff]  }
  0x90   :  { %6583 = vmatpush3.bf16.msra.mxu0 %v7250_v50  ;;  %v7301_v50 = vld [vmem:[%s9362_s1 + $0x640] sm:$0xff]  }
  0x91   :  { %6584 = vmatprep.subr.bf16.mxu0 %v7252_v52  ;;  %v7303_v52 = vld [vmem:[%s9362_s1 + $0x600] sm:$0xff]  }
  0x92   :  { %6605 = vmatpush3.bf16.msra.mxu1 %v7251_v51  ;;  %v7302_v51 = vld [vmem:[%s9362_s1 + $0x6c0] sm:$0xff]  }
  0x93   :  { %6606 = vmatprep.subr.bf16.mxu1 %v7253_v53  ;;  %v7304_v53 = vld [vmem:[%s9362_s1 + $0x680] sm:$0xff]  }
  0x94   :  { %6585 = vmatpush3.bf16.msra.mxu0 %v7254_v54  ;;  %v1207_v54 = vcombine.high %v1191_v49, %v1191_v49 }
  0x95   :  { %6586 = vmatprep.subr.bf16.mxu0 %v7256_v56  ;;  %v7306_v56 = vld [vmem:[%s9362_s1 + $0x6c8] sm:$0xff]  }
  0x96   :  { %6607 = vmatpush3.bf16.msra.mxu1 %v7255_v55  ;;  %v7305_v55 = vld [vmem:[%s9362_s1 + $0x648] sm:$0xff]  }
  0x97   :  { %6608 = vmatprep.subr.bf16.mxu1 %v7257_v57  ;;  %v7307_v57 = vld [vmem:[%s9362_s1 + $0x608] sm:$0xff]  }
  0x98   :  { %6587 = vmatpush3.bf16.msra.mxu0 %v7258_v58  ;;  %v7308_v58 = vld [vmem:[%s9362_s1 + $0x688] sm:$0xff]  }
  0x99   :  { %6588 = vmatprep.subr.bf16.mxu0 %v7260_v60  ;;  %v7310_v60 = vld [vmem:[%s9362_s1 + $0x6d0] sm:$0xff]  }
  0x9a   :  { %6609 = vmatpush3.bf16.msra.mxu1 %v7259_v59  ;;  %v7309_v59 = vld [vmem:[%s9362_s1 + $0x650] sm:$0xff]  }
  0x9b   :  { %6610 = vmatprep.subr.bf16.mxu1 %v7261_v62  ;;  %v7312_v62 = vld [vmem:[%s9362_s1 + $0x690] sm:$0xff]  }
  0x9c   :  { %6589 = vmatpush3.bf16.msra.mxu0 %v7262_v1  ;;  %v7315_v1 = vld [vmem:[%s9362_s1 + $0x618] sm:$0xff]  }
  0x9d   :  { %6590 = vmatprep.subr.bf16.mxu0 %v7264_v5  ;;  %v7319_v5 = vld [vmem:[%s9362_s1 + $0x620] sm:$0xff]  }
  0x9e   :  { %6611 = vmatpush3.bf16.msra.mxu1 %v7263_v2  ;;  %v7316_v2 = vld [vmem:[%s9362_s1 + $0x698] sm:$0xff]  }
  0x9f   :  { %6612 = vmatprep.subr.bf16.mxu1 %v7265_v6  ;;  %v7320_v6 = vld [vmem:[%s9362_s1 + $0x6a0] sm:$0xff]  }
  0xa0   :  { %6591 = vmatpush3.bf16.msra.mxu0 %v7266_v9  ;;  %v7323_v9 = vld [vmem:[%s9362_s1 + $0x628] sm:$0xff]  }
  0xa1   :  { %6620 = vmatprep.subr.bf16.mxu0 %v7268_v13  ;;  %v7326_v13 = vld [vmem:[%s9362_s1 + $0x6f0] sm:$0xff]  }
  0xa2   :  { %6613 = vmatpush3.bf16.msra.mxu1 %v7267_v10  ;;  %v7324_v10 = vld [vmem:[%s9362_s1 + $0x6a8] sm:$0xff]  }
  0xa3   :  { %4944 = vmatmul.mubr.bf16.vlgmr.msra.gmra.mrb[16].mxu0 %v1184_v12  ;;  %6642 = vmatprep.subr.bf16.mxu1 %v7269_v14  ;;  %v19_v12 = vld [vmem:[%s9361_s0 + $0x18] sm:$0xff] }
  0xa4   :  { %6621 = vmatpush3.bf16.msra.mxu0 %v7270_v16  ;;  %5023 = vmatprep.mubr.bf16.mxu0 %v1205_v15  ;;  %v1217_v14 = vrot.slane %v19_v12, %v7777_v41  ;;  %v1210_v15 = vcombine.high %v19_v12, %v19_v12  ;;  %v7327_v16 = vld [vmem:[%s9362_s1 + $0x630] sm:$0xff]   ;;  %v7364_v12 = vld [vmem:[%s9362_s1 + $0x7b8] sm:$0xff]  }
  0xa5   :  { %4984 = vmatmul.mubr.bf16.vlgmr.msra.gmra.mrb[16].mxu1 %v1206_v18  ;;  %6622 = vmatprep.subr.bf16.mxu0 %v7272_v19 }
  0xa6   :  { %6643 = vmatpush3.bf16.msra.mxu1 %v7271_v17  ;;  %5063 = vmatprep.mubr.bf16.mxu1 %v1209_v21  ;;  %v7329_v17 = vld [vmem:[%s9362_s1 + $0x678] sm:$0xff]   ;;  %v1225_v18 = vcombine.high %v1217_v14, %v1217_v14  ;;  %v8381_v19 = vrot.slane %v1210_v15, %v7777_v41  ;;  %v7367_v15 = vld [vmem:[%s9362_s1 + $0x8c0] sm:$0xff]  }
  0xa7   :  { %6644 = vmatprep.subr.bf16.mxu1 %v7273_v20  ;;  %v7328_v20 = vld [vmem:[%s9362_s1 + $0x6b0] sm:$0xff]   ;;  %v7330_v21 = vld [vmem:[%s9362_s1 + $0x6f8] sm:$0xff]  }
  0xa8   :  { %6623 = vmatpush3.bf16.msra.mxu0 %v7274_v22  ;;  %v1247_v22 = vrot.slane %v1225_v18, %v7777_v41 }
  0xa9   :  { %6624 = vmatprep.subr.bf16.mxu0 %v7276_v24  ;;  %v7331_v24 = vld [vmem:[%s9362_s1 + $0x638] sm:$0xff]  }
  0xaa   :  { %6645 = vmatpush3.bf16.msra.mxu1 %v7275_v23  ;;  %v1226_v23 = vcombine.high %v8381_v19, %v8381_v19 }
  0xab   :  { %6646 = vmatprep.subr.bf16.mxu1 %v7277_v25  ;;  %v1257_v25 = vcombine.high %v1247_v22, %v1247_v22 }
  0xac   :  { %6625 = vmatpush3.bf16.msra.mxu0 %v7278_v26  ;;  %v1233_v26 = vrot.slane %v1217_v14, %v7777_v41  ;;  %v7366_v14 = vld [vmem:[%s9362_s1 + $0x840] sm:$0xff]  }
  0xad   :  { %6626 = vmatprep.subr.bf16.mxu0 %v7280_v28  ;;  %v7332_v28 = vld [vmem:[%s9362_s1 + $0x6b8] sm:$0xff]  }
  0xae   :  { %6647 = vmatpush3.bf16.msra.mxu1 %v7279_v27  ;;  %v7333_v27 = vld [vmem:[%s9362_s1 + $0x740] sm:$0xff]  }
  0xaf   :  { %6648 = vmatprep.subr.bf16.mxu1 %v7281_v29  ;;  %v1254_v29 = vrot.slane %v1226_v23, %v7777_v41  ;;  %v7374_v23 = vld [vmem:[%s9362_s1 + $0x850] sm:$0xff]  }
  0xb0   :  { %6627 = vmatpush3.bf16.msra.mxu0 %v7282_v30  ;;  %v7334_v30 = vld [vmem:[%s9362_s1 + $0x7c0] sm:$0xff]  }
  0xb1   :  { %6628 = vmatprep.subr.bf16.mxu0 %v7284_v32  ;;  %v1255_v32 = vcombine.high %v1233_v26, %v1233_v26 }
  0xb2   :  { %6649 = vmatpush3.bf16.msra.mxu1 %v7283_v31  ;;  %v7335_v31 = vld [vmem:[%s9362_s1 + $0x700] sm:$0xff]  }
  0xb3   :  { %6650 = vmatprep.subr.bf16.mxu1 %v7285_v33  ;;  %v7337_v33 = vld [vmem:[%s9362_s1 + $0x748] sm:$0xff]  }
  0xb4   :  { %6629 = vmatpush3.bf16.msra.mxu0 %v7286_v34  ;;  %v7336_v34 = vld [vmem:[%s9362_s1 + $0x780] sm:$0xff]  }
  0xb5   :  { %6630 = vmatprep.subr.bf16.mxu0 %v7288_v36  ;;  %v7338_v36 = vld [vmem:[%s9362_s1 + $0x7c8] sm:$0xff]  }
  0xb6   :  { %6651 = vmatpush3.bf16.msra.mxu1 %v7287_v35  ;;  %v1258_v35 = vcombine.high %v1254_v29, %v1254_v29 }
  0xb7   :  { %6652 = vmatprep.subr.bf16.mxu1 %v7289_v37  ;;  %v7339_v37 = vld [vmem:[%s9362_s1 + $0x708] sm:$0xff]  }
  0xb8   :  { %6631 = vmatpush3.bf16.msra.mxu0 %v7290_v38  ;;  %v7341_v38 = vld [vmem:[%s9362_s1 + $0x750] sm:$0xff]  }
  0xb9   :  { %6632 = vmatprep.subr.bf16.mxu0 %v7292_v40  ;;  %v7342_v40 = vld [vmem:[%s9362_s1 + $0x7d0] sm:$0xff]  }
  0xba   :  { %6653 = vmatpush3.bf16.msra.mxu1 %v7291_v39  ;;  %v7340_v39 = vld [vmem:[%s9362_s1 + $0x788] sm:$0xff]  }
  0xbb   :  { %6654 = vmatprep.subr.bf16.mxu1 %v7293_v42  ;;  %v7343_v42 = vld [vmem:[%s9362_s1 + $0x710] sm:$0xff]  }
  0xbc   :  { %6633 = vmatpush3.bf16.msra.mxu0 %v7294_v43  ;;  %v7345_v43 = vld [vmem:[%s9362_s1 + $0x758] sm:$0xff]  }
  0xbd   :  { %6634 = vmatprep.subr.bf16.mxu0 %v7296_v45  ;;  %v7346_v45 = vld [vmem:[%s9362_s1 + $0x7d8] sm:$0xff]  }
  0xbe   :  { %6655 = vmatpush3.bf16.msra.mxu1 %v7295_v44  ;;  %v7344_v44 = vld [vmem:[%s9362_s1 + $0x790] sm:$0xff]  }
  0xbf   :  { %6656 = vmatprep.subr.bf16.mxu1 %v7297_v46  ;;  %v7347_v46 = vld [vmem:[%s9362_s1 + $0x718] sm:$0xff]  }
  0xc0   :  { %6635 = vmatpush3.bf16.msra.mxu0 %v7298_v47  ;;  %v7348_v47 = vld [vmem:[%s9362_s1 + $0x798] sm:$0xff]  }
  0xc1   :  { %6664 = vmatprep.subr.bf16.mxu0 %v7301_v50  ;;  %v7351_v50 = vld [vmem:[%s9362_s1 + $0x720] sm:$0xff]  }
  0xc2   :  { %6657 = vmatpush3.bf16.msra.mxu1 %v7299_v48  ;;  %v7349_v48 = vld [vmem:[%s9362_s1 + $0x760] sm:$0xff]  }
  0xc3   :  { %5024 = vmatmul.mubr.bf16.vlgmr.msra.gmra.mrb[20].mxu0 %v1191_v49  ;;  %6686 = vmatprep.subr.bf16.mxu1 %v7302_v51  ;;  %v7350_v49 = vld [vmem:[%s9362_s1 + $0x7e0] sm:$0xff]  }
  0xc4   :  { %6665 = vmatpush3.bf16.msra.mxu0 %v7303_v52  ;;  %5103 = vmatprep.mubr.bf16.mxu0 %v1247_v22  ;;  %v7352_v51 = vld [vmem:[%s9362_s1 + $0x7a0] sm:$0xff]   ;;  %v7353_v52 = vld [vmem:[%s9362_s1 + $0x768] sm:$0xff]  }
  0xc5   :  { %5064 = vmatmul.mubr.bf16.vlgmr.msra.gmra.mrb[20].mxu1 %v1207_v54  ;;  %6666 = vmatprep.subr.bf16.mxu0 %v7305_v55  ;;  %v7355_v54 = vld [vmem:[%s9362_s1 + $0x728] sm:$0xff]  }
  0xc6   :  { %6687 = vmatpush3.bf16.msra.mxu1 %v7304_v53  ;;  %5143 = vmatprep.mubr.bf16.mxu1 %v1257_v25  ;;  %v7354_v53 = vld [vmem:[%s9362_s1 + $0x7e8] sm:$0xff]   ;;  %v7376_v25 = vld [vmem:[%s9362_s1 + $0x810] sm:$0xff]  }
  0xc7   :  { %6688 = vmatprep.subr.bf16.mxu1 %v7306_v56  ;;  %v7356_v55 = vld [vmem:[%s9362_s1 + $0x7a8] sm:$0xff]   ;;  %v5887_v56 = vld [vmem:[%s9363_s2] ss:$0 sm:$0xff] }
  0xc8   :  { %6667 = vmatpush3.bf16.msra.mxu0 %v7307_v57  ;;  %v7357_v57 = vld [vmem:[%s9362_s1 + $0x770] sm:$0xff]   ;;  %v7373_v22 = vld [vmem:[%s9362_s1 + $0x888] sm:$0xff]  }
  0xc9   :  { %6668 = vmatprep.subr.bf16.mxu0 %v7309_v59  ;;  %v7358_v59 = vld [vmem:[%s9362_s1 + $0x7f0] sm:$0xff]  }
  0xca   :  { %6689 = vmatpush3.bf16.msra.mxu1 %v7308_v58 }
  0xcb   :  { %6690 = vmatprep.subr.bf16.mxu1 %v7310_v60 }
  0xcc   :  { %6669 = vmatpush3.bf16.msra.mxu0 %v7311_v61  ;;  %v7359_v61 = vld [vmem:[%s9362_s1 + $0x730] sm:$0xff]  }
  0xcd   :  { %6670 = vmatprep.subr.bf16.mxu0 %v7313_v63 }
  0xce   :  { %6691 = vmatpush3.bf16.msra.mxu1 %v7312_v62 }
  0xcf   :  { %6692 = vmatprep.subr.bf16.mxu1 %v7314_v0 }
  0xd0   :  { %6671 = vmatpush3.bf16.msra.mxu0 %v7315_v1  ;;  %v7360_v1 = vld [vmem:[%s9362_s1 + $0x7b0] sm:$0xff]  }
  0xd1   :  { %6672 = vmatprep.subr.bf16.mxu0 %v7317_v3 }
  0xd2   :  { %6693 = vmatpush3.bf16.msra.mxu1 %v7316_v2  ;;  %v7361_v2 = vld [vmem:[%s9362_s1 + $0x778] sm:$0xff]  }
  0xd3   :  { %6694 = vmatprep.subr.bf16.mxu1 %v7318_v4 }
  0xd4   :  { %6673 = vmatpush3.bf16.msra.mxu0 %v7319_v5 }
  0xd5   :  { %6674 = vmatprep.subr.bf16.mxu0 %v7321_v7 }
  0xd6   :  { %6695 = vmatpush3.bf16.msra.mxu1 %v7320_v6 }
  0xd7   :  { %6696 = vmatprep.subr.bf16.mxu1 %v7322_v8  ;;  %v7362_v8 = vld [vmem:[%s9362_s1 + $0x7f8] sm:$0xff]  }
  0xd8   :  { %6675 = vmatpush3.bf16.msra.mxu0 %v7323_v9 }
  0xd9   :  { %6676 = vmatprep.subr.bf16.mxu0 %v7325_v11 }
  0xda   :  { %6697 = vmatpush3.bf16.msra.mxu1 %v7324_v10  ;;  %v7363_v10 = vld [vmem:[%s9362_s1 + $0x738] sm:$0xff]  }
  0xdb   :  { %6698 = vmatprep.subr.bf16.mxu1 %v7326_v13  ;;  %v1240_v13 = vrot.slane %v8381_v19, %v7777_v41  ;;  %v7370_v19 = vld [vmem:[%s9362_s1 + $0x848] sm:$0xff]  }
  0xdc   :  { %6677 = vmatpush3.bf16.msra.mxu0 %v7327_v16  ;;  %v7368_v16 = vld [vmem:[%s9362_s1 + $0x800] sm:$0xff]  }
  0xdd   :  { %6678 = vmatprep.subr.bf16.mxu0 %v7329_v17  ;;  %v7369_v17 = vld [vmem:[%s9362_s1 + $0x880] sm:$0xff]   ;;  %v1256_v18 = vcombine.high %v1240_v13, %v1240_v13 }
  0xde   :  { %6699 = vmatpush3.bf16.msra.mxu1 %v7328_v20  ;;  %v7371_v20 = vld [vmem:[%s9362_s1 + $0x8c8] sm:$0xff]  }
  0xdf   :  { %6700 = vmatprep.subr.bf16.mxu1 %v7330_v21  ;;  %v7372_v21 = vld [vmem:[%s9362_s1 + $0x808] sm:$0xff]  }
  0xe0   :  { %6679 = vmatpush3.bf16.msra.mxu0 %v7331_v24  ;;  %v7375_v24 = vld [vmem:[%s9362_s1 + $0x8d0] sm:$0xff]  }
  0xe1   :  { %6708 = vmatprep.subr.bf16.mxu0 %v7333_v27  ;;  %v7378_v27 = vld [vmem:[%s9362_s1 + $0x858] sm:$0xff]  }
  0xe2   :  { %6701 = vmatpush3.bf16.msra.mxu1 %v7332_v28  ;;  %v7379_v28 = vld [vmem:[%s9362_s1 + $0x8d8] sm:$0xff]  }
  0xe3   :  { %5104 = vmatmul.mubr.bf16.vlgmr.msra.gmra.mrb[24].mxu0 %v1233_v26  ;;  %6730 = vmatprep.subr.bf16.mxu1 %v7334_v30  ;;  %v7377_v26 = vld [vmem:[%s9362_s1 + $0x890] sm:$0xff]   ;;  %v7381_v30 = vld [vmem:[%s9362_s1 + $0x898] sm:$0xff]  }
  0xe4   :  { %6709 = vmatpush3.bf16.msra.mxu0 %v7335_v31  ;;  %5183 = vmatprep.mubr.bf16.mxu0 %v1254_v29  ;;  %v7380_v29 = vld [vmem:[%s9362_s1 + $0x818] sm:$0xff]   ;;  %v7382_v31 = vld [vmem:[%s9362_s1 + $0x860] sm:$0xff]  }
  0xe5   :  { %5144 = vmatmul.mubr.bf16.vlgmr.msra.gmra.mrb[24].mxu1 %v1255_v32  ;;  %6710 = vmatprep.subr.bf16.mxu0 %v7337_v33  ;;  %v7383_v32 = vld [vmem:[%s9362_s1 + $0x8e0] sm:$0xff]  }
  0xe6   :  { %6731 = vmatpush3.bf16.msra.mxu1 %v7336_v34  ;;  %5223 = vmatprep.mubr.bf16.mxu1 %v1258_v35  ;;  %v7384_v33 = vld [vmem:[%s9362_s1 + $0x820] sm:$0xff]   ;;  %v7386_v35 = vld [vmem:[%s9362_s1 + $0x868] sm:$0xff]  }
  0xe7   :  { %6732 = vmatprep.subr.bf16.mxu1 %v7338_v36  ;;  %v7385_v34 = vld [vmem:[%s9362_s1 + $0x8a0] sm:$0xff]   ;;  %v7387_v36 = vld [vmem:[%s9362_s1 + $0x8e8] sm:$0xff]  }
  0xe8   :  { %6711 = vmatpush3.bf16.msra.mxu0 %v7339_v37  ;;  %v7388_v37 = vld [vmem:[%s9362_s1 + $0x828] sm:$0xff]  }
  0xe9   :  { %6712 = vmatprep.subr.bf16.mxu0 %v7341_v38  ;;  %v7389_v38 = vld [vmem:[%s9362_s1 + $0x8a8] sm:$0xff]  }
  0xea   :  { %6733 = vmatpush3.bf16.msra.mxu1 %v7340_v39  ;;  %v7390_v39 = vld [vmem:[%s9362_s1 + $0x870] sm:$0xff]  }
  0xeb   :  { %6734 = vmatprep.subr.bf16.mxu1 %v7342_v40  ;;  %v7391_v40 = vld [vmem:[%s9362_s1 + $0x8f0] sm:$0xff]  }
  0xec   :  { %6713 = vmatpush3.bf16.msra.mxu0 %v7343_v42 }
  0xed   :  { %6714 = vmatprep.subr.bf16.mxu0 %v7345_v43  ;;  %v7392_v43 = vld [vmem:[%s9362_s1 + $0x830] sm:$0xff]  }
  0xee   :  { %6735 = vmatpush3.bf16.msra.mxu1 %v7344_v44 }
  0xef   :  { %6736 = vmatprep.subr.bf16.mxu1 %v7346_v45  ;;  %v20_v45 = vld [vmem:[%s9361_s0 + $0x20] sm:$0xff] }
  0xf0   :  { %6715 = vmatpush3.bf16.msra.mxu0 %v7347_v46 }
  0xf1   :  { %6716 = vmatprep.subr.bf16.mxu0 %v7349_v48 }
  0xf2   :  { %6737 = vmatpush3.bf16.msra.mxu1 %v7348_v47 }
  0xf3   :  { %6738 = vmatprep.subr.bf16.mxu1 %v7350_v49  ;;  %v7393_v49 = vld [vmem:[%s9362_s1 + $0x8b0] sm:$0xff]  }
  0xf4   :  { %6717 = vmatpush3.bf16.msra.mxu0 %v7351_v50  ;;  %v7394_v50 = vld [vmem:[%s9362_s1 + $0x878] sm:$0xff]  }
  0xf5   :  { %6718 = vmatprep.subr.bf16.mxu0 %v7353_v52  ;;  %v1259_v52 = vcombine.high %v20_v45, %v20_v45 }
  0xf6   :  { %6739 = vmatpush3.bf16.msra.mxu1 %v7352_v51  ;;  %v6416_v58 = vpop.f32.mrb[0].mxu0  ;;  %v1266_v51 = vrot.slane %v20_v45, %v7777_v41 }
  0xf7   :  { %v6417_v60 = vpop.f32.mrb[1].mxu0  ;;  %6740 = vmatprep.subr.bf16.mxu1 %v7354_v53  ;;  %v6438_v62 = vpop.f32.mrb[0].mxu1 }
  0xf8   :  { %v6418_v63 = vadd.f32 %v6417_v60, %v6416_v58  ;;  %v6419_v0 = vpop.f32.mrb[2].mxu0  ;;  %6719 = vmatpush3.bf16.msra.mxu0 %v7355_v54  ;;  %v6439_v3 = vpop.f32.mrb[1].mxu1  ;;  %v7395_v58 = vld [vmem:[%s9362_s1 + $0x8f8] sm:$0xff]  }
  0xf9   :  { %v6420_v4 = vpop.f32.mrb[3].mxu0  ;;  %6720 = vmatprep.subr.bf16.mxu0 %v7357_v57  ;;  %v6440_v6 = vadd.f32 %v6439_v3, %v6438_v62  ;;  %v6441_v7 = vpop.f32.mrb[2].mxu1  ;;  %v8602_v62 = vrot.slane %v1259_v52, %v7777_v41  ;;  %v7397_v0 = vld [vmem:[%s9362_s1 + $0x8b8] sm:$0xff]   ;;  %v7398_v3 = vld [vmem:[%s9362_s1 + $0x940] sm:$0xff]  }
  0xfa   :  { %v4626_v5 = vadd.f32 %v6418_v63, %v5887_v56  ;;  %6741 = vmatpush3.bf16.msra.mxu1 %v7356_v55  ;;  %v6442_v9 = vpop.f32.mrb[3].mxu1  ;;  %v7400_v7 = vld [vmem:[%s9362_s1 + $0x900] sm:$0xff]   ;;  %v7429_v52 = vld [vmem:[%s9362_s1 + $0x9b8] sm:$0xff]  }
  0xfb   :  { %6742 = vmatprep.subr.bf16.mxu1 %v7358_v59  ;;  %v1274_v59 = vcombine.high %v1266_v51, %v1266_v51  ;;  %v1275_v4 = vcombine.high %v8602_v62, %v8602_v62  ;;  %v7401_v9 = vld [vmem:[%s9362_s1 + $0x980] sm:$0xff]  }
  0xfc   :  { %v8496_v11 = vadd.f32 %v6440_v6, %v4626_v5  ;;  %6721 = vmatpush3.bf16.msra.mxu0 %v7359_v61  ;;  %v7396_v61 = vld [vmem:[%s9362_s1 + $0x838] sm:$0xff]   ;;  %v7399_v6 = vld [vmem:[%s9362_s1 + $0x9c0] sm:$0xff]  }
  0xfd   :  { %6722 = vmatprep.subr.bf16.mxu0 %v7361_v2  ;;  %v1282_v2 = vrot.slane %v1266_v51, %v7777_v41 }
  0xfe   :  { %6743 = vmatpush3.bf16.msra.mxu1 %v7360_v1  ;;  %v1296_v1 = vrot.slane %v1274_v59, %v7777_v41  ;;  %v7435_v59 = vld [vmem:[%s9362_s1 + $0xa48] sm:$0xff]  }
  0xff   :  { %6744 = vmatprep.subr.bf16.mxu1 %v7362_v8  ;;  %v1303_v8 = vrot.slane %v1275_v4, %v7777_v41  ;;  %v7444_v4 = vld [vmem:[%s9362_s1 + $0xad8] sm:$0xff]  }
 0x100   :  { %6723 = vmatpush3.bf16.msra.mxu0 %v7363_v10  ;;  %v1306_v5 = vcombine.high %v1296_v1, %v1296_v1  ;;  %v1304_v10 = vcombine.high %v1282_v2, %v1282_v2 }
 0x101   :  { %6752 = vmatprep.subr.bf16.mxu0 %v7366_v14  ;;  %v7404_v14 = vld [vmem:[%s9362_s1 + $0x908] sm:$0xff]  }
 0x102   :  { %6745 = vmatpush3.bf16.msra.mxu1 %v7364_v12  ;;  %v7403_v12 = vld [vmem:[%s9362_s1 + $0x9c8] sm:$0xff]  }
 0x103   :  { %5184 = vmatmul.mubr.bf16.vlgmr.msra.gmra.mrb[28].mxu0 %v1240_v13  ;;  %6774 = vmatprep.subr.bf16.mxu1 %v7367_v15  ;;  %v1307_v13 = vcombine.high %v1303_v8, %v1303_v8  ;;  %v7405_v15 = vld [vmem:[%s9362_s1 + $0x988] sm:$0xff]  }
 0x104   :  { %6753 = vmatpush3.bf16.msra.mxu0 %v7368_v16  ;;  %5263 = vmatprep.mubr.bf16.mxu0 %v1296_v1  ;;  %v7406_v16 = vld [vmem:[%s9362_s1 + $0x950] sm:$0xff]  }
 0x105   :  { %5224 = vmatmul.mubr.bf16.vlgmr.msra.gmra.mrb[28].mxu1 %v1256_v18  ;;  %6754 = vmatprep.subr.bf16.mxu0 %v7370_v19  ;;  %v7408_v18 = vld [vmem:[%s9362_s1 + $0x910] sm:$0xff]  }
 0x106   :  { %6775 = vmatpush3.bf16.msra.mxu1 %v7369_v17  ;;  %5303 = vmatprep.mubr.bf16.mxu1 %v1306_v5  ;;  %v7407_v17 = vld [vmem:[%s9362_s1 + $0x9d0] sm:$0xff]   ;;  %v7445_v5 = vld [vmem:[%s9362_s1 + $0xa18] sm:$0xff]  }
 0x107   :  { %6776 = vmatprep.subr.bf16.mxu1 %v7371_v20  ;;  %v7409_v19 = vld [vmem:[%s9362_s1 + $0x990] sm:$0xff]   ;;  %v7410_v20 = vld [vmem:[%s9362_s1 + $0x958] sm:$0xff]  }
 0x108   :  { %6755 = vmatpush3.bf16.msra.mxu0 %v7372_v21  ;;  %v7411_v21 = vld [vmem:[%s9362_s1 + $0x9d8] sm:$0xff]   ;;  %v7441_v1 = vld [vmem:[%s9362_s1 + $0xa10] sm:$0xff]  }
 0x109   :  { %6756 = vmatprep.subr.bf16.mxu0 %v7374_v23  ;;  %v7413_v23 = vld [vmem:[%s9362_s1 + $0x998] sm:$0xff]  }
 0x10a   :  { %6777 = vmatpush3.bf16.msra.mxu1 %v7373_v22  ;;  %v7412_v22 = vld [vmem:[%s9362_s1 + $0x918] sm:$0xff]  }
 0x10b   :  { %6778 = vmatprep.subr.bf16.mxu1 %v7375_v24  ;;  %v7414_v24 = vld [vmem:[%s9362_s1 + $0x960] sm:$0xff]  }
 0x10c   :  { %6757 = vmatpush3.bf16.msra.mxu0 %v7376_v25  ;;  %v7415_v25 = vld [vmem:[%s9362_s1 + $0x9e0] sm:$0xff]  }
 0x10d   :  { %6758 = vmatprep.subr.bf16.mxu0 %v7378_v27  ;;  %v7417_v27 = vld [vmem:[%s9362_s1 + $0x9a0] sm:$0xff]  }
 0x10e   :  { %6779 = vmatpush3.bf16.msra.mxu1 %v7377_v26  ;;  %v7416_v26 = vld [vmem:[%s9362_s1 + $0x920] sm:$0xff]  }
 0x10f   :  { %6780 = vmatprep.subr.bf16.mxu1 %v7379_v28  ;;  %v7418_v28 = vld [vmem:[%s9362_s1 + $0x968] sm:$0xff]  }
 0x110   :  { %6759 = vmatpush3.bf16.msra.mxu0 %v7380_v29  ;;  %v7419_v29 = vld [vmem:[%s9362_s1 + $0x9e8] sm:$0xff]  }
 0x111   :  { %6760 = vmatprep.subr.bf16.mxu0 %v7382_v31  ;;  %v7421_v31 = vld [vmem:[%s9362_s1 + $0x9a8] sm:$0xff]  }
 0x112   :  { %6781 = vmatpush3.bf16.msra.mxu1 %v7381_v30  ;;  %v7420_v30 = vld [vmem:[%s9362_s1 + $0x928] sm:$0xff]  }
 0x113   :  { %6782 = vmatprep.subr.bf16.mxu1 %v7383_v32  ;;  %v7422_v32 = vld [vmem:[%s9362_s1 + $0x970] sm:$0xff]  }
 0x114   :  { %6761 = vmatpush3.bf16.msra.mxu0 %v7384_v33 }
 0x115   :  { %6762 = vmatprep.subr.bf16.mxu0 %v7386_v35 }
 0x116   :  { %6783 = vmatpush3.bf16.msra.mxu1 %v7385_v34  ;;  %v6460_v42 = vpop.f32.mrb[4].mxu0  ;;  %v7423_v34 = vld [vmem:[%s9362_s1 + $0x9f0] sm:$0xff]  }
 0x117   :  { %v6461_v44 = vpop.f32.mrb[5].mxu0  ;;  %6784 = vmatprep.subr.bf16.mxu1 %v7387_v36  ;;  %v6482_v46 = vpop.f32.mrb[4].mxu1  ;;  %v7424_v36 = vld [vmem:[%s9362_s1 + $0x930] sm:$0xff]  }
 0x118   :  { %v6462_v47 = vadd.f32 %v6461_v44, %v6460_v42  ;;  %v6463_v48 = vpop.f32.mrb[6].mxu0  ;;  %6763 = vmatpush3.bf16.msra.mxu0 %v7388_v37  ;;  %v6483_v53 = vpop.f32.mrb[5].mxu1  ;;  %v7426_v42 = vld [vmem:[%s9362_s1 + $0x978] sm:$0xff]  }
 0x119   :  { %v6464_v54 = vpop.f32.mrb[7].mxu0  ;;  %6764 = vmatprep.subr.bf16.mxu0 %v7390_v39  ;;  %v6484_v56 = vadd.f32 %v6483_v53, %v6482_v46  ;;  %v6485_v57 = vpop.f32.mrb[6].mxu1  ;;  %v7427_v48 = vld [vmem:[%s9362_s1 + $0x9f8] sm:$0xff]   ;;  %v1289_v53 = vrot.slane %v8602_v62, %v7777_v41  ;;  %v7438_v62 = vld [vmem:[%s9362_s1 + $0xa88] sm:$0xff]  }
 0x11a   :  { %v4706_v55 = vadd.f32 %v6462_v47, %v8496_v11  ;;  %6785 = vmatpush3.bf16.msra.mxu1 %v7389_v38  ;;  %v6486_v60 = vpop.f32.mrb[7].mxu1  ;;  %v7402_v11 = vld [vmem:[%s9362_s1 + $0x948] sm:$0xff]   ;;  %v7431_v54 = vld [vmem:[%s9362_s1 + $0xa40] sm:$0xff]  }
 0x11b   :  { %6786 = vmatprep.subr.bf16.mxu1 %v7391_v40  ;;  %v7425_v40 = vld [vmem:[%s9362_s1 + $0x9b0] sm:$0xff]   ;;  %v7434_v57 = vld [vmem:[%s9362_s1 + $0xa80] sm:$0xff]   ;;  %v7436_v60 = vld [vmem:[%s9362_s1 + $0xac8] sm:$0xff]  }
 0x11c   :  { %v8604_v63 = vadd.f32 %v6484_v56, %v4706_v55  ;;  %6765 = vmatpush3.bf16.msra.mxu0 %v7392_v43  ;;  %v7432_v55 = vld [vmem:[%s9362_s1 + $0xac0] sm:$0xff]  }
 0x11d   :  { %6766 = vmatprep.subr.bf16.mxu0 %v7394_v50  ;;  %v7428_v50 = vld [vmem:[%s9362_s1 + $0x938] sm:$0xff]   ;;  %v7433_v56 = vld [vmem:[%s9362_s1 + $0xa00] sm:$0xff]  }
 0x11e   :  { %6787 = vmatpush3.bf16.msra.mxu1 %v7393_v49 }
 0x11f   :  { %6788 = vmatprep.subr.bf16.mxu1 %v7395_v58  ;;  %v1305_v58 = vcombine.high %v1289_v53, %v1289_v53 }
 0x120   :  { %6767 = vmatpush3.bf16.msra.mxu0 %v7396_v61  ;;  %v7437_v61 = vld [vmem:[%s9362_s1 + $0xa08] sm:$0xff]  }
 0x121   :  { %6796 = vmatprep.subr.bf16.mxu0 %v7398_v3  ;;  %v7443_v3 = vld [vmem:[%s9362_s1 + $0xa58] sm:$0xff]  }
 0x122   :  { %6789 = vmatpush3.bf16.msra.mxu1 %v7397_v0  ;;  %v7440_v0 = vld [vmem:[%s9362_s1 + $0xad0] sm:$0xff]  }
 0x123   :  { %5264 = vmatmul.mubr.bf16.vlgmr.msra.gmra.mrb[32].mxu0 %v1282_v2  ;;  %6818 = vmatprep.subr.bf16.mxu1 %v7399_v6  ;;  %v7442_v2 = vld [vmem:[%s9362_s1 + $0xa90] sm:$0xff]   ;;  %v7446_v6 = vld [vmem:[%s9362_s1 + $0xa98] sm:$0xff]  }
 0x124   :  { %6797 = vmatpush3.bf16.msra.mxu0 %v7400_v7  ;;  %5343 = vmatprep.mubr.bf16.mxu0 %v1303_v8  ;;  %v7447_v7 = vld [vmem:[%s9362_s1 + $0xa60] sm:$0xff]  }
 0x125   :  { %5304 = vmatmul.mubr.bf16.vlgmr.msra.gmra.mrb[32].mxu1 %v1304_v10  ;;  %6798 = vmatprep.subr.bf16.mxu0 %v7402_v11  ;;  %v7448_v8 = vld [vmem:[%s9362_s1 + $0xae0] sm:$0xff]   ;;  %v7451_v11 = vld [vmem:[%s9362_s1 + $0xa68] sm:$0xff]  }
 0x126   :  { %6819 = vmatpush3.bf16.msra.mxu1 %v7401_v9  ;;  %5383 = vmatprep.mubr.bf16.mxu1 %v1307_v13  ;;  %v7449_v9 = vld [vmem:[%s9362_s1 + $0xa20] sm:$0xff]   ;;  %v7453_v13 = vld [vmem:[%s9362_s1 + $0xa28] sm:$0xff]  }
 0x127   :  { %6820 = vmatprep.subr.bf16.mxu1 %v7403_v12  ;;  %v7450_v10 = vld [vmem:[%s9362_s1 + $0xaa0] sm:$0xff]   ;;  %v7452_v12 = vld [vmem:[%s9362_s1 + $0xae8] sm:$0xff]  }
 0x128   :  { %6799 = vmatpush3.bf16.msra.mxu0 %v7404_v14  ;;  %v7454_v14 = vld [vmem:[%s9362_s1 + $0xaa8] sm:$0xff]  }
 0x129   :  { %6800 = vmatprep.subr.bf16.mxu0 %v7406_v16 }
 0x12a   :  { %6821 = vmatpush3.bf16.msra.mxu1 %v7405_v15  ;;  %v7455_v15 = vld [vmem:[%s9362_s1 + $0xa70] sm:$0xff]  }
 0x12b   :  { %6822 = vmatprep.subr.bf16.mxu1 %v7407_v17  ;;  %v7456_v17 = vld [vmem:[%s9362_s1 + $0xaf0] sm:$0xff]  }
 0x12c   :  { %6801 = vmatpush3.bf16.msra.mxu0 %v7408_v18 }
 0x12d   :  { %6802 = vmatprep.subr.bf16.mxu0 %v7410_v20 }
 0x12e   :  { %6823 = vmatpush3.bf16.msra.mxu1 %v7409_v19  ;;  %v7457_v19 = vld [vmem:[%s9362_s1 + $0xa30] sm:$0xff]  }
 0x12f   :  { %6824 = vmatprep.subr.bf16.mxu1 %v7411_v21 }
 0x130   :  { %6803 = vmatpush3.bf16.msra.mxu0 %v7412_v22 }
 0x131   :  { %6804 = vmatprep.subr.bf16.mxu0 %v7414_v24  ;;  %v7459_v24 = vld [vmem:[%s9362_s1 + $0xa78] sm:$0xff]  }
 0x132   :  { %6825 = vmatpush3.bf16.msra.mxu1 %v7413_v23  ;;  %v7458_v23 = vld [vmem:[%s9362_s1 + $0xab0] sm:$0xff]  }
 0x133   :  { %6826 = vmatprep.subr.bf16.mxu1 %v7415_v25  ;;  %v21_v25 = vld [vmem:[%s9361_s0 + $0x28] sm:$0xff] }
 0x134   :  { %6805 = vmatpush3.bf16.msra.mxu0 %v7416_v26 }
 0x135   :  { %6806 = vmatprep.subr.bf16.mxu0 %v7418_v28  ;;  %v1315_v28 = vrot.slane %v21_v25, %v7777_v41 }
 0x136   :  { %6827 = vmatpush3.bf16.msra.mxu1 %v7417_v27  ;;  %v6504_v33 = vpop.f32.mrb[8].mxu0 }
 0x137   :  { %v6505_v35 = vpop.f32.mrb[9].mxu0  ;;  %6828 = vmatprep.subr.bf16.mxu1 %v7419_v29  ;;  %v1308_v29 = vcombine.high %v21_v25, %v21_v25  ;;  %v7493_v25 = vld [vmem:[%s9362_s1 + $0xb38] sm:$0xff]  }
 0x138   :  { %v6526_v37 = vpop.f32.mrb[8].mxu1  ;;  %v6506_v38 = vadd.f32 %v6505_v35, %v6504_v33  ;;  %v6507_v39 = vpop.f32.mrb[10].mxu0  ;;  %6807 = vmatpush3.bf16.msra.mxu0 %v7420_v30  ;;  %v7460_v33 = vld [vmem:[%s9362_s1 + $0xaf8] sm:$0xff]  }
 0x139   :  { %v6527_v43 = vpop.f32.mrb[9].mxu1  ;;  %v6508_v44 = vpop.f32.mrb[11].mxu0  ;;  %6808 = vmatprep.subr.bf16.mxu0 %v7422_v32  ;;  %v7461_v35 = vld [vmem:[%s9362_s1 + $0xa38] sm:$0xff]  }
 0x13a   :  { %v4786_v45 = vadd.f32 %v6506_v38, %v8604_v63  ;;  %v6528_v46 = vadd.f32 %v6527_v43, %v6526_v37  ;;  %v6529_v47 = vpop.f32.mrb[10].mxu1  ;;  %6829 = vmatpush3.bf16.msra.mxu1 %v7421_v31  ;;  %v7439_v63 = vld [vmem:[%s9362_s1 + $0xa50] sm:$0xff]   ;;  %v8814_v37 = vrot.slane %v1308_v29, %v7777_v41  ;;  %v7462_v39 = vld [vmem:[%s9362_s1 + $0xab8] sm:$0xff]   ;;  %v7463_v43 = vld [vmem:[%s9362_s1 + $0xb40] sm:$0xff]  }
 0x13b   :  { %v6530_v49 = vpop.f32.mrb[11].mxu1  ;;  %6830 = vmatprep.subr.bf16.mxu1 %v7423_v34  ;;  %v7465_v47 = vld [vmem:[%s9362_s1 + $0xb00] sm:$0xff]  }
 0x13c   :  { %v8708_v51 = vadd.f32 %v6528_v46, %v4786_v45  ;;  %6809 = vmatpush3.bf16.msra.mxu0 %v7424_v36  ;;  %v1323_v36 = vcombine.high %v1315_v28, %v1315_v28  ;;  %v1324_v44 = vcombine.high %v8814_v37, %v8814_v37  ;;  %v7464_v45 = vld [vmem:[%s9362_s1 + $0xbc0] sm:$0xff]  }
 0x13d   :  { %6810 = vmatprep.subr.bf16.mxu0 %v7426_v42  ;;  %v1331_v42 = vrot.slane %v1315_v28, %v7777_v41  ;;  %v7466_v49 = vld [vmem:[%s9362_s1 + $0xb80] sm:$0xff]   ;;  %v1338_v28 = vrot.slane %v8814_v37, %v7777_v41  ;;  %v7503_v37 = vld [vmem:[%s9362_s1 + $0xc88] sm:$0xff]  }
 0x13e   :  { %6831 = vmatpush3.bf16.msra.mxu1 %v7425_v40  ;;  %v1345_v40 = vrot.slane %v1323_v36, %v7777_v41  ;;  %v7496_v29 = vld [vmem:[%s9362_s1 + $0xc40] sm:$0xff]   ;;  %v7502_v36 = vld [vmem:[%s9362_s1 + $0xc08] sm:$0xff]  }
 0x13f   :  { %6832 = vmatprep.subr.bf16.mxu1 %v7427_v48  ;;  %v1352_v48 = vrot.slane %v1324_v44, %v7777_v41  ;;  %v7509_v44 = vld [vmem:[%s9362_s1 + $0xcd8] sm:$0xff]  }
 0x140   :  { %6811 = vmatpush3.bf16.msra.mxu0 %v7428_v50  ;;  %v1355_v46 = vcombine.high %v1345_v40, %v1345_v40  ;;  %v1353_v50 = vcombine.high %v1331_v42, %v1331_v42 }
 0x141   :  { %6840 = vmatprep.subr.bf16.mxu0 %v7431_v54  ;;  %v7469_v54 = vld [vmem:[%s9362_s1 + $0xb08] sm:$0xff]  }
 0x142   :  { %6833 = vmatpush3.bf16.msra.mxu1 %v7429_v52  ;;  %v7468_v52 = vld [vmem:[%s9362_s1 + $0xbc8] sm:$0xff]  }
 0x143   :  { %5344 = vmatmul.mubr.bf16.vlgmr.msra.gmra.mrb[36].mxu0 %v1289_v53  ;;  %6862 = vmatprep.subr.bf16.mxu1 %v7432_v55  ;;  %v1356_v53 = vcombine.high %v1352_v48, %v1352_v48  ;;  %v7470_v55 = vld [vmem:[%s9362_s1 + $0xb88] sm:$0xff]  }
 0x144   :  { %6841 = vmatpush3.bf16.msra.mxu0 %v7433_v56  ;;  %5423 = vmatprep.mubr.bf16.mxu0 %v1345_v40  ;;  %v7471_v56 = vld [vmem:[%s9362_s1 + $0xb50] sm:$0xff]  }
 0x145   :  { %5384 = vmatmul.mubr.bf16.vlgmr.msra.gmra.mrb[36].mxu1 %v1305_v58  ;;  %6842 = vmatprep.subr.bf16.mxu0 %v7435_v59  ;;  %v7473_v58 = vld [vmem:[%s9362_s1 + $0xb10] sm:$0xff]  }
 0x146   :  { %6863 = vmatpush3.bf16.msra.mxu1 %v7434_v57  ;;  %5463 = vmatprep.mubr.bf16.mxu1 %v1355_v46  ;;  %v7472_v57 = vld [vmem:[%s9362_s1 + $0xbd0] sm:$0xff]   ;;  %v7511_v46 = vld [vmem:[%s9362_s1 + $0xc98] sm:$0xff]  }
 0x147   :  { %6864 = vmatprep.subr.bf16.mxu1 %v7436_v60  ;;  %v7474_v59 = vld [vmem:[%s9362_s1 + $0xb90] sm:$0xff]   ;;  %v7475_v60 = vld [vmem:[%s9362_s1 + $0xb58] sm:$0xff]  }
 0x148   :  { %6843 = vmatpush3.bf16.msra.mxu0 %v7437_v61  ;;  %v7476_v61 = vld [vmem:[%s9362_s1 + $0xbd8] sm:$0xff]   ;;  %v7506_v40 = vld [vmem:[%s9362_s1 + $0xc10] sm:$0xff]  }
 0x149   :  { %6844 = vmatprep.subr.bf16.mxu0 %v7439_v63  ;;  %v7478_v63 = vld [vmem:[%s9362_s1 + $0xb98] sm:$0xff]  }
 0x14a   :  { %6865 = vmatpush3.bf16.msra.mxu1 %v7438_v62  ;;  %v7477_v62 = vld [vmem:[%s9362_s1 + $0xb18] sm:$0xff]  }
 0x14b   :  { %6866 = vmatprep.subr.bf16.mxu1 %v7440_v0  ;;  %v7479_v0 = vld [vmem:[%s9362_s1 + $0xb60] sm:$0xff]  }
 0x14c   :  { %6845 = vmatpush3.bf16.msra.mxu0 %v7441_v1  ;;  %v7480_v1 = vld [vmem:[%s9362_s1 + $0xbe0] sm:$0xff]  }
 0x14d   :  { %6846 = vmatprep.subr.bf16.mxu0 %v7443_v3  ;;  %v7482_v3 = vld [vmem:[%s9362_s1 + $0xba0] sm:$0xff]  }
 0x14e   :  { %6867 = vmatpush3.bf16.msra.mxu1 %v7442_v2  ;;  %v7481_v2 = vld [vmem:[%s9362_s1 + $0xb20] sm:$0xff]  }
 0x14f   :  { %6868 = vmatprep.subr.bf16.mxu1 %v7444_v4  ;;  %v7483_v4 = vld [vmem:[%s9362_s1 + $0xb68] sm:$0xff]  }
 0x150   :  { %6847 = vmatpush3.bf16.msra.mxu0 %v7445_v5  ;;  %v7484_v5 = vld [vmem:[%s9362_s1 + $0xbe8] sm:$0xff]  }
 0x151   :  { %6848 = vmatprep.subr.bf16.mxu0 %v7447_v7  ;;  %v7486_v7 = vld [vmem:[%s9362_s1 + $0xba8] sm:$0xff]  }
 0x152   :  { %6869 = vmatpush3.bf16.msra.mxu1 %v7446_v6  ;;  %v7485_v6 = vld [vmem:[%s9362_s1 + $0xb28] sm:$0xff]  }
 0x153   :  { %6870 = vmatprep.subr.bf16.mxu1 %v7448_v8  ;;  %v7487_v8 = vld [vmem:[%s9362_s1 + $0xb70] sm:$0xff]  }
 0x154   :  { %6849 = vmatpush3.bf16.msra.mxu0 %v7449_v9 }
 0x155   :  { %6850 = vmatprep.subr.bf16.mxu0 %v7451_v11 }
 0x156   :  { %6871 = vmatpush3.bf16.msra.mxu1 %v7450_v10  ;;  %v6548_v16 = vpop.f32.mrb[12].mxu0  ;;  %v7488_v10 = vld [vmem:[%s9362_s1 + $0xbf0] sm:$0xff]  }
 0x157   :  { %v6549_v18 = vpop.f32.mrb[13].mxu0  ;;  %6872 = vmatprep.subr.bf16.mxu1 %v7452_v12  ;;  %v7489_v12 = vld [vmem:[%s9362_s1 + $0xb30] sm:$0xff]  }
 0x158   :  { %v6570_v20 = vpop.f32.mrb[12].mxu1  ;;  %v6550_v21 = vadd.f32 %v6549_v18, %v6548_v16  ;;  %v6551_v22 = vpop.f32.mrb[14].mxu0  ;;  %6851 = vmatpush3.bf16.msra.mxu0 %v7453_v13  ;;  %v7490_v16 = vld [vmem:[%s9362_s1 + $0xbb0] sm:$0xff]  }
 0x159   :  { %v6571_v26 = vpop.f32.mrb[13].mxu1  ;;  %v6552_v27 = vpop.f32.mrb[15].mxu0  ;;  %6852 = vmatprep.subr.bf16.mxu0 %v7455_v15 }
 0x15a   :  { %v4866_v30 = vadd.f32 %v6550_v21, %v8708_v51  ;;  %v6572_v31 = vadd.f32 %v6571_v26, %v6570_v20  ;;  %v6573_v32 = vpop.f32.mrb[14].mxu1  ;;  %6873 = vmatpush3.bf16.msra.mxu1 %v7454_v14  ;;  %v7467_v51 = vld [vmem:[%s9362_s1 + $0xb48] sm:$0xff]   ;;  %v7494_v27 = vld [vmem:[%s9362_s1 + $0xbb8] sm:$0xff]  }
 0x15b   :  { %v6574_v34 = vpop.f32.mrb[15].mxu1  ;;  %6874 = vmatprep.subr.bf16.mxu1 %v7456_v17  ;;  %v7491_v17 = vld [vmem:[%s9362_s1 + $0xb78] sm:$0xff]   ;;  %v7499_v32 = vld [vmem:[%s9362_s1 + $0xc80] sm:$0xff]  }
 0x15c   :  { %v8816_v38 = vadd.f32 %v6572_v31, %v4866_v30  ;;  %6853 = vmatpush3.bf16.msra.mxu0 %v7457_v19  ;;  %v7497_v30 = vld [vmem:[%s9362_s1 + $0xcc0] sm:$0xff]   ;;  %v7500_v34 = vld [vmem:[%s9362_s1 + $0xc48] sm:$0xff]  }
 0x15d   :  { %6854 = vmatprep.subr.bf16.mxu0 %v7459_v24  ;;  %v7498_v31 = vld [vmem:[%s9362_s1 + $0xc00] sm:$0xff]  }
 0x15e   :  { %6875 = vmatpush3.bf16.msra.mxu1 %v7458_v23  ;;  %v7492_v23 = vld [vmem:[%s9362_s1 + $0xbf8] sm:$0xff]  }
 0x15f   :  { %6876 = vmatprep.subr.bf16.mxu1 %v7460_v33  ;;  %v1354_v33 = vcombine.high %v1338_v28, %v1338_v28 }
 0x160   :  { %6855 = vmatpush3.bf16.msra.mxu0 %v7461_v35  ;;  %v7501_v35 = vld [vmem:[%s9362_s1 + $0xcc8] sm:$0xff]  }
 0x161   :  { %6884 = vmatprep.subr.bf16.mxu0 %v7463_v43  ;;  %v7508_v43 = vld [vmem:[%s9362_s1 + $0xc58] sm:$0xff]  }
 0x162   :  { %6877 = vmatpush3.bf16.msra.mxu1 %v7462_v39  ;;  %v7505_v39 = vld [vmem:[%s9362_s1 + $0xcd0] sm:$0xff]  }
 0x163   :  { %5424 = vmatmul.mubr.bf16.vlgmr.msra.gmra.mrb[40].mxu0 %v1331_v42  ;;  %6906 = vmatprep.subr.bf16.mxu1 %v7464_v45  ;;  %v7507_v42 = vld [vmem:[%s9362_s1 + $0xc90] sm:$0xff]   ;;  %v7510_v45 = vld [vmem:[%s9362_s1 + $0xc18] sm:$0xff]  }
 0x164   :  { %6885 = vmatpush3.bf16.msra.mxu0 %v7465_v47  ;;  %5503 = vmatprep.mubr.bf16.mxu0 %v1352_v48  ;;  %v7512_v47 = vld [vmem:[%s9362_s1 + $0xc60] sm:$0xff]  }
 0x165   :  { %5464 = vmatmul.mubr.bf16.vlgmr.msra.gmra.mrb[40].mxu1 %v1353_v50  ;;  %6886 = vmatprep.subr.bf16.mxu0 %v7467_v51  ;;  %v7513_v48 = vld [vmem:[%s9362_s1 + $0xce0] sm:$0xff]   ;;  %v7516_v51 = vld [vmem:[%s9362_s1 + $0xc68] sm:$0xff]  }
 0x166   :  { %6907 = vmatpush3.bf16.msra.mxu1 %v7466_v49  ;;  %5543 = vmatprep.mubr.bf16.mxu1 %v1356_v53  ;;  %v7514_v49 = vld [vmem:[%s9362_s1 + $0xc20] sm:$0xff]   ;;  %v7518_v53 = vld [vmem:[%s9362_s1 + $0xc28] sm:$0xff]  }
 0x167   :  { %6908 = vmatprep.subr.bf16.mxu1 %v7468_v52  ;;  %v7515_v50 = vld [vmem:[%s9362_s1 + $0xca0] sm:$0xff]   ;;  %v7517_v52 = vld [vmem:[%s9362_s1 + $0xce8] sm:$0xff]  }
 0x168   :  { %6887 = vmatpush3.bf16.msra.mxu0 %v7469_v54  ;;  %v7519_v54 = vld [vmem:[%s9362_s1 + $0xca8] sm:$0xff]  }
 0x169   :  { %6888 = vmatprep.subr.bf16.mxu0 %v7471_v56 }
 0x16a   :  { %6909 = vmatpush3.bf16.msra.mxu1 %v7470_v55  ;;  %v7520_v55 = vld [vmem:[%s9362_s1 + $0xc70] sm:$0xff]  }
 0x16b   :  { %6910 = vmatprep.subr.bf16.mxu1 %v7472_v57  ;;  %v7521_v57 = vld [vmem:[%s9362_s1 + $0xcf0] sm:$0xff]  }
 0x16c   :  { %6889 = vmatpush3.bf16.msra.mxu0 %v7473_v58 }
 0x16d   :  { %6890 = vmatprep.subr.bf16.mxu0 %v7475_v60 }
 0x16e   :  { %6911 = vmatpush3.bf16.msra.mxu1 %v7474_v59  ;;  %v7522_v59 = vld [vmem:[%s9362_s1 + $0xc30] sm:$0xff]  }
 0x16f   :  { %6912 = vmatprep.subr.bf16.mxu1 %v7476_v61 }
 0x170   :  { %6891 = vmatpush3.bf16.msra.mxu0 %v7477_v62 }
 0x171   :  { %6892 = vmatprep.subr.bf16.mxu0 %v7479_v0 }
 0x172   :  { %6913 = vmatpush3.bf16.msra.mxu1 %v7478_v63  ;;  %v7523_v63 = vld [vmem:[%s9362_s1 + $0xcb0] sm:$0xff]  }
 0x173   :  { %6914 = vmatprep.subr.bf16.mxu1 %v7480_v1 }
 0x174   :  { %6893 = vmatpush3.bf16.msra.mxu0 %v7481_v2  ;;  %v7524_v2 = vld [vmem:[%s9362_s1 + $0xc78] sm:$0xff]  }
 0x175   :  { %6894 = vmatprep.subr.bf16.mxu0 %v7483_v4 }
 0x176   :  { %6915 = vmatpush3.bf16.msra.mxu1 %v7482_v3  ;;  %v6592_v9 = vpop.f32.mrb[16].mxu0  ;;  %v22_v3 = vld [vmem:[%s9361_s0 + $0x30] sm:$0xff] }
 0x177   :  { %v6593_v11 = vpop.f32.mrb[17].mxu0  ;;  %6916 = vmatprep.subr.bf16.mxu1 %v7484_v5 }
 0x178   :  { %v6614_v13 = vpop.f32.mrb[16].mxu1  ;;  %v6594_v14 = vadd.f32 %v6593_v11, %v6592_v9  ;;  %v6595_v15 = vpop.f32.mrb[18].mxu0  ;;  %6895 = vmatpush3.bf16.msra.mxu0 %v7485_v6  ;;  %v1357_v9 = vcombine.high %v22_v3, %v22_v3  ;;  %v7526_v11 = vld [vmem:[%s9362_s1 + $0xc38] sm:$0xff]  }
 0x179   :  { %v6615_v18 = vpop.f32.mrb[17].mxu1  ;;  %v6596_v19 = vpop.f32.mrb[19].mxu0  ;;  %6896 = vmatprep.subr.bf16.mxu0 %v7487_v8  ;;  %v1364_v8 = vrot.slane %v22_v3, %v7777_v41  ;;  %v7559_v3 = vld [vmem:[%s9362_s1 + $0xdb8] sm:$0xff]  }
 0x17a   :  { %v4946_v20 = vadd.f32 %v6594_v14, %v8816_v38  ;;  %v6616_v21 = vadd.f32 %v6615_v18, %v6614_v13  ;;  %v6617_v22 = vpop.f32.mrb[18].mxu1  ;;  %6917 = vmatpush3.bf16.msra.mxu1 %v7486_v7  ;;  %v7504_v38 = vld [vmem:[%s9362_s1 + $0xc50] sm:$0xff]   ;;  %v7525_v7 = vld [vmem:[%s9362_s1 + $0xcf8] sm:$0xff]   ;;  %v9031_v15 = vrot.slane %v1357_v9, %v7777_v41  ;;  %v7529_v19 = vld [vmem:[%s9362_s1 + $0xdc0] sm:$0xff]  }
 0x17b   :  { %v6618_v24 = vpop.f32.mrb[19].mxu1  ;;  %6918 = vmatprep.subr.bf16.mxu1 %v7488_v10  ;;  %v7527_v13 = vld [vmem:[%s9362_s1 + $0xcb8] sm:$0xff]   ;;  %v1372_v14 = vcombine.high %v1364_v8, %v1364_v8 }
 0x17c   :  { %v8920_v26 = vadd.f32 %v6616_v21, %v4946_v20  ;;  %6897 = vmatpush3.bf16.msra.mxu0 %v7489_v12  ;;  %v1373_v20 = vcombine.high %v9031_v15, %v9031_v15  ;;  %v7530_v21 = vld [vmem:[%s9362_s1 + $0xd00] sm:$0xff]  }
 0x17d   :  { %6898 = vmatprep.subr.bf16.mxu0 %v7491_v17  ;;  %v7528_v17 = vld [vmem:[%s9362_s1 + $0xd40] sm:$0xff]   ;;  %v1394_v18 = vrot.slane %v1372_v14, %v7777_v41  ;;  %v7569_v14 = vld [vmem:[%s9362_s1 + $0xe50] sm:$0xff]  }
 0x17e   :  { %6919 = vmatpush3.bf16.msra.mxu1 %v7490_v16  ;;  %v1380_v16 = vrot.slane %v1364_v8, %v7777_v41  ;;  %v1401_v24 = vrot.slane %v1373_v20, %v7777_v41  ;;  %v7564_v8 = vld [vmem:[%s9362_s1 + $0xe80] sm:$0xff]   ;;  %v7575_v20 = vld [vmem:[%s9362_s1 + $0xe18] sm:$0xff]  }
 0x17f   :  { %6920 = vmatprep.subr.bf16.mxu1 %v7492_v23  ;;  %v1404_v22 = vcombine.high %v1394_v18, %v1394_v18  ;;  %v7531_v23 = vld [vmem:[%s9362_s1 + $0xd80] sm:$0xff]  }
 0x180   :  { %6899 = vmatpush3.bf16.msra.mxu0 %v7493_v25  ;;  %v1402_v25 = vcombine.high %v1380_v16, %v1380_v16 }
 0x181   :  { %6928 = vmatprep.subr.bf16.mxu0 %v7496_v29  ;;  %v7534_v29 = vld [vmem:[%s9362_s1 + $0xd08] sm:$0xff]  }
 0x182   :  { %6921 = vmatpush3.bf16.msra.mxu1 %v7494_v27  ;;  %v7533_v27 = vld [vmem:[%s9362_s1 + $0xdc8] sm:$0xff]  }
 0x183   :  { %5504 = vmatmul.mubr.bf16.vlgmr.msra.gmra.mrb[44].mxu0 %v1338_v28  ;;  %6950 = vmatprep.subr.bf16.mxu1 %v7497_v30  ;;  %v1405_v28 = vcombine.high %v1401_v24, %v1401_v24  ;;  %v7535_v30 = vld [vmem:[%s9362_s1 + $0xd88] sm:$0xff]  }
 0x184   :  { %6929 = vmatpush3.bf16.msra.mxu0 %v7498_v31  ;;  %5583 = vmatprep.mubr.bf16.mxu0 %v1394_v18  ;;  %v7536_v31 = vld [vmem:[%s9362_s1 + $0xd50] sm:$0xff]   ;;  %v7573_v18 = vld [vmem:[%s9362_s1 + $0xe58] sm:$0xff]  }
 0x185   :  { %5544 = vmatmul.mubr.bf16.vlgmr.msra.gmra.mrb[44].mxu1 %v1354_v33  ;;  %6930 = vmatprep.subr.bf16.mxu0 %v7500_v34  ;;  %v7538_v33 = vld [vmem:[%s9362_s1 + $0xd10] sm:$0xff]  }
 0x186   :  { %6951 = vmatpush3.bf16.msra.mxu1 %v7499_v32  ;;  %5623 = vmatprep.mubr.bf16.mxu1 %v1404_v22  ;;  %v7537_v32 = vld [vmem:[%s9362_s1 + $0xdd0] sm:$0xff]   ;;  %v7577_v22 = vld [vmem:[%s9362_s1 + $0xe60] sm:$0xff]  }
 0x187   :  { %6952 = vmatprep.subr.bf16.mxu1 %v7501_v35  ;;  %v7539_v34 = vld [vmem:[%s9362_s1 + $0xd90] sm:$0xff]   ;;  %v7540_v35 = vld [vmem:[%s9362_s1 + $0xd58] sm:$0xff]  }
 0x188   :  { %6931 = vmatpush3.bf16.msra.mxu0 %v7502_v36  ;;  %v7541_v36 = vld [vmem:[%s9362_s1 + $0xdd8] sm:$0xff]  }
 0x189   :  { %6932 = vmatprep.subr.bf16.mxu0 %v7504_v38  ;;  %v7543_v38 = vld [vmem:[%s9362_s1 + $0xd98] sm:$0xff]  }
 0x18a   :  { %6953 = vmatpush3.bf16.msra.mxu1 %v7503_v37  ;;  %v7542_v37 = vld [vmem:[%s9362_s1 + $0xd18] sm:$0xff]  }
 0x18b   :  { %6954 = vmatprep.subr.bf16.mxu1 %v7505_v39  ;;  %v7544_v39 = vld [vmem:[%s9362_s1 + $0xd60] sm:$0xff]  }
 0x18c   :  { %6933 = vmatpush3.bf16.msra.mxu0 %v7506_v40  ;;  %v7545_v40 = vld [vmem:[%s9362_s1 + $0xde0] sm:$0xff]  }
 0x18d   :  { %6934 = vmatprep.subr.bf16.mxu0 %v7508_v43  ;;  %v7547_v43 = vld [vmem:[%s9362_s1 + $0xda0] sm:$0xff]  }
 0x18e   :  { %6955 = vmatpush3.bf16.msra.mxu1 %v7507_v42  ;;  %v7546_v42 = vld [vmem:[%s9362_s1 + $0xd20] sm:$0xff]  }
 0x18f   :  { %6956 = vmatprep.subr.bf16.mxu1 %v7509_v44  ;;  %v7548_v44 = vld [vmem:[%s9362_s1 + $0xd68] sm:$0xff]  }
 0x190   :  { %6935 = vmatpush3.bf16.msra.mxu0 %v7510_v45  ;;  %v7549_v45 = vld [vmem:[%s9362_s1 + $0xde8] sm:$0xff]  }
 0x191   :  { %6936 = vmatprep.subr.bf16.mxu0 %v7512_v47  ;;  %v7551_v47 = vld [vmem:[%s9362_s1 + $0xda8] sm:$0xff]  }
 0x192   :  { %6957 = vmatpush3.bf16.msra.mxu1 %v7511_v46  ;;  %v7550_v46 = vld [vmem:[%s9362_s1 + $0xd28] sm:$0xff]  }
 0x193   :  { %6958 = vmatprep.subr.bf16.mxu1 %v7513_v48  ;;  %v7552_v48 = vld [vmem:[%s9362_s1 + $0xd70] sm:$0xff]  }
 0x194   :  { %6937 = vmatpush3.bf16.msra.mxu0 %v7514_v49 }
 0x195   :  { %6938 = vmatprep.subr.bf16.mxu0 %v7516_v51 }
 0x196   :  { %6959 = vmatpush3.bf16.msra.mxu1 %v7515_v50  ;;  %v6636_v56 = vpop.f32.mrb[20].mxu0  ;;  %v7553_v50 = vld [vmem:[%s9362_s1 + $0xdf0] sm:$0xff]  }
 0x197   :  { %v6637_v58 = vpop.f32.mrb[21].mxu0  ;;  %6960 = vmatprep.subr.bf16.mxu1 %v7517_v52  ;;  %v7554_v52 = vld [vmem:[%s9362_s1 + $0xd30] sm:$0xff]  }
 0x198   :  { %v6658_v60 = vpop.f32.mrb[20].mxu1  ;;  %v6638_v61 = vadd.f32 %v6637_v58, %v6636_v56  ;;  %v6639_v62 = vpop.f32.mrb[22].mxu0  ;;  %6939 = vmatpush3.bf16.msra.mxu0 %v7518_v53  ;;  %v7555_v56 = vld [vmem:[%s9362_s1 + $0xdb0] sm:$0xff]  }
 0x199   :  { %v6659_v0 = vpop.f32.mrb[21].mxu1  ;;  %v6640_v1 = vpop.f32.mrb[23].mxu0  ;;  %6940 = vmatprep.subr.bf16.mxu0 %v7520_v55 }
 0x19a   :  { %v5026_v4 = vadd.f32 %v6638_v61, %v8920_v26  ;;  %v6660_v5 = vadd.f32 %v6659_v0, %v6658_v60  ;;  %v6661_v6 = vpop.f32.mrb[22].mxu1  ;;  %6961 = vmatpush3.bf16.msra.mxu1 %v7519_v54  ;;  %v7532_v26 = vld [vmem:[%s9362_s1 + $0xd48] sm:$0xff]   ;;  %v7558_v1 = vld [vmem:[%s9362_s1 + $0xd38] sm:$0xff]  }
 0x19b   :  { %v6662_v10 = vpop.f32.mrb[23].mxu1  ;;  %6962 = vmatprep.subr.bf16.mxu1 %v7521_v57  ;;  %v7556_v57 = vld [vmem:[%s9362_s1 + $0xd78] sm:$0xff]   ;;  %v7562_v6 = vld [vmem:[%s9362_s1 + $0xec0] sm:$0xff]  }
 0x19c   :  { %v9025_v12 = vadd.f32 %v6660_v5, %v5026_v4  ;;  %6941 = vmatpush3.bf16.msra.mxu0 %v7522_v59  ;;  %v1387_v4 = vrot.slane %v9031_v15, %v7777_v41  ;;  %v7561_v5 = vld [vmem:[%s9362_s1 + $0xe40] sm:$0xff]   ;;  %v7565_v10 = vld [vmem:[%s9362_s1 + $0xe48] sm:$0xff]   ;;  %v7570_v15 = vld [vmem:[%s9362_s1 + $0xed0] sm:$0xff]  }
 0x19d   :  { %6942 = vmatprep.subr.bf16.mxu0 %v7524_v2 }
 0x19e   :  { %6963 = vmatpush3.bf16.msra.mxu1 %v7523_v63  ;;  %v7557_v63 = vld [vmem:[%s9362_s1 + $0xdf8] sm:$0xff]   ;;  %v1403_v9 = vcombine.high %v1387_v4, %v1387_v4 }
 0x19f   :  { %6964 = vmatprep.subr.bf16.mxu1 %v7525_v7  ;;  %v7563_v7 = vld [vmem:[%s9362_s1 + $0xe00] sm:$0xff]  }
 0x1a0   :  { %6943 = vmatpush3.bf16.msra.mxu0 %v7526_v11  ;;  %v7566_v11 = vld [vmem:[%s9362_s1 + $0xec8] sm:$0xff]  }
 0x1a1   :  { %6972 = vmatprep.subr.bf16.mxu0 %v7528_v17  ;;  %v7572_v17 = vld [vmem:[%s9362_s1 + $0xe90] sm:$0xff]  }
 0x1a2   :  { %6965 = vmatpush3.bf16.msra.mxu1 %v7527_v13  ;;  %v7568_v13 = vld [vmem:[%s9362_s1 + $0xe88] sm:$0xff]  }
 0x1a3   :  { %5584 = vmatmul.mubr.bf16.vlgmr.msra.gmra.mrb[48].mxu0 %v1380_v16  ;;  %6994 = vmatprep.subr.bf16.mxu1 %v7529_v19  ;;  %v7571_v16 = vld [vmem:[%s9362_s1 + $0xe10] sm:$0xff]   ;;  %v7574_v19 = vld [vmem:[%s9362_s1 + $0xed8] sm:$0xff]  }
 0x1a4   :  { %6973 = vmatpush3.bf16.msra.mxu0 %v7530_v21  ;;  %5663 = vmatprep.mubr.bf16.mxu0 %v1401_v24  ;;  %v7576_v21 = vld [vmem:[%s9362_s1 + $0xe98] sm:$0xff]   ;;  %v7579_v24 = vld [vmem:[%s9362_s1 + $0xe20] sm:$0xff]  }
 0x1a5   :  { %5624 = vmatmul.mubr.bf16.vlgmr.msra.gmra.mrb[48].mxu1 %v1402_v25  ;;  %6974 = vmatprep.subr.bf16.mxu0 %v7532_v26  ;;  %v7580_v25 = vld [vmem:[%s9362_s1 + $0xea0] sm:$0xff]   ;;  %v7581_v26 = vld [vmem:[%s9362_s1 + $0xe68] sm:$0xff]  }
 0x1a6   :  { %6995 = vmatpush3.bf16.msra.mxu1 %v7531_v23  ;;  %5703 = vmatprep.mubr.bf16.mxu1 %v1405_v28  ;;  %v7578_v23 = vld [vmem:[%s9362_s1 + $0xee0] sm:$0xff]   ;;  %v7583_v28 = vld [vmem:[%s9362_s1 + $0xe28] sm:$0xff]  }
 0x1a7   :  { %6996 = vmatprep.subr.bf16.mxu1 %v7533_v27  ;;  %v7582_v27 = vld [vmem:[%s9362_s1 + $0xee8] sm:$0xff]  }
 0x1a8   :  { %6975 = vmatpush3.bf16.msra.mxu0 %v7534_v29  ;;  %v7584_v29 = vld [vmem:[%s9362_s1 + $0xea8] sm:$0xff]  }
 0x1a9   :  { %6976 = vmatprep.subr.bf16.mxu0 %v7536_v31 }
 0x1aa   :  { %6997 = vmatpush3.bf16.msra.mxu1 %v7535_v30  ;;  %v7585_v30 = vld [vmem:[%s9362_s1 + $0xe70] sm:$0xff]  }
 0x1ab   :  { %6998 = vmatprep.subr.bf16.mxu1 %v7537_v32  ;;  %v7586_v32 = vld [vmem:[%s9362_s1 + $0xef0] sm:$0xff]  }
 0x1ac   :  { %6977 = vmatpush3.bf16.msra.mxu0 %v7538_v33 }
 0x1ad   :  { %6978 = vmatprep.subr.bf16.mxu0 %v7540_v35 }
 0x1ae   :  { %6999 = vmatpush3.bf16.msra.mxu1 %v7539_v34  ;;  %v7587_v34 = vld [vmem:[%s9362_s1 + $0xe30] sm:$0xff]  }
 0x1af   :  { %7000 = vmatprep.subr.bf16.mxu1 %v7541_v36 }
 0x1b0   :  { %6979 = vmatpush3.bf16.msra.mxu0 %v7542_v37 }
 0x1b1   :  { %6980 = vmatprep.subr.bf16.mxu0 %v7544_v39 }
 0x1b2   :  { %7001 = vmatpush3.bf16.msra.mxu1 %v7543_v38 }
 0x1b3   :  { %7002 = vmatprep.subr.bf16.mxu1 %v7545_v40  ;;  %v7588_v40 = vld [vmem:[%s9362_s1 + $0xeb0] sm:$0xff]  }
 0x1b4   :  { %6981 = vmatpush3.bf16.msra.mxu0 %v7546_v42  ;;  %v7589_v42 = vld [vmem:[%s9362_s1 + $0xe78] sm:$0xff]  }
 0x1b5   :  { %6982 = vmatprep.subr.bf16.mxu0 %v7548_v44 }
 0x1b6   :  { %7003 = vmatpush3.bf16.msra.mxu1 %v7547_v43  ;;  %v6680_v49 = vpop.f32.mrb[24].mxu0 }
 0x1b7   :  { %v6681_v51 = vpop.f32.mrb[25].mxu0  ;;  %7004 = vmatprep.subr.bf16.mxu1 %v7549_v45 }
 0x1b8   :  { %v6702_v53 = vpop.f32.mrb[24].mxu1  ;;  %v6682_v54 = vadd.f32 %v6681_v51, %v6680_v49  ;;  %v6683_v55 = vpop.f32.mrb[26].mxu0  ;;  %6983 = vmatpush3.bf16.msra.mxu0 %v7550_v46  ;;  %v23_v46 = vld [vmem:[%s9361_s0 + $0x38] sm:$0xff] }
 0x1b9   :  { %v6703_v58 = vpop.f32.mrb[25].mxu1  ;;  %v6684_v59 = vpop.f32.mrb[27].mxu0  ;;  %6984 = vmatprep.subr.bf16.mxu0 %v7552_v48  ;;  %v7590_v48 = vld [vmem:[%s9362_s1 + $0xef8] sm:$0xff]   ;;  %v1413_v49 = vrot.slane %v23_v46, %v7777_v41  ;;  %v7593_v55 = vld [vmem:[%s9362_s1 + $0xf40] sm:$0xff]  }
 0x1ba   :  { %v5106_v60 = vadd.f32 %v6682_v54, %v9025_v12  ;;  %v6704_v61 = vadd.f32 %v6703_v58, %v6702_v53  ;;  %v6705_v62 = vpop.f32.mrb[26].mxu1  ;;  %7005 = vmatpush3.bf16.msra.mxu1 %v7551_v47  ;;  %v7567_v12 = vld [vmem:[%s9362_s1 + $0xe08] sm:$0xff]   ;;  %v7594_v59 = vld [vmem:[%s9362_s1 + $0xfc0] sm:$0xff]  }
 0x1bb   :  { %v6706_v0 = vpop.f32.mrb[27].mxu1  ;;  %7006 = vmatprep.subr.bf16.mxu1 %v7553_v50  ;;  %v1406_v50 = vcombine.high %v23_v46, %v23_v46  ;;  %v1421_v53 = vcombine.high %v1413_v49, %v1413_v49  ;;  %v1429_v54 = vrot.slane %v1413_v49, %v7777_v41 }
 0x1bc   :  { %v9132_v2 = vadd.f32 %v6704_v61, %v5106_v60  ;;  %6985 = vmatpush3.bf16.msra.mxu0 %v7554_v52  ;;  %v7591_v52 = vld [vmem:[%s9362_s1 + $0xe38] sm:$0xff]   ;;  %v7595_v61 = vld [vmem:[%s9362_s1 + $0xf00] sm:$0xff]   ;;  %v7597_v0 = vld [vmem:[%s9362_s1 + $0xf48] sm:$0xff]  }
 0x1bd   :  { %6986 = vmatprep.subr.bf16.mxu0 %v7556_v57  ;;  %v7592_v57 = vld [vmem:[%s9362_s1 + $0xeb8] sm:$0xff]   ;;  %v1443_v58 = vrot.slane %v1421_v53, %v7777_v41 }
 0x1be   :  { %7007 = vmatpush3.bf16.msra.mxu1 %v7555_v56  ;;  %v9244_v56 = vrot.slane %v1406_v50, %v7777_v41 }
 0x1bf   :  { %7008 = vmatprep.subr.bf16.mxu1 %v7557_v63  ;;  %v1453_v62 = vcombine.high %v1443_v58, %v1443_v58  ;;  %v1451_v63 = vcombine.high %v1429_v54, %v1429_v54 }
 0x1c0   :  { %6987 = vmatpush3.bf16.msra.mxu0 %v7558_v1  ;;  %v1422_v60 = vcombine.high %v9244_v56, %v9244_v56 }
 0x1c1   :  { %7016 = vmatprep.subr.bf16.mxu0 %v7561_v5  ;;  %v7599_v5 = vld [vmem:[%s9362_s1 + $0xf08] sm:$0xff]  }
 0x1c2   :  { %7009 = vmatpush3.bf16.msra.mxu1 %v7559_v3  ;;  %v1450_v1 = vrot.slane %v1422_v60, %v7777_v41  ;;  %v7598_v3 = vld [vmem:[%s9362_s1 + $0xfc8] sm:$0xff]  }
 0x1c3   :  { %5664 = vmatmul.mubr.bf16.vlgmr.msra.gmra.mrb[52].mxu0 %v1387_v4  ;;  %7038 = vmatprep.subr.bf16.mxu1 %v7562_v6  ;;  %v7601_v6 = vld [vmem:[%s9362_s1 + $0xf50] sm:$0xff]  }
 0x1c4   :  { %7017 = vmatpush3.bf16.msra.mxu0 %v7563_v7  ;;  %5743 = vmatprep.mubr.bf16.mxu0 %v1443_v58  ;;  %v1454_v4 = vcombine.high %v1450_v1, %v1450_v1  ;;  %v7600_v7 = vld [vmem:[%s9362_s1 + $0xf88] sm:$0xff]  }
 0x1c5   :  { %5704 = vmatmul.mubr.bf16.vlgmr.msra.gmra.mrb[52].mxu1 %v1403_v9  ;;  %7018 = vmatprep.subr.bf16.mxu0 %v7565_v10  ;;  %v7603_v9 = vld [vmem:[%s9362_s1 + $0xf10] sm:$0xff]   ;;  %v7605_v10 = vld [vmem:[%s9362_s1 + $0xf58] sm:$0xff]  }
 0x1c6   :  { %7039 = vmatpush3.bf16.msra.mxu1 %v7564_v8  ;;  %5783 = vmatprep.mubr.bf16.mxu1 %v1453_v62  ;;  %v7602_v8 = vld [vmem:[%s9362_s1 + $0xfd0] sm:$0xff]  }
 0x1c7   :  { %7040 = vmatprep.subr.bf16.mxu1 %v7566_v11  ;;  %v7604_v11 = vld [vmem:[%s9362_s1 + $0xf90] sm:$0xff]  }
 0x1c8   :  { %7019 = vmatpush3.bf16.msra.mxu0 %v7567_v12  ;;  %v7606_v12 = vld [vmem:[%s9362_s1 + $0xfd8] sm:$0xff]  }
 0x1c9   :  { %7020 = vmatprep.subr.bf16.mxu0 %v7569_v14  ;;  %v7609_v14 = vld [vmem:[%s9362_s1 + $0xf60] sm:$0xff]  }
 0x1ca   :  { %7041 = vmatpush3.bf16.msra.mxu1 %v7568_v13  ;;  %v7607_v13 = vld [vmem:[%s9362_s1 + $0xf18] sm:$0xff]  }
 0x1cb   :  { %7042 = vmatprep.subr.bf16.mxu1 %v7570_v15  ;;  %v7608_v15 = vld [vmem:[%s9362_s1 + $0xf98] sm:$0xff]  }
 0x1cc   :  { %7021 = vmatpush3.bf16.msra.mxu0 %v7571_v16  ;;  %v7610_v16 = vld [vmem:[%s9362_s1 + $0xfe0] sm:$0xff]  }
 0x1cd   :  { %7022 = vmatprep.subr.bf16.mxu0 %v7573_v18  ;;  %v7613_v18 = vld [vmem:[%s9362_s1 + $0xf68] sm:$0xff]  }
 0x1ce   :  { %7043 = vmatpush3.bf16.msra.mxu1 %v7572_v17  ;;  %v7611_v17 = vld [vmem:[%s9362_s1 + $0xf20] sm:$0xff]  }
 0x1cf   :  { %7044 = vmatprep.subr.bf16.mxu1 %v7574_v19  ;;  %v7612_v19 = vld [vmem:[%s9362_s1 + $0xfa0] sm:$0xff]  }
 0x1d0   :  { %7023 = vmatpush3.bf16.msra.mxu0 %v7575_v20  ;;  %v7614_v20 = vld [vmem:[%s9362_s1 + $0xfe8] sm:$0xff]  }
 0x1d1   :  { %7024 = vmatprep.subr.bf16.mxu0 %v7577_v22  ;;  %v7617_v22 = vld [vmem:[%s9362_s1 + $0xf70] sm:$0xff]  }
 0x1d2   :  { %7045 = vmatpush3.bf16.msra.mxu1 %v7576_v21  ;;  %v7615_v21 = vld [vmem:[%s9362_s1 + $0xf28] sm:$0xff]  }
 0x1d3   :  { %7046 = vmatprep.subr.bf16.mxu1 %v7578_v23 }
 0x1d4   :  { %7025 = vmatpush3.bf16.msra.mxu0 %v7579_v24  ;;  %v7616_v24 = vld [vmem:[%s9362_s1 + $0xfa8] sm:$0xff]  }
 0x1d5   :  { %7026 = vmatprep.subr.bf16.mxu0 %v7581_v26  ;;  %v7618_v26 = vld [vmem:[%s9362_s1 + $0xff0] sm:$0xff]  }
 0x1d6   :  { %7047 = vmatpush3.bf16.msra.mxu1 %v7580_v25  ;;  %v6724_v31 = vpop.f32.mrb[28].mxu0 }
 0x1d7   :  { %v6725_v33 = vpop.f32.mrb[29].mxu0  ;;  %7048 = vmatprep.subr.bf16.mxu1 %v7582_v27 }
 0x1d8   :  { %v6746_v35 = vpop.f32.mrb[28].mxu1  ;;  %v6726_v36 = vadd.f32 %v6725_v33, %v6724_v31  ;;  %v6727_v37 = vpop.f32.mrb[30].mxu0  ;;  %7027 = vmatpush3.bf16.msra.mxu0 %v7583_v28  ;;  %v7621_v31 = vld [vmem:[%s9362_s1 + $0xf78] sm:$0xff]  }
 0x1d9   :  { %v6747_v38 = vpop.f32.mrb[29].mxu1  ;;  %v6728_v39 = vpop.f32.mrb[31].mxu0  ;;  %7028 = vmatprep.subr.bf16.mxu0 %v7585_v30  ;;  %v7619_v30 = vld [vmem:[%s9362_s1 + $0xf30] sm:$0xff]  }
 0x1da   :  { %v5186_v43 = vadd.f32 %v6726_v36, %v9132_v2  ;;  %v6748_v44 = vadd.f32 %v6747_v38, %v6746_v35  ;;  %v6749_v45 = vpop.f32.mrb[30].mxu1  ;;  %7049 = vmatpush3.bf16.msra.mxu1 %v7584_v29  ;;  %v7596_v2 = vld [vmem:[%s9362_s1 + $0xf80] sm:$0xff]   ;;  %v7620_v37 = vld [vmem:[%s9362_s1 + $0xfb0] sm:$0xff]   ;;  %v7622_v39 = vld [vmem:[%s9362_s1 + $0xff8] sm:$0xff]  }
 0x1db   :  { %v6750_v47 = vpop.f32.mrb[31].mxu1  ;;  %7050 = vmatprep.subr.bf16.mxu1 %v7586_v32 }
 0x1dc   :  { %v9234_v51 = vadd.f32 %v6748_v44, %v5186_v43  ;;  %7029 = vmatpush3.bf16.msra.mxu0 %v7587_v34 }
 0x1dd   :  { %7030 = vmatprep.subr.bf16.mxu0 %v7589_v42 }
 0x1de   :  { %7051 = vmatpush3.bf16.msra.mxu1 %v7588_v40 }
 0x1df   :  { %7052 = vmatprep.subr.bf16.mxu1 %v7590_v48 }
 0x1e0   :  { %7031 = vmatpush3.bf16.msra.mxu0 %v7591_v52 }
 0x1e1   :  { %7060 = vmatprep.subr.bf16.mxu0 %v7593_v55 }
 0x1e2   :  { %7053 = vmatpush3.bf16.msra.mxu1 %v7592_v57 }
 0x1e3   :  { %5744 = vmatmul.mubr.bf16.vlgmr.msra.gmra.mrb[56].mxu0 %v1429_v54  ;;  %7082 = vmatprep.subr.bf16.mxu1 %v7594_v59 }
 0x1e4   :  { %7061 = vmatpush3.bf16.msra.mxu0 %v7595_v61  ;;  %5823 = vmatprep.mubr.bf16.mxu0 %v1450_v1 }
 0x1e5   :  { %5784 = vmatmul.mubr.bf16.vlgmr.msra.gmra.mrb[56].mxu1 %v1451_v63  ;;  %7062 = vmatprep.subr.bf16.mxu0 %v7597_v0 }
 0x1e6   :  { %7083 = vmatpush3.bf16.msra.mxu1 %v7596_v2  ;;  %5863 = vmatprep.mubr.bf16.mxu1 %v1454_v4 }
 0x1e7   :  { %7084 = vmatprep.subr.bf16.mxu1 %v7598_v3 }
 0x1e8   :  { %7063 = vmatpush3.bf16.msra.mxu0 %v7599_v5 }
 0x1e9   :  { %7064 = vmatprep.subr.bf16.mxu0 %v7601_v6 }
 0x1ea   :  { %7085 = vmatpush3.bf16.msra.mxu1 %v7600_v7 }
 0x1eb   :  { %7086 = vmatprep.subr.bf16.mxu1 %v7602_v8 }
 0x1ec   :  { %7065 = vmatpush3.bf16.msra.mxu0 %v7603_v9 }
 0x1ed   :  { %7066 = vmatprep.subr.bf16.mxu0 %v7605_v10 }
 0x1ee   :  { %7087 = vmatpush3.bf16.msra.mxu1 %v7604_v11 }
 0x1ef   :  { %7088 = vmatprep.subr.bf16.mxu1 %v7606_v12 }
 0x1f0   :  { %7067 = vmatpush3.bf16.msra.mxu0 %v7607_v13 }
 0x1f1   :  { %7068 = vmatprep.subr.bf16.mxu0 %v7609_v14 }
 0x1f2   :  { %7089 = vmatpush3.bf16.msra.mxu1 %v7608_v15 }
 0x1f3   :  { %7090 = vmatprep.subr.bf16.mxu1 %v7610_v16 }
 0x1f4   :  { %7069 = vmatpush3.bf16.msra.mxu0 %v7611_v17 }
 0x1f5   :  { %7070 = vmatprep.subr.bf16.mxu0 %v7613_v18 }
 0x1f6   :  { %7091 = vmatpush3.bf16.msra.mxu1 %v7612_v19  ;;  %v6768_v23 = vpop.f32.mrb[32].mxu0 }
 0x1f7   :  { %v6769_v25 = vpop.f32.mrb[33].mxu0  ;;  %7092 = vmatprep.subr.bf16.mxu1 %v7614_v20 }
 0x1f8   :  { %v6790_v27 = vpop.f32.mrb[32].mxu1  ;;  %v6770_v28 = vadd.f32 %v6769_v25, %v6768_v23  ;;  %v6771_v29 = vpop.f32.mrb[34].mxu0  ;;  %7071 = vmatpush3.bf16.msra.mxu0 %v7615_v21 }
 0x1f9   :  { %v6791_v32 = vpop.f32.mrb[33].mxu1  ;;  %v6772_v33 = vpop.f32.mrb[35].mxu0  ;;  %7072 = vmatprep.subr.bf16.mxu0 %v7617_v22 }
 0x1fa   :  { %v5266_v34 = vadd.f32 %v6770_v28, %v9234_v51  ;;  %v6792_v35 = vadd.f32 %v6791_v32, %v6790_v27  ;;  %v6793_v36 = vpop.f32.mrb[34].mxu1  ;;  %7093 = vmatpush3.bf16.msra.mxu1 %v7616_v24 }
 0x1fb   :  { %v6794_v38 = vpop.f32.mrb[35].mxu1  ;;  %7094 = vmatprep.subr.bf16.mxu1 %v7618_v26 }
 0x1fc   :  { %8 = vsyncpa [#allocation3], 0  ;;  %v5306_v40 = vadd.f32 %v6792_v35, %v5266_v34  ;;  %7073 = vmatpush3.bf16.msra.mxu0 %v7619_v30  ;;  %v7623_v42 = vld [vmem:[%s9362_s1 + $0xf38] sm:$0xff]   ;;  %v1436_v43 = vrot.slane %v9244_v56, %v7777_v41  ;;  %vm5871_vm0 = vcmask 74752  }
 0x1fd   :  { %7074 = vmatprep.subr.bf16.mxu0 %v7621_v31  ;;  %v7624_v44 = vld [vmem:[%s9362_s1 + $0xfb8] sm:$0xff]   ;;  %s7651_s1 = smov [#allocation2]  }
 0x1fe   :  { %7095 = vmatpush3.bf16.msra.mxu1 %v7620_v37  ;;  %v1452_v45 = vcombine.high %v1436_v43, %v1436_v43  ;;  %s5879_s6 = sshll.u32 %s7651_s1, 4  ;;  %s5880_s6 = int_to_ptr.vmem [resolvable:$true] %s5879_s6 }
 0x1ff   :  { %7096 = vmatprep.subr.bf16.mxu1 %v7622_v39  ;;  %s7626_s7 = scalar_lea.vmem %s5880_s6, 32  ;;  %p7631_p1 = scmp.lt.s32.totalorder %s5880_s6, %s5880_s6 }
 0x200   :  { %7075 = vmatpush3.bf16.msra.mxu0 %v7623_v42  ;;  %p7627_p0 = scmp.ne.s32.totalorder %s5880_s6, %s7626_s7  ;;  %p7632_p2 = scmp.lt.s32.totalorder %s7626_s7, %s7626_s7 }
 0x202   :  { %7097 = vmatpush3.bf16.msra.mxu1 %v7624_v44  ;;  %p7633_p3 = por %p7632_p2, %p7631_p1 }
 0x203   :  { %5824 = vmatmul.mubr.bf16.vlgmr.msra.gmra.mrb[60].mxu0 %v1436_v43 }
 0x204   :  { %p7634_p4 = pnand %p7633_p3, %p7627_p0 }
 0x205   :  { %5864 = vmatmul.mubr.bf16.vlgmr.msra.gmra.mrb[60].mxu1 %v1452_v45 }
 0x216   :  { %v6812_v46 = vpop.f32.mrb[36].mxu0 }
 0x217   :  { %v6813_v47 = vpop.f32.mrb[37].mxu0 }
 0x218   :  { %v6834_v48 = vpop.f32.mrb[36].mxu1  ;;  %v6814_v49 = vadd.f32 %v6813_v47, %v6812_v46  ;;  %v6815_v50 = vpop.f32.mrb[38].mxu0 }
 0x219   :  { %v6835_v51 = vpop.f32.mrb[37].mxu1  ;;  %v6816_v52 = vpop.f32.mrb[39].mxu0 }
 0x21a   :  { %v5346_v53 = vadd.f32 %v6814_v49, %v5306_v40  ;;  %v6836_v41 = vadd.f32 %v6835_v51, %v6834_v48  ;;  %v6837_v54 = vpop.f32.mrb[38].mxu1 }
 0x21b   :  { %v6838_v55 = vpop.f32.mrb[39].mxu1 }
 0x21c   :  { %v5386_v56 = vadd.f32 %v6836_v41, %v5346_v53 }
 0x236   :  { %v6856_v57 = vpop.f32.mrb[40].mxu0 }
 0x237   :  { %v6857_v58 = vpop.f32.mrb[41].mxu0 }
 0x238   :  { %v6878_v59 = vpop.f32.mrb[40].mxu1  ;;  %v6858_v60 = vadd.f32 %v6857_v58, %v6856_v57  ;;  %v6859_v61 = vpop.f32.mrb[42].mxu0 }
 0x239   :  { %v6879_v62 = vpop.f32.mrb[41].mxu1  ;;  %v6860_v63 = vpop.f32.mrb[43].mxu0 }
 0x23a   :  { %v5426_v0 = vadd.f32 %v6858_v60, %v5386_v56  ;;  %v6880_v1 = vadd.f32 %v6879_v62, %v6878_v59  ;;  %v6881_v2 = vpop.f32.mrb[42].mxu1 }
 0x23b   :  { %v6882_v3 = vpop.f32.mrb[43].mxu1 }
 0x23c   :  { %v5466_v4 = vadd.f32 %v6880_v1, %v5426_v0 }
 0x256   :  { %v6900_v5 = vpop.f32.mrb[44].mxu0 }
 0x257   :  { %v6901_v6 = vpop.f32.mrb[45].mxu0 }
 0x258   :  { %v6922_v7 = vpop.f32.mrb[44].mxu1  ;;  %v6902_v8 = vadd.f32 %v6901_v6, %v6900_v5  ;;  %v6903_v9 = vpop.f32.mrb[46].mxu0 }
 0x259   :  { %v6923_v10 = vpop.f32.mrb[45].mxu1  ;;  %v6904_v11 = vpop.f32.mrb[47].mxu0 }
 0x25a   :  { %v5506_v12 = vadd.f32 %v6902_v8, %v5466_v4  ;;  %v6924_v13 = vadd.f32 %v6923_v10, %v6922_v7  ;;  %v6925_v14 = vpop.f32.mrb[46].mxu1 }
 0x25b   :  { %v6926_v15 = vpop.f32.mrb[47].mxu1 }
 0x25c   :  { %v5546_v16 = vadd.f32 %v6924_v13, %v5506_v12 }
 0x276   :  { %v6944_v17 = vpop.f32.mrb[48].mxu0 }
 0x277   :  { %v6945_v18 = vpop.f32.mrb[49].mxu0 }
 0x278   :  { %v6966_v19 = vpop.f32.mrb[48].mxu1  ;;  %v6946_v20 = vadd.f32 %v6945_v18, %v6944_v17  ;;  %v6947_v21 = vpop.f32.mrb[50].mxu0 }
 0x279   :  { %v6967_v22 = vpop.f32.mrb[49].mxu1  ;;  %v6948_v23 = vpop.f32.mrb[51].mxu0 }
 0x27a   :  { %v5586_v24 = vadd.f32 %v6946_v20, %v5546_v16  ;;  %v6968_v25 = vadd.f32 %v6967_v22, %v6966_v19  ;;  %v6969_v26 = vpop.f32.mrb[50].mxu1 }
 0x27b   :  { %v6970_v27 = vpop.f32.mrb[51].mxu1 }
 0x27c   :  { %v5626_v28 = vadd.f32 %v6968_v25, %v5586_v24 }
 0x296   :  { %v6988_v29 = vpop.f32.mrb[52].mxu0 }
 0x297   :  { %v6989_v30 = vpop.f32.mrb[53].mxu0 }
 0x298   :  { %v7010_v31 = vpop.f32.mrb[52].mxu1  ;;  %v6990_v32 = vadd.f32 %v6989_v30, %v6988_v29  ;;  %v6991_v33 = vpop.f32.mrb[54].mxu0 }
 0x299   :  { %v7011_v34 = vpop.f32.mrb[53].mxu1  ;;  %v6992_v35 = vpop.f32.mrb[55].mxu0 }
 0x29a   :  { %v5666_v36 = vadd.f32 %v6990_v32, %v5626_v28  ;;  %v7012_v37 = vadd.f32 %v7011_v34, %v7010_v31  ;;  %v7013_v38 = vpop.f32.mrb[54].mxu1 }
 0x29b   :  { %v7014_v39 = vpop.f32.mrb[55].mxu1 }
 0x29c   :  { %v5706_v40 = vadd.f32 %v7012_v37, %v5666_v36 }
 0x2b6   :  { %v7032_v42 = vpop.f32.mrb[56].mxu0 }
 0x2b7   :  { %v7033_v43 = vpop.f32.mrb[57].mxu0 }
 0x2b8   :  { %v7054_v44 = vpop.f32.mrb[56].mxu1  ;;  %v7034_v45 = vadd.f32 %v7033_v43, %v7032_v42  ;;  %v7035_v46 = vpop.f32.mrb[58].mxu0 }
 0x2b9   :  { %v7055_v47 = vpop.f32.mrb[57].mxu1  ;;  %v7036_v48 = vpop.f32.mrb[59].mxu0 }
 0x2ba   :  { %v5746_v49 = vadd.f32 %v7034_v45, %v5706_v40  ;;  %v7056_v50 = vadd.f32 %v7055_v47, %v7054_v44  ;;  %v7057_v51 = vpop.f32.mrb[58].mxu1 }
 0x2bb   :  { %v7058_v52 = vpop.f32.mrb[59].mxu1 }
 0x2bc   :  { %v5786_v53 = vadd.f32 %v7056_v50, %v5746_v49 }
 0x2d6   :  { %v7076_v41 = vpop.f32.mrb[60].mxu0 }
 0x2d7   :  { %v7077_v54 = vpop.f32.mrb[61].mxu0 }
 0x2d8   :  { %v7098_v55 = vpop.f32.mrb[60].mxu1  ;;  %v7078_v56 = vadd.f32 %v7077_v54, %v7076_v41  ;;  %v7079_v57 = vpop.f32.mrb[62].mxu0 }
 0x2d9   :  { %v7099_v58 = vpop.f32.mrb[61].mxu1  ;;  %v7080_v59 = vpop.f32.mrb[63].mxu0 }
 0x2da   :  { %v5826_v60 = vadd.f32 %v7078_v56, %v5786_v53  ;;  %v7100_v61 = vadd.f32 %v7099_v58, %v7098_v55  ;;  %v7101_v62 = vpop.f32.mrb[62].mxu1 }
 0x2db   :  { %v7102_v63 = vpop.f32.mrb[63].mxu1 }
 0x2dc   :  { %v5866_v0 = vadd.f32 %v7100_v61, %v5826_v60 }
 0x2de   :  { %5872 = vst.msk [vmem:[#allocation2] sm:$0x3] %vm5871_vm0, %v5866_v0 }
 0x2df   :  { %7637 = shalt.err (!%p7634_p4)
}
 0x2e0   :  { %s7638_s10 = scalar_lea.hbm %s9364_s3, 32 }
 0x2e1   :  { %p7639_p5 = scmp.ne.s32.totalorder %s9364_s3, %s7638_s10  ;;  %p7642_p6 = scmp.lt.u32.totalorder %s7638_s10, %s9364_s3 }
 0x2e3   :  { %p7644_p7 = pnand %p7642_p6, %p7639_p5 }
 0x2e5   :  { %7647 = shalt.err (!%p7644_p7)
}
 0x2e6   :  { %5882 = dma.vmem_to_hbm [thread:$0]  %s5880_s6, 32, %s9364_s3, [#allocation3]  }
 0x2e7   :  { %7648 = dma.done.wait [#allocation3], 32  }
 0x2e8   :  { %7649 = vsyncadd [#allocation3], 4294967264 }
 0x2e9   :  { %5886 = vsyncpa [#allocation3], 1 }

</bundles_post_ra>
